<compile_context>
chip_gen: v5e
topology: v5e:2x2
jax: 0.10.0
libtpu: 0.0.40
codegen_flags: <defaults>
</compile_context>

<pallas_src>
import functools

import jax
import jax.numpy as jnp
import numpy as np
from jax.experimental import pallas as pl
from jax.experimental.pallas import tpu as pltpu

# ---------------------------------------------------------------------------
# Layer configuration (mirrors PatchDiscriminator.__init__ with
# opt.in_channels=4 (3-ch img + 1-ch mask), opt.latent_channels=8,
# opt.pad_type='zero', opt.activation='lrelu').
# Each entry: (in_c, out_c, kernel, stride, pad, apply_lrelu)
# ---------------------------------------------------------------------------
IN_CHANNELS = 4
LATENT = 8
LAYER_CFG = [
    (IN_CHANNELS, LATENT,     7, 1, 3, True),
    (LATENT,      LATENT * 2, 4, 2, 1, True),
    (LATENT * 2,  LATENT * 4, 4, 2, 1, True),
    (LATENT * 4,  LATENT * 4, 4, 2, 1, True),
    (LATENT * 4,  LATENT * 4, 4, 2, 1, True),
    (LATENT * 4,  1,          4, 2, 1, False),   # last layer: norm='none'
]

LRELU_SLOPE = 0.2      # matches F.leaky_relu(x, 0.2)


# ---------------------------------------------------------------------------
# Pallas kernel: fused im2col (tap accumulation) + GEMM + bias + leaky-relu.
# ---------------------------------------------------------------------------
def _conv_tap_kernel(x_ref, w_ref, b_ref, o_ref, *, kq, Wq, L, lrelu):
    """One batch element; stride-1 conv over the flattened padded image.

    x_ref: (1, C, HWq)   bf16   zero-padded input, spatial dims flattened
    w_ref: (kq*kq, N, C) bf16   per-tap weight matrices (VMEM resident)
    b_ref: (N, 1)        f32
    o_ref: (1, N, L)            "wide" output rows; wrapper crops Wq -> OW
    """
    x = x_ref[0]                                     # (C, HWq) bf16
    n_out = w_ref.shape[1]
    acc = jnp.zeros((n_out, L), jnp.float32)
    for qh in range(kq):                             # unrolled static tap loop
        for qw in range(kq):
            t = qh * kq + qw
            off = qh * Wq + qw                       # static lane offset
            slab = x[:, off:off + L]                 # (C, L) contiguous slice
            acc = acc + jnp.dot(w_ref[t], slab,
                                preferred_element_type=jnp.float32)
    acc = acc + b_ref[...]                           # (N, 1) broadcasts
    if lrelu:
        acc = jnp.where(acc > 0, acc, LRELU_SLOPE * acc)
    o_ref[0] = acc.astype(o_ref.dtype)


def conv_pallas(x_flat, w_taps, bias, *, kq, Wq, L, lrelu, out_dtype):
    """x_flat: (B, C, HWq) bf16, w_taps: (kq*kq, N, C) bf16, bias: (N,) f32."""
    B, C, HWq = x_flat.shape
    T, N, _ = w_taps.shape
    kernel = functools.partial(_conv_tap_kernel, kq=kq, Wq=Wq, L=L, lrelu=lrelu)
    return pl.pallas_call(
        kernel,
        out_shape=jax.ShapeDtypeStruct((B, N, L), out_dtype),
        grid=(B,),
        in_specs=[
            # Full padded image per batch element; last two dims equal the
            # full array extents -> no (8,128) padding copies needed.
            pl.BlockSpec((1, C, HWq), lambda b: (b, 0, 0)),
            pl.BlockSpec((T, N, C), lambda b: (0, 0, 0)),    # VMEM resident
            pl.BlockSpec((N, 1), lambda b: (0, 0)),          # VMEM resident
        ],
        out_specs=pl.BlockSpec((1, N, L), lambda b: (b, 0, 0)),
        compiler_params=pltpu.CompilerParams(
            dimension_semantics=("parallel",)),
    )(x_flat, w_taps, bias.reshape(N, 1))


# ---------------------------------------------------------------------------
# Glue: spectral norm, space-to-depth (stride-s conv -> stride-1 conv)
# ---------------------------------------------------------------------------
def _l2normalize(v, eps=1e-12):
    return v / (jnp.linalg.norm(v) + eps)


def spectral_normalize(w, u, v):
    """One power iteration, exactly like the PyTorch forward (f32)."""
    oc = w.shape[0]
    w_mat = w.reshape(oc, -1)
    v_new = _l2normalize(w_mat.T @ u)
    u_new = _l2normalize(w_mat @ v_new)
    sigma = u_new @ (w_mat @ v_new)
    return w / sigma


def space_to_depth(x, s):
    """(B, C, H, W) -> (B, C*s*s, H/s, W/s), channel order (c, ph, pw)."""
    B, C, H, W = x.shape
    x = x.reshape(B, C, H // s, s, W // s, s)       # (b, c, hq, ph, wq, pw)
    x = x.transpose(0, 1, 3, 5, 2, 4)               # (b, c, ph, pw, hq, wq)
    return x.reshape(B, C * s * s, H // s, W // s)


def rearrange_weight(w, s):
    """(N, C, k, k) -> (N, C*s*s, k/s, k/s), channel order (c, ph, pw)."""
    N, C, k, _ = w.shape
    kq = k // s
    w = w.reshape(N, C, kq, s, kq, s)               # (n, c, qh, ph, qw, pw)
    w = w.transpose(0, 1, 3, 5, 2, 4)               # (n, c, ph, pw, qh, qw)
    return w.reshape(N, C * s * s, kq, kq)


def conv_layer(x, w, b, u, v, cfg):
    """One spectral-norm conv (+ optional lrelu) layer, NCHW in / NCHW out."""
    ic, oc, k, s, p, lrelu = cfg
    B, _, H, W = x.shape
    OH = (H + 2 * p - k) // s + 1
    OW = (W + 2 * p - k) // s + 1

    w_sn = spectral_normalize(w, u, v)              # f32 spectral norm

    # Zero pad (on bf16); `s` extra bottom rows give the "wide" slab reads
    # in-bounds overflow room (the wrapped-around columns are cropped below).
    xp = jnp.pad(x, ((0, 0), (0, 0), (p, p + s), (p, p)))
    if s > 1:
        assert xp.shape[2] % s == 0 and xp.shape[3] % s == 0
        xp = space_to_depth(xp, s)                  # stride-s -> stride-1 conv
        w_sn = rearrange_weight(w_sn, s)
    kq = k // s
    _, Cq, Hq, Wq = xp.shape
    x_flat = xp.reshape(B, Cq, Hq * Wq)             # free reshape, stays NCHW

    w_taps = (w_sn.transpose(2, 3, 0, 1)            # (kq, kq, N, Cq)
              .reshape(kq * kq, oc, Cq)
              .astype(jnp.bfloat16))

    L = OH * Wq                                     # wide rows; crop Wq -> OW
    out_dtype = jnp.bfloat16 if lrelu else jnp.float32
    out = conv_pallas(x_flat, w_taps, b, kq=kq, Wq=Wq, L=L,
                      lrelu=lrelu, out_dtype=out_dtype)       # (B, oc, L)
    out = out.reshape(B, oc, OH, Wq)[:, :, :, :OW]            # (B, oc, OH, OW)
    return out


# ---------------------------------------------------------------------------
# Parameter init (deterministic, mirrors build_parameters)
# ---------------------------------------------------------------------------
def init_params(key):
    params = []
    for (ic, oc, k, _, _, _) in LAYER_CFG:
        key, kw, ku, kv = jax.random.split(key, 4)
        fan_in = ic * k * k
        std = float(np.sqrt(2.0 / fan_in))          # kaiming_normal_, fan_in
        w = std * jax.random.normal(kw, (oc, ic, k, k), jnp.float32)
        b = jnp.zeros((oc,), jnp.float32)
        u = _l2normalize(jax.random.normal(ku, (oc,), jnp.float32))
        v = _l2normalize(jax.random.normal(kv, (ic * k * k,), jnp.float32))
        params.append((w, b, u, v))
    return params


# ---------------------------------------------------------------------------
# Forward pass (Pallas path, NCHW end-to-end, bf16 intermediates)
# ---------------------------------------------------------------------------
def forward(img, mask, params):
    x = jnp.concatenate([img, mask], axis=1).astype(jnp.bfloat16)
    for (w, b, u, v), cfg in zip(params, LAYER_CFG):
        x = conv_layer(x, w, b, u, v, cfg)
    return x                                        # f32 from the last layer


# ---------------------------------------------------------------------------
# Pure-JAX reference (lax.conv, f32) for correctness check
# ---------------------------------------------------------------------------
def reference_forward(img, mask, params):
    x = jnp.concatenate([img, mask], axis=1)
    for (w, b, u, v), (ic, oc, k, s, p, lrelu) in zip(params, LAYER_CFG):
        w_sn = spectral_normalize(w, u, v)
        x = jnp.pad(x, ((0, 0), (0, 0), (p, p), (p, p)))
        x = jax.lax.conv_general_dilated(
            x, w_sn, (s, s), "VALID",
            dimension_numbers=("NCHW", "OIHW", "NCHW"))
        x = x + b.reshape(1, -1, 1, 1)
        if lrelu:
            x = jnp.where(x > 0, x, LRELU_SLOPE * x)
    return x


if __name__ == "__main__":
    key = jax.random.PRNGKey(0)
    k_img, k_mask, k_param = jax.random.split(key, 3)

    B, H, W = 2, 32, 32
    img = jax.random.normal(k_img, (B, 3, H, W), jnp.float32)
    mask = jax.random.normal(k_mask, (B, 1, H, W), jnp.float32)
    params = init_params(k_param)

    fwd = jax.jit(forward)
    out = fwd(img, mask, params)
    out = jax.block_until_ready(out)

    ref = reference_forward(img, mask, params)
    err = float(jnp.max(jnp.abs(out - ref)))
    scale = float(jnp.max(jnp.abs(ref))) + 1.0
    assert out.shape == (B, 1, 1, 1), out.shape
    # bf16 operands vs f32 reference: allow ~2% relative error.
    assert err / scale < 2e-2, f"mismatch vs reference: max abs err {err}"

    print("KERNEL_OK")
</pallas_src>

<mosaic_0001>
module attributes {stable_mosaic.version = 11 : i64} {
  func.func @_conv_tap_kernel(%arg0: i32, %arg1: memref<1x4x1482xbf16, #tpu.memory_space<vmem>>, %arg2: memref<49x8x4xbf16, #tpu.memory_space<vmem>>, %arg3: memref<8x1xf32, #tpu.memory_space<vmem>>, %arg4: memref<1x8x1216xbf16, #tpu.memory_space<vmem>>) attributes {dimension_semantics = [#tpu.dimension_semantics<parallel>], iteration_bounds = array<i64: 2>, scalar_prefetch = 0 : i64, scratch_operands = 0 : i64, tpu.core_type = #tpu.core_type<tc>, window_params = [{transform_indices = @transform_0, window_bounds = array<i64: 1, 4, 1482>}, {pipeline_mode = #tpu.pipeline_mode<synchronous>, transform_indices = @transform_1, window_bounds = array<i64: 49, 8, 4>}, {pipeline_mode = #tpu.pipeline_mode<synchronous>, transform_indices = @transform_2, window_bounds = array<i64: 8, 1>}, {transform_indices = @transform_3, window_bounds = array<i64: 1, 8, 1216>}]} {
    %c0 = arith.constant 0 : index
    %c0_0 = arith.constant 0 : index
    %c0_1 = arith.constant 0 : index
    %0 = vector.load %arg1[%c0, %c0_0, %c0_1] : memref<1x4x1482xbf16, #tpu.memory_space<vmem>>, vector<1x4x1482xbf16>
    %1 = vector.shape_cast %0 : vector<1x4x1482xbf16> to vector<4x1482xbf16>
    %cst = arith.constant 0.000000e+00 : f32
    %2 = vector.broadcast %cst : f32 to vector<8x1216xf32>
    %3 = vector.extract_strided_slice %1 {offsets = [0, 0], sizes = [4, 1216], strides = [1, 1]} : vector<4x1482xbf16> to vector<4x1216xbf16>
    %c0_2 = arith.constant 0 : index
    %c0_3 = arith.constant 0 : index
    %c0_4 = arith.constant 0 : index
    %4 = vector.load %arg2[%c0_2, %c0_3, %c0_4] : memref<49x8x4xbf16, #tpu.memory_space<vmem>>, vector<1x8x4xbf16>
    %5 = vector.shape_cast %4 : vector<1x8x4xbf16> to vector<8x4xbf16>
    %cst_5 = arith.constant dense<0.000000e+00> : vector<8x1216xf32>
    %6 = tpu.matmul %5, %3, %cst_5 {dimension_numbers = #tpu.dot_dimension_numbers<[1], [0], [0], [1], [0, 0, 1, 1], [], []>} : vector<8x4xbf16>, vector<4x1216xbf16>, vector<8x1216xf32> -> vector<8x1216xf32>
    %7 = arith.addf %2, %6 : vector<8x1216xf32>
    %8 = vector.extract_strided_slice %1 {offsets = [0, 1], sizes = [4, 1216], strides = [1, 1]} : vector<4x1482xbf16> to vector<4x1216xbf16>
    %c1 = arith.constant 1 : index
    %c0_6 = arith.constant 0 : index
    %c0_7 = arith.constant 0 : index
    %9 = vector.load %arg2[%c1, %c0_6, %c0_7] : memref<49x8x4xbf16, #tpu.memory_space<vmem>>, vector<1x8x4xbf16>
    %10 = vector.shape_cast %9 : vector<1x8x4xbf16> to vector<8x4xbf16>
    %cst_8 = arith.constant dense<0.000000e+00> : vector<8x1216xf32>
    %11 = tpu.matmul %10, %8, %cst_8 {dimension_numbers = #tpu.dot_dimension_numbers<[1], [0], [0], [1], [0, 0, 1, 1], [], []>} : vector<8x4xbf16>, vector<4x1216xbf16>, vector<8x1216xf32> -> vector<8x1216xf32>
    %12 = arith.addf %7, %11 : vector<8x1216xf32>
    %13 = vector.extract_strided_slice %1 {offsets = [0, 2], sizes = [4, 1216], strides = [1, 1]} : vector<4x1482xbf16> to vector<4x1216xbf16>
    %c2 = arith.constant 2 : index
    %c0_9 = arith.constant 0 : index
    %c0_10 = arith.constant 0 : index
    %14 = vector.load %arg2[%c2, %c0_9, %c0_10] : memref<49x8x4xbf16, #tpu.memory_space<vmem>>, vector<1x8x4xbf16>
    %15 = vector.shape_cast %14 : vector<1x8x4xbf16> to vector<8x4xbf16>
    %cst_11 = arith.constant dense<0.000000e+00> : vector<8x1216xf32>
    %16 = tpu.matmul %15, %13, %cst_11 {dimension_numbers = #tpu.dot_dimension_numbers<[1], [0], [0], [1], [0, 0, 1, 1], [], []>} : vector<8x4xbf16>, vector<4x1216xbf16>, vector<8x1216xf32> -> vector<8x1216xf32>
    %17 = arith.addf %12, %16 : vector<8x1216xf32>
    %18 = vector.extract_strided_slice %1 {offsets = [0, 3], sizes = [4, 1216], strides = [1, 1]} : vector<4x1482xbf16> to vector<4x1216xbf16>
    %c3 = arith.constant 3 : index
    %c0_12 = arith.constant 0 : index
    %c0_13 = arith.constant 0 : index
    %19 = vector.load %arg2[%c3, %c0_12, %c0_13] : memref<49x8x4xbf16, #tpu.memory_space<vmem>>, vector<1x8x4xbf16>
    %20 = vector.shape_cast %19 : vector<1x8x4xbf16> to vector<8x4xbf16>
    %cst_14 = arith.constant dense<0.000000e+00> : vector<8x1216xf32>
    %21 = tpu.matmul %20, %18, %cst_14 {dimension_numbers = #tpu.dot_dimension_numbers<[1], [0], [0], [1], [0, 0, 1, 1], [], []>} : vector<8x4xbf16>, vector<4x1216xbf16>, vector<8x1216xf32> -> vector<8x1216xf32>
    %22 = arith.addf %17, %21 : vector<8x1216xf32>
    %23 = vector.extract_strided_slice %1 {offsets = [0, 4], sizes = [4, 1216], strides = [1, 1]} : vector<4x1482xbf16> to vector<4x1216xbf16>
    %c4 = arith.constant 4 : index
    %c0_15 = arith.constant 0 : index
    %c0_16 = arith.constant 0 : index
    %24 = vector.load %arg2[%c4, %c0_15, %c0_16] : memref<49x8x4xbf16, #tpu.memory_space<vmem>>, vector<1x8x4xbf16>
    %25 = vector.shape_cast %24 : vector<1x8x4xbf16> to vector<8x4xbf16>
    %cst_17 = arith.constant dense<0.000000e+00> : vector<8x1216xf32>
    %26 = tpu.matmul %25, %23, %cst_17 {dimension_numbers = #tpu.dot_dimension_numbers<[1], [0], [0], [1], [0, 0, 1, 1], [], []>} : vector<8x4xbf16>, vector<4x1216xbf16>, vector<8x1216xf32> -> vector<8x1216xf32>
    %27 = arith.addf %22, %26 : vector<8x1216xf32>
    %28 = vector.extract_strided_slice %1 {offsets = [0, 5], sizes = [4, 1216], strides = [1, 1]} : vector<4x1482xbf16> to vector<4x1216xbf16>
    %c5 = arith.constant 5 : index
    %c0_18 = arith.constant 0 : index
    %c0_19 = arith.constant 0 : index
    %29 = vector.load %arg2[%c5, %c0_18, %c0_19] : memref<49x8x4xbf16, #tpu.memory_space<vmem>>, vector<1x8x4xbf16>
    %30 = vector.shape_cast %29 : vector<1x8x4xbf16> to vector<8x4xbf16>
    %cst_20 = arith.constant dense<0.000000e+00> : vector<8x1216xf32>
    %31 = tpu.matmul %30, %28, %cst_20 {dimension_numbers = #tpu.dot_dimension_numbers<[1], [0], [0], [1], [0, 0, 1, 1], [], []>} : vector<8x4xbf16>, vector<4x1216xbf16>, vector<8x1216xf32> -> vector<8x1216xf32>
    %32 = arith.addf %27, %31 : vector<8x1216xf32>
    %33 = vector.extract_strided_slice %1 {offsets = [0, 6], sizes = [4, 1216], strides = [1, 1]} : vector<4x1482xbf16> to vector<4x1216xbf16>
    %c6 = arith.constant 6 : index
    %c0_21 = arith.constant 0 : index
    %c0_22 = arith.constant 0 : index
    %34 = vector.load %arg2[%c6, %c0_21, %c0_22] : memref<49x8x4xbf16, #tpu.memory_space<vmem>>, vector<1x8x4xbf16>
    %35 = vector.shape_cast %34 : vector<1x8x4xbf16> to vector<8x4xbf16>
    %cst_23 = arith.constant dense<0.000000e+00> : vector<8x1216xf32>
    %36 = tpu.matmul %35, %33, %cst_23 {dimension_numbers = #tpu.dot_dimension_numbers<[1], [0], [0], [1], [0, 0, 1, 1], [], []>} : vector<8x4xbf16>, vector<4x1216xbf16>, vector<8x1216xf32> -> vector<8x1216xf32>
    %37 = arith.addf %32, %36 : vector<8x1216xf32>
    %38 = vector.extract_strided_slice %1 {offsets = [0, 38], sizes = [4, 1216], strides = [1, 1]} : vector<4x1482xbf16> to vector<4x1216xbf16>
    %c7 = arith.constant 7 : index
    %c0_24 = arith.constant 0 : index
    %c0_25 = arith.constant 0 : index
    %39 = vector.load %arg2[%c7, %c0_24, %c0_25] : memref<49x8x4xbf16, #tpu.memory_space<vmem>>, vector<1x8x4xbf16>
    %40 = vector.shape_cast %39 : vector<1x8x4xbf16> to vector<8x4xbf16>
    %cst_26 = arith.constant dense<0.000000e+00> : vector<8x1216xf32>
    %41 = tpu.matmul %40, %38, %cst_26 {dimension_numbers = #tpu.dot_dimension_numbers<[1], [0], [0], [1], [0, 0, 1, 1], [], []>} : vector<8x4xbf16>, vector<4x1216xbf16>, vector<8x1216xf32> -> vector<8x1216xf32>
    %42 = arith.addf %37, %41 : vector<8x1216xf32>
    %43 = vector.extract_strided_slice %1 {offsets = [0, 39], sizes = [4, 1216], strides = [1, 1]} : vector<4x1482xbf16> to vector<4x1216xbf16>
    %c8 = arith.constant 8 : index
    %c0_27 = arith.constant 0 : index
    %c0_28 = arith.constant 0 : index
    %44 = vector.load %arg2[%c8, %c0_27, %c0_28] : memref<49x8x4xbf16, #tpu.memory_space<vmem>>, vector<1x8x4xbf16>
    %45 = vector.shape_cast %44 : vector<1x8x4xbf16> to vector<8x4xbf16>
    %cst_29 = arith.constant dense<0.000000e+00> : vector<8x1216xf32>
    %46 = tpu.matmul %45, %43, %cst_29 {dimension_numbers = #tpu.dot_dimension_numbers<[1], [0], [0], [1], [0, 0, 1, 1], [], []>} : vector<8x4xbf16>, vector<4x1216xbf16>, vector<8x1216xf32> -> vector<8x1216xf32>
    %47 = arith.addf %42, %46 : vector<8x1216xf32>
    %48 = vector.extract_strided_slice %1 {offsets = [0, 40], sizes = [4, 1216], strides = [1, 1]} : vector<4x1482xbf16> to vector<4x1216xbf16>
    %c9 = arith.constant 9 : index
    %c0_30 = arith.constant 0 : index
    %c0_31 = arith.constant 0 : index
    %49 = vector.load %arg2[%c9, %c0_30, %c0_31] : memref<49x8x4xbf16, #tpu.memory_space<vmem>>, vector<1x8x4xbf16>
    %50 = vector.shape_cast %49 : vector<1x8x4xbf16> to vector<8x4xbf16>
    %cst_32 = arith.constant dense<0.000000e+00> : vector<8x1216xf32>
    %51 = tpu.matmul %50, %48, %cst_32 {dimension_numbers = #tpu.dot_dimension_numbers<[1], [0], [0], [1], [0, 0, 1, 1], [], []>} : vector<8x4xbf16>, vector<4x1216xbf16>, vector<8x1216xf32> -> vector<8x1216xf32>
    %52 = arith.addf %47, %51 : vector<8x1216xf32>
    %53 = vector.extract_strided_slice %1 {offsets = [0, 41], sizes = [4, 1216], strides = [1, 1]} : vector<4x1482xbf16> to vector<4x1216xbf16>
    %c10 = arith.constant 10 : index
    %c0_33 = arith.constant 0 : index
    %c0_34 = arith.constant 0 : index
    %54 = vector.load %arg2[%c10, %c0_33, %c0_34] : memref<49x8x4xbf16, #tpu.memory_space<vmem>>, vector<1x8x4xbf16>
    %55 = vector.shape_cast %54 : vector<1x8x4xbf16> to vector<8x4xbf16>
    %cst_35 = arith.constant dense<0.000000e+00> : vector<8x1216xf32>
    %56 = tpu.matmul %55, %53, %cst_35 {dimension_numbers = #tpu.dot_dimension_numbers<[1], [0], [0], [1], [0, 0, 1, 1], [], []>} : vector<8x4xbf16>, vector<4x1216xbf16>, vector<8x1216xf32> -> vector<8x1216xf32>
    %57 = arith.addf %52, %56 : vector<8x1216xf32>
    %58 = vector.extract_strided_slice %1 {offsets = [0, 42], sizes = [4, 1216], strides = [1, 1]} : vector<4x1482xbf16> to vector<4x1216xbf16>
    %c11 = arith.constant 11 : index
    %c0_36 = arith.constant 0 : index
    %c0_37 = arith.constant 0 : index
    %59 = vector.load %arg2[%c11, %c0_36, %c0_37] : memref<49x8x4xbf16, #tpu.memory_space<vmem>>, vector<1x8x4xbf16>
    %60 = vector.shape_cast %59 : vector<1x8x4xbf16> to vector<8x4xbf16>
    %cst_38 = arith.constant dense<0.000000e+00> : vector<8x1216xf32>
    %61 = tpu.matmul %60, %58, %cst_38 {dimension_numbers = #tpu.dot_dimension_numbers<[1], [0], [0], [1], [0, 0, 1, 1], [], []>} : vector<8x4xbf16>, vector<4x1216xbf16>, vector<8x1216xf32> -> vector<8x1216xf32>
    %62 = arith.addf %57, %61 : vector<8x1216xf32>
    %63 = vector.extract_strided_slice %1 {offsets = [0, 43], sizes = [4, 1216], strides = [1, 1]} : vector<4x1482xbf16> to vector<4x1216xbf16>
    %c12 = arith.constant 12 : index
    %c0_39 = arith.constant 0 : index
    %c0_40 = arith.constant 0 : index
    %64 = vector.load %arg2[%c12, %c0_39, %c0_40] : memref<49x8x4xbf16, #tpu.memory_space<vmem>>, vector<1x8x4xbf16>
    %65 = vector.shape_cast %64 : vector<1x8x4xbf16> to vector<8x4xbf16>
    %cst_41 = arith.constant dense<0.000000e+00> : vector<8x1216xf32>
    %66 = tpu.matmul %65, %63, %cst_41 {dimension_numbers = #tpu.dot_dimension_numbers<[1], [0], [0], [1], [0, 0, 1, 1], [], []>} : vector<8x4xbf16>, vector<4x1216xbf16>, vector<8x1216xf32> -> vector<8x1216xf32>
    %67 = arith.addf %62, %66 : vector<8x1216xf32>
    %68 = vector.extract_strided_slice %1 {offsets = [0, 44], sizes = [4, 1216], strides = [1, 1]} : vector<4x1482xbf16> to vector<4x1216xbf16>
    %c13 = arith.constant 13 : index
    %c0_42 = arith.constant 0 : index
    %c0_43 = arith.constant 0 : index
    %69 = vector.load %arg2[%c13, %c0_42, %c0_43] : memref<49x8x4xbf16, #tpu.memory_space<vmem>>, vector<1x8x4xbf16>
    %70 = vector.shape_cast %69 : vector<1x8x4xbf16> to vector<8x4xbf16>
    %cst_44 = arith.constant dense<0.000000e+00> : vector<8x1216xf32>
    %71 = tpu.matmul %70, %68, %cst_44 {dimension_numbers = #tpu.dot_dimension_numbers<[1], [0], [0], [1], [0, 0, 1, 1], [], []>} : vector<8x4xbf16>, vector<4x1216xbf16>, vector<8x1216xf32> -> vector<8x1216xf32>
    %72 = arith.addf %67, %71 : vector<8x1216xf32>
    %73 = vector.extract_strided_slice %1 {offsets = [0, 76], sizes = [4, 1216], strides = [1, 1]} : vector<4x1482xbf16> to vector<4x1216xbf16>
    %c14 = arith.constant 14 : index
    %c0_45 = arith.constant 0 : index
    %c0_46 = arith.constant 0 : index
    %74 = vector.load %arg2[%c14, %c0_45, %c0_46] : memref<49x8x4xbf16, #tpu.memory_space<vmem>>, vector<1x8x4xbf16>
    %75 = vector.shape_cast %74 : vector<1x8x4xbf16> to vector<8x4xbf16>
    %cst_47 = arith.constant dense<0.000000e+00> : vector<8x1216xf32>
    %76 = tpu.matmul %75, %73, %cst_47 {dimension_numbers = #tpu.dot_dimension_numbers<[1], [0], [0], [1], [0, 0, 1, 1], [], []>} : vector<8x4xbf16>, vector<4x1216xbf16>, vector<8x1216xf32> -> vector<8x1216xf32>
    %77 = arith.addf %72, %76 : vector<8x1216xf32>
    %78 = vector.extract_strided_slice %1 {offsets = [0, 77], sizes = [4, 1216], strides = [1, 1]} : vector<4x1482xbf16> to vector<4x1216xbf16>
    %c15 = arith.constant 15 : index
    %c0_48 = arith.constant 0 : index
    %c0_49 = arith.constant 0 : index
    %79 = vector.load %arg2[%c15, %c0_48, %c0_49] : memref<49x8x4xbf16, #tpu.memory_space<vmem>>, vector<1x8x4xbf16>
    %80 = vector.shape_cast %79 : vector<1x8x4xbf16> to vector<8x4xbf16>
    %cst_50 = arith.constant dense<0.000000e+00> : vector<8x1216xf32>
    %81 = tpu.matmul %80, %78, %cst_50 {dimension_numbers = #tpu.dot_dimension_numbers<[1], [0], [0], [1], [0, 0, 1, 1], [], []>} : vector<8x4xbf16>, vector<4x1216xbf16>, vector<8x1216xf32> -> vector<8x1216xf32>
    %82 = arith.addf %77, %81 : vector<8x1216xf32>
    %83 = vector.extract_strided_slice %1 {offsets = [0, 78], sizes = [4, 1216], strides = [1, 1]} : vector<4x1482xbf16> to vector<4x1216xbf16>
    %c16 = arith.constant 16 : index
    %c0_51 = arith.constant 0 : index
    %c0_52 = arith.constant 0 : index
    %84 = vector.load %arg2[%c16, %c0_51, %c0_52] : memref<49x8x4xbf16, #tpu.memory_space<vmem>>, vector<1x8x4xbf16>
    %85 = vector.shape_cast %84 : vector<1x8x4xbf16> to vector<8x4xbf16>
    %cst_53 = arith.constant dense<0.000000e+00> : vector<8x1216xf32>
    %86 = tpu.matmul %85, %83, %cst_53 {dimension_numbers = #tpu.dot_dimension_numbers<[1], [0], [0], [1], [0, 0, 1, 1], [], []>} : vector<8x4xbf16>, vector<4x1216xbf16>, vector<8x1216xf32> -> vector<8x1216xf32>
    %87 = arith.addf %82, %86 : vector<8x1216xf32>
    %88 = vector.extract_strided_slice %1 {offsets = [0, 79], sizes = [4, 1216], strides = [1, 1]} : vector<4x1482xbf16> to vector<4x1216xbf16>
    %c17 = arith.constant 17 : index
    %c0_54 = arith.constant 0 : index
    %c0_55 = arith.constant 0 : index
    %89 = vector.load %arg2[%c17, %c0_54, %c0_55] : memref<49x8x4xbf16, #tpu.memory_space<vmem>>, vector<1x8x4xbf16>
    %90 = vector.shape_cast %89 : vector<1x8x4xbf16> to vector<8x4xbf16>
    %cst_56 = arith.constant dense<0.000000e+00> : vector<8x1216xf32>
    %91 = tpu.matmul %90, %88, %cst_56 {dimension_numbers = #tpu.dot_dimension_numbers<[1], [0], [0], [1], [0, 0, 1, 1], [], []>} : vector<8x4xbf16>, vector<4x1216xbf16>, vector<8x1216xf32> -> vector<8x1216xf32>
    %92 = arith.addf %87, %91 : vector<8x1216xf32>
    %93 = vector.extract_strided_slice %1 {offsets = [0, 80], sizes = [4, 1216], strides = [1, 1]} : vector<4x1482xbf16> to vector<4x1216xbf16>
    %c18 = arith.constant 18 : index
    %c0_57 = arith.constant 0 : index
    %c0_58 = arith.constant 0 : index
    %94 = vector.load %arg2[%c18, %c0_57, %c0_58] : memref<49x8x4xbf16, #tpu.memory_space<vmem>>, vector<1x8x4xbf16>
    %95 = vector.shape_cast %94 : vector<1x8x4xbf16> to vector<8x4xbf16>
    %cst_59 = arith.constant dense<0.000000e+00> : vector<8x1216xf32>
    %96 = tpu.matmul %95, %93, %cst_59 {dimension_numbers = #tpu.dot_dimension_numbers<[1], [0], [0], [1], [0, 0, 1, 1], [], []>} : vector<8x4xbf16>, vector<4x1216xbf16>, vector<8x1216xf32> -> vector<8x1216xf32>
    %97 = arith.addf %92, %96 : vector<8x1216xf32>
    %98 = vector.extract_strided_slice %1 {offsets = [0, 81], sizes = [4, 1216], strides = [1, 1]} : vector<4x1482xbf16> to vector<4x1216xbf16>
    %c19 = arith.constant 19 : index
    %c0_60 = arith.constant 0 : index
    %c0_61 = arith.constant 0 : index
    %99 = vector.load %arg2[%c19, %c0_60, %c0_61] : memref<49x8x4xbf16, #tpu.memory_space<vmem>>, vector<1x8x4xbf16>
    %100 = vector.shape_cast %99 : vector<1x8x4xbf16> to vector<8x4xbf16>
    %cst_62 = arith.constant dense<0.000000e+00> : vector<8x1216xf32>
    %101 = tpu.matmul %100, %98, %cst_62 {dimension_numbers = #tpu.dot_dimension_numbers<[1], [0], [0], [1], [0, 0, 1, 1], [], []>} : vector<8x4xbf16>, vector<4x1216xbf16>, vector<8x1216xf32> -> vector<8x1216xf32>
    %102 = arith.addf %97, %101 : vector<8x1216xf32>
    %103 = vector.extract_strided_slice %1 {offsets = [0, 82], sizes = [4, 1216], strides = [1, 1]} : vector<4x1482xbf16> to vector<4x1216xbf16>
    %c20 = arith.constant 20 : index
    %c0_63 = arith.constant 0 : index
    %c0_64 = arith.constant 0 : index
    %104 = vector.load %arg2[%c20, %c0_63, %c0_64] : memref<49x8x4xbf16, #tpu.memory_space<vmem>>, vector<1x8x4xbf16>
    %105 = vector.shape_cast %104 : vector<1x8x4xbf16> to vector<8x4xbf16>
    %cst_65 = arith.constant dense<0.000000e+00> : vector<8x1216xf32>
    %106 = tpu.matmul %105, %103, %cst_65 {dimension_numbers = #tpu.dot_dimension_numbers<[1], [0], [0], [1], [0, 0, 1, 1], [], []>} : vector<8x4xbf16>, vector<4x1216xbf16>, vector<8x1216xf32> -> vector<8x1216xf32>
    %107 = arith.addf %102, %106 : vector<8x1216xf32>
    %108 = vector.extract_strided_slice %1 {offsets = [0, 114], sizes = [4, 1216], strides = [1, 1]} : vector<4x1482xbf16> to vector<4x1216xbf16>
    %c21 = arith.constant 21 : index
    %c0_66 = arith.constant 0 : index
    %c0_67 = arith.constant 0 : index
    %109 = vector.load %arg2[%c21, %c0_66, %c0_67] : memref<49x8x4xbf16, #tpu.memory_space<vmem>>, vector<1x8x4xbf16>
    %110 = vector.shape_cast %109 : vector<1x8x4xbf16> to vector<8x4xbf16>
    %cst_68 = arith.constant dense<0.000000e+00> : vector<8x1216xf32>
    %111 = tpu.matmul %110, %108, %cst_68 {dimension_numbers = #tpu.dot_dimension_numbers<[1], [0], [0], [1], [0, 0, 1, 1], [], []>} : vector<8x4xbf16>, vector<4x1216xbf16>, vector<8x1216xf32> -> vector<8x1216xf32>
    %112 = arith.addf %107, %111 : vector<8x1216xf32>
    %113 = vector.extract_strided_slice %1 {offsets = [0, 115], sizes = [4, 1216], strides = [1, 1]} : vector<4x1482xbf16> to vector<4x1216xbf16>
    %c22 = arith.constant 22 : index
    %c0_69 = arith.constant 0 : index
    %c0_70 = arith.constant 0 : index
    %114 = vector.load %arg2[%c22, %c0_69, %c0_70] : memref<49x8x4xbf16, #tpu.memory_space<vmem>>, vector<1x8x4xbf16>
    %115 = vector.shape_cast %114 : vector<1x8x4xbf16> to vector<8x4xbf16>
    %cst_71 = arith.constant dense<0.000000e+00> : vector<8x1216xf32>
    %116 = tpu.matmul %115, %113, %cst_71 {dimension_numbers = #tpu.dot_dimension_numbers<[1], [0], [0], [1], [0, 0, 1, 1], [], []>} : vector<8x4xbf16>, vector<4x1216xbf16>, vector<8x1216xf32> -> vector<8x1216xf32>
    %117 = arith.addf %112, %116 : vector<8x1216xf32>
    %118 = vector.extract_strided_slice %1 {offsets = [0, 116], sizes = [4, 1216], strides = [1, 1]} : vector<4x1482xbf16> to vector<4x1216xbf16>
    %c23 = arith.constant 23 : index
    %c0_72 = arith.constant 0 : index
    %c0_73 = arith.constant 0 : index
    %119 = vector.load %arg2[%c23, %c0_72, %c0_73] : memref<49x8x4xbf16, #tpu.memory_space<vmem>>, vector<1x8x4xbf16>
    %120 = vector.shape_cast %119 : vector<1x8x4xbf16> to vector<8x4xbf16>
    %cst_74 = arith.constant dense<0.000000e+00> : vector<8x1216xf32>
    %121 = tpu.matmul %120, %118, %cst_74 {dimension_numbers = #tpu.dot_dimension_numbers<[1], [0], [0], [1], [0, 0, 1, 1], [], []>} : vector<8x4xbf16>, vector<4x1216xbf16>, vector<8x1216xf32> -> vector<8x1216xf32>
    %122 = arith.addf %117, %121 : vector<8x1216xf32>
    %123 = vector.extract_strided_slice %1 {offsets = [0, 117], sizes = [4, 1216], strides = [1, 1]} : vector<4x1482xbf16> to vector<4x1216xbf16>
    %c24 = arith.constant 24 : index
    %c0_75 = arith.constant 0 : index
    %c0_76 = arith.constant 0 : index
    %124 = vector.load %arg2[%c24, %c0_75, %c0_76] : memref<49x8x4xbf16, #tpu.memory_space<vmem>>, vector<1x8x4xbf16>
    %125 = vector.shape_cast %124 : vector<1x8x4xbf16> to vector<8x4xbf16>
    %cst_77 = arith.constant dense<0.000000e+00> : vector<8x1216xf32>
    %126 = tpu.matmul %125, %123, %cst_77 {dimension_numbers = #tpu.dot_dimension_numbers<[1], [0], [0], [1], [0, 0, 1, 1], [], []>} : vector<8x4xbf16>, vector<4x1216xbf16>, vector<8x1216xf32> -> vector<8x1216xf32>
    %127 = arith.addf %122, %126 : vector<8x1216xf32>
    %128 = vector.extract_strided_slice %1 {offsets = [0, 118], sizes = [4, 1216], strides = [1, 1]} : vector<4x1482xbf16> to vector<4x1216xbf16>
    %c25 = arith.constant 25 : index
    %c0_78 = arith.constant 0 : index
    %c0_79 = arith.constant 0 : index
    %129 = vector.load %arg2[%c25, %c0_78, %c0_79] : memref<49x8x4xbf16, #tpu.memory_space<vmem>>, vector<1x8x4xbf16>
    %130 = vector.shape_cast %129 : vector<1x8x4xbf16> to vector<8x4xbf16>
    %cst_80 = arith.constant dense<0.000000e+00> : vector<8x1216xf32>
    %131 = tpu.matmul %130, %128, %cst_80 {dimension_numbers = #tpu.dot_dimension_numbers<[1], [0], [0], [1], [0, 0, 1, 1], [], []>} : vector<8x4xbf16>, vector<4x1216xbf16>, vector<8x1216xf32> -> vector<8x1216xf32>
    %132 = arith.addf %127, %131 : vector<8x1216xf32>
    %133 = vector.extract_strided_slice %1 {offsets = [0, 119], sizes = [4, 1216], strides = [1, 1]} : vector<4x1482xbf16> to vector<4x1216xbf16>
    %c26 = arith.constant 26 : index
    %c0_81 = arith.constant 0 : index
    %c0_82 = arith.constant 0 : index
    %134 = vector.load %arg2[%c26, %c0_81, %c0_82] : memref<49x8x4xbf16, #tpu.memory_space<vmem>>, vector<1x8x4xbf16>
    %135 = vector.shape_cast %134 : vector<1x8x4xbf16> to vector<8x4xbf16>
    %cst_83 = arith.constant dense<0.000000e+00> : vector<8x1216xf32>
    %136 = tpu.matmul %135, %133, %cst_83 {dimension_numbers = #tpu.dot_dimension_numbers<[1], [0], [0], [1], [0, 0, 1, 1], [], []>} : vector<8x4xbf16>, vector<4x1216xbf16>, vector<8x1216xf32> -> vector<8x1216xf32>
    %137 = arith.addf %132, %136 : vector<8x1216xf32>
    %138 = vector.extract_strided_slice %1 {offsets = [0, 120], sizes = [4, 1216], strides = [1, 1]} : vector<4x1482xbf16> to vector<4x1216xbf16>
    %c27 = arith.constant 27 : index
    %c0_84 = arith.constant 0 : index
    %c0_85 = arith.constant 0 : index
    %139 = vector.load %arg2[%c27, %c0_84, %c0_85] : memref<49x8x4xbf16, #tpu.memory_space<vmem>>, vector<1x8x4xbf16>
    %140 = vector.shape_cast %139 : vector<1x8x4xbf16> to vector<8x4xbf16>
    %cst_86 = arith.constant dense<0.000000e+00> : vector<8x1216xf32>
    %141 = tpu.matmul %140, %138, %cst_86 {dimension_numbers = #tpu.dot_dimension_numbers<[1], [0], [0], [1], [0, 0, 1, 1], [], []>} : vector<8x4xbf16>, vector<4x1216xbf16>, vector<8x1216xf32> -> vector<8x1216xf32>
    %142 = arith.addf %137, %141 : vector<8x1216xf32>
    %143 = vector.extract_strided_slice %1 {offsets = [0, 152], sizes = [4, 1216], strides = [1, 1]} : vector<4x1482xbf16> to vector<4x1216xbf16>
    %c28 = arith.constant 28 : index
    %c0_87 = arith.constant 0 : index
    %c0_88 = arith.constant 0 : index
    %144 = vector.load %arg2[%c28, %c0_87, %c0_88] : memref<49x8x4xbf16, #tpu.memory_space<vmem>>, vector<1x8x4xbf16>
    %145 = vector.shape_cast %144 : vector<1x8x4xbf16> to vector<8x4xbf16>
    %cst_89 = arith.constant dense<0.000000e+00> : vector<8x1216xf32>
    %146 = tpu.matmul %145, %143, %cst_89 {dimension_numbers = #tpu.dot_dimension_numbers<[1], [0], [0], [1], [0, 0, 1, 1], [], []>} : vector<8x4xbf16>, vector<4x1216xbf16>, vector<8x1216xf32> -> vector<8x1216xf32>
    %147 = arith.addf %142, %146 : vector<8x1216xf32>
    %148 = vector.extract_strided_slice %1 {offsets = [0, 153], sizes = [4, 1216], strides = [1, 1]} : vector<4x1482xbf16> to vector<4x1216xbf16>
    %c29 = arith.constant 29 : index
    %c0_90 = arith.constant 0 : index
    %c0_91 = arith.constant 0 : index
    %149 = vector.load %arg2[%c29, %c0_90, %c0_91] : memref<49x8x4xbf16, #tpu.memory_space<vmem>>, vector<1x8x4xbf16>
    %150 = vector.shape_cast %149 : vector<1x8x4xbf16> to vector<8x4xbf16>
    %cst_92 = arith.constant dense<0.000000e+00> : vector<8x1216xf32>
    %151 = tpu.matmul %150, %148, %cst_92 {dimension_numbers = #tpu.dot_dimension_numbers<[1], [0], [0], [1], [0, 0, 1, 1], [], []>} : vector<8x4xbf16>, vector<4x1216xbf16>, vector<8x1216xf32> -> vector<8x1216xf32>
    %152 = arith.addf %147, %151 : vector<8x1216xf32>
    %153 = vector.extract_strided_slice %1 {offsets = [0, 154], sizes = [4, 1216], strides = [1, 1]} : vector<4x1482xbf16> to vector<4x1216xbf16>
    %c30 = arith.constant 30 : index
    %c0_93 = arith.constant 0 : index
    %c0_94 = arith.constant 0 : index
    %154 = vector.load %arg2[%c30, %c0_93, %c0_94] : memref<49x8x4xbf16, #tpu.memory_space<vmem>>, vector<1x8x4xbf16>
    %155 = vector.shape_cast %154 : vector<1x8x4xbf16> to vector<8x4xbf16>
    %cst_95 = arith.constant dense<0.000000e+00> : vector<8x1216xf32>
    %156 = tpu.matmul %155, %153, %cst_95 {dimension_numbers = #tpu.dot_dimension_numbers<[1], [0], [0], [1], [0, 0, 1, 1], [], []>} : vector<8x4xbf16>, vector<4x1216xbf16>, vector<8x1216xf32> -> vector<8x1216xf32>
    %157 = arith.addf %152, %156 : vector<8x1216xf32>
    %158 = vector.extract_strided_slice %1 {offsets = [0, 155], sizes = [4, 1216], strides = [1, 1]} : vector<4x1482xbf16> to vector<4x1216xbf16>
    %c31 = arith.constant 31 : index
    %c0_96 = arith.constant 0 : index
    %c0_97 = arith.constant 0 : index
    %159 = vector.load %arg2[%c31, %c0_96, %c0_97] : memref<49x8x4xbf16, #tpu.memory_space<vmem>>, vector<1x8x4xbf16>
    %160 = vector.shape_cast %159 : vector<1x8x4xbf16> to vector<8x4xbf16>
    %cst_98 = arith.constant dense<0.000000e+00> : vector<8x1216xf32>
    %161 = tpu.matmul %160, %158, %cst_98 {dimension_numbers = #tpu.dot_dimension_numbers<[1], [0], [0], [1], [0, 0, 1, 1], [], []>} : vector<8x4xbf16>, vector<4x1216xbf16>, vector<8x1216xf32> -> vector<8x1216xf32>
    %162 = arith.addf %157, %161 : vector<8x1216xf32>
    %163 = vector.extract_strided_slice %1 {offsets = [0, 156], sizes = [4, 1216], strides = [1, 1]} : vector<4x1482xbf16> to vector<4x1216xbf16>
    %c32 = arith.constant 32 : index
    %c0_99 = arith.constant 0 : index
    %c0_100 = arith.constant 0 : index
    %164 = vector.load %arg2[%c32, %c0_99, %c0_100] : memref<49x8x4xbf16, #tpu.memory_space<vmem>>, vector<1x8x4xbf16>
    %165 = vector.shape_cast %164 : vector<1x8x4xbf16> to vector<8x4xbf16>
    %cst_101 = arith.constant dense<0.000000e+00> : vector<8x1216xf32>
    %166 = tpu.matmul %165, %163, %cst_101 {dimension_numbers = #tpu.dot_dimension_numbers<[1], [0], [0], [1], [0, 0, 1, 1], [], []>} : vector<8x4xbf16>, vector<4x1216xbf16>, vector<8x1216xf32> -> vector<8x1216xf32>
    %167 = arith.addf %162, %166 : vector<8x1216xf32>
    %168 = vector.extract_strided_slice %1 {offsets = [0, 157], sizes = [4, 1216], strides = [1, 1]} : vector<4x1482xbf16> to vector<4x1216xbf16>
    %c33 = arith.constant 33 : index
    %c0_102 = arith.constant 0 : index
    %c0_103 = arith.constant 0 : index
    %169 = vector.load %arg2[%c33, %c0_102, %c0_103] : memref<49x8x4xbf16, #tpu.memory_space<vmem>>, vector<1x8x4xbf16>
    %170 = vector.shape_cast %169 : vector<1x8x4xbf16> to vector<8x4xbf16>
    %cst_104 = arith.constant dense<0.000000e+00> : vector<8x1216xf32>
    %171 = tpu.matmul %170, %168, %cst_104 {dimension_numbers = #tpu.dot_dimension_numbers<[1], [0], [0], [1], [0, 0, 1, 1], [], []>} : vector<8x4xbf16>, vector<4x1216xbf16>, vector<8x1216xf32> -> vector<8x1216xf32>
    %172 = arith.addf %167, %171 : vector<8x1216xf32>
    %173 = vector.extract_strided_slice %1 {offsets = [0, 158], sizes = [4, 1216], strides = [1, 1]} : vector<4x1482xbf16> to vector<4x1216xbf16>
    %c34 = arith.constant 34 : index
    %c0_105 = arith.constant 0 : index
    %c0_106 = arith.constant 0 : index
    %174 = vector.load %arg2[%c34, %c0_105, %c0_106] : memref<49x8x4xbf16, #tpu.memory_space<vmem>>, vector<1x8x4xbf16>
    %175 = vector.shape_cast %174 : vector<1x8x4xbf16> to vector<8x4xbf16>
    %cst_107 = arith.constant dense<0.000000e+00> : vector<8x1216xf32>
    %176 = tpu.matmul %175, %173, %cst_107 {dimension_numbers = #tpu.dot_dimension_numbers<[1], [0], [0], [1], [0, 0, 1, 1], [], []>} : vector<8x4xbf16>, vector<4x1216xbf16>, vector<8x1216xf32> -> vector<8x1216xf32>
    %177 = arith.addf %172, %176 : vector<8x1216xf32>
    %178 = vector.extract_strided_slice %1 {offsets = [0, 190], sizes = [4, 1216], strides = [1, 1]} : vector<4x1482xbf16> to vector<4x1216xbf16>
    %c35 = arith.constant 35 : index
    %c0_108 = arith.constant 0 : index
    %c0_109 = arith.constant 0 : index
    %179 = vector.load %arg2[%c35, %c0_108, %c0_109] : memref<49x8x4xbf16, #tpu.memory_space<vmem>>, vector<1x8x4xbf16>
    %180 = vector.shape_cast %179 : vector<1x8x4xbf16> to vector<8x4xbf16>
    %cst_110 = arith.constant dense<0.000000e+00> : vector<8x1216xf32>
    %181 = tpu.matmul %180, %178, %cst_110 {dimension_numbers = #tpu.dot_dimension_numbers<[1], [0], [0], [1], [0, 0, 1, 1], [], []>} : vector<8x4xbf16>, vector<4x1216xbf16>, vector<8x1216xf32> -> vector<8x1216xf32>
    %182 = arith.addf %177, %181 : vector<8x1216xf32>
    %183 = vector.extract_strided_slice %1 {offsets = [0, 191], sizes = [4, 1216], strides = [1, 1]} : vector<4x1482xbf16> to vector<4x1216xbf16>
    %c36 = arith.constant 36 : index
    %c0_111 = arith.constant 0 : index
    %c0_112 = arith.constant 0 : index
    %184 = vector.load %arg2[%c36, %c0_111, %c0_112] : memref<49x8x4xbf16, #tpu.memory_space<vmem>>, vector<1x8x4xbf16>
    %185 = vector.shape_cast %184 : vector<1x8x4xbf16> to vector<8x4xbf16>
    %cst_113 = arith.constant dense<0.000000e+00> : vector<8x1216xf32>
    %186 = tpu.matmul %185, %183, %cst_113 {dimension_numbers = #tpu.dot_dimension_numbers<[1], [0], [0], [1], [0, 0, 1, 1], [], []>} : vector<8x4xbf16>, vector<4x1216xbf16>, vector<8x1216xf32> -> vector<8x1216xf32>
    %187 = arith.addf %182, %186 : vector<8x1216xf32>
    %188 = vector.extract_strided_slice %1 {offsets = [0, 192], sizes = [4, 1216], strides = [1, 1]} : vector<4x1482xbf16> to vector<4x1216xbf16>
    %c37 = arith.constant 37 : index
    %c0_114 = arith.constant 0 : index
    %c0_115 = arith.constant 0 : index
    %189 = vector.load %arg2[%c37, %c0_114, %c0_115] : memref<49x8x4xbf16, #tpu.memory_space<vmem>>, vector<1x8x4xbf16>
    %190 = vector.shape_cast %189 : vector<1x8x4xbf16> to vector<8x4xbf16>
    %cst_116 = arith.constant dense<0.000000e+00> : vector<8x1216xf32>
    %191 = tpu.matmul %190, %188, %cst_116 {dimension_numbers = #tpu.dot_dimension_numbers<[1], [0], [0], [1], [0, 0, 1, 1], [], []>} : vector<8x4xbf16>, vector<4x1216xbf16>, vector<8x1216xf32> -> vector<8x1216xf32>
    %192 = arith.addf %187, %191 : vector<8x1216xf32>
    %193 = vector.extract_strided_slice %1 {offsets = [0, 193], sizes = [4, 1216], strides = [1, 1]} : vector<4x1482xbf16> to vector<4x1216xbf16>
    %c38 = arith.constant 38 : index
    %c0_117 = arith.constant 0 : index
    %c0_118 = arith.constant 0 : index
    %194 = vector.load %arg2[%c38, %c0_117, %c0_118] : memref<49x8x4xbf16, #tpu.memory_space<vmem>>, vector<1x8x4xbf16>
    %195 = vector.shape_cast %194 : vector<1x8x4xbf16> to vector<8x4xbf16>
    %cst_119 = arith.constant dense<0.000000e+00> : vector<8x1216xf32>
    %196 = tpu.matmul %195, %193, %cst_119 {dimension_numbers = #tpu.dot_dimension_numbers<[1], [0], [0], [1], [0, 0, 1, 1], [], []>} : vector<8x4xbf16>, vector<4x1216xbf16>, vector<8x1216xf32> -> vector<8x1216xf32>
    %197 = arith.addf %192, %196 : vector<8x1216xf32>
    %198 = vector.extract_strided_slice %1 {offsets = [0, 194], sizes = [4, 1216], strides = [1, 1]} : vector<4x1482xbf16> to vector<4x1216xbf16>
    %c39 = arith.constant 39 : index
    %c0_120 = arith.constant 0 : index
    %c0_121 = arith.constant 0 : index
    %199 = vector.load %arg2[%c39, %c0_120, %c0_121] : memref<49x8x4xbf16, #tpu.memory_space<vmem>>, vector<1x8x4xbf16>
    %200 = vector.shape_cast %199 : vector<1x8x4xbf16> to vector<8x4xbf16>
    %cst_122 = arith.constant dense<0.000000e+00> : vector<8x1216xf32>
    %201 = tpu.matmul %200, %198, %cst_122 {dimension_numbers = #tpu.dot_dimension_numbers<[1], [0], [0], [1], [0, 0, 1, 1], [], []>} : vector<8x4xbf16>, vector<4x1216xbf16>, vector<8x1216xf32> -> vector<8x1216xf32>
    %202 = arith.addf %197, %201 : vector<8x1216xf32>
    %203 = vector.extract_strided_slice %1 {offsets = [0, 195], sizes = [4, 1216], strides = [1, 1]} : vector<4x1482xbf16> to vector<4x1216xbf16>
    %c40 = arith.constant 40 : index
    %c0_123 = arith.constant 0 : index
    %c0_124 = arith.constant 0 : index
    %204 = vector.load %arg2[%c40, %c0_123, %c0_124] : memref<49x8x4xbf16, #tpu.memory_space<vmem>>, vector<1x8x4xbf16>
    %205 = vector.shape_cast %204 : vector<1x8x4xbf16> to vector<8x4xbf16>
    %cst_125 = arith.constant dense<0.000000e+00> : vector<8x1216xf32>
    %206 = tpu.matmul %205, %203, %cst_125 {dimension_numbers = #tpu.dot_dimension_numbers<[1], [0], [0], [1], [0, 0, 1, 1], [], []>} : vector<8x4xbf16>, vector<4x1216xbf16>, vector<8x1216xf32> -> vector<8x1216xf32>
    %207 = arith.addf %202, %206 : vector<8x1216xf32>
    %208 = vector.extract_strided_slice %1 {offsets = [0, 196], sizes = [4, 1216], strides = [1, 1]} : vector<4x1482xbf16> to vector<4x1216xbf16>
    %c41 = arith.constant 41 : index
    %c0_126 = arith.constant 0 : index
    %c0_127 = arith.constant 0 : index
    %209 = vector.load %arg2[%c41, %c0_126, %c0_127] : memref<49x8x4xbf16, #tpu.memory_space<vmem>>, vector<1x8x4xbf16>
    %210 = vector.shape_cast %209 : vector<1x8x4xbf16> to vector<8x4xbf16>
    %cst_128 = arith.constant dense<0.000000e+00> : vector<8x1216xf32>
    %211 = tpu.matmul %210, %208, %cst_128 {dimension_numbers = #tpu.dot_dimension_numbers<[1], [0], [0], [1], [0, 0, 1, 1], [], []>} : vector<8x4xbf16>, vector<4x1216xbf16>, vector<8x1216xf32> -> vector<8x1216xf32>
    %212 = arith.addf %207, %211 : vector<8x1216xf32>
    %213 = vector.extract_strided_slice %1 {offsets = [0, 228], sizes = [4, 1216], strides = [1, 1]} : vector<4x1482xbf16> to vector<4x1216xbf16>
    %c42 = arith.constant 42 : index
    %c0_129 = arith.constant 0 : index
    %c0_130 = arith.constant 0 : index
    %214 = vector.load %arg2[%c42, %c0_129, %c0_130] : memref<49x8x4xbf16, #tpu.memory_space<vmem>>, vector<1x8x4xbf16>
    %215 = vector.shape_cast %214 : vector<1x8x4xbf16> to vector<8x4xbf16>
    %cst_131 = arith.constant dense<0.000000e+00> : vector<8x1216xf32>
    %216 = tpu.matmul %215, %213, %cst_131 {dimension_numbers = #tpu.dot_dimension_numbers<[1], [0], [0], [1], [0, 0, 1, 1], [], []>} : vector<8x4xbf16>, vector<4x1216xbf16>, vector<8x1216xf32> -> vector<8x1216xf32>
    %217 = arith.addf %212, %216 : vector<8x1216xf32>
    %218 = vector.extract_strided_slice %1 {offsets = [0, 229], sizes = [4, 1216], strides = [1, 1]} : vector<4x1482xbf16> to vector<4x1216xbf16>
    %c43 = arith.constant 43 : index
    %c0_132 = arith.constant 0 : index
    %c0_133 = arith.constant 0 : index
    %219 = vector.load %arg2[%c43, %c0_132, %c0_133] : memref<49x8x4xbf16, #tpu.memory_space<vmem>>, vector<1x8x4xbf16>
    %220 = vector.shape_cast %219 : vector<1x8x4xbf16> to vector<8x4xbf16>
    %cst_134 = arith.constant dense<0.000000e+00> : vector<8x1216xf32>
    %221 = tpu.matmul %220, %218, %cst_134 {dimension_numbers = #tpu.dot_dimension_numbers<[1], [0], [0], [1], [0, 0, 1, 1], [], []>} : vector<8x4xbf16>, vector<4x1216xbf16>, vector<8x1216xf32> -> vector<8x1216xf32>
    %222 = arith.addf %217, %221 : vector<8x1216xf32>
    %223 = vector.extract_strided_slice %1 {offsets = [0, 230], sizes = [4, 1216], strides = [1, 1]} : vector<4x1482xbf16> to vector<4x1216xbf16>
    %c44 = arith.constant 44 : index
    %c0_135 = arith.constant 0 : index
    %c0_136 = arith.constant 0 : index
    %224 = vector.load %arg2[%c44, %c0_135, %c0_136] : memref<49x8x4xbf16, #tpu.memory_space<vmem>>, vector<1x8x4xbf16>
    %225 = vector.shape_cast %224 : vector<1x8x4xbf16> to vector<8x4xbf16>
    %cst_137 = arith.constant dense<0.000000e+00> : vector<8x1216xf32>
    %226 = tpu.matmul %225, %223, %cst_137 {dimension_numbers = #tpu.dot_dimension_numbers<[1], [0], [0], [1], [0, 0, 1, 1], [], []>} : vector<8x4xbf16>, vector<4x1216xbf16>, vector<8x1216xf32> -> vector<8x1216xf32>
    %227 = arith.addf %222, %226 : vector<8x1216xf32>
    %228 = vector.extract_strided_slice %1 {offsets = [0, 231], sizes = [4, 1216], strides = [1, 1]} : vector<4x1482xbf16> to vector<4x1216xbf16>
    %c45 = arith.constant 45 : index
    %c0_138 = arith.constant 0 : index
    %c0_139 = arith.constant 0 : index
    %229 = vector.load %arg2[%c45, %c0_138, %c0_139] : memref<49x8x4xbf16, #tpu.memory_space<vmem>>, vector<1x8x4xbf16>
    %230 = vector.shape_cast %229 : vector<1x8x4xbf16> to vector<8x4xbf16>
    %cst_140 = arith.constant dense<0.000000e+00> : vector<8x1216xf32>
    %231 = tpu.matmul %230, %228, %cst_140 {dimension_numbers = #tpu.dot_dimension_numbers<[1], [0], [0], [1], [0, 0, 1, 1], [], []>} : vector<8x4xbf16>, vector<4x1216xbf16>, vector<8x1216xf32> -> vector<8x1216xf32>
    %232 = arith.addf %227, %231 : vector<8x1216xf32>
    %233 = vector.extract_strided_slice %1 {offsets = [0, 232], sizes = [4, 1216], strides = [1, 1]} : vector<4x1482xbf16> to vector<4x1216xbf16>
    %c46 = arith.constant 46 : index
    %c0_141 = arith.constant 0 : index
    %c0_142 = arith.constant 0 : index
    %234 = vector.load %arg2[%c46, %c0_141, %c0_142] : memref<49x8x4xbf16, #tpu.memory_space<vmem>>, vector<1x8x4xbf16>
    %235 = vector.shape_cast %234 : vector<1x8x4xbf16> to vector<8x4xbf16>
    %cst_143 = arith.constant dense<0.000000e+00> : vector<8x1216xf32>
    %236 = tpu.matmul %235, %233, %cst_143 {dimension_numbers = #tpu.dot_dimension_numbers<[1], [0], [0], [1], [0, 0, 1, 1], [], []>} : vector<8x4xbf16>, vector<4x1216xbf16>, vector<8x1216xf32> -> vector<8x1216xf32>
    %237 = arith.addf %232, %236 : vector<8x1216xf32>
    %238 = vector.extract_strided_slice %1 {offsets = [0, 233], sizes = [4, 1216], strides = [1, 1]} : vector<4x1482xbf16> to vector<4x1216xbf16>
    %c47 = arith.constant 47 : index
    %c0_144 = arith.constant 0 : index
    %c0_145 = arith.constant 0 : index
    %239 = vector.load %arg2[%c47, %c0_144, %c0_145] : memref<49x8x4xbf16, #tpu.memory_space<vmem>>, vector<1x8x4xbf16>
    %240 = vector.shape_cast %239 : vector<1x8x4xbf16> to vector<8x4xbf16>
    %cst_146 = arith.constant dense<0.000000e+00> : vector<8x1216xf32>
    %241 = tpu.matmul %240, %238, %cst_146 {dimension_numbers = #tpu.dot_dimension_numbers<[1], [0], [0], [1], [0, 0, 1, 1], [], []>} : vector<8x4xbf16>, vector<4x1216xbf16>, vector<8x1216xf32> -> vector<8x1216xf32>
    %242 = arith.addf %237, %241 : vector<8x1216xf32>
    %243 = vector.extract_strided_slice %1 {offsets = [0, 234], sizes = [4, 1216], strides = [1, 1]} : vector<4x1482xbf16> to vector<4x1216xbf16>
    %c48 = arith.constant 48 : index
    %c0_147 = arith.constant 0 : index
    %c0_148 = arith.constant 0 : index
    %244 = vector.load %arg2[%c48, %c0_147, %c0_148] : memref<49x8x4xbf16, #tpu.memory_space<vmem>>, vector<1x8x4xbf16>
    %245 = vector.shape_cast %244 : vector<1x8x4xbf16> to vector<8x4xbf16>
    %cst_149 = arith.constant dense<0.000000e+00> : vector<8x1216xf32>
    %246 = tpu.matmul %245, %243, %cst_149 {dimension_numbers = #tpu.dot_dimension_numbers<[1], [0], [0], [1], [0, 0, 1, 1], [], []>} : vector<8x4xbf16>, vector<4x1216xbf16>, vector<8x1216xf32> -> vector<8x1216xf32>
    %247 = arith.addf %242, %246 : vector<8x1216xf32>
    %c0_150 = arith.constant 0 : index
    %c0_151 = arith.constant 0 : index
    %248 = vector.load %arg3[%c0_150, %c0_151] : memref<8x1xf32, #tpu.memory_space<vmem>>, vector<8x1xf32>
    %249 = vector.broadcast %248 : vector<8x1xf32> to vector<8x1216xf32>
    %250 = arith.addf %247, %249 : vector<8x1216xf32>
    %cst_152 = arith.constant 0.000000e+00 : f32
    %251 = vector.broadcast %cst_152 : f32 to vector<8x1216xf32>
    %252 = arith.cmpf ogt, %250, %251 : vector<8x1216xf32>
    %cst_153 = arith.constant 2.000000e-01 : f32
    %253 = vector.broadcast %cst_153 : f32 to vector<8x1216xf32>
    %254 = arith.mulf %253, %250 : vector<8x1216xf32>
    %255 = arith.select %252, %250, %254 : vector<8x1216xi1>, vector<8x1216xf32>
    %256 = arith.truncf %255 : vector<8x1216xf32> to vector<8x1216xbf16>
    %c0_154 = arith.constant 0 : index
    %c0_155 = arith.constant 0 : index
    %c0_156 = arith.constant 0 : index
    %257 = vector.load %arg4[%c0_154, %c0_155, %c0_156] : memref<1x8x1216xbf16, #tpu.memory_space<vmem>>, vector<1x8x1216xbf16>
    %258 = vector.shape_cast %257 : vector<1x8x1216xbf16> to vector<8x1216xbf16>
    %259 = vector.shape_cast %256 : vector<8x1216xbf16> to vector<1x8x1216xbf16>
    tpu.vector_store %arg4[%c0_154, %c0_155, %c0_156], %259 {strides = array<i32>} : memref<1x8x1216xbf16, #tpu.memory_space<vmem>>, vector<1x8x1216xbf16>,
    return
  }
  func.func @transform_0(%arg0: i32) -> (i32, i32, i32) {
    %c0_i32 = arith.constant 0 : i32
    %c0_i32_0 = arith.constant 0 : i32
    %c0_i32_1 = arith.constant 0 : i32
    return %arg0, %c0_i32, %c0_i32_0 : i32, i32, i32
  }
  func.func @transform_1(%arg0: i32) -> (i32, i32, i32) {
    %c0_i32 = arith.constant 0 : i32
    %c0_i32_0 = arith.constant 0 : i32
    %c0_i32_1 = arith.constant 0 : i32
    %c0_i32_2 = arith.constant 0 : i32
    return %c0_i32, %c0_i32_0, %c0_i32_1 : i32, i32, i32
  }
  func.func @transform_2(%arg0: i32) -> (i32, i32) {
    %c0_i32 = arith.constant 0 : i32
    %c0_i32_0 = arith.constant 0 : i32
    %c0_i32_1 = arith.constant 0 : i32
    return %c0_i32, %c0_i32_0 : i32, i32
  }
  func.func @transform_3(%arg0: i32) -> (i32, i32, i32) {
    %c0_i32 = arith.constant 0 : i32
    %c0_i32_0 = arith.constant 0 : i32
    %c0_i32_1 = arith.constant 0 : i32
    return %arg0, %c0_i32, %c0_i32_0 : i32, i32, i32
  }
}

module attributes {stable_mosaic.version = 11 : i64} {
  func.func @_conv_tap_kernel(%arg0: i32, %arg1: memref<1x32x306xbf16, #tpu.memory_space<vmem>>, %arg2: memref<4x16x32xbf16, #tpu.memory_space<vmem>>, %arg3: memref<16x1xf32, #tpu.memory_space<vmem>>, %arg4: memref<1x16x272xbf16, #tpu.memory_space<vmem>>) attributes {dimension_semantics = [#tpu.dimension_semantics<parallel>], iteration_bounds = array<i64: 2>, scalar_prefetch = 0 : i64, scratch_operands = 0 : i64, tpu.core_type = #tpu.core_type<tc>, window_params = [{transform_indices = @transform_0, window_bounds = array<i64: 1, 32, 306>}, {pipeline_mode = #tpu.pipeline_mode<synchronous>, transform_indices = @transform_1, window_bounds = array<i64: 4, 16, 32>}, {pipeline_mode = #tpu.pipeline_mode<synchronous>, transform_indices = @transform_2, window_bounds = array<i64: 16, 1>}, {transform_indices = @transform_3, window_bounds = array<i64: 1, 16, 272>}]} {
    %c0 = arith.constant 0 : index
    %c0_0 = arith.constant 0 : index
    %c0_1 = arith.constant 0 : index
    %0 = vector.load %arg1[%c0, %c0_0, %c0_1] : memref<1x32x306xbf16, #tpu.memory_space<vmem>>, vector<1x32x306xbf16>
    %1 = vector.shape_cast %0 : vector<1x32x306xbf16> to vector<32x306xbf16>
    %cst = arith.constant 0.000000e+00 : f32
    %2 = vector.broadcast %cst : f32 to vector<16x272xf32>
    %3 = vector.extract_strided_slice %1 {offsets = [0, 0], sizes = [32, 272], strides = [1, 1]} : vector<32x306xbf16> to vector<32x272xbf16>
    %c0_2 = arith.constant 0 : index
    %c0_3 = arith.constant 0 : index
    %c0_4 = arith.constant 0 : index
    %4 = vector.load %arg2[%c0_2, %c0_3, %c0_4] : memref<4x16x32xbf16, #tpu.memory_space<vmem>>, vector<1x16x32xbf16>
    %5 = vector.shape_cast %4 : vector<1x16x32xbf16> to vector<16x32xbf16>
    %cst_5 = arith.constant dense<0.000000e+00> : vector<16x272xf32>
    %6 = tpu.matmul %5, %3, %cst_5 {dimension_numbers = #tpu.dot_dimension_numbers<[1], [0], [0], [1], [0, 0, 1, 1], [], []>} : vector<16x32xbf16>, vector<32x272xbf16>, vector<16x272xf32> -> vector<16x272xf32>
    %7 = arith.addf %2, %6 : vector<16x272xf32>
    %8 = vector.extract_strided_slice %1 {offsets = [0, 1], sizes = [32, 272], strides = [1, 1]} : vector<32x306xbf16> to vector<32x272xbf16>
    %c1 = arith.constant 1 : index
    %c0_6 = arith.constant 0 : index
    %c0_7 = arith.constant 0 : index
    %9 = vector.load %arg2[%c1, %c0_6, %c0_7] : memref<4x16x32xbf16, #tpu.memory_space<vmem>>, vector<1x16x32xbf16>
    %10 = vector.shape_cast %9 : vector<1x16x32xbf16> to vector<16x32xbf16>
    %cst_8 = arith.constant dense<0.000000e+00> : vector<16x272xf32>
    %11 = tpu.matmul %10, %8, %cst_8 {dimension_numbers = #tpu.dot_dimension_numbers<[1], [0], [0], [1], [0, 0, 1, 1], [], []>} : vector<16x32xbf16>, vector<32x272xbf16>, vector<16x272xf32> -> vector<16x272xf32>
    %12 = arith.addf %7, %11 : vector<16x272xf32>
    %13 = vector.extract_strided_slice %1 {offsets = [0, 17], sizes = [32, 272], strides = [1, 1]} : vector<32x306xbf16> to vector<32x272xbf16>
    %c2 = arith.constant 2 : index
    %c0_9 = arith.constant 0 : index
    %c0_10 = arith.constant 0 : index
    %14 = vector.load %arg2[%c2, %c0_9, %c0_10] : memref<4x16x32xbf16, #tpu.memory_space<vmem>>, vector<1x16x32xbf16>
    %15 = vector.shape_cast %14 : vector<1x16x32xbf16> to vector<16x32xbf16>
    %cst_11 = arith.constant dense<0.000000e+00> : vector<16x272xf32>
    %16 = tpu.matmul %15, %13, %cst_11 {dimension_numbers = #tpu.dot_dimension_numbers<[1], [0], [0], [1], [0, 0, 1, 1], [], []>} : vector<16x32xbf16>, vector<32x272xbf16>, vector<16x272xf32> -> vector<16x272xf32>
    %17 = arith.addf %12, %16 : vector<16x272xf32>
    %18 = vector.extract_strided_slice %1 {offsets = [0, 18], sizes = [32, 272], strides = [1, 1]} : vector<32x306xbf16> to vector<32x272xbf16>
    %c3 = arith.constant 3 : index
    %c0_12 = arith.constant 0 : index
    %c0_13 = arith.constant 0 : index
    %19 = vector.load %arg2[%c3, %c0_12, %c0_13] : memref<4x16x32xbf16, #tpu.memory_space<vmem>>, vector<1x16x32xbf16>
    %20 = vector.shape_cast %19 : vector<1x16x32xbf16> to vector<16x32xbf16>
    %cst_14 = arith.constant dense<0.000000e+00> : vector<16x272xf32>
    %21 = tpu.matmul %20, %18, %cst_14 {dimension_numbers = #tpu.dot_dimension_numbers<[1], [0], [0], [1], [0, 0, 1, 1], [], []>} : vector<16x32xbf16>, vector<32x272xbf16>, vector<16x272xf32> -> vector<16x272xf32>
    %22 = arith.addf %17, %21 : vector<16x272xf32>
    %c0_15 = arith.constant 0 : index
    %c0_16 = arith.constant 0 : index
    %23 = vector.load %arg3[%c0_15, %c0_16] : memref<16x1xf32, #tpu.memory_space<vmem>>, vector<16x1xf32>
    %24 = vector.broadcast %23 : vector<16x1xf32> to vector<16x272xf32>
    %25 = arith.addf %22, %24 : vector<16x272xf32>
    %cst_17 = arith.constant 0.000000e+00 : f32
    %26 = vector.broadcast %cst_17 : f32 to vector<16x272xf32>
    %27 = arith.cmpf ogt, %25, %26 : vector<16x272xf32>
    %cst_18 = arith.constant 2.000000e-01 : f32
    %28 = vector.broadcast %cst_18 : f32 to vector<16x272xf32>
    %29 = arith.mulf %28, %25 : vector<16x272xf32>
    %30 = arith.select %27, %25, %29 : vector<16x272xi1>, vector<16x272xf32>
    %31 = arith.truncf %30 : vector<16x272xf32> to vector<16x272xbf16>
    %c0_19 = arith.constant 0 : index
    %c0_20 = arith.constant 0 : index
    %c0_21 = arith.constant 0 : index
    %32 = vector.load %arg4[%c0_19, %c0_20, %c0_21] : memref<1x16x272xbf16, #tpu.memory_space<vmem>>, vector<1x16x272xbf16>
    %33 = vector.shape_cast %32 : vector<1x16x272xbf16> to vector<16x272xbf16>
    %34 = vector.shape_cast %31 : vector<16x272xbf16> to vector<1x16x272xbf16>
    tpu.vector_store %arg4[%c0_19, %c0_20, %c0_21], %34 {strides = array<i32>} : memref<1x16x272xbf16, #tpu.memory_space<vmem>>, vector<1x16x272xbf16>,
    return
  }
  func.func @transform_0(%arg0: i32) -> (i32, i32, i32) {
    %c0_i32 = arith.constant 0 : i32
    %c0_i32_0 = arith.constant 0 : i32
    %c0_i32_1 = arith.constant 0 : i32
    return %arg0, %c0_i32, %c0_i32_0 : i32, i32, i32
  }
  func.func @transform_1(%arg0: i32) -> (i32, i32, i32) {
    %c0_i32 = arith.constant 0 : i32
    %c0_i32_0 = arith.constant 0 : i32
    %c0_i32_1 = arith.constant 0 : i32
    %c0_i32_2 = arith.constant 0 : i32
    return %c0_i32, %c0_i32_0, %c0_i32_1 : i32, i32, i32
  }
  func.func @transform_2(%arg0: i32) -> (i32, i32) {
    %c0_i32 = arith.constant 0 : i32
    %c0_i32_0 = arith.constant 0 : i32
    %c0_i32_1 = arith.constant 0 : i32
    return %c0_i32, %c0_i32_0 : i32, i32
  }
  func.func @transform_3(%arg0: i32) -> (i32, i32, i32) {
    %c0_i32 = arith.constant 0 : i32
    %c0_i32_0 = arith.constant 0 : i32
    %c0_i32_1 = arith.constant 0 : i32
    return %arg0, %c0_i32, %c0_i32_0 : i32, i32, i32
  }
}

module attributes {stable_mosaic.version = 11 : i64} {
  func.func @_conv_tap_kernel(%arg0: i32, %arg1: memref<1x64x90xbf16, #tpu.memory_space<vmem>>, %arg2: memref<4x32x64xbf16, #tpu.memory_space<vmem>>, %arg3: memref<32x1xf32, #tpu.memory_space<vmem>>, %arg4: memref<1x32x72xbf16, #tpu.memory_space<vmem>>) attributes {dimension_semantics = [#tpu.dimension_semantics<parallel>], iteration_bounds = array<i64: 2>, scalar_prefetch = 0 : i64, scratch_operands = 0 : i64, tpu.core_type = #tpu.core_type<tc>, window_params = [{transform_indices = @transform_0, window_bounds = array<i64: 1, 64, 90>}, {pipeline_mode = #tpu.pipeline_mode<synchronous>, transform_indices = @transform_1, window_bounds = array<i64: 4, 32, 64>}, {pipeline_mode = #tpu.pipeline_mode<synchronous>, transform_indices = @transform_2, window_bounds = array<i64: 32, 1>}, {transform_indices = @transform_3, window_bounds = array<i64: 1, 32, 72>}]} {
    %c0 = arith.constant 0 : index
    %c0_0 = arith.constant 0 : index
    %c0_1 = arith.constant 0 : index
    %0 = vector.load %arg1[%c0, %c0_0, %c0_1] : memref<1x64x90xbf16, #tpu.memory_space<vmem>>, vector<1x64x90xbf16>
    %1 = vector.shape_cast %0 : vector<1x64x90xbf16> to vector<64x90xbf16>
    %cst = arith.constant 0.000000e+00 : f32
    %2 = vector.broadcast %cst : f32 to vector<32x72xf32>
    %3 = vector.extract_strided_slice %1 {offsets = [0, 0], sizes = [64, 72], strides = [1, 1]} : vector<64x90xbf16> to vector<64x72xbf16>
    %c0_2 = arith.constant 0 : index
    %c0_3 = arith.constant 0 : index
    %c0_4 = arith.constant 0 : index
    %4 = vector.load %arg2[%c0_2, %c0_3, %c0_4] : memref<4x32x64xbf16, #tpu.memory_space<vmem>>, vector<1x32x64xbf16>
    %5 = vector.shape_cast %4 : vector<1x32x64xbf16> to vector<32x64xbf16>
    %cst_5 = arith.constant dense<0.000000e+00> : vector<32x72xf32>
    %6 = tpu.matmul %5, %3, %cst_5 {dimension_numbers = #tpu.dot_dimension_numbers<[1], [0], [0], [1], [0, 0, 1, 1], [], []>} : vector<32x64xbf16>, vector<64x72xbf16>, vector<32x72xf32> -> vector<32x72xf32>
    %7 = arith.addf %2, %6 : vector<32x72xf32>
    %8 = vector.extract_strided_slice %1 {offsets = [0, 1], sizes = [64, 72], strides = [1, 1]} : vector<64x90xbf16> to vector<64x72xbf16>
    %c1 = arith.constant 1 : index
    %c0_6 = arith.constant 0 : index
    %c0_7 = arith.constant 0 : index
    %9 = vector.load %arg2[%c1, %c0_6, %c0_7] : memref<4x32x64xbf16, #tpu.memory_space<vmem>>, vector<1x32x64xbf16>
    %10 = vector.shape_cast %9 : vector<1x32x64xbf16> to vector<32x64xbf16>
    %cst_8 = arith.constant dense<0.000000e+00> : vector<32x72xf32>
    %11 = tpu.matmul %10, %8, %cst_8 {dimension_numbers = #tpu.dot_dimension_numbers<[1], [0], [0], [1], [0, 0, 1, 1], [], []>} : vector<32x64xbf16>, vector<64x72xbf16>, vector<32x72xf32> -> vector<32x72xf32>
    %12 = arith.addf %7, %11 : vector<32x72xf32>
    %13 = vector.extract_strided_slice %1 {offsets = [0, 9], sizes = [64, 72], strides = [1, 1]} : vector<64x90xbf16> to vector<64x72xbf16>
    %c2 = arith.constant 2 : index
    %c0_9 = arith.constant 0 : index
    %c0_10 = arith.constant 0 : index
    %14 = vector.load %arg2[%c2, %c0_9, %c0_10] : memref<4x32x64xbf16, #tpu.memory_space<vmem>>, vector<1x32x64xbf16>
    %15 = vector.shape_cast %14 : vector<1x32x64xbf16> to vector<32x64xbf16>
    %cst_11 = arith.constant dense<0.000000e+00> : vector<32x72xf32>
    %16 = tpu.matmul %15, %13, %cst_11 {dimension_numbers = #tpu.dot_dimension_numbers<[1], [0], [0], [1], [0, 0, 1, 1], [], []>} : vector<32x64xbf16>, vector<64x72xbf16>, vector<32x72xf32> -> vector<32x72xf32>
    %17 = arith.addf %12, %16 : vector<32x72xf32>
    %18 = vector.extract_strided_slice %1 {offsets = [0, 10], sizes = [64, 72], strides = [1, 1]} : vector<64x90xbf16> to vector<64x72xbf16>
    %c3 = arith.constant 3 : index
    %c0_12 = arith.constant 0 : index
    %c0_13 = arith.constant 0 : index
    %19 = vector.load %arg2[%c3, %c0_12, %c0_13] : memref<4x32x64xbf16, #tpu.memory_space<vmem>>, vector<1x32x64xbf16>
    %20 = vector.shape_cast %19 : vector<1x32x64xbf16> to vector<32x64xbf16>
    %cst_14 = arith.constant dense<0.000000e+00> : vector<32x72xf32>
    %21 = tpu.matmul %20, %18, %cst_14 {dimension_numbers = #tpu.dot_dimension_numbers<[1], [0], [0], [1], [0, 0, 1, 1], [], []>} : vector<32x64xbf16>, vector<64x72xbf16>, vector<32x72xf32> -> vector<32x72xf32>
    %22 = arith.addf %17, %21 : vector<32x72xf32>
    %c0_15 = arith.constant 0 : index
    %c0_16 = arith.constant 0 : index
    %23 = vector.load %arg3[%c0_15, %c0_16] : memref<32x1xf32, #tpu.memory_space<vmem>>, vector<32x1xf32>
    %24 = vector.broadcast %23 : vector<32x1xf32> to vector<32x72xf32>
    %25 = arith.addf %22, %24 : vector<32x72xf32>
    %cst_17 = arith.constant 0.000000e+00 : f32
    %26 = vector.broadcast %cst_17 : f32 to vector<32x72xf32>
    %27 = arith.cmpf ogt, %25, %26 : vector<32x72xf32>
    %cst_18 = arith.constant 2.000000e-01 : f32
    %28 = vector.broadcast %cst_18 : f32 to vector<32x72xf32>
    %29 = arith.mulf %28, %25 : vector<32x72xf32>
    %30 = arith.select %27, %25, %29 : vector<32x72xi1>, vector<32x72xf32>
    %31 = arith.truncf %30 : vector<32x72xf32> to vector<32x72xbf16>
    %c0_19 = arith.constant 0 : index
    %c0_20 = arith.constant 0 : index
    %c0_21 = arith.constant 0 : index
    %32 = vector.load %arg4[%c0_19, %c0_20, %c0_21] : memref<1x32x72xbf16, #tpu.memory_space<vmem>>, vector<1x32x72xbf16>
    %33 = vector.shape_cast %32 : vector<1x32x72xbf16> to vector<32x72xbf16>
    %34 = vector.shape_cast %31 : vector<32x72xbf16> to vector<1x32x72xbf16>
    tpu.vector_store %arg4[%c0_19, %c0_20, %c0_21], %34 {strides = array<i32>} : memref<1x32x72xbf16, #tpu.memory_space<vmem>>, vector<1x32x72xbf16>,
    return
  }
  func.func @transform_0(%arg0: i32) -> (i32, i32, i32) {
    %c0_i32 = arith.constant 0 : i32
    %c0_i32_0 = arith.constant 0 : i32
    %c0_i32_1 = arith.constant 0 : i32
    return %arg0, %c0_i32, %c0_i32_0 : i32, i32, i32
  }
  func.func @transform_1(%arg0: i32) -> (i32, i32, i32) {
    %c0_i32 = arith.constant 0 : i32
    %c0_i32_0 = arith.constant 0 : i32
    %c0_i32_1 = arith.constant 0 : i32
    %c0_i32_2 = arith.constant 0 : i32
    return %c0_i32, %c0_i32_0, %c0_i32_1 : i32, i32, i32
  }
  func.func @transform_2(%arg0: i32) -> (i32, i32) {
    %c0_i32 = arith.constant 0 : i32
    %c0_i32_0 = arith.constant 0 : i32
    %c0_i32_1 = arith.constant 0 : i32
    return %c0_i32, %c0_i32_0 : i32, i32
  }
  func.func @transform_3(%arg0: i32) -> (i32, i32, i32) {
    %c0_i32 = arith.constant 0 : i32
    %c0_i32_0 = arith.constant 0 : i32
    %c0_i32_1 = arith.constant 0 : i32
    return %arg0, %c0_i32, %c0_i32_0 : i32, i32, i32
  }
}

module attributes {stable_mosaic.version = 11 : i64} {
  func.func @_conv_tap_kernel(%arg0: i32, %arg1: memref<1x128x30xbf16, #tpu.memory_space<vmem>>, %arg2: memref<4x32x128xbf16, #tpu.memory_space<vmem>>, %arg3: memref<32x1xf32, #tpu.memory_space<vmem>>, %arg4: memref<1x32x20xbf16, #tpu.memory_space<vmem>>) attributes {dimension_semantics = [#tpu.dimension_semantics<parallel>], iteration_bounds = array<i64: 2>, scalar_prefetch = 0 : i64, scratch_operands = 0 : i64, tpu.core_type = #tpu.core_type<tc>, window_params = [{transform_indices = @transform_0, window_bounds = array<i64: 1, 128, 30>}, {pipeline_mode = #tpu.pipeline_mode<synchronous>, transform_indices = @transform_1, window_bounds = array<i64: 4, 32, 128>}, {pipeline_mode = #tpu.pipeline_mode<synchronous>, transform_indices = @transform_2, window_bounds = array<i64: 32, 1>}, {transform_indices = @transform_3, window_bounds = array<i64: 1, 32, 20>}]} {
    %c0 = arith.constant 0 : index
    %c0_0 = arith.constant 0 : index
    %c0_1 = arith.constant 0 : index
    %0 = vector.load %arg1[%c0, %c0_0, %c0_1] : memref<1x128x30xbf16, #tpu.memory_space<vmem>>, vector<1x128x30xbf16>
    %1 = vector.shape_cast %0 : vector<1x128x30xbf16> to vector<128x30xbf16>
    %cst = arith.constant 0.000000e+00 : f32
    %2 = vector.broadcast %cst : f32 to vector<32x20xf32>
    %3 = vector.extract_strided_slice %1 {offsets = [0, 0], sizes = [128, 20], strides = [1, 1]} : vector<128x30xbf16> to vector<128x20xbf16>
    %c0_2 = arith.constant 0 : index
    %c0_3 = arith.constant 0 : index
    %c0_4 = arith.constant 0 : index
    %4 = vector.load %arg2[%c0_2, %c0_3, %c0_4] : memref<4x32x128xbf16, #tpu.memory_space<vmem>>, vector<1x32x128xbf16>
    %5 = vector.shape_cast %4 : vector<1x32x128xbf16> to vector<32x128xbf16>
    %cst_5 = arith.constant dense<0.000000e+00> : vector<32x20xf32>
    %6 = tpu.matmul %5, %3, %cst_5 {dimension_numbers = #tpu.dot_dimension_numbers<[1], [0], [0], [1], [0, 0, 1, 1], [], []>} : vector<32x128xbf16>, vector<128x20xbf16>, vector<32x20xf32> -> vector<32x20xf32>
    %7 = arith.addf %2, %6 : vector<32x20xf32>
    %8 = vector.extract_strided_slice %1 {offsets = [0, 1], sizes = [128, 20], strides = [1, 1]} : vector<128x30xbf16> to vector<128x20xbf16>
    %c1 = arith.constant 1 : index
    %c0_6 = arith.constant 0 : index
    %c0_7 = arith.constant 0 : index
    %9 = vector.load %arg2[%c1, %c0_6, %c0_7] : memref<4x32x128xbf16, #tpu.memory_space<vmem>>, vector<1x32x128xbf16>
    %10 = vector.shape_cast %9 : vector<1x32x128xbf16> to vector<32x128xbf16>
    %cst_8 = arith.constant dense<0.000000e+00> : vector<32x20xf32>
    %11 = tpu.matmul %10, %8, %cst_8 {dimension_numbers = #tpu.dot_dimension_numbers<[1], [0], [0], [1], [0, 0, 1, 1], [], []>} : vector<32x128xbf16>, vector<128x20xbf16>, vector<32x20xf32> -> vector<32x20xf32>
    %12 = arith.addf %7, %11 : vector<32x20xf32>
    %13 = vector.extract_strided_slice %1 {offsets = [0, 5], sizes = [128, 20], strides = [1, 1]} : vector<128x30xbf16> to vector<128x20xbf16>
    %c2 = arith.constant 2 : index
    %c0_9 = arith.constant 0 : index
    %c0_10 = arith.constant 0 : index
    %14 = vector.load %arg2[%c2, %c0_9, %c0_10] : memref<4x32x128xbf16, #tpu.memory_space<vmem>>, vector<1x32x128xbf16>
    %15 = vector.shape_cast %14 : vector<1x32x128xbf16> to vector<32x128xbf16>
    %cst_11 = arith.constant dense<0.000000e+00> : vector<32x20xf32>
    %16 = tpu.matmul %15, %13, %cst_11 {dimension_numbers = #tpu.dot_dimension_numbers<[1], [0], [0], [1], [0, 0, 1, 1], [], []>} : vector<32x128xbf16>, vector<128x20xbf16>, vector<32x20xf32> -> vector<32x20xf32>
    %17 = arith.addf %12, %16 : vector<32x20xf32>
    %18 = vector.extract_strided_slice %1 {offsets = [0, 6], sizes = [128, 20], strides = [1, 1]} : vector<128x30xbf16> to vector<128x20xbf16>
    %c3 = arith.constant 3 : index
    %c0_12 = arith.constant 0 : index
    %c0_13 = arith.constant 0 : index
    %19 = vector.load %arg2[%c3, %c0_12, %c0_13] : memref<4x32x128xbf16, #tpu.memory_space<vmem>>, vector<1x32x128xbf16>
    %20 = vector.shape_cast %19 : vector<1x32x128xbf16> to vector<32x128xbf16>
    %cst_14 = arith.constant dense<0.000000e+00> : vector<32x20xf32>
    %21 = tpu.matmul %20, %18, %cst_14 {dimension_numbers = #tpu.dot_dimension_numbers<[1], [0], [0], [1], [0, 0, 1, 1], [], []>} : vector<32x128xbf16>, vector<128x20xbf16>, vector<32x20xf32> -> vector<32x20xf32>
    %22 = arith.addf %17, %21 : vector<32x20xf32>
    %c0_15 = arith.constant 0 : index
    %c0_16 = arith.constant 0 : index
    %23 = vector.load %arg3[%c0_15, %c0_16] : memref<32x1xf32, #tpu.memory_space<vmem>>, vector<32x1xf32>
    %24 = vector.broadcast %23 : vector<32x1xf32> to vector<32x20xf32>
    %25 = arith.addf %22, %24 : vector<32x20xf32>
    %cst_17 = arith.constant 0.000000e+00 : f32
    %26 = vector.broadcast %cst_17 : f32 to vector<32x20xf32>
    %27 = arith.cmpf ogt, %25, %26 : vector<32x20xf32>
    %cst_18 = arith.constant 2.000000e-01 : f32
    %28 = vector.broadcast %cst_18 : f32 to vector<32x20xf32>
    %29 = arith.mulf %28, %25 : vector<32x20xf32>
    %30 = arith.select %27, %25, %29 : vector<32x20xi1>, vector<32x20xf32>
    %31 = arith.truncf %30 : vector<32x20xf32> to vector<32x20xbf16>
    %c0_19 = arith.constant 0 : index
    %c0_20 = arith.constant 0 : index
    %c0_21 = arith.constant 0 : index
    %32 = vector.load %arg4[%c0_19, %c0_20, %c0_21] : memref<1x32x20xbf16, #tpu.memory_space<vmem>>, vector<1x32x20xbf16>
    %33 = vector.shape_cast %32 : vector<1x32x20xbf16> to vector<32x20xbf16>
    %34 = vector.shape_cast %31 : vector<32x20xbf16> to vector<1x32x20xbf16>
    tpu.vector_store %arg4[%c0_19, %c0_20, %c0_21], %34 {strides = array<i32>} : memref<1x32x20xbf16, #tpu.memory_space<vmem>>, vector<1x32x20xbf16>,
    return
  }
  func.func @transform_0(%arg0: i32) -> (i32, i32, i32) {
    %c0_i32 = arith.constant 0 : i32
    %c0_i32_0 = arith.constant 0 : i32
    %c0_i32_1 = arith.constant 0 : i32
    return %arg0, %c0_i32, %c0_i32_0 : i32, i32, i32
  }
  func.func @transform_1(%arg0: i32) -> (i32, i32, i32) {
    %c0_i32 = arith.constant 0 : i32
    %c0_i32_0 = arith.constant 0 : i32
    %c0_i32_1 = arith.constant 0 : i32
    %c0_i32_2 = arith.constant 0 : i32
    return %c0_i32, %c0_i32_0, %c0_i32_1 : i32, i32, i32
  }
  func.func @transform_2(%arg0: i32) -> (i32, i32) {
    %c0_i32 = arith.constant 0 : i32
    %c0_i32_0 = arith.constant 0 : i32
    %c0_i32_1 = arith.constant 0 : i32
    return %c0_i32, %c0_i32_0 : i32, i32
  }
  func.func @transform_3(%arg0: i32) -> (i32, i32, i32) {
    %c0_i32 = arith.constant 0 : i32
    %c0_i32_0 = arith.constant 0 : i32
    %c0_i32_1 = arith.constant 0 : i32
    return %arg0, %c0_i32, %c0_i32_0 : i32, i32, i32
  }
}

module attributes {stable_mosaic.version = 11 : i64} {
  func.func @_conv_tap_kernel(%arg0: i32, %arg1: memref<1x128x12xbf16, #tpu.memory_space<vmem>>, %arg2: memref<4x32x128xbf16, #tpu.memory_space<vmem>>, %arg3: memref<32x1xf32, #tpu.memory_space<vmem>>, %arg4: memref<1x32x6xbf16, #tpu.memory_space<vmem>>) attributes {dimension_semantics = [#tpu.dimension_semantics<parallel>], iteration_bounds = array<i64: 2>, scalar_prefetch = 0 : i64, scratch_operands = 0 : i64, tpu.core_type = #tpu.core_type<tc>, window_params = [{transform_indices = @transform_0, window_bounds = array<i64: 1, 128, 12>}, {pipeline_mode = #tpu.pipeline_mode<synchronous>, transform_indices = @transform_1, window_bounds = array<i64: 4, 32, 128>}, {pipeline_mode = #tpu.pipeline_mode<synchronous>, transform_indices = @transform_2, window_bounds = array<i64: 32, 1>}, {transform_indices = @transform_3, window_bounds = array<i64: 1, 32, 6>}]} {
    %c0 = arith.constant 0 : index
    %c0_0 = arith.constant 0 : index
    %c0_1 = arith.constant 0 : index
    %0 = vector.load %arg1[%c0, %c0_0, %c0_1] : memref<1x128x12xbf16, #tpu.memory_space<vmem>>, vector<1x128x12xbf16>
    %1 = vector.shape_cast %0 : vector<1x128x12xbf16> to vector<128x12xbf16>
    %cst = arith.constant 0.000000e+00 : f32
    %2 = vector.broadcast %cst : f32 to vector<32x6xf32>
    %3 = vector.extract_strided_slice %1 {offsets = [0, 0], sizes = [128, 6], strides = [1, 1]} : vector<128x12xbf16> to vector<128x6xbf16>
    %c0_2 = arith.constant 0 : index
    %c0_3 = arith.constant 0 : index
    %c0_4 = arith.constant 0 : index
    %4 = vector.load %arg2[%c0_2, %c0_3, %c0_4] : memref<4x32x128xbf16, #tpu.memory_space<vmem>>, vector<1x32x128xbf16>
    %5 = vector.shape_cast %4 : vector<1x32x128xbf16> to vector<32x128xbf16>
    %cst_5 = arith.constant dense<0.000000e+00> : vector<32x6xf32>
    %6 = tpu.matmul %5, %3, %cst_5 {dimension_numbers = #tpu.dot_dimension_numbers<[1], [0], [0], [1], [0, 0, 1, 1], [], []>} : vector<32x128xbf16>, vector<128x6xbf16>, vector<32x6xf32> -> vector<32x6xf32>
    %7 = arith.addf %2, %6 : vector<32x6xf32>
    %8 = vector.extract_strided_slice %1 {offsets = [0, 1], sizes = [128, 6], strides = [1, 1]} : vector<128x12xbf16> to vector<128x6xbf16>
    %c1 = arith.constant 1 : index
    %c0_6 = arith.constant 0 : index
    %c0_7 = arith.constant 0 : index
    %9 = vector.load %arg2[%c1, %c0_6, %c0_7] : memref<4x32x128xbf16, #tpu.memory_space<vmem>>, vector<1x32x128xbf16>
    %10 = vector.shape_cast %9 : vector<1x32x128xbf16> to vector<32x128xbf16>
    %cst_8 = arith.constant dense<0.000000e+00> : vector<32x6xf32>
    %11 = tpu.matmul %10, %8, %cst_8 {dimension_numbers = #tpu.dot_dimension_numbers<[1], [0], [0], [1], [0, 0, 1, 1], [], []>} : vector<32x128xbf16>, vector<128x6xbf16>, vector<32x6xf32> -> vector<32x6xf32>
    %12 = arith.addf %7, %11 : vector<32x6xf32>
    %13 = vector.extract_strided_slice %1 {offsets = [0, 3], sizes = [128, 6], strides = [1, 1]} : vector<128x12xbf16> to vector<128x6xbf16>
    %c2 = arith.constant 2 : index
    %c0_9 = arith.constant 0 : index
    %c0_10 = arith.constant 0 : index
    %14 = vector.load %arg2[%c2, %c0_9, %c0_10] : memref<4x32x128xbf16, #tpu.memory_space<vmem>>, vector<1x32x128xbf16>
    %15 = vector.shape_cast %14 : vector<1x32x128xbf16> to vector<32x128xbf16>
    %cst_11 = arith.constant dense<0.000000e+00> : vector<32x6xf32>
    %16 = tpu.matmul %15, %13, %cst_11 {dimension_numbers = #tpu.dot_dimension_numbers<[1], [0], [0], [1], [0, 0, 1, 1], [], []>} : vector<32x128xbf16>, vector<128x6xbf16>, vector<32x6xf32> -> vector<32x6xf32>
    %17 = arith.addf %12, %16 : vector<32x6xf32>
    %18 = vector.extract_strided_slice %1 {offsets = [0, 4], sizes = [128, 6], strides = [1, 1]} : vector<128x12xbf16> to vector<128x6xbf16>
    %c3 = arith.constant 3 : index
    %c0_12 = arith.constant 0 : index
    %c0_13 = arith.constant 0 : index
    %19 = vector.load %arg2[%c3, %c0_12, %c0_13] : memref<4x32x128xbf16, #tpu.memory_space<vmem>>, vector<1x32x128xbf16>
    %20 = vector.shape_cast %19 : vector<1x32x128xbf16> to vector<32x128xbf16>
    %cst_14 = arith.constant dense<0.000000e+00> : vector<32x6xf32>
    %21 = tpu.matmul %20, %18, %cst_14 {dimension_numbers = #tpu.dot_dimension_numbers<[1], [0], [0], [1], [0, 0, 1, 1], [], []>} : vector<32x128xbf16>, vector<128x6xbf16>, vector<32x6xf32> -> vector<32x6xf32>
    %22 = arith.addf %17, %21 : vector<32x6xf32>
    %c0_15 = arith.constant 0 : index
    %c0_16 = arith.constant 0 : index
    %23 = vector.load %arg3[%c0_15, %c0_16] : memref<32x1xf32, #tpu.memory_space<vmem>>, vector<32x1xf32>
    %24 = vector.broadcast %23 : vector<32x1xf32> to vector<32x6xf32>
    %25 = arith.addf %22, %24 : vector<32x6xf32>
    %cst_17 = arith.constant 0.000000e+00 : f32
    %26 = vector.broadcast %cst_17 : f32 to vector<32x6xf32>
    %27 = arith.cmpf ogt, %25, %26 : vector<32x6xf32>
    %cst_18 = arith.constant 2.000000e-01 : f32
    %28 = vector.broadcast %cst_18 : f32 to vector<32x6xf32>
    %29 = arith.mulf %28, %25 : vector<32x6xf32>
    %30 = arith.select %27, %25, %29 : vector<32x6xi1>, vector<32x6xf32>
    %31 = arith.truncf %30 : vector<32x6xf32> to vector<32x6xbf16>
    %c0_19 = arith.constant 0 : index
    %c0_20 = arith.constant 0 : index
    %c0_21 = arith.constant 0 : index
    %32 = vector.load %arg4[%c0_19, %c0_20, %c0_21] : memref<1x32x6xbf16, #tpu.memory_space<vmem>>, vector<1x32x6xbf16>
    %33 = vector.shape_cast %32 : vector<1x32x6xbf16> to vector<32x6xbf16>
    %34 = vector.shape_cast %31 : vector<32x6xbf16> to vector<1x32x6xbf16>
    tpu.vector_store %arg4[%c0_19, %c0_20, %c0_21], %34 {strides = array<i32>} : memref<1x32x6xbf16, #tpu.memory_space<vmem>>, vector<1x32x6xbf16>,
    return
  }
  func.func @transform_0(%arg0: i32) -> (i32, i32, i32) {
    %c0_i32 = arith.constant 0 : i32
    %c0_i32_0 = arith.constant 0 : i32
    %c0_i32_1 = arith.constant 0 : i32
    return %arg0, %c0_i32, %c0_i32_0 : i32, i32, i32
  }
  func.func @transform_1(%arg0: i32) -> (i32, i32, i32) {
    %c0_i32 = arith.constant 0 : i32
    %c0_i32_0 = arith.constant 0 : i32
    %c0_i32_1 = arith.constant 0 : i32
    %c0_i32_2 = arith.constant 0 : i32
    return %c0_i32, %c0_i32_0, %c0_i32_1 : i32, i32, i32
  }
  func.func @transform_2(%arg0: i32) -> (i32, i32) {
    %c0_i32 = arith.constant 0 : i32
    %c0_i32_0 = arith.constant 0 : i32
    %c0_i32_1 = arith.constant 0 : i32
    return %c0_i32, %c0_i32_0 : i32, i32
  }
  func.func @transform_3(%arg0: i32) -> (i32, i32, i32) {
    %c0_i32 = arith.constant 0 : i32
    %c0_i32_0 = arith.constant 0 : i32
    %c0_i32_1 = arith.constant 0 : i32
    return %arg0, %c0_i32, %c0_i32_0 : i32, i32, i32
  }
}

module attributes {stable_mosaic.version = 11 : i64} {
  func.func @_conv_tap_kernel(%arg0: i32, %arg1: memref<1x128x6xbf16, #tpu.memory_space<vmem>>, %arg2: memref<4x1x128xbf16, #tpu.memory_space<vmem>>, %arg3: memref<1x1xf32, #tpu.memory_space<vmem>>, %arg4: memref<1x1x2xf32, #tpu.memory_space<vmem>>) attributes {dimension_semantics = [#tpu.dimension_semantics<parallel>], iteration_bounds = array<i64: 2>, scalar_prefetch = 0 : i64, scratch_operands = 0 : i64, tpu.core_type = #tpu.core_type<tc>, window_params = [{transform_indices = @transform_0, window_bounds = array<i64: 1, 128, 6>}, {pipeline_mode = #tpu.pipeline_mode<synchronous>, transform_indices = @transform_1, window_bounds = array<i64: 4, 1, 128>}, {pipeline_mode = #tpu.pipeline_mode<synchronous>, transform_indices = @transform_2, window_bounds = array<i64: 1, 1>}, {transform_indices = @transform_3, window_bounds = array<i64: 1, 1, 2>}]} {
    %c0 = arith.constant 0 : index
    %c0_0 = arith.constant 0 : index
    %c0_1 = arith.constant 0 : index
    %0 = vector.load %arg1[%c0, %c0_0, %c0_1] : memref<1x128x6xbf16, #tpu.memory_space<vmem>>, vector<1x128x6xbf16>
    %1 = vector.shape_cast %0 : vector<1x128x6xbf16> to vector<128x6xbf16>
    %cst = arith.constant 0.000000e+00 : f32
    %2 = vector.broadcast %cst : f32 to vector<1x2xf32>
    %3 = vector.extract_strided_slice %1 {offsets = [0, 0], sizes = [128, 2], strides = [1, 1]} : vector<128x6xbf16> to vector<128x2xbf16>
    %c0_2 = arith.constant 0 : index
    %c0_3 = arith.constant 0 : index
    %c0_4 = arith.constant 0 : index
    %4 = vector.load %arg2[%c0_2, %c0_3, %c0_4] : memref<4x1x128xbf16, #tpu.memory_space<vmem>>, vector<1x1x128xbf16>
    %5 = vector.shape_cast %4 : vector<1x1x128xbf16> to vector<1x128xbf16>
    %cst_5 = arith.constant dense<0.000000e+00> : vector<1x2xf32>
    %6 = tpu.matmul %5, %3, %cst_5 {dimension_numbers = #tpu.dot_dimension_numbers<[1], [0], [0], [1], [0, 0, 1, 1], [], []>} : vector<1x128xbf16>, vector<128x2xbf16>, vector<1x2xf32> -> vector<1x2xf32>
    %7 = arith.addf %2, %6 : vector<1x2xf32>
    %8 = vector.extract_strided_slice %1 {offsets = [0, 1], sizes = [128, 2], strides = [1, 1]} : vector<128x6xbf16> to vector<128x2xbf16>
    %c1 = arith.constant 1 : index
    %c0_6 = arith.constant 0 : index
    %c0_7 = arith.constant 0 : index
    %9 = vector.load %arg2[%c1, %c0_6, %c0_7] : memref<4x1x128xbf16, #tpu.memory_space<vmem>>, vector<1x1x128xbf16>
    %10 = vector.shape_cast %9 : vector<1x1x128xbf16> to vector<1x128xbf16>
    %cst_8 = arith.constant dense<0.000000e+00> : vector<1x2xf32>
    %11 = tpu.matmul %10, %8, %cst_8 {dimension_numbers = #tpu.dot_dimension_numbers<[1], [0], [0], [1], [0, 0, 1, 1], [], []>} : vector<1x128xbf16>, vector<128x2xbf16>, vector<1x2xf32> -> vector<1x2xf32>
    %12 = arith.addf %7, %11 : vector<1x2xf32>
    %13 = vector.extract_strided_slice %1 {offsets = [0, 2], sizes = [128, 2], strides = [1, 1]} : vector<128x6xbf16> to vector<128x2xbf16>
    %c2 = arith.constant 2 : index
    %c0_9 = arith.constant 0 : index
    %c0_10 = arith.constant 0 : index
    %14 = vector.load %arg2[%c2, %c0_9, %c0_10] : memref<4x1x128xbf16, #tpu.memory_space<vmem>>, vector<1x1x128xbf16>
    %15 = vector.shape_cast %14 : vector<1x1x128xbf16> to vector<1x128xbf16>
    %cst_11 = arith.constant dense<0.000000e+00> : vector<1x2xf32>
    %16 = tpu.matmul %15, %13, %cst_11 {dimension_numbers = #tpu.dot_dimension_numbers<[1], [0], [0], [1], [0, 0, 1, 1], [], []>} : vector<1x128xbf16>, vector<128x2xbf16>, vector<1x2xf32> -> vector<1x2xf32>
    %17 = arith.addf %12, %16 : vector<1x2xf32>
    %18 = vector.extract_strided_slice %1 {offsets = [0, 3], sizes = [128, 2], strides = [1, 1]} : vector<128x6xbf16> to vector<128x2xbf16>
    %c3 = arith.constant 3 : index
    %c0_12 = arith.constant 0 : index
    %c0_13 = arith.constant 0 : index
    %19 = vector.load %arg2[%c3, %c0_12, %c0_13] : memref<4x1x128xbf16, #tpu.memory_space<vmem>>, vector<1x1x128xbf16>
    %20 = vector.shape_cast %19 : vector<1x1x128xbf16> to vector<1x128xbf16>
    %cst_14 = arith.constant dense<0.000000e+00> : vector<1x2xf32>
    %21 = tpu.matmul %20, %18, %cst_14 {dimension_numbers = #tpu.dot_dimension_numbers<[1], [0], [0], [1], [0, 0, 1, 1], [], []>} : vector<1x128xbf16>, vector<128x2xbf16>, vector<1x2xf32> -> vector<1x2xf32>
    %22 = arith.addf %17, %21 : vector<1x2xf32>
    %c0_15 = arith.constant 0 : index
    %c0_16 = arith.constant 0 : index
    %23 = vector.load %arg3[%c0_15, %c0_16] : memref<1x1xf32, #tpu.memory_space<vmem>>, vector<1x1xf32>
    %24 = vector.broadcast %23 : vector<1x1xf32> to vector<1x2xf32>
    %25 = arith.addf %22, %24 : vector<1x2xf32>
    %c0_17 = arith.constant 0 : index
    %c0_18 = arith.constant 0 : index
    %c0_19 = arith.constant 0 : index
    %26 = vector.load %arg4[%c0_17, %c0_18, %c0_19] : memref<1x1x2xf32, #tpu.memory_space<vmem>>, vector<1x1x2xf32>
    %27 = vector.shape_cast %26 : vector<1x1x2xf32> to vector<1x2xf32>
    %28 = vector.shape_cast %25 : vector<1x2xf32> to vector<1x1x2xf32>
    tpu.vector_store %arg4[%c0_17, %c0_18, %c0_19], %28 {strides = array<i32>} : memref<1x1x2xf32, #tpu.memory_space<vmem>>, vector<1x1x2xf32>,
    return
  }
  func.func @transform_0(%arg0: i32) -> (i32, i32, i32) {
    %c0_i32 = arith.constant 0 : i32
    %c0_i32_0 = arith.constant 0 : i32
    %c0_i32_1 = arith.constant 0 : i32
    return %arg0, %c0_i32, %c0_i32_0 : i32, i32, i32
  }
  func.func @transform_1(%arg0: i32) -> (i32, i32, i32) {
    %c0_i32 = arith.constant 0 : i32
    %c0_i32_0 = arith.constant 0 : i32
    %c0_i32_1 = arith.constant 0 : i32
    %c0_i32_2 = arith.constant 0 : i32
    return %c0_i32, %c0_i32_0, %c0_i32_1 : i32, i32, i32
  }
  func.func @transform_2(%arg0: i32) -> (i32, i32) {
    %c0_i32 = arith.constant 0 : i32
    %c0_i32_0 = arith.constant 0 : i32
    %c0_i32_1 = arith.constant 0 : i32
    return %c0_i32, %c0_i32_0 : i32, i32
  }
  func.func @transform_3(%arg0: i32) -> (i32, i32, i32) {
    %c0_i32 = arith.constant 0 : i32
    %c0_i32_0 = arith.constant 0 : i32
    %c0_i32_1 = arith.constant 0 : i32
    return %arg0, %c0_i32, %c0_i32_0 : i32, i32, i32
  }
}

</mosaic_0001>

<bundles_post_ra>
// kernel: forward.7
= control target key start
LH: loop header
LB: loop body
LE: loop exit
PB: predicated region body
PF: predicated region fallthrough
CT: control target
= control target key end

     0   :  { %s730_s12 = smov 0   ;;  %s795_s0 = inlined_call_operand.vmem [shape: bf16[2,32,306], index: 0, kind: input, shape index: {}]   ;;  %s796_s1 = inlined_call_operand.vmem [shape: bf16[4,16,32], index: 1, kind: input, shape index: {}]   ;;  %s797_s2 = inlined_call_operand.vmem [shape: f32[16,1], index: 2, kind: input, shape index: {}]   ;;  %s798_s3 = inlined_call_operand.vmem [shape: bf16[2,16,272], index: 3, kind: output, shape index: {}]  }
   0x1 LB: > { %s605_s13 = sadd.s32 4294967295, %s704_s12   ;;  %p609_p0 = scmp.ge.s32.totalorder %s704_s12, 1  ;;  %s704_s12 = sphi %s730_s12, %s13_s12  }
   0x2   : > { %p137_p1 = scmp.lt.s32.totalorder %s704_s12, 3 }
   0x4   : > { %p138_p2 = pnand %p609_p0, %p137_p1 }
   0x5   : > { %p161_p3 = scmp.lt.s32.totalorder (!%p138_p2), %s605_s13, 1  ;;  %s706_s18 = smov (!%p138_p2), 127  }
   0x6   : > { %141 = sbr.rel (%p138_p2) target bundleno = 330 (0x14a), region = 32  ;;  %s707_s19 = smov (!%p138_p2), 111  }
   0x7   : > { %s708_s20 = smov (!%p138_p2), 110  }
   0xb   : > { %s800_s13 = smov (!%p161_p3, %s605_s13), 1  ;;  %v678_v18 = vld [vmem:[%s796_s1] sm:$0xff]  ;;  %vm239_vm0 = vcmask 261120   ;;  %vm228_vm1 = vcmask 1039360   ;;  %v679_v27 = vld [vmem:[%s796_s1 + $0x8] sm:$0xff]  ;;  %vm361_vm2 = vcmask 908288  }
   0xc   : > { %s682_s14 = smul.u32 48, %s800_s13  ;;  %v505_v35 = vld [vmem:[%s797_s2] sm:$0xff]  ;;  %v709_v36 = vmov 0   ;;  %v506_v37 = vld [vmem:[%s797_s2 + $0x8] sm:$0xff]  ;;  %v680_v43 = vld [vmem:[%s796_s1 + $0x10] sm:$0xff]  ;;  %vm443_vm3 = vcmask 900096  }
   0xd   : > { %696 = vset.pattern.permute.xlu0 %v709_v36  ;;  %697 = vset.pattern.permute.xlu1 %v709_v36  ;;  %v681_v52 = vld [vmem:[%s796_s1 + $0x18] sm:$0xff]  ;;  %s683_s6 = smul.u32 24, %s800_s13  ;;  %vm546_vm7 = vcmask 125952  }
   0xe   : > { %s165_s17 = scalar_lea.vmem %s795_s0, %s682_s14 }
   0xf   : > { %v640_v0 = vld [vmem:[%s165_s17 + $0x20] sm:$0xf]  ;;  %v677_v1 = vld [vmem:[%s165_s17 + $0x28] sm:$0xf0]  ;;  %v675_v2 = vld [vmem:[%s165_s17 + $0x1c] sm:$0xf]  ;;  %s170_s9 = scalar_lea.vmem %s798_s3, %s683_s6 }
  0x10   : > { %v641_v3 = vor.u32 %v677_v1, %v640_v0  ;;  %v634_v4 = vld [vmem:[%s165_s17 + $0x24] sm:$0xf0]  ;;  %v632_v5 = vld [vmem:[%s165_s17 + $0x18] sm:$0xf]  ;;  %v676_v6 = vld [vmem:[%s165_s17 + $0x20] sm:$0xf0] }
  0x11   : > { %v637_v7 = vor.u32 %v675_v2, %v634_v4  ;;  %v633_v8 = vor.u32 %v676_v6, %v632_v5  ;;  %v620_v9 = vld [vmem:[%s165_s17] sm:$0xf]  ;;  %v673_v10 = vld [vmem:[%s165_s17 + $0x8] sm:$0xf0]  ;;  %v628_v12 = vld [vmem:[%s165_s17 + $0x8] sm:$0xf] }
  0x12   : > { %226 = vrot.lane.b32.xlu0 %v641_v3, %s706_s18  ;;  %v621_v11 = vor.u32 %v673_v10, %v620_v9  ;;  %v674_v13 = vld [vmem:[%s165_s17 + $0x10] sm:$0xf0]  ;;  %v672_v14 = vld [vmem:[%s165_s17 + $0x4] sm:$0xf]  ;;  %v622_v15 = vld [vmem:[%s165_s17 + $0xc] sm:$0xf0] }
  0x13   : > { %224 = vrot.lane.b32.xlu1 %v637_v7, %s706_s18  ;;  %305 = vmatpush.bf16.msra.mxu3 %v633_v8  ;;  %v629_v16 = vor.u32 %v674_v13, %v628_v12  ;;  %v625_v17 = vor.u32 %v672_v14, %v622_v15 }
  0x14   : > { %216 = vrot.lane.b32.xlu2 %v621_v11, %s706_s18 }
  0x17   : > { %306 = vmatpush.bf16.msra.mxu3 %v621_v11 }
  0x1a   : > { %222 = vrot.lane.b32.xlu0 %v633_v8, %s706_s18  ;;  %649 = vmatmul.msk.bf16.vlgmr.msra.gmra.mxu3 %vm239_vm0, %v678_v18 }
  0x1b   : > { %220 = vrot.lane.b32.xlu1 %v629_v16, %s706_s18 }
  0x1c   : > { %218 = vrot.lane.b32.xlu2 %v625_v17, %s706_s18 }
  0x22   : > { %355 = vrot.lane.b32.xlu0 %v633_v8, %s707_s19 }
  0x23   : > { %357 = vrot.lane.b32.xlu1 %v637_v7, %s707_s19 }
  0x24   : > { %359 = vrot.lane.b32.xlu2 %v641_v3, %s707_s19 }
  0x2a   : > { %349 = vrot.lane.b32.xlu0 %v621_v11, %s707_s19 }
  0x2b   : > { %351 = vrot.lane.b32.xlu1 %v625_v17, %s707_s19 }
  0x2c   : > { %353 = vrot.lane.b32.xlu2 %v629_v16, %s707_s19 }
  0x32   : > { %439 = vrot.lane.b32.xlu0 %v637_v7, %s708_s20 }
  0x33   : > { %441 = vrot.lane.b32.xlu1 %v641_v3, %s708_s20 }
  0x34   : > { %433 = vrot.lane.b32.xlu2 %v625_v17, %s708_s20 }
  0x3a   : > { %435 = vrot.lane.b32.xlu0 %v629_v16, %s708_s20 }
  0x3b   : > { %437 = vrot.lane.b32.xlu1 %v633_v8, %s708_s20 }
  0x3c   : > { %431 = vrot.lane.b32.xlu2 %v621_v11, %s708_s20 }
  0x42   : > { %509 = vperm.xlu0 %696, %v505_v35  }
  0x43   : > { %514 = vperm.xlu1 %697, %v506_v37  }
  0x6e   : > { %v217_v19 = vpop.permute.xlu2 %216 }
  0x76   : > { %v219_v23 = vpop.permute.xlu2 %218 }
  0x77   : > { %v229_v29 = vsel %vm228_vm1, %v217_v19, %v219_v23 }
  0x7e   : > { %v360_v30 = vpop.permute.xlu2 %359 }
  0x84   : > { %v227_v20 = vpop.permute.xlu0 %226 }
  0x85   : > { %v225_v21 = vpop.permute.xlu1 %224  ;;  %277 = vmatpush.bf16.msra.mxu2 %v227_v20 }
  0x86   : > { %v232_v22 = vsel %vm228_vm1, %v225_v21, %v227_v20  ;;  %v354_v38 = vpop.permute.xlu2 %353 }
  0x87   : > { %263 = vmatpush.bf16.msra.mxu1 %v232_v22 }
  0x8c   : > { %v223_v24 = vpop.permute.xlu0 %222 }
  0x8d   : > { %v221_v25 = vpop.permute.xlu1 %220  ;;  %v231_v26 = vsel %vm228_vm1, %v223_v24, %v225_v21 }
  0x8e   : > { %278 = vmatpush.bf16.msra.mxu2 %v221_v25  ;;  %249 = vmatpush.bf16.msra.mxu0 %v231_v26  ;;  %v230_v28 = vsel %vm228_vm1, %v219_v23, %v221_v25  ;;  %v434_v46 = vpop.permute.xlu2 %433 }
  0x8f   : > { %264 = vmatpush.bf16.msra.mxu1 %v230_v28 }
  0x91   : > { %644 = vmatmul.msk.bf16.vlgmr.msra.gmra.mxu2 %vm239_vm0, %v679_v27 }
  0x92   : > { %643 = vmatmul.msk.bf16.vlgmr.msra.gmra.mxu1 %vm239_vm0, %v679_v27  ;;  %250 = vmatpush.bf16.msra.mxu0 %v229_v29 }
  0x93   : > { %333 = vmatpush.bf16.msrb.mxu1 %v641_v3 }
  0x94   : > { %v356_v31 = vpop.permute.xlu0 %355 }
  0x95   : > { %v358_v32 = vpop.permute.xlu1 %357  ;;  %642 = vmatmul.msk.bf16.vlgmr.msra.gmra.mxu0 %vm239_vm0, %v679_v27 }
  0x96   : > { %319 = vmatpush.bf16.msrb.mxu0 %v637_v7  ;;  %v364_v33 = vsel %vm361_vm2, %v356_v31, %v358_v32  ;;  %v365_v34 = vsel %vm361_vm2, %v358_v32, %v360_v30  ;;  %v432_v53 = vpop.permute.xlu2 %431 }
  0x97   : > { %334 = vmatpush.bf16.msrb.mxu1 %v629_v16  ;;  %381 = vmatpush.bf16.msrb.mxu2 %v364_v33  ;;  %v444_v54 = vsel %vm443_vm3, %v432_v53, %v434_v46 }
  0x98   : > { %395 = vmatpush.bf16.msrb.mxu3 %v365_v34 }
  0x9a   : > { %320 = vmatpush.bf16.msrb.mxu0 %v625_v17 }
  0x9c   : > { %v350_v39 = vpop.permute.xlu0 %349 }
  0x9d   : > { %v352_v40 = vpop.permute.xlu1 %351  ;;  %v308_v57 = vpop.f32.mrf.mxu3 }
  0x9e   : > { %409 = vmatpush.bf16.msra.mxu0 %v360_v30  ;;  %v362_v41 = vsel %vm361_vm2, %v350_v39, %v352_v40  ;;  %v363_v42 = vsel %vm361_vm2, %v352_v40, %v354_v38 }
  0x9f   : > { %382 = vmatpush.bf16.msrb.mxu2 %v362_v41  ;;  %396 = vmatpush.bf16.msrb.mxu3 %v363_v42 }
  0xa2   : > { %410 = vmatpush.bf16.msra.mxu0 %v354_v38  ;;  %651 = vmatmul.msk.bf16.vlgmr.msrb.gmra.mxu1 %vm239_vm0, %v678_v18 }
  0xa3   : > { %658 = vmatmul.msk.bf16.vlgmr.msrb.gmra.mxu2 %vm239_vm0, %v680_v43  ;;  %659 = vmatmul.msk.bf16.vlgmr.msrb.gmra.mxu3 %vm239_vm0, %v680_v43 }
  0xa4   : > { %v440_v44 = vpop.permute.xlu0 %439 }
  0xa5   : > { %v442_v45 = vpop.permute.xlu1 %441  ;;  %650 = vmatmul.msk.bf16.vlgmr.msrb.gmra.mxu0 %vm239_vm0, %v678_v18  ;;  %v310_v62 = vpop.f32.mrf.mxu3 }
  0xa6   : > { %v447_v47 = vsel %vm443_vm3, %v440_v44, %v442_v45  ;;  %491 = vmatpush.bf16.msra.mxu3 %v442_v45 }
  0xa7   : > { %477 = vmatpush.bf16.msra.mxu2 %v447_v47 }
  0xac   : > { %v436_v48 = vpop.permute.xlu0 %435 }
  0xad   : > { %v438_v49 = vpop.permute.xlu1 %437  ;;  %v445_v50 = vsel %vm443_vm3, %v434_v46, %v436_v48  ;;  %492 = vmatpush.bf16.msra.mxu3 %v436_v48 }
  0xae   : > { %v446_v51 = vsel %vm443_vm3, %v438_v49, %v440_v44  ;;  %478 = vmatpush.bf16.msra.mxu2 %v445_v50 }
  0xaf   : > { %463 = vmatpush.bf16.msra.mxu1 %v446_v51 }
  0xb3   : > { %668 = vmatmul.msk.bf16.vlgmr.msra.gmra.mxu2 %vm239_vm0, %v681_v52  ;;  %669 = vmatmul.msk.bf16.vlgmr.msra.gmra.mxu3 %vm239_vm0, %v681_v52 }
  0xb4   : > { %464 = vmatpush.bf16.msra.mxu1 %v444_v54  ;;  %v510_v14 = vpop.permute.xlu0 %509 }
  0xb5   : > { %660 = vmatmul.msk.bf16.vlgmr.msra.gmra.mxu0 %vm239_vm0, %v680_v43  ;;  %v515_v34 = vpop.permute.xlu1 %514 }
  0xb7   : > { %667 = vmatmul.msk.bf16.vlgmr.msra.gmra.mxu1 %vm239_vm0, %v681_v52 }
 0x10f   : > { %v266_v55 = vpop.f32.mrf.mxu1 }
 0x112   : > { %v252_v56 = vpop.f32.mrf.mxu0 }
 0x113   : > { %v309_v7 = vadd.f32 %v308_v57, %v252_v56 }
 0x114   : > { %v280_v58 = vpop.f32.mrf.mxu2 }
 0x117   : > { %v268_v59 = vpop.f32.mrf.mxu1 }
 0x11a   : > { %v254_v60 = vpop.f32.mrf.mxu0 }
 0x11b   : > { %v311_v22 = vadd.f32 %v310_v62, %v254_v60 }
 0x11c   : > { %v282_v61 = vpop.f32.mrf.mxu2 }
 0x11f   : > { %v336_v63 = vpop.f32.mrf.mxu1 }
 0x120   : > { %v337_v9 = vadd.f32 %v336_v63, %v280_v58 }
 0x122   : > { %v322_v0 = vpop.f32.mrf.mxu0 }
 0x123   : > { %v323_v8 = vadd.f32 %v322_v0, %v266_v55 }
 0x126   : > { %v384_v1 = vpop.f32.mrf.mxu2  ;;  %v398_v2 = vpop.f32.mrf.mxu3 }
 0x127   : > { %v338_v4 = vpop.f32.mrf.mxu1  ;;  %v417_v10 = vadd.f32 %v384_v1, %v309_v7  ;;  %v418_v15 = vadd.f32 %v398_v2, %v323_v8 }
 0x128   : > { %v339_v26 = vadd.f32 %v338_v4, %v282_v61 }
 0x12a   : > { %v324_v3 = vpop.f32.mrf.mxu0 }
 0x12b   : > { %v325_v23 = vadd.f32 %v324_v3, %v268_v59 }
 0x12e   : > { %v386_v5 = vpop.f32.mrf.mxu2  ;;  %v400_v6 = vpop.f32.mrf.mxu3 }
 0x12f   : > { %v420_v28 = vadd.f32 %v386_v5, %v311_v22  ;;  %v421_v35 = vadd.f32 %v400_v6, %v325_v23 }
 0x132   : > { %v412_v11 = vpop.f32.mrf.mxu0 }
 0x133   : > { %v419_v12 = vadd.f32 %v412_v11, %v337_v9 }
 0x134   : > { %v466_v13 = vpop.f32.mrf.mxu1 }
 0x135   : > { %v499_v16 = vadd.f32 %v466_v13, %v417_v10 }
 0x136   : > { %v480_v17 = vpop.f32.mrf.mxu2  ;;  %v494_v20 = vpop.f32.mrf.mxu3 }
 0x137   : > { %v517_v18 = vadd.f32 %v510_v14, %v499_v16  ;;  %v500_v19 = vadd.f32 %v480_v17, %v418_v15  ;;  %v501_v21 = vadd.f32 %v494_v20, %v419_v12 }
 0x139   : > { %v529_v24 = vmul.f32 0.2, %v517_v18  ;;  %v518_v25 = vadd.f32 %v510_v14, %v500_v19  ;;  %vm523_vm4 = vcmp.gt.f32.partialorder %v517_v18, 0.0  ;;  %v519_v27 = vadd.f32 %v510_v14, %v501_v21 }
 0x13a   : > { %v414_v30 = vpop.f32.mrf.mxu0 }
 0x13b   : > { %vm524_vm5 = vcmp.gt.f32.partialorder %v518_v25, 0.0  ;;  %v530_v29 = vmul.f32 0.2, %v518_v25  ;;  %vm525_vm6 = vcmp.gt.f32.partialorder %v519_v27, 0.0  ;;  %v531_v31 = vmul.f32 0.2, %v519_v27 }
 0x13c   : > { %v422_v32 = vadd.f32 %v414_v30, %v339_v26  ;;  %v468_v33 = vpop.f32.mrf.mxu1  ;;  %v535_v36 = vsel %vm523_vm4, %v517_v18, %v529_v24 }
 0x13d   : > { %v536_v37 = vsel %vm524_vm5, %v518_v25, %v530_v29  ;;  %v502_v38 = vadd.f32 %v468_v33, %v420_v28  ;;  %v537_v40 = vsel %vm525_vm6, %v519_v27, %v531_v31 }
 0x13e   : > { %v541_v39 = vpack.c.bf16 %v536_v37, %v535_v36  ;;  %v482_v41 = vpop.f32.mrf.mxu2  ;;  %v542_v42 = vpack.c.bf16 %v537_v40, %v537_v40  ;;  %v496_v45 = vpop.f32.mrf.mxu3 }
 0x13f   : > { %v520_v43 = vadd.f32 %v515_v34, %v502_v38  ;;  %v503_v44 = vadd.f32 %v482_v41, %v421_v35  ;;  %v504_v46 = vadd.f32 %v496_v45, %v422_v32 }
 0x140   : > { %545 = vst [vmem:[%s170_s9] sm:$0xff] %v541_v39 }
 0x141   : > { %547 = vst.msk [vmem:[%s170_s9 + $0x8] sm:$0xf] %vm546_vm7, %v542_v42  ;;  %v532_v47 = vmul.f32 0.2, %v520_v43  ;;  %v521_v48 = vadd.f32 %v515_v34, %v503_v44  ;;  %vm526_vm8 = vcmp.gt.f32.partialorder %v520_v43, 0.0  ;;  %v522_v49 = vadd.f32 %v515_v34, %v504_v46 }
 0x143   : > { %vm527_vm9 = vcmp.gt.f32.partialorder %v521_v48, 0.0  ;;  %v533_v50 = vmul.f32 0.2, %v521_v48  ;;  %vm528_vm10 = vcmp.gt.f32.partialorder %v522_v49, 0.0  ;;  %v534_v51 = vmul.f32 0.2, %v522_v49 }
 0x144   : > { %v538_v52 = vsel %vm526_vm8, %v520_v43, %v532_v47 }
 0x145   : > { %v539_v53 = vsel %vm527_vm9, %v521_v48, %v533_v50  ;;  %v540_v55 = vsel %vm528_vm10, %v522_v49, %v534_v51 }
 0x146   : > { %v543_v54 = vpack.c.bf16 %v539_v53, %v538_v52  ;;  %v544_v56 = vpack.c.bf16 %v540_v55, %v540_v55 }
 0x148   : > { %548 = vst [vmem:[%s170_s9 + $0xc] sm:$0xff] %v543_v54 }
 0x149   : > { %549 = vst.msk [vmem:[%s170_s9 + $0x14] sm:$0xf] %vm546_vm7, %v544_v56 }
 0x14a PF: > { %s13_s12 = sadd.s32 1, %s704_s12  }
 0x14b   : > { %p10_p4 = scmp.ge.s32.totalorder %s13_s12, 4  }
 0x14d   :  { %12 = sbr.rel (!%p10_p4) target bundleno = 1 (0x1), region = 65 }

// kernel: forward.6
= control target key start
LH: loop header
LB: loop body
LE: loop exit
PB: predicated region body
PF: predicated region fallthrough
CT: control target
= control target key end

     0   :  { %s12254_s12 = smov 0   ;;  %s16557_s0 = inlined_call_operand.vmem [shape: bf16[2,4,1482], index: 0, kind: input, shape index: {}]   ;;  %s16558_s1 = inlined_call_operand.vmem [shape: bf16[49,8,4], index: 1, kind: input, shape index: {}]   ;;  %s16559_s2 = inlined_call_operand.vmem [shape: f32[8,1], index: 2, kind: input, shape index: {}]   ;;  %s16560_s3 = inlined_call_operand.vmem [shape: bf16[2,8,1216], index: 3, kind: output, shape index: {}]  }
   0x1 LB: > { %s11569_s13 = sadd.s32 4294967295, %s12183_s12   ;;  %p11573_p0 = scmp.ge.s32.totalorder %s12183_s12, 1  ;;  %s12183_s12 = sphi %s12254_s12, %s13_s12  }
   0x2   : > { %p137_p1 = scmp.lt.s32.totalorder %s12183_s12, 3 }
   0x4   : > { %p138_p2 = pnand %p11573_p0, %p137_p1 }
   0x5   : > { %p161_p3 = scmp.lt.s32.totalorder (!%p138_p2), %s11569_s13, 1  ;;  %s12185_s18 = smov (!%p138_p2), 127  }
   0x6   : > { %141 = sbr.rel (%p138_p2) target bundleno = 2241 (0x8c1), region = 32  ;;  %s12186_s19 = smov (!%p138_p2), 126  }
   0x7   : > { %s12187_s20 = smov (!%p138_p2), 125   ;;  %s12188_s21 = smov (!%p138_p2), 124  }
   0x8   : > { %s12189_s26 = smov (!%p138_p2), 123   ;;  %s12190_s29 = smov (!%p138_p2), 122  }
   0x9   : > { %s12191_s5 = smov (!%p138_p2), 90   ;;  %s12192_s8 = smov (!%p138_p2), 89  }
   0xa   : > { %s12193_s11 = smov (!%p138_p2), 88   ;;  %s12196_s22 = smov (!%p138_p2), 85  }
   0xb   : > { %s16562_s13 = smov (!%p161_p3, %s11569_s13), 1  ;;  %vm225_vm0 = vcmask 1039360   ;;  %vm239_vm1 = vcmask 1041408   ;;  %v12339_v59 = vld [vmem:[%s16558_s1 + $0x4] sm:$0xf]  ;;  %vm235_vm2 = vcmask 31744  }
   0xc   : > { %s12116_s14 = smul.u32 24, %s16562_s13  ;;  %vm613_vm3 = vcmask 1031168   ;;  %vm842_vm4 = vcmask 1022976   ;;  %vm1071_vm5 = vcmask 1014784   ;;  %vm1300_vm6 = vcmask 1006592   ;;  %s12197_s25 = smov 84  }
   0xd   : > { %vm1529_vm7 = vcmask 998400   ;;  %vm1758_vm8 = vcmask 736256   ;;  %vm1987_vm9 = vcmask 728064   ;;  %vm2216_vm10 = vcmask 719872   ;;  %s12198_s28 = smov 52   ;;  %s12199_s4 = smov 51  }
   0xe   : > { %s165_s17 = scalar_lea.vmem %s16557_s0, %s12116_s14  ;;  %s12194_s14 = smov 87   ;;  %vm2445_vm11 = vcmask 711680   ;;  %vm2674_vm12 = vcmask 703488   ;;  %vm2903_vm13 = vcmask 695296   ;;  %vm3132_vm14 = vcmask 687104  }
   0xf   : > { %v12268_v0 = vld [vmem:[%s165_s17] sm:$0xff]  ;;  %v12270_v1 = vld [vmem:[%s165_s17 + $0x8] sm:$0xff]  ;;  %v12274_v2 = vld [vmem:[%s165_s17 + $0x10] sm:$0xff]  ;;  %s12200_s7 = smov 50   ;;  %vm3365_vm15 = vcmask 424960   ;;  %s12201_s10 = smov 49  }
  0x10   : > { %179 = vst [vmem:[#allocation1] ss:$4 sm:$0xff] %v12268_v0  ;;  %s12202_s15 = smov 48   ;;  %s12205_s24 = smov 14  }
  0x11   : > { %182 = vst [vmem:[#allocation1 + $0x20] ss:$4 sm:$0xff] %v12270_v1  ;;  %s12206_s27 = smov 13   ;;  %s12207_s30 = smov 12  }
  0x12   : > { %s12208_s6 = smov 11   ;;  %s12209_s9 = smov 10  }
  0x13   : > { %s12211_s17 = smov 8   ;;  %s12213_s23 = smov 103  }
  0x14   : > { %s12219_s16 = smov 66  }
  0x17   : > { %v187_v3 = vld.sshfl [vmem:[#allocation1 + $0x10] sm:$0xff pattern:$0x73625140]  ;;  %v183_v4 = vld.sshfl [vmem:[#allocation1] sm:$0xff pattern:$0x73625140] }
  0x18   : > { %209 = vrot.lane.b32.xlu1 %v187_v3, %s12185_s18  ;;  %205 = vrot.lane.b32.xlu0 %v183_v4, %s12185_s18  ;;  %v189_v5 = vld.sshfl [vmem:[#allocation1 + $0x18] sm:$0xff pattern:$0x73625140]  ;;  %v185_v6 = vld.sshfl [vmem:[#allocation1 + $0x8] sm:$0xff pattern:$0x73625140] }
  0x19   : > { %v197_v7 = vld.sshfl [vmem:[#allocation1 + $0x38] sm:$0xff pattern:$0x73625140]  ;;  %v191_v8 = vld.sshfl [vmem:[#allocation1 + $0x20] sm:$0xff pattern:$0x73625140] }
  0x1a   : > { %200 = vst [vmem:[#allocation1] ss:$4 sm:$0xff] %v12274_v2  ;;  %v195_v9 = vld.sshfl [vmem:[#allocation1 + $0x30] sm:$0xff pattern:$0x73625140]  ;;  %213 = vrot.lane.b32.xlu2 %v191_v8, %s12185_s18 }
  0x1b   : > { %v193_v10 = vld.sshfl [vmem:[#allocation1 + $0x28] sm:$0xff pattern:$0x73625140] }
  0x1c   : > { %402 = vst [vmem:[#allocation1 + $0x20] ss:$4 sm:$0xff] %v12270_v1 }
  0x20   : > { %211 = vrot.lane.b32.xlu1 %v189_v5, %s12185_s18  ;;  %207 = vrot.lane.b32.xlu0 %v185_v6, %s12185_s18 }
  0x21   : > { %v203_v11 = vld.sshfl [vmem:[#allocation1 + $0x8] sm:$0xff pattern:$0x73625140]  ;;  %v201_v12 = vld.sshfl [vmem:[#allocation1] sm:$0xff pattern:$0x73625140] }
  0x22   : > { %400 = vst [vmem:[#allocation1] ss:$4 sm:$0xff] %v12268_v0  ;;  %215 = vrot.lane.b32.xlu2 %v193_v10, %s12185_s18 }
  0x23   : > { %v12285_v13 = vld.sshfl [vmem:[#allocation1 + $0x20] sm:$0xff pattern:$0x73625140]  ;;  %v12287_v14 = vld.sshfl [vmem:[#allocation1 + $0x28] sm:$0xff pattern:$0x73625140] }
  0x24   : > { %v12289_v15 = vld.sshfl [vmem:[#allocation1 + $0x30] sm:$0xff pattern:$0x73625140]  ;;  %v12291_v16 = vld.sshfl [vmem:[#allocation1 + $0x38] sm:$0xff pattern:$0x73625140] }
  0x25   : > { %571 = vst [vmem:[#allocation1 + $0x20] ss:$4 sm:$0xff] %v12270_v1 }
  0x28   : > { %219 = vrot.lane.b32.xlu1 %v197_v7, %s12185_s18  ;;  %217 = vrot.lane.b32.xlu0 %v195_v9, %s12185_s18 }
  0x29   : > { %v12296_v17 = vld.sshfl [vmem:[#allocation1] sm:$0xff pattern:$0x73625140]  ;;  %v12298_v18 = vld.sshfl [vmem:[#allocation1 + $0x8] sm:$0xff pattern:$0x73625140] }
  0x2a   : > { %v12300_v19 = vld.sshfl [vmem:[#allocation1 + $0x10] sm:$0xff pattern:$0x73625140]  ;;  %v12302_v20 = vld.sshfl [vmem:[#allocation1 + $0x18] sm:$0xff pattern:$0x73625140]  ;;  %221 = vrot.lane.b32.xlu2 %v201_v12, %s12185_s18 }
  0x2b   : > { %411 = vst [vmem:[#allocation1] ss:$4 sm:$0xff] %v12274_v2  ;;  %v417_v8 = vsel %vm239_vm1, %v12296_v17, 0  ;;  %v419_v12 = vsel %vm239_vm1, %v12298_v18, 0  ;;  %v421_v18 = vsel %vm239_vm1, %v12300_v19, 0 }
  0x2c   : > { %v582_v27 = vld.sshfl [vmem:[#allocation1 + $0x28] sm:$0xff pattern:$0x73625140]  ;;  %v580_v28 = vld.sshfl [vmem:[#allocation1 + $0x20] sm:$0xff pattern:$0x73625140] }
  0x2d   : > { %v584_v31 = vld.sshfl [vmem:[#allocation1 + $0x30] sm:$0xff pattern:$0x73625140]  ;;  %v586_v32 = vld.sshfl [vmem:[#allocation1 + $0x38] sm:$0xff pattern:$0x73625140] }
  0x2e   : > { %800 = vst [vmem:[#allocation1 + $0x20] ss:$4 sm:$0xff] %v12270_v1 }
  0x30   : > { %223 = vrot.lane.b32.xlu0 %v203_v11, %s12185_s18  ;;  %s12203_s18 = smov 47  }
  0x32   : > { %v12307_v21 = vld.sshfl [vmem:[#allocation1] sm:$0xff pattern:$0x73625140]  ;;  %v12309_v22 = vld.sshfl [vmem:[#allocation1 + $0x8] sm:$0xff pattern:$0x73625140] }
  0x33   : > { %569 = vst [vmem:[#allocation1] ss:$4 sm:$0xff] %v12268_v0 }
  0x35   : > { %v811_v35 = vld.sshfl [vmem:[#allocation1 + $0x28] sm:$0xff pattern:$0x73625140]  ;;  %v809_v36 = vld.sshfl [vmem:[#allocation1 + $0x20] sm:$0xff pattern:$0x73625140] }
  0x36   : > { %v815_v39 = vld.sshfl [vmem:[#allocation1 + $0x38] sm:$0xff pattern:$0x73625140]  ;;  %v813_v61 = vld.sshfl [vmem:[#allocation1 + $0x30] sm:$0xff pattern:$0x73625140] }
  0x37   : > { %1029 = vst [vmem:[#allocation1 + $0x20] ss:$4 sm:$0xff] %v12270_v1 }
  0x3a   : > { %v572_v23 = vld.sshfl [vmem:[#allocation1] sm:$0xff pattern:$0x73625140]  ;;  %v576_v24 = vld.sshfl [vmem:[#allocation1 + $0x10] sm:$0xff pattern:$0x73625140] }
  0x3b   : > { %593 = vrot.lane.b32.xlu1 %v572_v23, %s12186_s19  ;;  %597 = vrot.lane.b32.xlu0 %v576_v24, %s12186_s19  ;;  %v578_v25 = vld.sshfl [vmem:[#allocation1 + $0x18] sm:$0xff pattern:$0x73625140]  ;;  %v574_v26 = vld.sshfl [vmem:[#allocation1 + $0x8] sm:$0xff pattern:$0x73625140] }
  0x3c   : > { %595 = vrot.lane.b32.xlu2 %v574_v26, %s12186_s19  ;;  %588 = vst [vmem:[#allocation1] ss:$4 sm:$0xff] %v12274_v2 }
  0x3e   : > { %v1038_v23 = vld.sshfl [vmem:[#allocation1 + $0x20] sm:$0xff pattern:$0x73625140]  ;;  %v1044_v19 = vld.sshfl [vmem:[#allocation1 + $0x38] sm:$0xff pattern:$0x73625140] }
  0x43   : > { %599 = vrot.lane.b32.xlu1 %v578_v25, %s12186_s19  ;;  %603 = vrot.lane.b32.xlu0 %v582_v27, %s12186_s19  ;;  %v589_v29 = vld.sshfl [vmem:[#allocation1] sm:$0xff pattern:$0x73625140]  ;;  %v591_v30 = vld.sshfl [vmem:[#allocation1 + $0x8] sm:$0xff pattern:$0x73625140] }
  0x44   : > { %798 = vst [vmem:[#allocation1] ss:$4 sm:$0xff] %v12268_v0  ;;  %601 = vrot.lane.b32.xlu2 %v580_v28, %s12186_s19  ;;  %v423_v27 = vsel %vm239_vm1, %v12302_v20, 0  ;;  %v425_v28 = vsel %vm239_vm1, %v12285_v13, 0 }
  0x45   : > { %v1042_v20 = vld.sshfl [vmem:[#allocation1 + $0x30] sm:$0xff pattern:$0x73625140] }
  0x4b   : > { %605 = vrot.lane.b32.xlu1 %v584_v31, %s12186_s19  ;;  %609 = vrot.lane.b32.xlu0 %v589_v29, %s12186_s19  ;;  %v805_v33 = vld.sshfl [vmem:[#allocation1 + $0x10] sm:$0xff pattern:$0x73625140]  ;;  %v803_v34 = vld.sshfl [vmem:[#allocation1 + $0x8] sm:$0xff pattern:$0x73625140] }
  0x4c   : > { %607 = vrot.lane.b32.xlu2 %v586_v32, %s12186_s19  ;;  %v807_v37 = vld.sshfl [vmem:[#allocation1 + $0x18] sm:$0xff pattern:$0x73625140]  ;;  %v801_v38 = vld.sshfl [vmem:[#allocation1] sm:$0xff pattern:$0x73625140] }
  0x4d   : > { %817 = vst [vmem:[#allocation1] ss:$4 sm:$0xff] %v12274_v2  ;;  %v427_v29 = vsel %vm239_vm1, %v12287_v14, 0  ;;  %v12393_v31 = vld [vmem:[%s16558_s1] sm:$0xf]  ;;  %v429_v32 = vsel %vm239_vm1, %v12289_v15, 0 }
  0x53   : > { %611 = vrot.lane.b32.xlu1 %v591_v30, %s12186_s19  ;;  %824 = vrot.lane.b32.xlu0 %v803_v34, %s12187_s20  ;;  %s12195_s19 = smov 86  }
  0x54   : > { %822 = vrot.lane.b32.xlu2 %v801_v38, %s12187_s20  ;;  %v818_v41 = vld.sshfl [vmem:[#allocation1] sm:$0xff pattern:$0x73625140]  ;;  %v820_v42 = vld.sshfl [vmem:[#allocation1 + $0x8] sm:$0xff pattern:$0x73625140] }
  0x55   : > { %1027 = vst [vmem:[#allocation1] ss:$4 sm:$0xff] %v12268_v0 }
  0x5b   : > { %826 = vrot.lane.b32.xlu1 %v805_v33, %s12187_s20  ;;  %830 = vrot.lane.b32.xlu0 %v809_v36, %s12187_s20  ;;  %v431_v33 = vsel %vm239_vm1, %v12291_v16, 0  ;;  %v435_v36 = vsel %vm239_vm1, %v12309_v22, 0  ;;  %v1040_v16 = vld.sshfl [vmem:[#allocation1 + $0x28] sm:$0xff pattern:$0x73625140] }
  0x5c   : > { %828 = vrot.lane.b32.xlu2 %v807_v37, %s12187_s20  ;;  %v1030_v47 = vld.sshfl [vmem:[#allocation1] sm:$0xff pattern:$0x73625140]  ;;  %v1032_v62 = vld.sshfl [vmem:[#allocation1 + $0x8] sm:$0xff pattern:$0x73625140] }
  0x5d   : > { %v1036_v4 = vld.sshfl [vmem:[#allocation1 + $0x18] sm:$0xff pattern:$0x73625140]  ;;  %v1034_v30 = vld.sshfl [vmem:[#allocation1 + $0x10] sm:$0xff pattern:$0x73625140] }
  0x5e   : > { %1046 = vst [vmem:[#allocation1] ss:$4 sm:$0xff] %v12274_v2 }
  0x5f   : > { %1258 = vst [vmem:[#allocation1 + $0x20] ss:$4 sm:$0xff] %v12270_v1 }
  0x63   : > { %832 = vrot.lane.b32.xlu1 %v811_v35, %s12187_s20  ;;  %836 = vrot.lane.b32.xlu0 %v815_v39, %s12187_s20  ;;  %v433_v35 = vsel %vm239_vm1, %v12307_v21, 0 }
  0x64   : > { %834 = vrot.lane.b32.xlu2 %v813_v61, %s12187_s20 }
  0x65   : > { %v1049_v13 = vld.sshfl [vmem:[#allocation1 + $0x8] sm:$0xff pattern:$0x73625140]  ;;  %v1047_v14 = vld.sshfl [vmem:[#allocation1] sm:$0xff pattern:$0x73625140] }
  0x66   : > { %1256 = vst [vmem:[#allocation1] ss:$4 sm:$0xff] %v12268_v0 }
  0x6b   : > { %838 = vrot.lane.b32.xlu1 %v818_v41, %s12187_s20  ;;  %1051 = vrot.lane.b32.xlu0 %v1030_v47, %s12188_s21 }
  0x6c   : > { %840 = vrot.lane.b32.xlu2 %v820_v42, %s12187_s20  ;;  %s12212_s20 = smov 104  }
  0x6d   : > { %v1259_v37 = vld.sshfl [vmem:[#allocation1] sm:$0xff pattern:$0x73625140]  ;;  %v1263_v38 = vld.sshfl [vmem:[#allocation1 + $0x10] sm:$0xff pattern:$0x73625140] }
  0x6e   : > { %v1265_v22 = vld.sshfl [vmem:[#allocation1 + $0x18] sm:$0xff pattern:$0x73625140] }
  0x73   : > { %1053 = vrot.lane.b32.xlu1 %v1032_v62, %s12188_s21  ;;  %1057 = vrot.lane.b32.xlu0 %v1036_v4, %s12188_s21 }
  0x74   : > { %v214_v40 = vpop.permute.xlu2 %213  ;;  %1055 = vrot.lane.b32.xlu2 %v1034_v30, %s12188_s21 }
  0x7b   : > { %1059 = vrot.lane.b32.xlu1 %v1038_v23, %s12188_s21  ;;  %1063 = vrot.lane.b32.xlu0 %v1042_v20, %s12188_s21 }
  0x7c   : > { %v216_v45 = vpop.permute.xlu2 %215  ;;  %1061 = vrot.lane.b32.xlu2 %v1040_v16, %s12188_s21 }
  0x7d   : > { %v230_v46 = vsel %vm225_vm0, %v214_v40, %v216_v45 }
  0x7e   : > { %v253_v50 = vsel %vm239_vm1, %v230_v46, 0 }
  0x83   : > { %1065 = vrot.lane.b32.xlu1 %v1044_v19, %s12188_s21  ;;  %1069 = vrot.lane.b32.xlu0 %v1049_v13, %s12188_s21 }
  0x84   : > { %v222_v60 = vpop.permute.xlu2 %221  ;;  %1067 = vrot.lane.b32.xlu2 %v1047_v14, %s12188_s21  ;;  %s12204_s21 = smov 46  }
  0x8a   : > { %v210_v43 = vpop.permute.xlu1 %209  ;;  %v206_v44 = vpop.permute.xlu0 %205 }
  0x8b   : > { %1280 = vrot.lane.b32.xlu1 %v1259_v37, %s12189_s26  ;;  %1284 = vrot.lane.b32.xlu0 %v1263_v38, %s12189_s26 }
  0x92   : > { %v212_v48 = vpop.permute.xlu1 %211  ;;  %v208_v49 = vpop.permute.xlu0 %207 }
  0x93   : > { %v226_v51 = vsel %vm225_vm0, %v206_v44, %v208_v49  ;;  %v227_v52 = vsel %vm225_vm0, %v208_v49, %v210_v43  ;;  %v228_v53 = vsel %vm225_vm0, %v210_v43, %v212_v48  ;;  %v229_v54 = vsel %vm225_vm0, %v212_v48, %v214_v40  ;;  %1286 = vrot.lane.b32.xlu1 %v1265_v22, %s12189_s26 }
  0x94   : > { %v241_v55 = vsel %vm239_vm1, %v226_v51, 0  ;;  %v244_v56 = vsel %vm239_vm1, %v227_v52, 0  ;;  %v247_v57 = vsel %vm239_vm1, %v228_v53, 0  ;;  %v250_v58 = vsel %vm239_vm1, %v229_v54, 0 }
  0x95   : > { %277 = vmatpush.bf16.msra.mxu0 %v241_v55  ;;  %290 = vmatpush.bf16.msra.mxu1 %v244_v56  ;;  %v1271_v51 = vld.sshfl [vmem:[#allocation1 + $0x30] sm:$0xff pattern:$0x73625140] }
  0x96   : > { %303 = vmatpush.bf16.msra.mxu2 %v247_v57  ;;  %316 = vmatpush.bf16.msra.mxu3 %v250_v58  ;;  %v596_v15 = vpop.permute.xlu2 %595 }
  0x98   : > { %11577 = vmatmul.msk.bf16.vlgmr.msra.gmra.mxu0 %vm235_vm2, %v12339_v59  ;;  %11578 = vmatmul.msk.bf16.vlgmr.msra.gmra.mxu1 %vm235_vm2, %v12339_v59 }
  0x99   : > { %329 = vmatpush.bf16.msrb.mxu0 %v253_v50  ;;  %11579 = vmatmul.msk.bf16.vlgmr.msra.gmra.mxu2 %vm235_vm2, %v12339_v59  ;;  %v1269_v50 = vld.sshfl [vmem:[#allocation1 + $0x28] sm:$0xff pattern:$0x73625140] }
  0x9a   : > { %11580 = vmatmul.msk.bf16.vlgmr.msra.gmra.mxu3 %vm235_vm2, %v12339_v59  ;;  %v220_v63 = vpop.permute.xlu1 %219  ;;  %v218_v3 = vpop.permute.xlu0 %217  ;;  %1290 = vrot.lane.b32.xlu0 %v1269_v50, %s12189_s26 }
  0x9b   : > { %v231_v5 = vsel %vm225_vm0, %v216_v45, %v218_v3  ;;  %v232_v6 = vsel %vm225_vm0, %v218_v3, %v220_v63  ;;  %v233_v7 = vsel %vm225_vm0, %v220_v63, %v222_v60  ;;  %1292 = vrot.lane.b32.xlu1 %v1271_v51, %s12189_s26  ;;  %v1261_v3 = vld.sshfl [vmem:[#allocation1 + $0x8] sm:$0xff pattern:$0x73625140] }
  0x9c   : > { %v256_v9 = vsel %vm239_vm1, %v231_v5, 0  ;;  %v259_v10 = vsel %vm239_vm1, %v232_v6, 0  ;;  %v262_v11 = vsel %vm239_vm1, %v233_v7, 0  ;;  %1275 = vst [vmem:[#allocation1] ss:$4 sm:$0xff] %v12274_v2  ;;  %1282 = vrot.lane.b32.xlu2 %v1261_v3, %s12189_s26 }
  0x9d   : > { %342 = vmatpush.bf16.msrb.mxu1 %v256_v9  ;;  %355 = vmatpush.bf16.msrb.mxu2 %v259_v10  ;;  %v1267_v7 = vld.sshfl [vmem:[#allocation1 + $0x20] sm:$0xff pattern:$0x73625140] }
  0x9e   : > { %368 = vmatpush.bf16.msrb.mxu3 %v262_v11  ;;  %v602_v40 = vpop.permute.xlu2 %601  ;;  %v12461_v11 = vld [vmem:[%s16558_s1 + $0x8] sm:$0xf] }
  0xa1   : > { %444 = vmatpush.bf16.msra.mxu2 %v417_v8 }
  0xa2   : > { %457 = vmatpush.bf16.msra.mxu3 %v419_v12  ;;  %v224_v24 = vpop.permute.xlu0 %223 }
  0xa3   : > { %v234_v17 = vsel %vm225_vm0, %v222_v60, %v224_v24  ;;  %v268_v25 = vsel %vm239_vm1, %v224_v24, 0  ;;  %v1278_v4 = vld.sshfl [vmem:[#allocation1 + $0x8] sm:$0xff pattern:$0x73625140]  ;;  %vm3599_vm0 = vcmask 416768  }
  0xa4   : > { %v265_v26 = vsel %vm239_vm1, %v234_v17, 0  ;;  %394 = vmatpush.bf16.msra.mxu1 %v268_v25  ;;  %v1276_v5 = vld.sshfl [vmem:[#allocation1] sm:$0xff pattern:$0x73625140]  ;;  %1298 = vrot.lane.b32.xlu1 %v1278_v4, %s12189_s26 }
  0xa5   : > { %381 = vmatpush.bf16.msra.mxu0 %v265_v26  ;;  %1296 = vrot.lane.b32.xlu0 %v1276_v5, %s12189_s26  ;;  %1485 = vst [vmem:[#allocation1] ss:$4 sm:$0xff] %v12268_v0 }
  0xa6   : > { %v608_v53 = vpop.permute.xlu2 %607  ;;  %1288 = vrot.lane.b32.xlu2 %v1267_v7, %s12189_s26 }
  0xa8   : > { %11581 = vmatmul.msk.bf16.vlgmr.msrb.gmra.mxu0 %vm235_vm2, %v12339_v59  ;;  %11582 = vmatmul.msk.bf16.vlgmr.msrb.gmra.mxu1 %vm235_vm2, %v12339_v59 }
  0xa9   : > { %11583 = vmatmul.msk.bf16.vlgmr.msrb.gmra.mxu2 %vm235_vm2, %v12339_v59  ;;  %470 = vmatpush.bf16.msrb.mxu0 %v421_v18 }
  0xaa   : > { %11584 = vmatmul.msk.bf16.vlgmr.msrb.gmra.mxu3 %vm235_vm2, %v12339_v59  ;;  %483 = vmatpush.bf16.msrb.mxu1 %v423_v27 }
  0xab   : > { %496 = vmatpush.bf16.msrb.mxu2 %v425_v28  ;;  %509 = vmatpush.bf16.msrb.mxu3 %v427_v29  ;;  %v1273_v28 = vld.sshfl [vmem:[#allocation1 + $0x38] sm:$0xff pattern:$0x73625140] }
  0xac   : > { %v1490_v18 = vld.sshfl [vmem:[#allocation1 + $0x8] sm:$0xff pattern:$0x73625140]  ;;  %v1492_v27 = vld.sshfl [vmem:[#allocation1 + $0x10] sm:$0xff pattern:$0x73625140] }
  0xad   : > { %v594_v34 = vpop.permute.xlu1 %593  ;;  %v598_v21 = vpop.permute.xlu0 %597  ;;  %1487 = vst [vmem:[#allocation1 + $0x20] ss:$4 sm:$0xff] %v12270_v1  ;;  %1513 = vrot.lane.b32.xlu1 %v1492_v27, %s12190_s29  ;;  %1511 = vrot.lane.b32.xlu0 %v1490_v18, %s12190_s29  ;;  %v1488_v37 = vld.sshfl [vmem:[#allocation1] sm:$0xff pattern:$0x73625140] }
  0xae   : > { %v614_v41 = vsel %vm613_vm3, %v594_v34, %v596_v15  ;;  %v615_v42 = vsel %vm613_vm3, %v596_v15, %v598_v21  ;;  %v823_v6 = vpop.permute.xlu2 %822  ;;  %1294 = vrot.lane.b32.xlu2 %v1273_v28, %s12189_s26  ;;  %v1494_v38 = vld.sshfl [vmem:[#allocation1 + $0x18] sm:$0xff pattern:$0x73625140] }
  0xaf   : > { %v627_v45 = vsel %vm239_vm1, %v614_v41, 0  ;;  %v630_v46 = vsel %vm239_vm1, %v615_v42, 0  ;;  %1504 = vst [vmem:[#allocation1] ss:$4 sm:$0xff] %v12274_v2 }
  0xb4   : > { %v1496_v30 = vld.sshfl [vmem:[#allocation1 + $0x20] sm:$0xff pattern:$0x73625140]  ;;  %v1498_v13 = vld.sshfl [vmem:[#allocation1 + $0x28] sm:$0xff pattern:$0x73625140] }
  0xb5   : > { %v600_v39 = vpop.permute.xlu1 %599  ;;  %v604_v48 = vpop.permute.xlu0 %603  ;;  %1517 = vrot.lane.b32.xlu0 %v1496_v30, %s12190_s29  ;;  %1519 = vrot.lane.b32.xlu1 %v1498_v13, %s12190_s29 }
  0xb6   : > { %v616_v43 = vsel %vm613_vm3, %v598_v21, %v600_v39  ;;  %v617_v44 = vsel %vm613_vm3, %v600_v39, %v602_v40  ;;  %v618_v55 = vsel %vm613_vm3, %v602_v40, %v604_v48  ;;  %v829_v29 = vpop.permute.xlu2 %828  ;;  %v1502_v21 = vld.sshfl [vmem:[#allocation1 + $0x38] sm:$0xff pattern:$0x73625140]  ;;  %1509 = vrot.lane.b32.xlu2 %v1488_v37, %s12190_s29  ;;  %v1505_v39 = vld.sshfl [vmem:[#allocation1] sm:$0xff pattern:$0x73625140] }
  0xb7   : > { %v633_v47 = vsel %vm239_vm1, %v616_v43, 0  ;;  %v636_v49 = vsel %vm239_vm1, %v617_v44, 0  ;;  %v1507_v40 = vld.sshfl [vmem:[#allocation1 + $0x8] sm:$0xff pattern:$0x73625140] }
  0xb8   : > { %11585 = vmatmul.msk.bf16.vlgmr.msra.gmra.mxu0 %vm235_vm2, %v12339_v59  ;;  %11586 = vmatmul.msk.bf16.vlgmr.msra.gmra.mxu1 %vm235_vm2, %v12339_v59  ;;  %v639_v59 = vsel %vm239_vm1, %v618_v55, 0  ;;  %1714 = vst [vmem:[#allocation1] ss:$4 sm:$0xff] %v12268_v0 }
  0xb9   : > { %11587 = vmatmul.msk.bf16.vlgmr.msra.gmra.mxu2 %vm235_vm2, %v12393_v31  ;;  %522 = vmatpush.bf16.msra.mxu0 %v429_v32 }
  0xba   : > { %11588 = vmatmul.msk.bf16.vlgmr.msra.gmra.mxu3 %vm235_vm2, %v12393_v31  ;;  %535 = vmatpush.bf16.msra.mxu1 %v431_v33 }
  0xbb   : > { %548 = vmatpush.bf16.msra.mxu2 %v433_v35  ;;  %561 = vmatpush.bf16.msra.mxu3 %v435_v36 }
  0xbd   : > { %v606_v52 = vpop.permute.xlu1 %605  ;;  %v610_v54 = vpop.permute.xlu0 %609  ;;  %1523 = vrot.lane.b32.xlu0 %v1502_v21, %s12190_s29  ;;  %1525 = vrot.lane.b32.xlu1 %v1505_v39, %s12190_s29 }
  0xbe   : > { %v619_v56 = vsel %vm613_vm3, %v604_v48, %v606_v52  ;;  %v620_v57 = vsel %vm613_vm3, %v606_v52, %v608_v53  ;;  %v621_v58 = vsel %vm613_vm3, %v608_v53, %v610_v54  ;;  %v835_v33 = vpop.permute.xlu2 %834  ;;  %1515 = vrot.lane.b32.xlu2 %v1494_v38, %s12190_s29 }
  0xbf   : > { %v642_v60 = vsel %vm239_vm1, %v619_v56, 0  ;;  %v645_v61 = vsel %vm239_vm1, %v620_v57, 0  ;;  %v648_v63 = vsel %vm239_vm1, %v621_v58, 0  ;;  %v1717_v52 = vld.sshfl [vmem:[#allocation1] sm:$0xff pattern:$0x73625140] }
  0xc0   : > { %v1719_v55 = vld.sshfl [vmem:[#allocation1 + $0x8] sm:$0xff pattern:$0x73625140]  ;;  %v1723_v57 = vld.sshfl [vmem:[#allocation1 + $0x18] sm:$0xff pattern:$0x73625140] }
  0xc5   : > { %v612_v62 = vpop.permute.xlu1 %611  ;;  %v825_v9 = vpop.permute.xlu0 %824  ;;  %1738 = vrot.lane.b32.xlu0 %v1717_v52, %s12191_s5  ;;  %1740 = vrot.lane.b32.xlu1 %v1719_v55, %s12191_s5 }
  0xc6   : > { %v622_v10 = vsel %vm613_vm3, %v610_v54, %v612_v62  ;;  %v843_v12 = vsel %vm842_vm4, %v823_v6, %v825_v9  ;;  %v654_v17 = vsel %vm239_vm1, %v612_v62, 0  ;;  %v841_v42 = vpop.permute.xlu2 %840  ;;  %v1500_v54 = vld.sshfl [vmem:[#allocation1 + $0x30] sm:$0xff pattern:$0x73625140]  ;;  %vm3833_vm3 = vcmask 408576  }
  0xc7   : > { %v651_v24 = vsel %vm239_vm1, %v622_v10, 0  ;;  %v856_v25 = vsel %vm239_vm1, %v843_v12, 0  ;;  %v883_v51 = vsel %vm239_vm1, %v841_v42, 0  ;;  %1521 = vrot.lane.b32.xlu2 %v1500_v54, %s12190_s29  ;;  %1716 = vst [vmem:[#allocation1 + $0x20] ss:$4 sm:$0xff] %v12270_v1 }
  0xc8   : > { %11589 = vmatmul.msk.bf16.vlgmr.msrb.gmra.mxu0 %vm235_vm2, %v12393_v31  ;;  %11590 = vmatmul.msk.bf16.vlgmr.msrb.gmra.mxu1 %vm235_vm2, %v12393_v31 }
  0xc9   : > { %11591 = vmatmul.msk.bf16.vlgmr.msrb.gmra.mxu2 %vm235_vm2, %v12393_v31  ;;  %663 = vmatpush.bf16.msrb.mxu0 %v627_v45 }
  0xca   : > { %11592 = vmatmul.msk.bf16.vlgmr.msrb.gmra.mxu3 %vm235_vm2, %v12393_v31  ;;  %676 = vmatpush.bf16.msrb.mxu1 %v630_v46  ;;  %v12511_v46 = vld [vmem:[%s16558_s1 + $0xc] sm:$0xf] }
  0xcb   : > { %689 = vmatpush.bf16.msrb.mxu2 %v633_v47  ;;  %702 = vmatpush.bf16.msrb.mxu3 %v636_v49 }
  0xcd   : > { %v827_v8 = vpop.permute.xlu1 %826  ;;  %v831_v20 = vpop.permute.xlu0 %830  ;;  %1744 = vrot.lane.b32.xlu0 %v1723_v57, %s12191_s5 }
  0xce   : > { %v844_v23 = vsel %vm842_vm4, %v825_v9, %v827_v8  ;;  %v845_v14 = vsel %vm842_vm4, %v827_v8, %v829_v29  ;;  %v1056_v56 = vpop.permute.xlu2 %1055  ;;  %v1725_v10 = vld.sshfl [vmem:[#allocation1 + $0x20] sm:$0xff pattern:$0x73625140] }
  0xcf   : > { %v859_v26 = vsel %vm239_vm1, %v844_v23, 0  ;;  %v862_v35 = vsel %vm239_vm1, %v845_v14, 0  ;;  %1527 = vrot.lane.b32.xlu2 %v1507_v40, %s12190_s29  ;;  %1746 = vrot.lane.b32.xlu1 %v1725_v10, %s12191_s5  ;;  %s12215_s29 = smov 101  }
  0xd5   : > { %v833_v19 = vpop.permute.xlu1 %832  ;;  %v837_v22 = vpop.permute.xlu0 %836 }
  0xd6   : > { %v847_v32 = vsel %vm842_vm4, %v831_v20, %v833_v19  ;;  %v848_v34 = vsel %vm842_vm4, %v833_v19, %v835_v33  ;;  %v849_v43 = vsel %vm842_vm4, %v835_v33, %v837_v22  ;;  %v1062_v8 = vpop.permute.xlu2 %1061 }
  0xd7   : > { %v868_v15 = vsel %vm239_vm1, %v847_v32, 0  ;;  %v871_v16 = vsel %vm239_vm1, %v848_v34, 0  ;;  %v874_v47 = vsel %vm239_vm1, %v849_v43, 0 }
  0xd8   : > { %11593 = vmatmul.msk.bf16.vlgmr.msra.gmra.mxu0 %vm235_vm2, %v12393_v31  ;;  %11594 = vmatmul.msk.bf16.vlgmr.msra.gmra.mxu1 %vm235_vm2, %v12393_v31 }
  0xd9   : > { %11595 = vmatmul.msk.bf16.vlgmr.msra.gmra.mxu2 %vm235_vm2, %v12393_v31  ;;  %715 = vmatpush.bf16.msra.mxu0 %v639_v59 }
  0xda   : > { %11596 = vmatmul.msk.bf16.vlgmr.msra.gmra.mxu3 %vm235_vm2, %v12393_v31  ;;  %728 = vmatpush.bf16.msra.mxu1 %v642_v60  ;;  %v846_v31 = vsel %vm842_vm4, %v829_v29, %v831_v20 }
  0xdb   : > { %741 = vmatpush.bf16.msra.mxu2 %v645_v61  ;;  %754 = vmatpush.bf16.msra.mxu3 %v648_v63  ;;  %v865_v36 = vsel %vm239_vm1, %v846_v31, 0 }
  0xdd   : > { %v839_v41 = vpop.permute.xlu1 %838  ;;  %v1052_v50 = vpop.permute.xlu0 %1051 }
  0xde   : > { %v850_v44 = vsel %vm842_vm4, %v837_v22, %v839_v41  ;;  %v851_v45 = vsel %vm842_vm4, %v839_v41, %v841_v42  ;;  %v1068_v27 = vpop.permute.xlu2 %1067  ;;  %v1727_v22 = vld.sshfl [vmem:[#allocation1 + $0x28] sm:$0xff pattern:$0x73625140]  ;;  %vm4067_vm4 = vcmask 400384  }
  0xdf   : > { %v877_v48 = vsel %vm239_vm1, %v850_v44, 0  ;;  %v880_v49 = vsel %vm239_vm1, %v851_v45, 0 }
  0xe5   : > { %v1054_v53 = vpop.permute.xlu1 %1053  ;;  %v1058_v58 = vpop.permute.xlu0 %1057 }
  0xe6   : > { %v1072_v59 = vsel %vm1071_vm5, %v1052_v50, %v1054_v53  ;;  %v1073_v60 = vsel %vm1071_vm5, %v1054_v53, %v1056_v56  ;;  %v1074_v3 = vsel %vm1071_vm5, %v1056_v56, %v1058_v58 }
  0xe7   : > { %v1085_v5 = vsel %vm239_vm1, %v1072_v59, 0  ;;  %v1088_v6 = vsel %vm239_vm1, %v1073_v60, 0  ;;  %v1091_v7 = vsel %vm239_vm1, %v1074_v3, 0 }
  0xe8   : > { %11598 = vmatmul.msk.bf16.vlgmr.msrb.gmra.mxu0 %vm235_vm2, %v12461_v11  ;;  %11599 = vmatmul.msk.bf16.vlgmr.msrb.gmra.mxu1 %vm235_vm2, %v12461_v11 }
  0xe9   : > { %11600 = vmatmul.msk.bf16.vlgmr.msrb.gmra.mxu2 %vm235_vm2, %v12461_v11  ;;  %767 = vmatpush.bf16.msrb.mxu0 %v651_v24 }
  0xea   : > { %11601 = vmatmul.msk.bf16.vlgmr.msrb.gmra.mxu3 %vm235_vm2, %v12461_v11  ;;  %780 = vmatpush.bf16.msrb.mxu1 %v654_v17  ;;  %v1729_v17 = vld.sshfl [vmem:[#allocation1 + $0x30] sm:$0xff pattern:$0x73625140] }
  0xeb   : > { %892 = vmatpush.bf16.msrb.mxu2 %v856_v25  ;;  %905 = vmatpush.bf16.msrb.mxu3 %v859_v26  ;;  %v1731_v26 = vld.sshfl [vmem:[#allocation1 + $0x38] sm:$0xff pattern:$0x73625140] }
  0xec   : > { %1750 = vrot.lane.b32.xlu0 %v1729_v17, %s12191_s5  ;;  %1752 = vrot.lane.b32.xlu1 %v1731_v26, %s12191_s5  ;;  %1945 = vst [vmem:[#allocation1 + $0x20] ss:$4 sm:$0xff] %v12270_v1 }
  0xed   : > { %v1060_v61 = vpop.permute.xlu1 %1059  ;;  %v1064_v25 = vpop.permute.xlu0 %1063 }
  0xee   : > { %v1075_v4 = vsel %vm1071_vm5, %v1058_v58, %v1060_v61  ;;  %v1076_v19 = vsel %vm1071_vm5, %v1060_v61, %v1062_v8  ;;  %v1077_v20 = vsel %vm1071_vm5, %v1062_v8, %v1064_v25 }
  0xef   : > { %v1094_v9 = vsel %vm239_vm1, %v1075_v4, 0  ;;  %v1097_v32 = vsel %vm239_vm1, %v1076_v19, 0  ;;  %v1100_v33 = vsel %vm239_vm1, %v1077_v20, 0 }
  0xf3   : > { %v1956_v8 = vld.sshfl [vmem:[#allocation1 + $0x28] sm:$0xff pattern:$0x73625140] }
  0xf5   : > { %v1066_v18 = vpop.permute.xlu1 %1065 }
  0xf6   : > { %v1078_v14 = vsel %vm1071_vm5, %v1064_v25, %v1066_v18  ;;  %v1079_v31 = vsel %vm1071_vm5, %v1066_v18, %v1068_v27 }
  0xf7   : > { %v1103_v34 = vsel %vm239_vm1, %v1078_v14, 0 }
  0xf8   : > { %11602 = vmatmul.msk.bf16.vlgmr.msra.gmra.mxu0 %vm235_vm2, %v12461_v11  ;;  %11603 = vmatmul.msk.bf16.vlgmr.msra.gmra.mxu1 %vm235_vm2, %v12461_v11 }
  0xf9   : > { %11604 = vmatmul.msk.bf16.vlgmr.msra.gmra.mxu2 %vm235_vm2, %v12461_v11  ;;  %918 = vmatpush.bf16.msra.mxu0 %v862_v35  ;;  %v1106_v35 = vsel %vm239_vm1, %v1079_v31, 0 }
  0xfa   : > { %11605 = vmatmul.msk.bf16.vlgmr.msra.gmra.mxu3 %vm235_vm2, %v12461_v11  ;;  %931 = vmatpush.bf16.msra.mxu1 %v865_v36  ;;  %v1721_v36 = vld.sshfl [vmem:[#allocation1 + $0x10] sm:$0xff pattern:$0x73625140] }
  0xfb   : > { %944 = vmatpush.bf16.msra.mxu2 %v868_v15  ;;  %957 = vmatpush.bf16.msra.mxu3 %v871_v16  ;;  %v1070_v15 = vpop.permute.xlu0 %1069  ;;  %1733 = vst [vmem:[#allocation1] ss:$4 sm:$0xff] %v12274_v2 }
  0xfc   : > { %1742 = vrot.lane.b32.xlu2 %v1721_v36, %s12191_s5  ;;  %v1080_v45 = vsel %vm1071_vm5, %v1068_v27, %v1070_v15  ;;  %vm4301_vm5 = vcmask 392192  }
  0xfd   : > { %v1281_v39 = vpop.permute.xlu1 %1280  ;;  %v1109_v50 = vsel %vm239_vm1, %v1080_v45, 0 }
 0x102   : > { %v1736_v40 = vld.sshfl [vmem:[#allocation1 + $0x8] sm:$0xff pattern:$0x73625140]  ;;  %v1734_v41 = vld.sshfl [vmem:[#allocation1] sm:$0xff pattern:$0x73625140] }
 0x103   : > { %1756 = vrot.lane.b32.xlu0 %v1736_v40, %s12191_s5  ;;  %1943 = vst [vmem:[#allocation1] ss:$4 sm:$0xff] %v12268_v0  ;;  %v1285_v42 = vpop.permute.xlu0 %1284 }
 0x104   : > { %1748 = vrot.lane.b32.xlu2 %v1727_v22, %s12191_s5 }
 0x105   : > { %v1287_v55 = vpop.permute.xlu1 %1286 }
 0x106   : > { %v1303_v17 = vsel %vm1300_vm6, %v1285_v42, %v1287_v55 }
 0x108   : > { %11606 = vmatmul.msk.bf16.vlgmr.msrb.gmra.mxu0 %vm235_vm2, %v12461_v11  ;;  %11607 = vmatmul.msk.bf16.vlgmr.msrb.gmra.mxu1 %vm235_vm2, %v12461_v11 }
 0x109   : > { %11609 = vmatmul.msk.bf16.vlgmr.msrb.gmra.mxu2 %vm235_vm2, %v12511_v46  ;;  %970 = vmatpush.bf16.msrb.mxu0 %v874_v47 }
 0x10a   : > { %11610 = vmatmul.msk.bf16.vlgmr.msrb.gmra.mxu3 %vm235_vm2, %v12511_v46  ;;  %983 = vmatpush.bf16.msrb.mxu1 %v877_v48  ;;  %v12596_v48 = vld [vmem:[%s16558_s1 + $0x10] sm:$0xf]  ;;  %v1946_v54 = vld.sshfl [vmem:[#allocation1] sm:$0xff pattern:$0x73625140] }
 0x10b   : > { %996 = vmatpush.bf16.msrb.mxu2 %v880_v49  ;;  %1009 = vmatpush.bf16.msrb.mxu3 %v883_v51  ;;  %v1283_v49 = vpop.permute.xlu2 %1282  ;;  %v1112_v51 = vsel %vm239_vm1, %v1070_v15, 0  ;;  %v1950_v58 = vld.sshfl [vmem:[#allocation1 + $0x10] sm:$0xff pattern:$0x73625140] }
 0x10c   : > { %v1301_v52 = vsel %vm1300_vm6, %v1281_v39, %v1283_v49  ;;  %v1302_v53 = vsel %vm1300_vm6, %v1283_v49, %v1285_v42  ;;  %1967 = vrot.lane.b32.xlu1 %v1946_v54, %s12192_s8  ;;  %1971 = vrot.lane.b32.xlu0 %v1950_v58, %s12192_s8  ;;  %v1948_v31 = vld.sshfl [vmem:[#allocation1 + $0x8] sm:$0xff pattern:$0x73625140]  ;;  %v1954_v54 = vld.sshfl [vmem:[#allocation1 + $0x20] sm:$0xff pattern:$0x73625140] }
 0x10d   : > { %v1314_v56 = vsel %vm239_vm1, %v1301_v52, 0  ;;  %v1317_v57 = vsel %vm239_vm1, %v1302_v53, 0  ;;  %1754 = vrot.lane.b32.xlu2 %v1734_v41, %s12191_s5  ;;  %v1293_v10 = vpop.permute.xlu1 %1292 }
 0x114   : > { %1977 = vrot.lane.b32.xlu0 %v1956_v8, %s12192_s8 }
 0x115   : > { %v12532_v62 = vpop.f32.mrf.mxu0  ;;  %v12534_v63 = vpop.f32.mrf.mxu1  ;;  %1969 = vrot.lane.b32.xlu2 %v1948_v31, %s12192_s8 }
 0x116   : > { %v1299_v22 = vpop.permute.xlu1 %1298 }
 0x118   : > { %11611 = vmatmul.msk.bf16.vlgmr.msra.gmra.mxu0 %vm235_vm2, %v12511_v46  ;;  %11612 = vmatmul.msk.bf16.vlgmr.msra.gmra.mxu1 %vm235_vm2, %v12511_v46 }
 0x119   : > { %11613 = vmatmul.msk.bf16.vlgmr.msra.gmra.mxu2 %vm235_vm2, %v12511_v46  ;;  %1121 = vmatpush.bf16.msra.mxu0 %v1085_v5 }
 0x11a   : > { %11614 = vmatmul.msk.bf16.vlgmr.msra.gmra.mxu3 %vm235_vm2, %v12511_v46  ;;  %1134 = vmatpush.bf16.msra.mxu1 %v1088_v6  ;;  %v1952_v6 = vld.sshfl [vmem:[#allocation1 + $0x18] sm:$0xff pattern:$0x73625140] }
 0x11b   : > { %1147 = vmatpush.bf16.msra.mxu2 %v1091_v7  ;;  %1160 = vmatpush.bf16.msra.mxu3 %v1094_v9  ;;  %v1289_v7 = vpop.permute.xlu2 %1288  ;;  %v1291_v9 = vpop.permute.xlu0 %1290  ;;  %1962 = vst [vmem:[#allocation1] ss:$4 sm:$0xff] %v12274_v2 }
 0x11c   : > { %v12551_v11 = vpop.f32.mrf.mxu2  ;;  %1973 = vrot.lane.b32.xlu1 %v1952_v6, %s12192_s8  ;;  %v1305_v26 = vsel %vm1300_vm6, %v1289_v7, %v1291_v9  ;;  %v1306_v18 = vsel %vm1300_vm6, %v1291_v9, %v1293_v10 }
 0x11d   : > { %v12553_v12 = vpop.f32.mrf.mxu3  ;;  %v281_v23 = vpop.f32.mrf.mxu0  ;;  %v1326_v20 = vsel %vm239_vm1, %v1305_v26, 0  ;;  %v1329_v14 = vsel %vm239_vm1, %v1306_v18, 0  ;;  %1975 = vrot.lane.b32.xlu2 %v1954_v54, %s12192_s8 }
 0x11e   : > { %v294_v24 = vpop.f32.mrf.mxu1 }
 0x11f   : > { %v1514_v6 = vpop.permute.xlu1 %1513 }
 0x123   : > { %v1295_v15 = vpop.permute.xlu2 %1294  ;;  %v1297_v39 = vpop.permute.xlu0 %1296 }
 0x124   : > { %v307_v28 = vpop.f32.mrf.mxu2  ;;  %v1307_v42 = vsel %vm1300_vm6, %v1293_v10, %v1295_v15 }
 0x125   : > { %v320_v29 = vpop.f32.mrf.mxu3  ;;  %v12560_v30 = vpop.f32.mrf.mxu0 }
 0x126   : > { %v12562_v13 = vpop.f32.mrf.mxu1  ;;  %v1320_v29 = vsel %vm239_vm1, %v1303_v17, 0 }
 0x128   : > { %11615 = vmatmul.msk.bf16.vlgmr.msrb.gmra.mxu0 %vm235_vm2, %v12511_v46  ;;  %11616 = vmatmul.msk.bf16.vlgmr.msrb.gmra.mxu1 %vm235_vm2, %v12511_v46 }
 0x129   : > { %11617 = vmatmul.msk.bf16.vlgmr.msrb.gmra.mxu2 %vm235_vm2, %v12511_v46  ;;  %1173 = vmatpush.bf16.msrb.mxu0 %v1097_v32 }
 0x12a   : > { %11618 = vmatmul.msk.bf16.vlgmr.msrb.gmra.mxu3 %vm235_vm2, %v12511_v46  ;;  %1186 = vmatpush.bf16.msrb.mxu1 %v1100_v33 }
 0x12b   : > { %1199 = vmatpush.bf16.msrb.mxu2 %v1103_v34  ;;  %1212 = vmatpush.bf16.msrb.mxu3 %v1106_v35  ;;  %v1510_v53 = vpop.permute.xlu2 %1509 }
 0x12c   : > { %v12579_v16 = vpop.f32.mrf.mxu2 }
 0x12d   : > { %v12581_v37 = vpop.f32.mrf.mxu3  ;;  %v333_v38 = vpop.f32.mrf.mxu0 }
 0x12e   : > { %v346_v21 = vpop.f32.mrf.mxu1  ;;  %v1963_v38 = vld.sshfl [vmem:[#allocation1] sm:$0xff pattern:$0x73625140] }
 0x12f   : > { %v1965_v21 = vld.sshfl [vmem:[#allocation1 + $0x8] sm:$0xff pattern:$0x73625140]  ;;  %1983 = vrot.lane.b32.xlu0 %v1963_v38, %s12192_s8 }
 0x130   : > { %2172 = vst [vmem:[#allocation1] ss:$4 sm:$0xff] %v12268_v0 }
 0x134   : > { %v359_v43 = vpop.f32.mrf.mxu2 }
 0x135   : > { %v372_v44 = vpop.f32.mrf.mxu3  ;;  %v12589_v46 = vpop.f32.mrf.mxu0 }
 0x136   : > { %v12591_v47 = vpop.f32.mrf.mxu1  ;;  %v1309_v44 = vsel %vm1300_vm6, %v1297_v39, %v1299_v22 }
 0x137   : > { %v2175_v38 = vld.sshfl [vmem:[#allocation1] sm:$0xff pattern:$0x73625140] }
 0x138   : > { %11620 = vmatmul.msk.bf16.vlgmr.msra.gmra.mxu0 %vm235_vm2, %v12596_v48  ;;  %11621 = vmatmul.msk.bf16.vlgmr.msra.gmra.mxu1 %vm235_vm2, %v12596_v48 }
 0x139   : > { %11622 = vmatmul.msk.bf16.vlgmr.msra.gmra.mxu2 %vm235_vm2, %v12596_v48  ;;  %1225 = vmatpush.bf16.msra.mxu0 %v1109_v50  ;;  %v12669_v50 = vld [vmem:[%s16558_s1 + $0x14] sm:$0xf] }
 0x13a   : > { %11623 = vmatmul.msk.bf16.vlgmr.msra.gmra.mxu3 %vm235_vm2, %v12596_v48  ;;  %1238 = vmatpush.bf16.msra.mxu1 %v1112_v51  ;;  %v1332_v51 = vsel %vm239_vm1, %v1307_v42, 0 }
 0x13b   : > { %1350 = vmatpush.bf16.msra.mxu2 %v1314_v56  ;;  %1363 = vmatpush.bf16.msra.mxu3 %v1317_v57 }
 0x13c   : > { %v446_v59 = vpop.f32.mrf.mxu2 }
 0x13d   : > { %v459_v60 = vpop.f32.mrf.mxu3  ;;  %v12615_v61 = vadd.f32 %v446_v59, %v12532_v62  ;;  %v385_v4 = vpop.f32.mrf.mxu0  ;;  %v1304_v62 = vsel %vm1300_vm6, %v1287_v55, %v1289_v7  ;;  %v2177_v7 = vld.sshfl [vmem:[#allocation1 + $0x8] sm:$0xff pattern:$0x73625140] }
 0x13e   : > { %v12618_v3 = vadd.f32 %v459_v60, %v12534_v63  ;;  %v398_v5 = vpop.f32.mrf.mxu1  ;;  %v1323_v19 = vsel %vm239_vm1, %v1304_v62, 0  ;;  %v1960_v60 = vld.sshfl [vmem:[#allocation1 + $0x38] sm:$0xff pattern:$0x73625140]  ;;  %2198 = vrot.lane.b32.xlu0 %v2177_v7, %s12193_s11 }
 0x13f   : > { %v2179_v4 = vld.sshfl [vmem:[#allocation1 + $0x10] sm:$0xff pattern:$0x73625140]  ;;  %v1512_v5 = vpop.permute.xlu0 %1511  ;;  %1981 = vrot.lane.b32.xlu2 %v1960_v60, %s12192_s8 }
 0x140   : > { %v1531_v10 = vsel %vm1529_vm7, %v1512_v5, %v1514_v6 }
 0x141   : > { %v1546_v18 = vsel %vm239_vm1, %v1531_v10, 0 }
 0x144   : > { %v448_v23 = vpop.f32.mrf.mxu2 }
 0x145   : > { %v461_v24 = vpop.f32.mrf.mxu3  ;;  %v472_v63 = vpop.f32.mrf.mxu0 }
 0x146   : > { %v485_v25 = vpop.f32.mrf.mxu1  ;;  %v12628_v27 = vadd.f32 %v472_v63, %v12551_v11  ;;  %v1958_v11 = vld.sshfl [vmem:[#allocation1 + $0x30] sm:$0xff pattern:$0x73625140] }
 0x147   : > { %v12631_v28 = vadd.f32 %v485_v25, %v12553_v12  ;;  %1979 = vrot.lane.b32.xlu1 %v1958_v11, %s12192_s8  ;;  %2174 = vst [vmem:[#allocation1 + $0x20] ss:$4 sm:$0xff] %v12270_v1  ;;  %v1518_v25 = vpop.permute.xlu0 %1517  ;;  %2196 = vrot.lane.b32.xlu2 %v2175_v38, %s12193_s11 }
 0x148   : > { %11624 = vmatmul.msk.bf16.vlgmr.msrb.gmra.mxu0 %vm235_vm2, %v12596_v48  ;;  %11625 = vmatmul.msk.bf16.vlgmr.msrb.gmra.mxu1 %vm235_vm2, %v12596_v48 }
 0x149   : > { %11626 = vmatmul.msk.bf16.vlgmr.msrb.gmra.mxu2 %vm235_vm2, %v12596_v48  ;;  %1376 = vmatpush.bf16.msrb.mxu0 %v1320_v29 }
 0x14a   : > { %11627 = vmatmul.msk.bf16.vlgmr.msrb.gmra.mxu3 %vm235_vm2, %v12596_v48  ;;  %1389 = vmatpush.bf16.msrb.mxu1 %v1323_v19 }
 0x14b   : > { %1402 = vmatpush.bf16.msrb.mxu2 %v1326_v20  ;;  %1415 = vmatpush.bf16.msrb.mxu3 %v1329_v14 }
 0x14c   : > { %v498_v12 = vpop.f32.mrf.mxu2 }
 0x14d   : > { %v511_v32 = vpop.f32.mrf.mxu3  ;;  %v12649_v33 = vadd.f32 %v498_v12, %v12560_v30  ;;  %v474_v35 = vpop.f32.mrf.mxu0  ;;  %v1308_v30 = vsel %vm1300_vm6, %v1295_v15, %v1297_v39  ;;  %v2181_v12 = vld.sshfl [vmem:[#allocation1 + $0x18] sm:$0xff pattern:$0x73625140]  ;;  %vm4535_vm6 = vcmask 384000  }
 0x14e   : > { %v12652_v34 = vadd.f32 %v511_v32, %v12562_v13  ;;  %v487_v36 = vpop.f32.mrf.mxu1  ;;  %v1335_v52 = vsel %vm239_vm1, %v1308_v30, 0  ;;  %v2185_v20 = vld.sshfl [vmem:[#allocation1 + $0x28] sm:$0xff pattern:$0x73625140]  ;;  %2191 = vst [vmem:[#allocation1] ss:$4 sm:$0xff] %v12274_v2 }
 0x14f   : > { %1985 = vrot.lane.b32.xlu1 %v1965_v21, %s12192_s8  ;;  %v2183_v14 = vld.sshfl [vmem:[#allocation1 + $0x20] sm:$0xff pattern:$0x73625140]  ;;  %v1524_v39 = vpop.permute.xlu0 %1523  ;;  %2202 = vrot.lane.b32.xlu2 %v2181_v12, %s12193_s11  ;;  %s12217_s8 = smov 99  }
 0x150   : > { %2204 = vrot.lane.b32.xlu0 %v2183_v14, %s12193_s11 }
 0x154   : > { %v500_v40 = vpop.f32.mrf.mxu2 }
 0x155   : > { %v513_v41 = vpop.f32.mrf.mxu3  ;;  %v524_v13 = vpop.f32.mrf.mxu0  ;;  %v12750_v54 = vld.sshfl [vmem:[#allocation1 + $0x8] sm:$0xff pattern:$0x73625140] }
 0x156   : > { %v537_v43 = vpop.f32.mrf.mxu1  ;;  %v12661_v45 = vadd.f32 %v524_v13, %v12579_v16  ;;  %v1338_v16 = vsel %vm239_vm1, %v1309_v44, 0 }
 0x157   : > { %v12664_v49 = vadd.f32 %v537_v43, %v12581_v37  ;;  %v1341_v37 = vsel %vm239_vm1, %v1299_v22, 0  ;;  %2200 = vrot.lane.b32.xlu1 %v2179_v4, %s12193_s11  ;;  %v2189_v22 = vld.sshfl [vmem:[#allocation1 + $0x38] sm:$0xff pattern:$0x73625140] }
 0x158   : > { %11628 = vmatmul.msk.bf16.vlgmr.msra.gmra.mxu0 %vm235_vm2, %v12596_v48  ;;  %11629 = vmatmul.msk.bf16.vlgmr.msra.gmra.mxu1 %vm235_vm2, %v12596_v48 }
 0x159   : > { %11631 = vmatmul.msk.bf16.vlgmr.msra.gmra.mxu2 %vm235_vm2, %v12669_v50  ;;  %1428 = vmatpush.bf16.msra.mxu0 %v1332_v51 }
 0x15a   : > { %11632 = vmatmul.msk.bf16.vlgmr.msra.gmra.mxu3 %vm235_vm2, %v12669_v50  ;;  %1441 = vmatpush.bf16.msra.mxu1 %v1335_v52 }
 0x15b   : > { %1454 = vmatpush.bf16.msra.mxu2 %v1338_v16  ;;  %1467 = vmatpush.bf16.msra.mxu3 %v1341_v37 }
 0x15c   : > { %v550_v55 = vpop.f32.mrf.mxu2  ;;  %2210 = vrot.lane.b32.xlu0 %v2189_v22, %s12193_s11 }
 0x15d   : > { %v563_v56 = vpop.f32.mrf.mxu3  ;;  %v12685_v48 = vadd.f32 %v550_v55, %v12589_v46  ;;  %v526_v58 = vpop.f32.mrf.mxu0 }
 0x15e   : > { %v12688_v57 = vadd.f32 %v563_v56, %v12591_v47  ;;  %v539_v59 = vpop.f32.mrf.mxu1  ;;  %v1516_v46 = vpop.permute.xlu2 %1515  ;;  %v1530_v47 = vsel %vm1529_vm7, %v1510_v53, %v1512_v5 }
 0x15f   : > { %v1532_v17 = vsel %vm1529_vm7, %v1514_v6, %v1516_v46  ;;  %v1543_v26 = vsel %vm239_vm1, %v1530_v47, 0  ;;  %v1533_v29 = vsel %vm1529_vm7, %v1516_v46, %v1518_v25  ;;  %2206 = vrot.lane.b32.xlu1 %v2185_v20, %s12193_s11  ;;  %v1739_v5 = vpop.permute.xlu0 %1738 }
 0x160   : > { %v1549_v19 = vsel %vm239_vm1, %v1532_v17, 0 }
 0x164   : > { %v552_v8 = vpop.f32.mrf.mxu2 }
 0x165   : > { %v565_v9 = vpop.f32.mrf.mxu3  ;;  %v665_v23 = vpop.f32.mrf.mxu0 }
 0x166   : > { %v678_v24 = vpop.f32.mrf.mxu1  ;;  %v12698_v62 = vadd.f32 %v665_v23, %v12615_v61  ;;  %v1552_v61 = vsel %vm239_vm1, %v1533_v29, 0  ;;  %v1522_v21 = vpop.permute.xlu2 %1521 }
 0x167   : > { %v12701_v63 = vadd.f32 %v678_v24, %v12618_v3  ;;  %v1520_v3 = vpop.permute.xlu1 %1519  ;;  %v1536_v43 = vsel %vm1529_vm7, %v1522_v21, %v1524_v39  ;;  %v1745_v29 = vpop.permute.xlu0 %1744 }
 0x168   : > { %11633 = vmatmul.msk.bf16.vlgmr.msrb.gmra.mxu0 %vm235_vm2, %v12669_v50  ;;  %11634 = vmatmul.msk.bf16.vlgmr.msrb.gmra.mxu1 %vm235_vm2, %v12669_v50  ;;  %v1534_v30 = vsel %vm1529_vm7, %v1518_v25, %v1520_v3  ;;  %v1561_v37 = vsel %vm239_vm1, %v1536_v43, 0 }
 0x169   : > { %11635 = vmatmul.msk.bf16.vlgmr.msrb.gmra.mxu2 %vm235_vm2, %v12669_v50  ;;  %1579 = vmatpush.bf16.msrb.mxu0 %v1543_v26  ;;  %v1555_v16 = vsel %vm239_vm1, %v1534_v30, 0 }
 0x16a   : > { %11636 = vmatmul.msk.bf16.vlgmr.msrb.gmra.mxu3 %vm235_vm2, %v12669_v50  ;;  %1592 = vmatpush.bf16.msrb.mxu1 %v1546_v18 }
 0x16b   : > { %1605 = vmatpush.bf16.msrb.mxu2 %v1549_v19  ;;  %1618 = vmatpush.bf16.msrb.mxu3 %v1552_v61 }
 0x16c   : > { %v691_v31 = vpop.f32.mrf.mxu2 }
 0x16d   : > { %v704_v11 = vpop.f32.mrf.mxu3  ;;  %v12719_v32 = vadd.f32 %v691_v31, %v12628_v27  ;;  %v667_v36 = vpop.f32.mrf.mxu0  ;;  %v1535_v27 = vsel %vm1529_vm7, %v1520_v3, %v1522_v21 }
 0x16e   : > { %v12722_v35 = vadd.f32 %v704_v11, %v12631_v28  ;;  %v680_v15 = vpop.f32.mrf.mxu1  ;;  %v1558_v53 = vsel %vm239_vm1, %v1535_v27, 0  ;;  %v1528_v55 = vpop.permute.xlu2 %1527 }
 0x16f   : > { %v1526_v40 = vpop.permute.xlu1 %1525  ;;  %v1570_v26 = vsel %vm239_vm1, %v1528_v55, 0  ;;  %v1751_v22 = vpop.permute.xlu0 %1750 }
 0x170   : > { %v1537_v44 = vsel %vm1529_vm7, %v1524_v39, %v1526_v40  ;;  %v1538_v9 = vsel %vm1529_vm7, %v1526_v40, %v1528_v55  ;;  %vm4769_vm7 = vcmask 375808  }
 0x171   : > { %v1567_v25 = vsel %vm239_vm1, %v1538_v9, 0 }
 0x174   : > { %v693_v41 = vpop.f32.mrf.mxu2 }
 0x175   : > { %v706_v42 = vpop.f32.mrf.mxu3  ;;  %v717_v28 = vpop.f32.mrf.mxu0 }
 0x176   : > { %v730_v13 = vpop.f32.mrf.mxu1  ;;  %v12732_v51 = vadd.f32 %v717_v28, %v12649_v33  ;;  %v1564_v33 = vsel %vm239_vm1, %v1537_v44, 0  ;;  %v1743_v17 = vpop.permute.xlu2 %1742 }
 0x177   : > { %v12735_v52 = vadd.f32 %v730_v13, %v12652_v34  ;;  %v2192_v34 = vld.sshfl [vmem:[#allocation1] sm:$0xff pattern:$0x73625140]  ;;  %v1741_v7 = vpop.permute.xlu1 %1740  ;;  %v1761_v41 = vsel %vm1758_vm8, %v1743_v17, %v1745_v29 }
 0x178   : > { %11637 = vmatmul.msk.bf16.vlgmr.msra.gmra.mxu0 %vm235_vm2, %v12669_v50  ;;  %11638 = vmatmul.msk.bf16.vlgmr.msra.gmra.mxu1 %vm235_vm2, %v12669_v50  ;;  %2401 = vst [vmem:[#allocation1] ss:$4 sm:$0xff] %v12268_v0  ;;  %v1760_v18 = vsel %vm1758_vm8, %v1741_v7, %v1743_v17  ;;  %v1778_v43 = vsel %vm239_vm1, %v1761_v41, 0  ;;  %v12844_v17 = vld [vmem:[%s16558_s1 + $0x1c] sm:$0xf] }
 0x179   : > { %11639 = vmatmul.msk.bf16.vlgmr.msra.gmra.mxu2 %vm235_vm2, %v12669_v50  ;;  %1631 = vmatpush.bf16.msra.mxu0 %v1555_v16  ;;  %v1775_v19 = vsel %vm239_vm1, %v1760_v18, 0 }
 0x17a   : > { %11640 = vmatmul.msk.bf16.vlgmr.msra.gmra.mxu3 %vm235_vm2, %v12669_v50  ;;  %1644 = vmatpush.bf16.msra.mxu1 %v1558_v53 }
 0x17b   : > { %1657 = vmatpush.bf16.msra.mxu2 %v1561_v37  ;;  %1670 = vmatpush.bf16.msra.mxu3 %v1564_v33 }
 0x17c   : > { %v743_v56 = vpop.f32.mrf.mxu2  ;;  %2212 = vrot.lane.b32.xlu1 %v2192_v34, %s12193_s11 }
 0x17d   : > { %v756_v58 = vpop.f32.mrf.mxu3  ;;  %v12755_v59 = vadd.f32 %v743_v56, %v12661_v45  ;;  %v719_v50 = vpop.f32.mrf.mxu0  ;;  %v12765_v45 = vld [vmem:[%s16558_s1 + $0x18] sm:$0xf] }
 0x17e   : > { %v12758_v60 = vadd.f32 %v756_v58, %v12664_v49  ;;  %v732_v4 = vpop.f32.mrf.mxu1  ;;  %v1759_v49 = vsel %vm1758_vm8, %v1739_v5, %v1741_v7  ;;  %v1749_v21 = vpop.permute.xlu2 %1748 }
 0x17f   : > { %v2404_v6 = vld.sshfl [vmem:[#allocation1] sm:$0xff pattern:$0x73625140]  ;;  %v2406_v61 = vld.sshfl [vmem:[#allocation1 + $0x8] sm:$0xff pattern:$0x73625140]  ;;  %v1747_v15 = vpop.permute.xlu1 %1746  ;;  %v1764_v27 = vsel %vm1758_vm8, %v1749_v21, %v1751_v22  ;;  %v1757_v5 = vpop.permute.xlu0 %1756 }
 0x180   : > { %2425 = vrot.lane.b32.xlu0 %v2404_v6, %s12194_s14  ;;  %v2410_v3 = vld.sshfl [vmem:[#allocation1 + $0x18] sm:$0xff pattern:$0x73625140]  ;;  %v1762_v42 = vsel %vm1758_vm8, %v1745_v29, %v1747_v15  ;;  %v1763_v30 = vsel %vm1758_vm8, %v1747_v15, %v1749_v21  ;;  %v1787_v53 = vsel %vm239_vm1, %v1764_v27, 0 }
 0x181   : > { %v1781_v44 = vsel %vm239_vm1, %v1762_v42, 0  ;;  %v1784_v16 = vsel %vm239_vm1, %v1763_v30, 0  ;;  %v2408_v58 = vld.sshfl [vmem:[#allocation1 + $0x10] sm:$0xff pattern:$0x73625140] }
 0x182   : > { %2420 = vst [vmem:[#allocation1] ss:$4 sm:$0xff] %v12274_v2 }
 0x184   : > { %v745_v46 = vpop.f32.mrf.mxu2  ;;  %2427 = vrot.lane.b32.xlu1 %v2406_v61, %s12194_s14 }
 0x185   : > { %v758_v8 = vpop.f32.mrf.mxu3  ;;  %v769_v47 = vpop.f32.mrf.mxu0 }
 0x186   : > { %v782_v10 = vpop.f32.mrf.mxu1  ;;  %v12769_v23 = vadd.f32 %v769_v47, %v12685_v48  ;;  %v1772_v48 = vsel %vm239_vm1, %v1759_v49, 0  ;;  %v1755_v4 = vpop.permute.xlu2 %1754 }
 0x187   : > { %v12772_v24 = vadd.f32 %v782_v10, %v12688_v57  ;;  %v2187_v57 = vld.sshfl [vmem:[#allocation1 + $0x30] sm:$0xff pattern:$0x73625140]  ;;  %v1753_v50 = vpop.permute.xlu1 %1752  ;;  %v1972_v15 = vpop.permute.xlu0 %1971 }
 0x188   : > { %11642 = vmatmul.msk.bf16.vlgmr.msrb.gmra.mxu0 %vm235_vm2, %v12765_v45  ;;  %11643 = vmatmul.msk.bf16.vlgmr.msrb.gmra.mxu1 %vm235_vm2, %v12765_v45  ;;  %2403 = vst [vmem:[#allocation1 + $0x20] ss:$4 sm:$0xff] %v12270_v1  ;;  %v1765_v46 = vsel %vm1758_vm8, %v1751_v22, %v1753_v50 }
 0x189   : > { %11644 = vmatmul.msk.bf16.vlgmr.msrb.gmra.mxu2 %vm235_vm2, %v12765_v45  ;;  %1683 = vmatpush.bf16.msrb.mxu0 %v1567_v25  ;;  %v2423_v47 = vld.sshfl [vmem:[#allocation1 + $0x8] sm:$0xff pattern:$0x73625140]  ;;  %v2421_v25 = vld.sshfl [vmem:[#allocation1] sm:$0xff pattern:$0x73625140] }
 0x18a   : > { %11645 = vmatmul.msk.bf16.vlgmr.msrb.gmra.mxu3 %vm235_vm2, %v12765_v45  ;;  %1696 = vmatpush.bf16.msrb.mxu1 %v1570_v26  ;;  %v1790_v26 = vsel %vm239_vm1, %v1765_v46, 0  ;;  %2630 = vst [vmem:[#allocation1] ss:$4 sm:$0xff] %v12268_v0 }
 0x18b   : > { %1808 = vmatpush.bf16.msrb.mxu2 %v1772_v48  ;;  %1821 = vmatpush.bf16.msrb.mxu3 %v1775_v19 }
 0x18c   : > { %v894_v20 = vpop.f32.mrf.mxu2  ;;  %2208 = vrot.lane.b32.xlu2 %v2187_v57, %s12193_s11  ;;  %2431 = vrot.lane.b32.xlu0 %v2410_v3, %s12194_s14 }
 0x18d   : > { %v907_v14 = vpop.f32.mrf.mxu3  ;;  %v12791_v31 = vadd.f32 %v894_v20, %v12698_v62  ;;  %v771_v12 = vpop.f32.mrf.mxu0 }
 0x18e   : > { %v12794_v11 = vadd.f32 %v907_v14, %v12701_v63  ;;  %v784_v36 = vpop.f32.mrf.mxu1  ;;  %v1970_v48 = vpop.permute.xlu2 %1969 }
 0x18f   : > { %v2412_v38 = vld.sshfl [vmem:[#allocation1 + $0x20] sm:$0xff pattern:$0x73625140]  ;;  %v2414_v29 = vld.sshfl [vmem:[#allocation1 + $0x28] sm:$0xff pattern:$0x73625140]  ;;  %v1968_v14 = vpop.permute.xlu1 %1967  ;;  %v1989_v22 = vsel %vm1987_vm9, %v1970_v48, %v1972_v15 }
 0x190   : > { %2433 = vrot.lane.b32.xlu1 %v2412_v38, %s12194_s14 }
 0x191   : > { %v2633_v12 = vld.sshfl [vmem:[#allocation1] sm:$0xff pattern:$0x73625140]  ;;  %v2637_v36 = vld.sshfl [vmem:[#allocation1 + $0x10] sm:$0xff pattern:$0x73625140] }
 0x194   : > { %v896_v39 = vpop.f32.mrf.mxu2  ;;  %2214 = vrot.lane.b32.xlu2 %v12750_v54, %s12193_s11  ;;  %s12218_s11 = smov 98  }
 0x195   : > { %v909_v40 = vpop.f32.mrf.mxu3  ;;  %v920_v62 = vpop.f32.mrf.mxu0 }
 0x196   : > { %v933_v63 = vpop.f32.mrf.mxu1  ;;  %v12805_v28 = vadd.f32 %v920_v62, %v12719_v32  ;;  %v2418_v32 = vld.sshfl [vmem:[#allocation1 + $0x38] sm:$0xff pattern:$0x73625140] }
 0x197   : > { %v12808_v13 = vadd.f32 %v933_v63, %v12722_v35  ;;  %v2416_v35 = vld.sshfl [vmem:[#allocation1 + $0x30] sm:$0xff pattern:$0x73625140]  ;;  %v1974_v62 = vpop.permute.xlu1 %1973  ;;  %v1976_v63 = vpop.permute.xlu2 %1975 }
 0x198   : > { %11646 = vmatmul.msk.bf16.vlgmr.msra.gmra.mxu0 %vm235_vm2, %v12765_v45  ;;  %11647 = vmatmul.msk.bf16.vlgmr.msra.gmra.mxu1 %vm235_vm2, %v12765_v45  ;;  %2632 = vst [vmem:[#allocation1 + $0x20] ss:$4 sm:$0xff] %v12270_v1  ;;  %v1990_v30 = vsel %vm1987_vm9, %v1972_v15, %v1974_v62 }
 0x199   : > { %11648 = vmatmul.msk.bf16.vlgmr.msra.gmra.mxu2 %vm235_vm2, %v12765_v45  ;;  %1834 = vmatpush.bf16.msra.mxu0 %v1778_v43  ;;  %v2004_v43 = vsel %vm239_vm1, %v1989_v22, 0  ;;  %v12940_v22 = vld [vmem:[%s16558_s1 + $0x20] sm:$0xf] }
 0x19a   : > { %11649 = vmatmul.msk.bf16.vlgmr.msra.gmra.mxu3 %vm235_vm2, %v12765_v45  ;;  %1847 = vmatpush.bf16.msra.mxu1 %v1781_v44  ;;  %v1991_v44 = vsel %vm1987_vm9, %v1974_v62, %v1976_v63 }
 0x19b   : > { %1860 = vmatpush.bf16.msra.mxu2 %v1784_v16  ;;  %1873 = vmatpush.bf16.msra.mxu3 %v1787_v53  ;;  %v1978_v16 = vpop.permute.xlu0 %1977 }
 0x19c   : > { %v946_v37 = vpop.f32.mrf.mxu2  ;;  %2439 = vrot.lane.b32.xlu1 %v2418_v32, %s12194_s14  ;;  %2437 = vrot.lane.b32.xlu0 %v2416_v35, %s12194_s14  ;;  %v1992_v46 = vsel %vm1987_vm9, %v1976_v63, %v1978_v16 }
 0x19d   : > { %v959_v33 = vpop.f32.mrf.mxu3  ;;  %v12825_v34 = vadd.f32 %v946_v37, %v12732_v51  ;;  %v922_v55 = vpop.f32.mrf.mxu0  ;;  %2429 = vrot.lane.b32.xlu2 %v2408_v58, %s12194_s14  ;;  %v1766_v51 = vsel %vm1758_vm8, %v1753_v50, %v1755_v4 }
 0x19e   : > { %v12828_v54 = vadd.f32 %v959_v33, %v12735_v52  ;;  %v935_v56 = vpop.f32.mrf.mxu1  ;;  %v1767_v52 = vsel %vm1758_vm8, %v1755_v4, %v1757_v5  ;;  %v1793_v18 = vsel %vm239_vm1, %v1766_v51, 0  ;;  %vm5003_vm8 = vcmask 113664  }
 0x19f   : > { %v2643_v53 = vld.sshfl [vmem:[#allocation1 + $0x28] sm:$0xff pattern:$0x73625140]  ;;  %v2645_v58 = vld.sshfl [vmem:[#allocation1 + $0x30] sm:$0xff pattern:$0x73625140]  ;;  %v1982_v4 = vpop.permute.xlu2 %1981 }
 0x1a4   : > { %v948_v6 = vpop.f32.mrf.mxu2  ;;  %2443 = vrot.lane.b32.xlu0 %v2423_v47, %s12194_s14  ;;  %2654 = vrot.lane.b32.xlu1 %v2633_v12, %s12195_s19  ;;  %v2641_v12 = vld.sshfl [vmem:[#allocation1 + $0x20] sm:$0xff pattern:$0x73625140] }
 0x1a5   : > { %v961_v7 = vpop.f32.mrf.mxu3  ;;  %v972_v8 = vpop.f32.mrf.mxu0  ;;  %2435 = vrot.lane.b32.xlu2 %v2414_v29, %s12194_s14 }
 0x1a6   : > { %v985_v9 = vpop.f32.mrf.mxu1  ;;  %v12836_v10 = vadd.f32 %v972_v8, %v12755_v59  ;;  %v1796_v59 = vsel %vm239_vm1, %v1767_v52, 0 }
 0x1a7   : > { %v12839_v49 = vadd.f32 %v985_v9, %v12758_v60  ;;  %v1799_v60 = vsel %vm239_vm1, %v1757_v5, 0  ;;  %v1984_v5 = vpop.permute.xlu0 %1983 }
 0x1a8   : > { %11650 = vmatmul.msk.bf16.vlgmr.msrb.gmra.mxu0 %vm235_vm2, %v12765_v45  ;;  %11651 = vmatmul.msk.bf16.vlgmr.msrb.gmra.mxu1 %vm235_vm2, %v12765_v45 }
 0x1a9   : > { %11653 = vmatmul.msk.bf16.vlgmr.msrb.gmra.mxu2 %vm235_vm2, %v12844_v17  ;;  %1886 = vmatpush.bf16.msrb.mxu0 %v1790_v26 }
 0x1aa   : > { %11654 = vmatmul.msk.bf16.vlgmr.msrb.gmra.mxu3 %vm235_vm2, %v12844_v17  ;;  %1899 = vmatpush.bf16.msrb.mxu1 %v1793_v18 }
 0x1ab   : > { %1912 = vmatpush.bf16.msrb.mxu2 %v1796_v59  ;;  %1925 = vmatpush.bf16.msrb.mxu3 %v1799_v60 }
 0x1ac   : > { %v998_v19 = vpop.f32.mrf.mxu2  ;;  %2658 = vrot.lane.b32.xlu0 %v2637_v36, %s12195_s19 }
 0x1ad   : > { %v1011_v45 = vpop.f32.mrf.mxu3  ;;  %v12863_v57 = vadd.f32 %v998_v19, %v12769_v23  ;;  %v974_v3 = vpop.f32.mrf.mxu0  ;;  %v1988_v23 = vsel %vm1987_vm9, %v1968_v14, %v1970_v48  ;;  %2441 = vrot.lane.b32.xlu2 %v2421_v25, %s12194_s14  ;;  %v2013_v25 = vsel %vm239_vm1, %v1992_v46, 0  ;;  %s12210_s14 = smov 9  }
 0x1ae   : > { %v12866_v61 = vadd.f32 %v1011_v45, %v12772_v24  ;;  %v987_v20 = vpop.f32.mrf.mxu1  ;;  %v2639_v24 = vld.sshfl [vmem:[#allocation1 + $0x18] sm:$0xff pattern:$0x73625140]  ;;  %v2001_v27 = vsel %vm239_vm1, %v1988_v23, 0  ;;  %v2197_v14 = vpop.permute.xlu2 %2196 }
 0x1af   : > { %2660 = vrot.lane.b32.xlu1 %v2639_v24, %s12195_s19 }
 0x1b0   : > { %v2199_v15 = vpop.permute.xlu0 %2198 }
 0x1b1   : > { %v2217_v24 = vsel %vm2216_vm10, %v2197_v14, %v2199_v15 }
 0x1b4   : > { %v1000_v38 = vpop.f32.mrf.mxu2  ;;  %2664 = vrot.lane.b32.xlu0 %v2643_v53, %s12195_s19 }
 0x1b5   : > { %v1013_v21 = vpop.f32.mrf.mxu3  ;;  %v1123_v39 = vpop.f32.mrf.mxu0 }
 0x1b6   : > { %v1136_v40 = vpop.f32.mrf.mxu1  ;;  %v12874_v41 = vadd.f32 %v1123_v39, %v12791_v31  ;;  %v2007_v31 = vsel %vm239_vm1, %v1990_v30, 0 }
 0x1b7   : > { %v12877_v42 = vadd.f32 %v1136_v40, %v12794_v11  ;;  %v2010_v11 = vsel %vm239_vm1, %v1991_v44, 0  ;;  %2666 = vrot.lane.b32.xlu1 %v2645_v58, %s12195_s19 }
 0x1b8   : > { %11655 = vmatmul.msk.bf16.vlgmr.msra.gmra.mxu0 %vm235_vm2, %v12844_v17  ;;  %11656 = vmatmul.msk.bf16.vlgmr.msra.gmra.mxu1 %vm235_vm2, %v12844_v17 }
 0x1b9   : > { %11657 = vmatmul.msk.bf16.vlgmr.msra.gmra.mxu2 %vm235_vm2, %v12844_v17  ;;  %2037 = vmatpush.bf16.msra.mxu0 %v2001_v27  ;;  %v1980_v50 = vpop.permute.xlu1 %1979  ;;  %v2230_v27 = vsel %vm239_vm1, %v2217_v24, 0 }
 0x1ba   : > { %11658 = vmatmul.msk.bf16.vlgmr.msra.gmra.mxu3 %vm235_vm2, %v12844_v17  ;;  %2050 = vmatpush.bf16.msra.mxu1 %v2004_v43  ;;  %v1993_v51 = vsel %vm1987_vm9, %v1978_v16, %v1980_v50  ;;  %v1994_v9 = vsel %vm1987_vm9, %v1980_v50, %v1982_v4 }
 0x1bb   : > { %2063 = vmatpush.bf16.msra.mxu2 %v2007_v31  ;;  %2076 = vmatpush.bf16.msra.mxu3 %v2010_v11  ;;  %v2016_v26 = vsel %vm239_vm1, %v1993_v51, 0  ;;  %v2019_v18 = vsel %vm239_vm1, %v1994_v9, 0  ;;  %v2203_v31 = vpop.permute.xlu2 %2202 }
 0x1bc   : > { %v1149_v32 = vpop.f32.mrf.mxu2 }
 0x1bd   : > { %v1162_v35 = vpop.f32.mrf.mxu3  ;;  %v12896_v37 = vadd.f32 %v1149_v32, %v12805_v28  ;;  %v1125_v55 = vpop.f32.mrf.mxu0 }
 0x1be   : > { %v12899_v33 = vadd.f32 %v1162_v35, %v12808_v13  ;;  %v1138_v56 = vpop.f32.mrf.mxu1  ;;  %v1995_v13 = vsel %vm1987_vm9, %v1982_v4, %v1984_v5 }
 0x1bf   : > { %v2022_v60 = vsel %vm239_vm1, %v1995_v13, 0 }
 0x1c1   : > { %v1986_v59 = vpop.permute.xlu1 %1985 }
 0x1c2   : > { %v2028_v30 = vsel %vm239_vm1, %v1986_v59, 0  ;;  %v2205_v56 = vpop.permute.xlu0 %2204 }
 0x1c3   : > { %v2220_v46 = vsel %vm2216_vm10, %v2203_v31, %v2205_v56 }
 0x1c4   : > { %v1151_v6 = vpop.f32.mrf.mxu2 }
 0x1c5   : > { %v1164_v7 = vpop.f32.mrf.mxu3  ;;  %v1175_v8 = vpop.f32.mrf.mxu0 }
 0x1c6   : > { %v1188_v28 = vpop.f32.mrf.mxu1  ;;  %v12907_v52 = vadd.f32 %v1175_v8, %v12825_v34  ;;  %v2635_v34 = vld.sshfl [vmem:[#allocation1 + $0x8] sm:$0xff pattern:$0x73625140] }
 0x1c7   : > { %v12910_v47 = vadd.f32 %v1188_v28, %v12828_v54  ;;  %2649 = vst [vmem:[#allocation1] ss:$4 sm:$0xff] %v12274_v2  ;;  %2656 = vrot.lane.b32.xlu2 %v2635_v34, %s12195_s19 }
 0x1c8   : > { %11659 = vmatmul.msk.bf16.vlgmr.msrb.gmra.mxu0 %vm235_vm2, %v12844_v17  ;;  %11660 = vmatmul.msk.bf16.vlgmr.msrb.gmra.mxu1 %vm235_vm2, %v12844_v17 }
 0x1c9   : > { %11661 = vmatmul.msk.bf16.vlgmr.msrb.gmra.mxu2 %vm235_vm2, %v12844_v17  ;;  %2089 = vmatpush.bf16.msrb.mxu0 %v2013_v25  ;;  %v2201_v36 = vpop.permute.xlu1 %2200  ;;  %v2239_v25 = vsel %vm239_vm1, %v2220_v46, 0 }
 0x1ca   : > { %11662 = vmatmul.msk.bf16.vlgmr.msrb.gmra.mxu3 %vm235_vm2, %v12844_v17  ;;  %2102 = vmatpush.bf16.msrb.mxu1 %v2016_v26  ;;  %v2218_v39 = vsel %vm2216_vm10, %v2199_v15, %v2201_v36  ;;  %v2219_v7 = vsel %vm2216_vm10, %v2201_v36, %v2203_v31 }
 0x1cb   : > { %2115 = vmatpush.bf16.msrb.mxu2 %v2019_v18  ;;  %2128 = vmatpush.bf16.msrb.mxu3 %v2022_v60  ;;  %v2233_v43 = vsel %vm239_vm1, %v2218_v39, 0  ;;  %v2236_v13 = vsel %vm239_vm1, %v2219_v7, 0 }
 0x1cc   : > { %v1201_v54 = vpop.f32.mrf.mxu2 }
 0x1cd   : > { %v1214_v29 = vpop.f32.mrf.mxu3  ;;  %v12927_v48 = vadd.f32 %v1201_v54, %v12836_v10  ;;  %v1177_v45 = vpop.f32.mrf.mxu0 }
 0x1ce   : > { %v12930_v19 = vadd.f32 %v1214_v29, %v12839_v49  ;;  %v1190_v3 = vpop.f32.mrf.mxu1  ;;  %v2652_v20 = vld.sshfl [vmem:[#allocation1 + $0x8] sm:$0xff pattern:$0x73625140]  ;;  %v2650_v17 = vld.sshfl [vmem:[#allocation1] sm:$0xff pattern:$0x73625140]  ;;  %v1996_v49 = vsel %vm1987_vm9, %v1984_v5, %v1986_v59 }
 0x1cf   : > { %2672 = vrot.lane.b32.xlu1 %v2652_v20, %s12195_s19  ;;  %2670 = vrot.lane.b32.xlu0 %v2650_v17, %s12195_s19  ;;  %2859 = vst [vmem:[#allocation1] ss:$4 sm:$0xff] %v12268_v0  ;;  %v2025_v63 = vsel %vm239_vm1, %v1996_v49, 0  ;;  %v2211_v17 = vpop.permute.xlu0 %2210  ;;  %vm5237_vm9 = vcmask 105472  }
 0x1d0   : > { %2662 = vrot.lane.b32.xlu2 %v2641_v12, %s12195_s19 }
 0x1d1   : > { %v2207_v4 = vpop.permute.xlu1 %2206 }
 0x1d2   : > { %v2221_v51 = vsel %vm2216_vm10, %v2205_v56, %v2207_v4 }
 0x1d3   : > { %v2242_v18 = vsel %vm239_vm1, %v2221_v51, 0 }
 0x1d4   : > { %v1203_v10 = vpop.f32.mrf.mxu2 }
 0x1d5   : > { %v1216_v38 = vpop.f32.mrf.mxu3  ;;  %v1227_v21 = vpop.f32.mrf.mxu0 }
 0x1d6   : > { %v1240_v23 = vpop.f32.mrf.mxu1  ;;  %v12945_v40 = vadd.f32 %v1227_v21, %v12863_v57  ;;  %v2864_v44 = vld.sshfl [vmem:[#allocation1 + $0x8] sm:$0xff pattern:$0x73625140]  ;;  %v2866_v57 = vld.sshfl [vmem:[#allocation1 + $0x10] sm:$0xff pattern:$0x73625140] }
 0x1d7   : > { %v12948_v62 = vadd.f32 %v1240_v23, %v12866_v61  ;;  %v2647_v61 = vld.sshfl [vmem:[#allocation1 + $0x38] sm:$0xff pattern:$0x73625140]  ;;  %2887 = vrot.lane.b32.xlu1 %v2866_v57, %s12196_s22  ;;  %2885 = vrot.lane.b32.xlu0 %v2864_v44, %s12196_s22  ;;  %v2862_v59 = vld.sshfl [vmem:[#allocation1] sm:$0xff pattern:$0x73625140] }
 0x1d8   : > { %11664 = vmatmul.msk.bf16.vlgmr.msra.gmra.mxu0 %vm235_vm2, %v12940_v22  ;;  %11665 = vmatmul.msk.bf16.vlgmr.msra.gmra.mxu1 %vm235_vm2, %v12940_v22  ;;  %2861 = vst [vmem:[#allocation1 + $0x20] ss:$4 sm:$0xff] %v12270_v1  ;;  %v2868_v60 = vld.sshfl [vmem:[#allocation1 + $0x18] sm:$0xff pattern:$0x73625140] }
 0x1d9   : > { %11666 = vmatmul.msk.bf16.vlgmr.msra.gmra.mxu2 %vm235_vm2, %v12940_v22  ;;  %2141 = vmatpush.bf16.msra.mxu0 %v2025_v63  ;;  %2878 = vst [vmem:[#allocation1] ss:$4 sm:$0xff] %v12274_v2  ;;  %v13020_v63 = vld [vmem:[%s16558_s1 + $0x24] sm:$0xf] }
 0x1da   : > { %11667 = vmatmul.msk.bf16.vlgmr.msra.gmra.mxu3 %vm235_vm2, %v12940_v22  ;;  %2154 = vmatpush.bf16.msra.mxu1 %v2028_v30 }
 0x1db   : > { %2266 = vmatpush.bf16.msra.mxu2 %v2230_v27  ;;  %2279 = vmatpush.bf16.msra.mxu3 %v2233_v43 }
 0x1dc   : > { %v1352_v11 = vpop.f32.mrf.mxu2  ;;  %2668 = vrot.lane.b32.xlu2 %v2647_v61, %s12195_s19 }
 0x1dd   : > { %v1365_v16 = vpop.f32.mrf.mxu3  ;;  %v12966_v53 = vadd.f32 %v1352_v11, %v12874_v41  ;;  %v1229_v35 = vpop.f32.mrf.mxu0 }
 0x1de   : > { %v12969_v32 = vadd.f32 %v1365_v16, %v12877_v42  ;;  %v1242_v55 = vpop.f32.mrf.mxu1 }
 0x1df   : > { %v2870_v58 = vld.sshfl [vmem:[#allocation1 + $0x20] sm:$0xff pattern:$0x73625140]  ;;  %v2872_v50 = vld.sshfl [vmem:[#allocation1 + $0x28] sm:$0xff pattern:$0x73625140] }
 0x1e0   : > { %2891 = vrot.lane.b32.xlu0 %v2870_v58, %s12196_s22  ;;  %2893 = vrot.lane.b32.xlu1 %v2872_v50, %s12196_s22  ;;  %v2879_v12 = vld.sshfl [vmem:[#allocation1] sm:$0xff pattern:$0x73625140]  ;;  %v2881_v36 = vld.sshfl [vmem:[#allocation1 + $0x8] sm:$0xff pattern:$0x73625140] }
 0x1e1   : > { %3088 = vst [vmem:[#allocation1] ss:$4 sm:$0xff] %v12268_v0  ;;  %v2874_v35 = vld.sshfl [vmem:[#allocation1 + $0x30] sm:$0xff pattern:$0x73625140] }
 0x1e4   : > { %v1354_v5 = vpop.f32.mrf.mxu2  ;;  %2883 = vrot.lane.b32.xlu2 %v2862_v59, %s12196_s22 }
 0x1e5   : > { %v1367_v6 = vpop.f32.mrf.mxu3  ;;  %v1378_v41 = vpop.f32.mrf.mxu0 }
 0x1e6   : > { %v1391_v42 = vpop.f32.mrf.mxu1  ;;  %v12978_v8 = vadd.f32 %v1378_v41, %v12896_v37  ;;  %v2209_v9 = vpop.permute.xlu2 %2208 }
 0x1e7   : > { %v12981_v28 = vadd.f32 %v1391_v42, %v12899_v33  ;;  %v2222_v26 = vsel %vm2216_vm10, %v2207_v4, %v2209_v9  ;;  %v2876_v33 = vld.sshfl [vmem:[#allocation1 + $0x38] sm:$0xff pattern:$0x73625140]  ;;  %v2223_v49 = vsel %vm2216_vm10, %v2209_v9, %v2211_v17 }
 0x1e8   : > { %11668 = vmatmul.msk.bf16.vlgmr.msrb.gmra.mxu0 %vm235_vm2, %v12940_v22  ;;  %11669 = vmatmul.msk.bf16.vlgmr.msrb.gmra.mxu1 %vm235_vm2, %v12940_v22  ;;  %v2245_v37 = vsel %vm239_vm1, %v2222_v26, 0  ;;  %v2248_v30 = vsel %vm239_vm1, %v2223_v49, 0  ;;  %v3091_v44 = vld.sshfl [vmem:[#allocation1] sm:$0xff pattern:$0x73625140] }
 0x1e9   : > { %11670 = vmatmul.msk.bf16.vlgmr.msrb.gmra.mxu2 %vm235_vm2, %v12940_v22  ;;  %2292 = vmatpush.bf16.msrb.mxu0 %v2236_v13  ;;  %v3093_v55 = vld.sshfl [vmem:[#allocation1 + $0x8] sm:$0xff pattern:$0x73625140]  ;;  %3090 = vst [vmem:[#allocation1 + $0x20] ss:$4 sm:$0xff] %v12270_v1 }
 0x1ea   : > { %11671 = vmatmul.msk.bf16.vlgmr.msrb.gmra.mxu3 %vm235_vm2, %v12940_v22  ;;  %2305 = vmatpush.bf16.msrb.mxu1 %v2239_v25  ;;  %v3097_v50 = vld.sshfl [vmem:[#allocation1 + $0x18] sm:$0xff pattern:$0x73625140] }
 0x1eb   : > { %2318 = vmatpush.bf16.msrb.mxu2 %v2242_v18  ;;  %2331 = vmatpush.bf16.msrb.mxu3 %v2245_v37 }
 0x1ec   : > { %v1404_v34 = vpop.f32.mrf.mxu2  ;;  %2897 = vrot.lane.b32.xlu0 %v2876_v33, %s12196_s22  ;;  %2899 = vrot.lane.b32.xlu1 %v2879_v12, %s12196_s22 }
 0x1ed   : > { %v1417_v54 = vpop.f32.mrf.mxu3  ;;  %v13000_v29 = vadd.f32 %v1404_v34, %v12907_v52  ;;  %v1380_v3 = vpop.f32.mrf.mxu0  ;;  %2889 = vrot.lane.b32.xlu2 %v2868_v60, %s12196_s22 }
 0x1ee   : > { %v13003_v45 = vadd.f32 %v1417_v54, %v12910_v47  ;;  %v1393_v20 = vpop.f32.mrf.mxu1  ;;  %v2213_v14 = vpop.permute.xlu1 %2212 }
 0x1ef   : > { %v2215_v15 = vpop.permute.xlu2 %2214  ;;  %v2224_v52 = vsel %vm2216_vm10, %v2211_v17, %v2213_v14 }
 0x1f0   : > { %v2225_v23 = vsel %vm2216_vm10, %v2213_v14, %v2215_v15  ;;  %v2251_v27 = vsel %vm239_vm1, %v2224_v52, 0  ;;  %v3099_v37 = vld.sshfl [vmem:[#allocation1 + $0x20] sm:$0xff pattern:$0x73625140]  ;;  %vm5471_vm10 = vcmask 97280  }
 0x1f1   : > { %v3103_v20 = vld.sshfl [vmem:[#allocation1 + $0x30] sm:$0xff pattern:$0x73625140]  ;;  %v3105_v14 = vld.sshfl [vmem:[#allocation1 + $0x38] sm:$0xff pattern:$0x73625140] }
 0x1f2   : > { %v2426_v43 = vpop.permute.xlu0 %2425 }
 0x1f4   : > { %v1406_v10 = vpop.f32.mrf.mxu2  ;;  %3112 = vrot.lane.b32.xlu0 %v3091_v44, %s12197_s25  ;;  %3114 = vrot.lane.b32.xlu1 %v3093_v55, %s12197_s25 }
 0x1f5   : > { %v1419_v38 = vpop.f32.mrf.mxu3  ;;  %v1430_v47 = vpop.f32.mrf.mxu0  ;;  %2895 = vrot.lane.b32.xlu2 %v2874_v35, %s12196_s22 }
 0x1f6   : > { %v1443_v21 = vpop.f32.mrf.mxu1  ;;  %v13012_v24 = vadd.f32 %v1430_v47, %v12927_v48  ;;  %v2254_v48 = vsel %vm239_vm1, %v2225_v23, 0  ;;  %v2428_v58 = vpop.permute.xlu1 %2427 }
 0x1f7   : > { %v13015_v39 = vadd.f32 %v1443_v21, %v12930_v19  ;;  %v2257_v19 = vsel %vm239_vm1, %v2215_v15, 0  ;;  %v2430_v56 = vpop.permute.xlu2 %2429 }
 0x1f8   : > { %11672 = vmatmul.msk.bf16.vlgmr.msra.gmra.mxu0 %vm235_vm2, %v12940_v22  ;;  %11673 = vmatmul.msk.bf16.vlgmr.msra.gmra.mxu1 %vm235_vm2, %v12940_v22  ;;  %v2447_v6 = vsel %vm2445_vm11, %v2428_v58, %v2430_v56 }
 0x1f9   : > { %11675 = vmatmul.msk.bf16.vlgmr.msra.gmra.mxu2 %vm235_vm2, %v13020_v63  ;;  %2344 = vmatpush.bf16.msra.mxu0 %v2248_v30  ;;  %v2462_v25 = vsel %vm239_vm1, %v2447_v6, 0 }
 0x1fa   : > { %11676 = vmatmul.msk.bf16.vlgmr.msra.gmra.mxu3 %vm235_vm2, %v13020_v63  ;;  %2357 = vmatpush.bf16.msra.mxu1 %v2251_v27 }
 0x1fb   : > { %2370 = vmatpush.bf16.msra.mxu2 %v2254_v48  ;;  %2383 = vmatpush.bf16.msra.mxu3 %v2257_v19  ;;  %v3095_v19 = vld.sshfl [vmem:[#allocation1 + $0x10] sm:$0xff pattern:$0x73625140] }
 0x1fc   : > { %v1456_v57 = vpop.f32.mrf.mxu2  ;;  %3118 = vrot.lane.b32.xlu0 %v3097_v50, %s12197_s25  ;;  %3120 = vrot.lane.b32.xlu1 %v3099_v37, %s12197_s25  ;;  %3107 = vst [vmem:[#allocation1] ss:$4 sm:$0xff] %v12274_v2 }
 0x1fd   : > { %v1469_v61 = vpop.f32.mrf.mxu3  ;;  %v13036_v22 = vadd.f32 %v1456_v57, %v12945_v40  ;;  %v1432_v11 = vpop.f32.mrf.mxu0  ;;  %2901 = vrot.lane.b32.xlu2 %v2881_v36, %s12196_s22  ;;  %s12221_s22 = smov 64  }
 0x1fe   : > { %v13039_v31 = vadd.f32 %v1469_v61, %v12948_v62  ;;  %v1445_v16 = vpop.f32.mrf.mxu1  ;;  %v2432_v4 = vpop.permute.xlu0 %2431  ;;  %v2446_v62 = vsel %vm2445_vm11, %v2426_v43, %v2428_v58 }
 0x1ff   : > { %v2448_v41 = vsel %vm2445_vm11, %v2430_v56, %v2432_v4  ;;  %v2459_v13 = vsel %vm239_vm1, %v2446_v62, 0  ;;  %v2436_v18 = vpop.permute.xlu2 %2435 }
 0x202   : > { %v2434_v9 = vpop.permute.xlu1 %2433 }
 0x203   : > { %v2449_v26 = vsel %vm2445_vm11, %v2432_v4, %v2434_v9  ;;  %v2450_v38 = vsel %vm2445_vm11, %v2434_v9, %v2436_v18  ;;  %v3110_v35 = vld.sshfl [vmem:[#allocation1 + $0x8] sm:$0xff pattern:$0x73625140]  ;;  %v3108_v55 = vld.sshfl [vmem:[#allocation1] sm:$0xff pattern:$0x73625140] }
 0x204   : > { %v1458_v40 = vpop.f32.mrf.mxu2  ;;  %3124 = vrot.lane.b32.xlu0 %v3103_v20, %s12197_s25  ;;  %3126 = vrot.lane.b32.xlu1 %v3105_v14, %s12197_s25  ;;  %v2471_v30 = vsel %vm239_vm1, %v2450_v38, 0  ;;  %3317 = vst [vmem:[#allocation1] ss:$4 sm:$0xff] %v12268_v0 }
 0x205   : > { %v1471_v5 = vpop.f32.mrf.mxu3  ;;  %v1581_v7 = vpop.f32.mrf.mxu0  ;;  %3116 = vrot.lane.b32.xlu2 %v3095_v19, %s12197_s25 }
 0x206   : > { %v1594_v46 = vpop.f32.mrf.mxu1  ;;  %v13049_v42 = vadd.f32 %v1581_v7, %v12966_v53  ;;  %v2465_v53 = vsel %vm239_vm1, %v2448_v41, 0  ;;  %v13115_v5 = vld [vmem:[%s16558_s1 + $0x28] sm:$0xf] }
 0x207   : > { %v13052_v51 = vadd.f32 %v1594_v46, %v12969_v32  ;;  %v2468_v32 = vsel %vm239_vm1, %v2449_v26, 0  ;;  %v2442_v36 = vpop.permute.xlu2 %2441 }
 0x208   : > { %11677 = vmatmul.msk.bf16.vlgmr.msrb.gmra.mxu0 %vm235_vm2, %v13020_v63  ;;  %11678 = vmatmul.msk.bf16.vlgmr.msrb.gmra.mxu1 %vm235_vm2, %v13020_v63 }
 0x209   : > { %11679 = vmatmul.msk.bf16.vlgmr.msrb.gmra.mxu2 %vm235_vm2, %v13020_v63  ;;  %2495 = vmatpush.bf16.msrb.mxu0 %v2459_v13 }
 0x20a   : > { %11680 = vmatmul.msk.bf16.vlgmr.msrb.gmra.mxu3 %vm235_vm2, %v13020_v63  ;;  %2508 = vmatpush.bf16.msrb.mxu1 %v2462_v25 }
 0x20b   : > { %2521 = vmatpush.bf16.msrb.mxu2 %v2465_v53  ;;  %2534 = vmatpush.bf16.msrb.mxu3 %v2468_v32  ;;  %v3324_v53 = vld.sshfl [vmem:[#allocation1 + $0x10] sm:$0xff pattern:$0x73625140] }
 0x20c   : > { %v1607_v59 = vpop.f32.mrf.mxu2  ;;  %3130 = vrot.lane.b32.xlu0 %v3110_v35, %s12197_s25 }
 0x20d   : > { %v1620_v33 = vpop.f32.mrf.mxu3  ;;  %v13070_v60 = vadd.f32 %v1607_v59, %v12978_v8  ;;  %v1583_v54 = vpop.f32.mrf.mxu0 }
 0x20e   : > { %v13073_v34 = vadd.f32 %v1620_v33, %v12981_v28  ;;  %v1596_v3 = vpop.f32.mrf.mxu1  ;;  %v2438_v17 = vpop.permute.xlu0 %2437 }
 0x20f   : > { %v2440_v12 = vpop.permute.xlu1 %2439  ;;  %v2451_v49 = vsel %vm2445_vm11, %v2436_v18, %v2438_v17  ;;  %v3326_v3 = vld.sshfl [vmem:[#allocation1 + $0x18] sm:$0xff pattern:$0x73625140] }
 0x210   : > { %v2452_v52 = vsel %vm2445_vm11, %v2438_v17, %v2440_v12  ;;  %v2453_v47 = vsel %vm2445_vm11, %v2440_v12, %v2442_v36  ;;  %v2474_v27 = vsel %vm239_vm1, %v2451_v49, 0 }
 0x211   : > { %v2477_v48 = vsel %vm239_vm1, %v2452_v52, 0  ;;  %v2480_v43 = vsel %vm239_vm1, %v2453_v47, 0 }
 0x214   : > { %v1609_v15 = vpop.f32.mrf.mxu2  ;;  %3347 = vrot.lane.b32.xlu0 %v3324_v53, %s12198_s28 }
 0x215   : > { %v1622_v10 = vpop.f32.mrf.mxu3  ;;  %v1633_v8 = vpop.f32.mrf.mxu0 }
 0x216   : > { %v1646_v28 = vpop.f32.mrf.mxu1  ;;  %v13082_v21 = vadd.f32 %v1633_v8, %v13000_v29  ;;  %v2444_v29 = vpop.permute.xlu0 %2443 }
 0x217   : > { %v13085_v23 = vadd.f32 %v1646_v28, %v13003_v45  ;;  %v2655_v56 = vpop.permute.xlu1 %2654  ;;  %v2486_v41 = vsel %vm239_vm1, %v2444_v29, 0 }
 0x218   : > { %11681 = vmatmul.msk.bf16.vlgmr.msra.gmra.mxu0 %vm235_vm2, %v13020_v63  ;;  %11682 = vmatmul.msk.bf16.vlgmr.msra.gmra.mxu1 %vm235_vm2, %v13020_v63 }
 0x219   : > { %11683 = vmatmul.msk.bf16.vlgmr.msra.gmra.mxu2 %vm235_vm2, %v13020_v63  ;;  %2547 = vmatpush.bf16.msra.mxu0 %v2471_v30 }
 0x21a   : > { %11684 = vmatmul.msk.bf16.vlgmr.msra.gmra.mxu3 %vm235_vm2, %v13020_v63  ;;  %2560 = vmatpush.bf16.msra.mxu1 %v2474_v27  ;;  %v3101_v63 = vld.sshfl [vmem:[#allocation1 + $0x28] sm:$0xff pattern:$0x73625140] }
 0x21b   : > { %2573 = vmatpush.bf16.msra.mxu2 %v2477_v48  ;;  %2586 = vmatpush.bf16.msra.mxu3 %v2480_v43  ;;  %3319 = vst [vmem:[#allocation1 + $0x20] ss:$4 sm:$0xff] %v12270_v1  ;;  %v3322_v43 = vld.sshfl [vmem:[#allocation1 + $0x8] sm:$0xff pattern:$0x73625140] }
 0x21c   : > { %v1659_v45 = vpop.f32.mrf.mxu2  ;;  %3122 = vrot.lane.b32.xlu2 %v3101_v63, %s12197_s25 }
 0x21d   : > { %v1672_v44 = vpop.f32.mrf.mxu3  ;;  %v13102_v57 = vadd.f32 %v1659_v45, %v13012_v24  ;;  %v1635_v11 = vpop.f32.mrf.mxu0  ;;  %v2454_v24 = vsel %vm2445_vm11, %v2442_v36, %v2444_v29  ;;  %vm5705_vm11 = vcmask 89088  }
 0x21e   : > { %v13105_v61 = vadd.f32 %v1672_v44, %v13015_v39  ;;  %v1648_v16 = vpop.f32.mrf.mxu1  ;;  %v2659_v58 = vpop.permute.xlu0 %2658  ;;  %v2483_v46 = vsel %vm239_vm1, %v2454_v24, 0 }
 0x221   : > { %v2657_v7 = vpop.permute.xlu2 %2656 }
 0x222   : > { %v2675_v9 = vsel %vm2674_vm12, %v2655_v56, %v2657_v7  ;;  %v2676_v13 = vsel %vm2674_vm12, %v2657_v7, %v2659_v58  ;;  %v3330_v17 = vld.sshfl [vmem:[#allocation1 + $0x28] sm:$0xff pattern:$0x73625140] }
 0x223   : > { %v2688_v25 = vsel %vm239_vm1, %v2675_v9, 0  ;;  %v2691_v26 = vsel %vm239_vm1, %v2676_v13, 0  ;;  %3353 = vrot.lane.b32.xlu0 %v3330_v17, %s12198_s28 }
 0x224   : > { %v1661_v50 = vpop.f32.mrf.mxu2  ;;  %3128 = vrot.lane.b32.xlu2 %v3108_v55, %s12197_s25 }
 0x225   : > { %v1674_v4 = vpop.f32.mrf.mxu3  ;;  %v1685_v39 = vpop.f32.mrf.mxu0 }
 0x226   : > { %v1698_v40 = vpop.f32.mrf.mxu1  ;;  %v13118_v62 = vadd.f32 %v1685_v39, %v13036_v22  ;;  %v3320_v22 = vld.sshfl [vmem:[#allocation1] sm:$0xff pattern:$0x73625140]  ;;  %v2665_v14 = vpop.permute.xlu0 %2664 }
 0x227   : > { %v13121_v6 = vadd.f32 %v1698_v40, %v13039_v31  ;;  %v2661_v31 = vpop.permute.xlu1 %2660  ;;  %3343 = vrot.lane.b32.xlu1 %v3320_v22, %s12198_s28  ;;  %3336 = vst [vmem:[#allocation1] ss:$4 sm:$0xff] %v12274_v2 }
 0x228   : > { %11686 = vmatmul.msk.bf16.vlgmr.msrb.gmra.mxu0 %vm235_vm2, %v13115_v5  ;;  %11687 = vmatmul.msk.bf16.vlgmr.msrb.gmra.mxu1 %vm235_vm2, %v13115_v5  ;;  %v2677_v10 = vsel %vm2674_vm12, %v2659_v58, %v2661_v31 }
 0x229   : > { %11688 = vmatmul.msk.bf16.vlgmr.msrb.gmra.mxu2 %vm235_vm2, %v13115_v5  ;;  %2599 = vmatpush.bf16.msrb.mxu0 %v2483_v46  ;;  %v2694_v47 = vsel %vm239_vm1, %v2677_v10, 0 }
 0x22a   : > { %11689 = vmatmul.msk.bf16.vlgmr.msrb.gmra.mxu3 %vm235_vm2, %v13115_v5  ;;  %2612 = vmatpush.bf16.msrb.mxu1 %v2486_v41  ;;  %v2663_v20 = vpop.permute.xlu2 %2662  ;;  %v13196_v41 = vld [vmem:[%s16558_s1 + $0x2c] sm:$0xf] }
 0x22b   : > { %2724 = vmatpush.bf16.msrb.mxu2 %v2688_v25  ;;  %2737 = vmatpush.bf16.msrb.mxu3 %v2691_v26  ;;  %v2679_v49 = vsel %vm2674_vm12, %v2663_v20, %v2665_v14  ;;  %v3328_v25 = vld.sshfl [vmem:[#allocation1 + $0x20] sm:$0xff pattern:$0x73625140] }
 0x22c   : > { %v1810_v18 = vpop.f32.mrf.mxu2  ;;  %v2700_v27 = vsel %vm239_vm1, %v2679_v49, 0  ;;  %3345 = vrot.lane.b32.xlu2 %v3322_v43, %s12198_s28 }
 0x22d   : > { %v1823_v32 = vpop.f32.mrf.mxu3  ;;  %v13140_v37 = vadd.f32 %v1810_v18, %v13049_v42  ;;  %v1687_v33 = vpop.f32.mrf.mxu0  ;;  %v2678_v42 = vsel %vm2674_vm12, %v2661_v31, %v2663_v20 }
 0x22e   : > { %v13143_v59 = vadd.f32 %v1823_v32, %v13052_v51  ;;  %v1700_v54 = vpop.f32.mrf.mxu1  ;;  %v2697_v30 = vsel %vm239_vm1, %v2678_v42, 0  ;;  %v3337_v63 = vld.sshfl [vmem:[#allocation1] sm:$0xff pattern:$0x73625140] }
 0x22f   : > { %v2667_v12 = vpop.permute.xlu1 %2666  ;;  %3349 = vrot.lane.b32.xlu1 %v3326_v3, %s12198_s28  ;;  %v13179_v35 = vld.sshfl [vmem:[#allocation1 + $0x10] sm:$0xff pattern:$0x73625140]  ;;  %3359 = vrot.lane.b32.xlu0 %v3337_v63, %s12198_s28  ;;  %v3339_v55 = vld.sshfl [vmem:[#allocation1 + $0x8] sm:$0xff pattern:$0x73625140] }
 0x230   : > { %v2680_v8 = vsel %vm2674_vm12, %v2665_v14, %v2667_v12  ;;  %3551 = vst [vmem:[#allocation1] ss:$4 sm:$0xff] %v12268_v0  ;;  %v3334_v54 = vld.sshfl [vmem:[#allocation1 + $0x38] sm:$0xff pattern:$0x73625140] }
 0x231   : > { %v2703_v48 = vsel %vm239_vm1, %v2680_v8, 0 }
 0x234   : > { %v1812_v36 = vpop.f32.mrf.mxu2  ;;  %3351 = vrot.lane.b32.xlu2 %v3328_v25, %s12198_s28 }
 0x235   : > { %v1825_v15 = vpop.f32.mrf.mxu3  ;;  %v1836_v51 = vpop.f32.mrf.mxu0 }
 0x236   : > { %v1849_v38 = vpop.f32.mrf.mxu1  ;;  %v13153_v28 = vadd.f32 %v1836_v51, %v13070_v60  ;;  %v3332_v60 = vld.sshfl [vmem:[#allocation1 + $0x30] sm:$0xff pattern:$0x73625140]  ;;  %v2669_v16 = vpop.permute.xlu2 %2668 }
 0x237   : > { %v13156_v52 = vadd.f32 %v1849_v38, %v13073_v34  ;;  %3355 = vrot.lane.b32.xlu1 %v3332_v60, %s12198_s28  ;;  %v3554_v31 = vld.sshfl [vmem:[#allocation1] sm:$0xff pattern:$0x73625140]  ;;  %v3556_v3 = vld.sshfl [vmem:[#allocation1 + $0x8] sm:$0xff pattern:$0x73625140] }
 0x238   : > { %11690 = vmatmul.msk.bf16.vlgmr.msra.gmra.mxu0 %vm235_vm2, %v13115_v5  ;;  %11691 = vmatmul.msk.bf16.vlgmr.msra.gmra.mxu1 %vm235_vm2, %v13115_v5  ;;  %3553 = vst [vmem:[#allocation1 + $0x20] ss:$4 sm:$0xff] %v12270_v1  ;;  %v3560_v14 = vld.sshfl [vmem:[#allocation1 + $0x18] sm:$0xff pattern:$0x73625140] }
 0x239   : > { %11692 = vmatmul.msk.bf16.vlgmr.msra.gmra.mxu2 %vm235_vm2, %v13115_v5  ;;  %2750 = vmatpush.bf16.msra.mxu0 %v2694_v47 }
 0x23a   : > { %11693 = vmatmul.msk.bf16.vlgmr.msra.gmra.mxu3 %vm235_vm2, %v13115_v5  ;;  %2763 = vmatpush.bf16.msra.mxu1 %v2697_v30 }
 0x23b   : > { %2776 = vmatpush.bf16.msra.mxu2 %v2700_v27  ;;  %2789 = vmatpush.bf16.msra.mxu3 %v2703_v48 }
 0x23c   : > { %v1862_v34 = vpop.f32.mrf.mxu2  ;;  %3577 = vrot.lane.b32.xlu0 %v3554_v31, %s12199_s4  ;;  %3357 = vrot.lane.b32.xlu2 %v3334_v54, %s12198_s28 }
 0x23d   : > { %v1875_v19 = vpop.f32.mrf.mxu3  ;;  %v13174_v29 = vadd.f32 %v1862_v34, %v13082_v21  ;;  %v1838_v44 = vpop.f32.mrf.mxu0  ;;  %v2681_v21 = vsel %vm2674_vm12, %v2667_v12, %v2669_v16 }
 0x23e   : > { %v13177_v45 = vadd.f32 %v1875_v19, %v13085_v23  ;;  %v1851_v11 = vpop.f32.mrf.mxu1  ;;  %v2706_v9 = vsel %vm239_vm1, %v2681_v21, 0  ;;  %v2884_v22 = vpop.permute.xlu2 %2883 }
 0x23f   : > { %3361 = vrot.lane.b32.xlu1 %v3339_v55, %s12198_s28  ;;  %v3566_v63 = vld.sshfl [vmem:[#allocation1 + $0x30] sm:$0xff pattern:$0x73625140] }
 0x241   : > { %v2673_v56 = vpop.permute.xlu1 %2672  ;;  %v2671_v58 = vpop.permute.xlu0 %2670 }
 0x242   : > { %v2682_v23 = vsel %vm2674_vm12, %v2669_v16, %v2671_v58  ;;  %v2683_v40 = vsel %vm2674_vm12, %v2671_v58, %v2673_v56  ;;  %vm5939_vm12 = vcmask 80896  }
 0x243   : > { %v2709_v13 = vsel %vm239_vm1, %v2682_v23, 0 }
 0x244   : > { %v1864_v50 = vpop.f32.mrf.mxu2  ;;  %3583 = vrot.lane.b32.xlu0 %v3560_v14, %s12199_s4  ;;  %3363 = vrot.lane.b32.xlu2 %v13179_v35, %s12198_s28  ;;  %s12223_s28 = smov 62  }
 0x245   : > { %v1877_v4 = vpop.f32.mrf.mxu3  ;;  %v1888_v24 = vpop.f32.mrf.mxu0 }
 0x246   : > { %v1901_v39 = vpop.f32.mrf.mxu1  ;;  %v13188_v7 = vadd.f32 %v1888_v24, %v13102_v57  ;;  %v2712_v57 = vsel %vm239_vm1, %v2683_v40, 0 }
 0x247   : > { %v13191_v46 = vadd.f32 %v1901_v39, %v13105_v61  ;;  %v2715_v61 = vsel %vm239_vm1, %v2673_v56, 0  ;;  %3579 = vrot.lane.b32.xlu1 %v3556_v3, %s12199_s4  ;;  %v2890_v12 = vpop.permute.xlu2 %2889  ;;  %v3568_v56 = vld.sshfl [vmem:[#allocation1 + $0x38] sm:$0xff pattern:$0x73625140] }
 0x248   : > { %11694 = vmatmul.msk.bf16.vlgmr.msrb.gmra.mxu0 %vm235_vm2, %v13115_v5  ;;  %11695 = vmatmul.msk.bf16.vlgmr.msrb.gmra.mxu1 %vm235_vm2, %v13115_v5 }
 0x249   : > { %11697 = vmatmul.msk.bf16.vlgmr.msrb.gmra.mxu2 %vm235_vm2, %v13196_v41  ;;  %2802 = vmatpush.bf16.msrb.mxu0 %v2706_v9  ;;  %v2886_v20 = vpop.permute.xlu0 %2885  ;;  %v2888_v17 = vpop.permute.xlu1 %2887 }
 0x24a   : > { %11698 = vmatmul.msk.bf16.vlgmr.msrb.gmra.mxu3 %vm235_vm2, %v13196_v41  ;;  %2815 = vmatpush.bf16.msrb.mxu1 %v2709_v13  ;;  %v2906_v51 = vsel %vm2903_vm13, %v2888_v17, %v2890_v12 }
 0x24b   : > { %2828 = vmatpush.bf16.msrb.mxu2 %v2712_v57  ;;  %2841 = vmatpush.bf16.msrb.mxu3 %v2715_v61  ;;  %v2923_v48 = vsel %vm239_vm1, %v2906_v51, 0  ;;  %v3558_v61 = vld.sshfl [vmem:[#allocation1 + $0x10] sm:$0xff pattern:$0x73625140] }
 0x24c   : > { %v1914_v26 = vpop.f32.mrf.mxu2  ;;  %3589 = vrot.lane.b32.xlu0 %v3566_v63, %s12199_s4  ;;  %3570 = vst [vmem:[#allocation1] ss:$4 sm:$0xff] %v12274_v2  ;;  %3581 = vrot.lane.b32.xlu2 %v3558_v61, %s12199_s4 }
 0x24d   : > { %v1927_v53 = vpop.f32.mrf.mxu3  ;;  %v13213_v5 = vadd.f32 %v1914_v26, %v13118_v62  ;;  %v1890_v32 = vpop.f32.mrf.mxu0  ;;  %v2904_v62 = vsel %vm2903_vm13, %v2884_v22, %v2886_v20 }
 0x24e   : > { %v13216_v18 = vadd.f32 %v1927_v53, %v13121_v6  ;;  %v1903_v33 = vpop.f32.mrf.mxu1  ;;  %v2905_v6 = vsel %vm2903_vm13, %v2886_v20, %v2888_v17  ;;  %v2917_v47 = vsel %vm239_vm1, %v2904_v62, 0  ;;  %v13294_v62 = vld [vmem:[%s16558_s1 + $0x30] sm:$0xf] }
 0x24f   : > { %v2920_v30 = vsel %vm239_vm1, %v2905_v6, 0  ;;  %v2896_v55 = vpop.permute.xlu2 %2895 }
 0x252   : > { %v2892_v8 = vpop.permute.xlu0 %2891  ;;  %v2894_v43 = vpop.permute.xlu1 %2893 }
 0x253   : > { %v2907_v27 = vsel %vm2903_vm13, %v2890_v12, %v2892_v8  ;;  %v2908_v21 = vsel %vm2903_vm13, %v2892_v8, %v2894_v43  ;;  %v2909_v35 = vsel %vm2903_vm13, %v2894_v43, %v2896_v55  ;;  %v3573_v3 = vld.sshfl [vmem:[#allocation1 + $0x8] sm:$0xff pattern:$0x73625140]  ;;  %v3571_v20 = vld.sshfl [vmem:[#allocation1] sm:$0xff pattern:$0x73625140] }
 0x254   : > { %v1916_v36 = vpop.f32.mrf.mxu2  ;;  %v2929_v9 = vsel %vm239_vm1, %v2908_v21, 0  ;;  %v2932_v13 = vsel %vm239_vm1, %v2909_v35, 0  ;;  %3595 = vrot.lane.b32.xlu0 %v3573_v3, %s12199_s4  ;;  %v3575_v17 = vld.sshfl [vmem:[#allocation1 + $0x10] sm:$0xff pattern:$0x73625140] }
 0x255   : > { %v1929_v15 = vpop.f32.mrf.mxu3  ;;  %v2039_v10 = vpop.f32.mrf.mxu0  ;;  %3785 = vst [vmem:[#allocation1] ss:$4 sm:$0xff] %v12268_v0 }
 0x256   : > { %v2052_v42 = vpop.f32.mrf.mxu1  ;;  %v13226_v38 = vadd.f32 %v2039_v10, %v13140_v37  ;;  %v2926_v37 = vsel %vm239_vm1, %v2907_v27, 0 }
 0x257   : > { %v13229_v49 = vadd.f32 %v2052_v42, %v13143_v59  ;;  %v3562_v59 = vld.sshfl [vmem:[#allocation1 + $0x20] sm:$0xff pattern:$0x73625140] }
 0x258   : > { %11699 = vmatmul.msk.bf16.vlgmr.msra.gmra.mxu0 %vm235_vm2, %v13196_v41  ;;  %11700 = vmatmul.msk.bf16.vlgmr.msra.gmra.mxu1 %vm235_vm2, %v13196_v41 }
 0x259   : > { %11701 = vmatmul.msk.bf16.vlgmr.msra.gmra.mxu2 %vm235_vm2, %v13196_v41  ;;  %2953 = vmatpush.bf16.msra.mxu0 %v2917_v47 }
 0x25a   : > { %11702 = vmatmul.msk.bf16.vlgmr.msra.gmra.mxu3 %vm235_vm2, %v13196_v41  ;;  %2966 = vmatpush.bf16.msra.mxu1 %v2920_v30 }
 0x25b   : > { %2979 = vmatpush.bf16.msra.mxu2 %v2923_v48  ;;  %2992 = vmatpush.bf16.msra.mxu3 %v2926_v37 }
 0x25c   : > { %v2065_v60 = vpop.f32.mrf.mxu2  ;;  %3585 = vrot.lane.b32.xlu1 %v3562_v59, %s12199_s4  ;;  %v3790_v37 = vld.sshfl [vmem:[#allocation1 + $0x8] sm:$0xff pattern:$0x73625140]  ;;  %v3788_v61 = vld.sshfl [vmem:[#allocation1] sm:$0xff pattern:$0x73625140] }
 0x25d   : > { %v2078_v34 = vpop.f32.mrf.mxu3  ;;  %v13248_v19 = vadd.f32 %v2065_v60, %v13153_v28  ;;  %v2041_v11 = vpop.f32.mrf.mxu0  ;;  %3813 = vrot.lane.b32.xlu0 %v3790_v37, %s12200_s7 }
 0x25e   : > { %v13251_v44 = vadd.f32 %v2078_v34, %v13156_v52  ;;  %v2054_v16 = vpop.f32.mrf.mxu1  ;;  %v2898_v58 = vpop.permute.xlu0 %2897 }
 0x25f   : > { %v2910_v52 = vsel %vm2903_vm13, %v2896_v55, %v2898_v58  ;;  %v2900_v40 = vpop.permute.xlu1 %2899 }
 0x260   : > { %v2911_v57 = vsel %vm2903_vm13, %v2898_v58, %v2900_v40  ;;  %v2935_v22 = vsel %vm239_vm1, %v2910_v52, 0 }
 0x264   : > { %v2067_v50 = vpop.f32.mrf.mxu2  ;;  %3591 = vrot.lane.b32.xlu1 %v3568_v56, %s12199_s4 }
 0x265   : > { %v2080_v4 = vpop.f32.mrf.mxu3  ;;  %v2091_v28 = vpop.f32.mrf.mxu0 }
 0x266   : > { %v2104_v23 = vpop.f32.mrf.mxu1  ;;  %v13259_v24 = vadd.f32 %v2091_v28, %v13174_v29  ;;  %v2938_v29 = vsel %vm239_vm1, %v2911_v57, 0  ;;  %v3113_v54 = vpop.permute.xlu0 %3112 }
 0x267   : > { %v13262_v39 = vadd.f32 %v2104_v23, %v13177_v45  ;;  %v2902_v45 = vpop.permute.xlu2 %2901 }
 0x268   : > { %11703 = vmatmul.msk.bf16.vlgmr.msrb.gmra.mxu0 %vm235_vm2, %v13196_v41  ;;  %11704 = vmatmul.msk.bf16.vlgmr.msrb.gmra.mxu1 %vm235_vm2, %v13196_v41  ;;  %v2912_v12 = vsel %vm2903_vm13, %v2900_v40, %v2902_v45  ;;  %v2944_v47 = vsel %vm239_vm1, %v2902_v45, 0  ;;  %vm6173_vm13 = vcmask 72704  }
 0x269   : > { %11705 = vmatmul.msk.bf16.vlgmr.msrb.gmra.mxu2 %vm235_vm2, %v13196_v41  ;;  %3005 = vmatpush.bf16.msrb.mxu0 %v2929_v9  ;;  %v2941_v8 = vsel %vm239_vm1, %v2912_v12, 0 }
 0x26a   : > { %11706 = vmatmul.msk.bf16.vlgmr.msrb.gmra.mxu3 %vm235_vm2, %v13196_v41  ;;  %3018 = vmatpush.bf16.msrb.mxu1 %v2932_v13  ;;  %v3564_v41 = vld.sshfl [vmem:[#allocation1 + $0x28] sm:$0xff pattern:$0x73625140] }
 0x26b   : > { %3031 = vmatpush.bf16.msrb.mxu2 %v2935_v22  ;;  %3044 = vmatpush.bf16.msrb.mxu3 %v2938_v29  ;;  %3787 = vst [vmem:[#allocation1 + $0x20] ss:$4 sm:$0xff] %v12270_v1 }
 0x26c   : > { %v2117_v25 = vpop.f32.mrf.mxu2  ;;  %3597 = vrot.lane.b32.xlu1 %v3575_v17, %s12199_s4  ;;  %3587 = vrot.lane.b32.xlu2 %v3564_v41, %s12199_s4 }
 0x26d   : > { %v2130_v31 = vpop.f32.mrf.mxu3  ;;  %v13280_v26 = vadd.f32 %v2117_v25, %v13188_v7  ;;  %v2093_v32 = vpop.f32.mrf.mxu0 }
 0x26e   : > { %v13283_v53 = vadd.f32 %v2130_v31, %v13191_v46  ;;  %v2106_v33 = vpop.f32.mrf.mxu1  ;;  %v3115_v7 = vpop.permute.xlu1 %3114 }
 0x26f   : > { %v3133_v6 = vsel %vm3132_vm14, %v3113_v54, %v3115_v7  ;;  %v3117_v51 = vpop.permute.xlu2 %3116  ;;  %v3119_v27 = vpop.permute.xlu0 %3118 }
 0x270   : > { %v3134_v30 = vsel %vm3132_vm14, %v3115_v7, %v3117_v51  ;;  %v3135_v35 = vsel %vm3132_vm14, %v3117_v51, %v3119_v27  ;;  %v13372_v51 = vld [vmem:[%s16558_s1 + $0x34] sm:$0xf] }
 0x271   : > { %v3149_v48 = vsel %vm239_vm1, %v3134_v30, 0  ;;  %v3152_v13 = vsel %vm239_vm1, %v3135_v35, 0 }
 0x272   : > { %v3796_v55 = vld.sshfl [vmem:[#allocation1 + $0x20] sm:$0xff pattern:$0x73625140]  ;;  %v3798_v56 = vld.sshfl [vmem:[#allocation1 + $0x28] sm:$0xff pattern:$0x73625140] }
 0x273   : > { %3819 = vrot.lane.b32.xlu0 %v3796_v55, %s12200_s7 }
 0x274   : > { %v2119_v14 = vpop.f32.mrf.mxu2  ;;  %3593 = vrot.lane.b32.xlu2 %v3571_v20, %s12199_s4  ;;  %s12224_s4 = smov 61  }
 0x275   : > { %v2132_v46 = vpop.f32.mrf.mxu3  ;;  %v2143_v36 = vpop.f32.mrf.mxu0 }
 0x276   : > { %v2156_v15 = vpop.f32.mrf.mxu1  ;;  %v13298_v10 = vadd.f32 %v2143_v36, %v13213_v5  ;;  %v3146_v5 = vsel %vm239_vm1, %v3133_v6, 0  ;;  %v3121_v63 = vpop.permute.xlu1 %3120 }
 0x277   : > { %v13301_v42 = vadd.f32 %v2156_v15, %v13216_v18  ;;  %v3792_v18 = vld.sshfl [vmem:[#allocation1 + $0x10] sm:$0xff pattern:$0x73625140]  ;;  %v3123_v58 = vpop.permute.xlu2 %3122  ;;  %v3125_v50 = vpop.permute.xlu0 %3124  ;;  %v3136_v28 = vsel %vm3132_vm14, %v3119_v27, %v3121_v63 }
 0x278   : > { %11708 = vmatmul.msk.bf16.vlgmr.msra.gmra.mxu0 %vm235_vm2, %v13294_v62  ;;  %11709 = vmatmul.msk.bf16.vlgmr.msra.gmra.mxu1 %vm235_vm2, %v13294_v62  ;;  %v3137_v23 = vsel %vm3132_vm14, %v3121_v63, %v3123_v58  ;;  %v3138_v52 = vsel %vm3132_vm14, %v3123_v58, %v3125_v50  ;;  %v3155_v57 = vsel %vm239_vm1, %v3136_v28, 0 }
 0x279   : > { %11710 = vmatmul.msk.bf16.vlgmr.msra.gmra.mxu2 %vm235_vm2, %v13294_v62  ;;  %3057 = vmatpush.bf16.msra.mxu0 %v2941_v8  ;;  %v3158_v22 = vsel %vm239_vm1, %v3137_v23, 0  ;;  %v3161_v29 = vsel %vm239_vm1, %v3138_v52, 0 }
 0x27a   : > { %11711 = vmatmul.msk.bf16.vlgmr.msra.gmra.mxu3 %vm235_vm2, %v13294_v62  ;;  %3070 = vmatpush.bf16.msra.mxu1 %v2944_v47 }
 0x27b   : > { %3182 = vmatpush.bf16.msra.mxu2 %v3146_v5  ;;  %3195 = vmatpush.bf16.msra.mxu3 %v3149_v48 }
 0x27c   : > { %v2268_v59 = vpop.f32.mrf.mxu2  ;;  %3815 = vrot.lane.b32.xlu1 %v3792_v18, %s12200_s7  ;;  %3811 = vrot.lane.b32.xlu2 %v3788_v61, %s12200_s7 }
 0x27d   : > { %v2281_v43 = vpop.f32.mrf.mxu3  ;;  %v13319_v60 = vadd.f32 %v2268_v59, %v13226_v38  ;;  %v2145_v11 = vpop.f32.mrf.mxu0 }
 0x27e   : > { %v13322_v34 = vadd.f32 %v2281_v43, %v13229_v49  ;;  %v2158_v16 = vpop.f32.mrf.mxu1  ;;  %v3127_v54 = vpop.permute.xlu1 %3126  ;;  %v3800_v11 = vld.sshfl [vmem:[#allocation1 + $0x30] sm:$0xff pattern:$0x73625140] }
 0x27f   : > { %v3129_v3 = vpop.permute.xlu2 %3128  ;;  %v3131_v17 = vpop.permute.xlu0 %3130  ;;  %v3139_v46 = vsel %vm3132_vm14, %v3125_v50, %v3127_v54 }
 0x280   : > { %v3140_v12 = vsel %vm3132_vm14, %v3127_v54, %v3129_v3  ;;  %v3164_v47 = vsel %vm239_vm1, %v3139_v46, 0 }
 0x281   : > { %v3167_v30 = vsel %vm239_vm1, %v3140_v12, 0 }
 0x284   : > { %v2270_v4 = vpop.f32.mrf.mxu2  ;;  %3821 = vrot.lane.b32.xlu1 %v3798_v56, %s12200_s7 }
 0x285   : > { %v2283_v21 = vpop.f32.mrf.mxu3  ;;  %v2294_v38 = vpop.f32.mrf.mxu0 }
 0x286   : > { %v2307_v49 = vpop.f32.mrf.mxu1  ;;  %v13332_v40 = vadd.f32 %v2294_v38, %v13248_v19  ;;  %v3802_v19 = vld.sshfl [vmem:[#allocation1 + $0x38] sm:$0xff pattern:$0x73625140] }
 0x287   : > { %v13335_v9 = vadd.f32 %v2307_v49, %v13251_v44  ;;  %v3794_v44 = vld.sshfl [vmem:[#allocation1 + $0x18] sm:$0xff pattern:$0x73625140]  ;;  %3825 = vrot.lane.b32.xlu0 %v3802_v19, %s12200_s7  ;;  %v3346_v5 = vpop.permute.xlu2 %3345  ;;  %4021 = vst [vmem:[#allocation1 + $0x20] ss:$4 sm:$0xff] %v12270_v1  ;;  %v3348_v63 = vpop.permute.xlu0 %3347 }
 0x288   : > { %11712 = vmatmul.msk.bf16.vlgmr.msrb.gmra.mxu0 %vm235_vm2, %v13294_v62  ;;  %11713 = vmatmul.msk.bf16.vlgmr.msrb.gmra.mxu1 %vm235_vm2, %v13294_v62  ;;  %3804 = vst [vmem:[#allocation1] ss:$4 sm:$0xff] %v12274_v2  ;;  %v3367_v50 = vsel %vm3365_vm15, %v3346_v5, %v3348_v63 }
 0x289   : > { %11714 = vmatmul.msk.bf16.vlgmr.msrb.gmra.mxu2 %vm235_vm2, %v13294_v62  ;;  %3208 = vmatpush.bf16.msrb.mxu0 %v3152_v13  ;;  %v3383_v13 = vsel %vm239_vm1, %v3367_v50, 0 }
 0x28a   : > { %11715 = vmatmul.msk.bf16.vlgmr.msrb.gmra.mxu3 %vm235_vm2, %v13294_v62  ;;  %3221 = vmatpush.bf16.msrb.mxu1 %v3155_v57 }
 0x28b   : > { %3234 = vmatpush.bf16.msrb.mxu2 %v3158_v22  ;;  %3247 = vmatpush.bf16.msrb.mxu3 %v3161_v29 }
 0x28c   : > { %v2320_v45 = vpop.f32.mrf.mxu2  ;;  %3817 = vrot.lane.b32.xlu2 %v3794_v44, %s12200_s7 }
 0x28d   : > { %v2333_v25 = vpop.f32.mrf.mxu3  ;;  %v13353_v31 = vadd.f32 %v2320_v45, %v13259_v24  ;;  %v2296_v33 = vpop.f32.mrf.mxu0 }
 0x28e   : > { %v13356_v32 = vadd.f32 %v2333_v25, %v13262_v39  ;;  %v2309_v41 = vpop.f32.mrf.mxu1  ;;  %v3141_v39 = vsel %vm3132_vm14, %v3129_v3, %v3131_v17  ;;  %v4032_v61 = vld.sshfl [vmem:[#allocation1 + $0x28] sm:$0xff pattern:$0x73625140]  ;;  %v4034_v3 = vld.sshfl [vmem:[#allocation1 + $0x30] sm:$0xff pattern:$0x73625140] }
 0x28f   : > { %v3805_v20 = vld.sshfl [vmem:[#allocation1] sm:$0xff pattern:$0x73625140]  ;;  %v3807_v8 = vld.sshfl [vmem:[#allocation1 + $0x8] sm:$0xff pattern:$0x73625140]  ;;  %v3352_v49 = vpop.permute.xlu2 %3351 }
 0x290   : > { %3827 = vrot.lane.b32.xlu1 %v3805_v20, %s12200_s7  ;;  %v3809_v27 = vld.sshfl [vmem:[#allocation1 + $0x10] sm:$0xff pattern:$0x73625140]  ;;  %vm6407_vm14 = vcmask 64512  }
 0x291   : > { %4019 = vst [vmem:[#allocation1] ss:$4 sm:$0xff] %v12268_v0  ;;  %3831 = vrot.lane.b32.xlu0 %v3809_v27, %s12200_s7 }
 0x294   : > { %v2322_v7 = vpop.f32.mrf.mxu2  ;;  %3823 = vrot.lane.b32.xlu2 %v3800_v11, %s12200_s7 }
 0x295   : > { %v2335_v14 = vpop.f32.mrf.mxu3  ;;  %v2346_v24 = vpop.f32.mrf.mxu0 }
 0x296   : > { %v2359_v36 = vpop.f32.mrf.mxu1  ;;  %v13364_v15 = vadd.f32 %v2346_v24, %v13280_v26  ;;  %v3170_v26 = vsel %vm239_vm1, %v3141_v39, 0  ;;  %v3354_v22 = vpop.permute.xlu0 %3353 }
 0x297   : > { %v13367_v6 = vadd.f32 %v2359_v36, %v13283_v53  ;;  %v3173_v53 = vsel %vm239_vm1, %v3131_v17, 0  ;;  %v3358_v20 = vpop.permute.xlu2 %3357  ;;  %v3370_v46 = vsel %vm3365_vm15, %v3352_v49, %v3354_v22 }
 0x298   : > { %11716 = vmatmul.msk.bf16.vlgmr.msra.gmra.mxu0 %vm235_vm2, %v13294_v62  ;;  %11717 = vmatmul.msk.bf16.vlgmr.msra.gmra.mxu1 %vm235_vm2, %v13294_v62  ;;  %v4022_v55 = vld.sshfl [vmem:[#allocation1] sm:$0xff pattern:$0x73625140]  ;;  %v4026_v56 = vld.sshfl [vmem:[#allocation1 + $0x10] sm:$0xff pattern:$0x73625140] }
 0x299   : > { %11719 = vmatmul.msk.bf16.vlgmr.msra.gmra.mxu2 %vm235_vm2, %v13372_v51  ;;  %3260 = vmatpush.bf16.msra.mxu0 %v3164_v47  ;;  %v3344_v16 = vpop.permute.xlu1 %3343  ;;  %v3392_v47 = vsel %vm239_vm1, %v3370_v46, 0 }
 0x29a   : > { %11720 = vmatmul.msk.bf16.vlgmr.msra.gmra.mxu3 %vm235_vm2, %v13372_v51  ;;  %3273 = vmatpush.bf16.msra.mxu1 %v3167_v30 }
 0x29b   : > { %3286 = vmatpush.bf16.msra.mxu2 %v3170_v26  ;;  %3299 = vmatpush.bf16.msra.mxu3 %v3173_v53 }
 0x29c   : > { %v2372_v48 = vpop.f32.mrf.mxu2  ;;  %4045 = vrot.lane.b32.xlu1 %v4022_v55, %s12201_s10  ;;  %4049 = vrot.lane.b32.xlu0 %v4026_v56, %s12201_s10  ;;  %v4030_v56 = vld.sshfl [vmem:[#allocation1 + $0x20] sm:$0xff pattern:$0x73625140] }
 0x29d   : > { %v2385_v62 = vpop.f32.mrf.mxu3  ;;  %v13389_v18 = vadd.f32 %v2372_v48, %v13298_v10  ;;  %v2348_v59 = vpop.f32.mrf.mxu0  ;;  %3829 = vrot.lane.b32.xlu2 %v3807_v8, %s12200_s7  ;;  %s12225_s7 = smov 60  }
 0x29e   : > { %v13392_v37 = vadd.f32 %v2385_v62, %v13301_v42  ;;  %v2361_v43 = vpop.f32.mrf.mxu1  ;;  %v3366_v42 = vsel %vm3365_vm15, %v3344_v16, %v3346_v5 }
 0x29f   : > { %v3380_v52 = vsel %vm239_vm1, %v3366_v42, 0 }
 0x2a1   : > { %v3350_v38 = vpop.permute.xlu1 %3349  ;;  %v3360_v17 = vpop.permute.xlu0 %3359 }
 0x2a2   : > { %v3368_v23 = vsel %vm3365_vm15, %v3348_v63, %v3350_v38  ;;  %v3369_v57 = vsel %vm3365_vm15, %v3350_v38, %v3352_v49 }
 0x2a3   : > { %v3389_v29 = vsel %vm239_vm1, %v3369_v57, 0 }
 0x2a4   : > { %v2374_v10 = vpop.f32.mrf.mxu2  ;;  %4055 = vrot.lane.b32.xlu0 %v4032_v61, %s12201_s10  ;;  %v4036_v61 = vld.sshfl [vmem:[#allocation1 + $0x38] sm:$0xff pattern:$0x73625140] }
 0x2a5   : > { %v2387_v58 = vpop.f32.mrf.mxu3  ;;  %v2497_v4 = vpop.f32.mrf.mxu0  ;;  %4255 = vst [vmem:[#allocation1 + $0x20] ss:$4 sm:$0xff] %v12270_v1 }
 0x2a6   : > { %v2510_v21 = vpop.f32.mrf.mxu1  ;;  %v13401_v35 = vadd.f32 %v2497_v4, %v13319_v60  ;;  %v3386_v60 = vsel %vm239_vm1, %v3368_v23, 0 }
 0x2a7   : > { %v13404_v28 = vadd.f32 %v2510_v21, %v13322_v34  ;;  %v4028_v34 = vld.sshfl [vmem:[#allocation1 + $0x18] sm:$0xff pattern:$0x73625140] }
 0x2a8   : > { %11721 = vmatmul.msk.bf16.vlgmr.msrb.gmra.mxu0 %vm235_vm2, %v13372_v51  ;;  %11722 = vmatmul.msk.bf16.vlgmr.msrb.gmra.mxu1 %vm235_vm2, %v13372_v51  ;;  %v13471_v21 = vld [vmem:[%s16558_s1 + $0x38] sm:$0xf] }
 0x2a9   : > { %11723 = vmatmul.msk.bf16.vlgmr.msrb.gmra.mxu2 %vm235_vm2, %v13372_v51  ;;  %3416 = vmatpush.bf16.msrb.mxu0 %v3380_v52  ;;  %v3356_v54 = vpop.permute.xlu1 %3355 }
 0x2aa   : > { %11724 = vmatmul.msk.bf16.vlgmr.msrb.gmra.mxu3 %vm235_vm2, %v13372_v51  ;;  %3429 = vmatpush.bf16.msrb.mxu1 %v3383_v13  ;;  %v3371_v12 = vsel %vm3365_vm15, %v3354_v22, %v3356_v54  ;;  %v3372_v36 = vsel %vm3365_vm15, %v3356_v54, %v3358_v20 }
 0x2ab   : > { %3442 = vmatpush.bf16.msrb.mxu2 %v3386_v60  ;;  %4051 = vrot.lane.b32.xlu1 %v4028_v34, %s12201_s10  ;;  %v3395_v30 = vsel %vm239_vm1, %v3371_v12, 0  ;;  %v3398_v26 = vsel %vm239_vm1, %v3372_v36, 0 }
 0x2ac   : > { %v2523_v19 = vpop.f32.mrf.mxu2  ;;  %3455 = vmatpush.bf16.msrb.mxu3 %v3389_v29 }
 0x2ad   : > { %v2536_v44 = vpop.f32.mrf.mxu3  ;;  %v13424_v45 = vadd.f32 %v2523_v19, %v13332_v40  ;;  %v2499_v33 = vpop.f32.mrf.mxu0 }
 0x2ae   : > { %v13427_v25 = vadd.f32 %v2536_v44, %v13335_v9  ;;  %v2512_v41 = vpop.f32.mrf.mxu1  ;;  %v3373_v9 = vsel %vm3365_vm15, %v3358_v20, %v3360_v17 }
 0x2af   : > { %v3401_v27 = vsel %vm239_vm1, %v3373_v9, 0 }
 0x2b1   : > { %v3362_v53 = vpop.permute.xlu1 %3361 }
 0x2b3   : > { %4057 = vrot.lane.b32.xlu1 %v4034_v3, %s12201_s10 }
 0x2b4   : > { %v2525_v7 = vpop.f32.mrf.mxu2 }
 0x2b5   : > { %v2538_v14 = vpop.f32.mrf.mxu3  ;;  %v2549_v24 = vpop.f32.mrf.mxu0 }
 0x2b6   : > { %v2562_v40 = vpop.f32.mrf.mxu1  ;;  %v13435_v39 = vadd.f32 %v2549_v24, %v13353_v31  ;;  %v4024_v31 = vld.sshfl [vmem:[#allocation1 + $0x8] sm:$0xff pattern:$0x73625140]  ;;  %v4264_v14 = vld.sshfl [vmem:[#allocation1 + $0x20] sm:$0xff pattern:$0x73625140] }
 0x2b7   : > { %v13438_v8 = vadd.f32 %v2562_v40, %v13356_v32  ;;  %4038 = vst [vmem:[#allocation1] ss:$4 sm:$0xff] %v12274_v2  ;;  %v3364_v32 = vpop.permute.xlu2 %3363  ;;  %4047 = vrot.lane.b32.xlu2 %v4024_v31, %s12201_s10 }
 0x2b8   : > { %11725 = vmatmul.msk.bf16.vlgmr.msra.gmra.mxu0 %vm235_vm2, %v13372_v51  ;;  %11726 = vmatmul.msk.bf16.vlgmr.msra.gmra.mxu1 %vm235_vm2, %v13372_v51  ;;  %v3375_v42 = vsel %vm3365_vm15, %v3362_v53, %v3364_v32 }
 0x2b9   : > { %11727 = vmatmul.msk.bf16.vlgmr.msra.gmra.mxu2 %vm235_vm2, %v13372_v51  ;;  %3468 = vmatpush.bf16.msra.mxu0 %v3392_v47  ;;  %v3407_v57 = vsel %vm239_vm1, %v3375_v42, 0 }
 0x2ba   : > { %11728 = vmatmul.msk.bf16.vlgmr.msra.gmra.mxu3 %vm235_vm2, %v13372_v51  ;;  %3481 = vmatpush.bf16.msra.mxu1 %v3395_v30  ;;  %v3578_v51 = vpop.permute.xlu0 %3577 }
 0x2bb   : > { %3494 = vmatpush.bf16.msra.mxu2 %v3398_v26  ;;  %3507 = vmatpush.bf16.msra.mxu3 %v3401_v27 }
 0x2bc   : > { %v2575_v5 = vpop.f32.mrf.mxu2 }
 0x2bd   : > { %v2588_v48 = vpop.f32.mrf.mxu3  ;;  %v13455_v62 = vadd.f32 %v2575_v5, %v13364_v15  ;;  %v2551_v43 = vpop.f32.mrf.mxu0 }
 0x2be   : > { %v13458_v59 = vadd.f32 %v2588_v48, %v13367_v6  ;;  %v2564_v11 = vpop.f32.mrf.mxu1  ;;  %v4041_v16 = vld.sshfl [vmem:[#allocation1 + $0x8] sm:$0xff pattern:$0x73625140]  ;;  %v13460_v63 = vld.sshfl [vmem:[#allocation1 + $0x10] sm:$0xff pattern:$0x73625140]  ;;  %v3580_v15 = vpop.permute.xlu1 %3579  ;;  %v3374_v6 = vsel %vm3365_vm15, %v3360_v17, %v3362_v53 }
 0x2bf   : > { %4063 = vrot.lane.b32.xlu1 %v4041_v16, %s12201_s10  ;;  %v4039_v55 = vld.sshfl [vmem:[#allocation1] sm:$0xff pattern:$0x73625140]  ;;  %4053 = vrot.lane.b32.xlu2 %v4030_v56, %s12201_s10  ;;  %v3600_v38 = vsel %vm3599_vm0, %v3578_v51, %v3580_v15  ;;  %v3582_v52 = vpop.permute.xlu2 %3581  ;;  %v3404_v13 = vsel %vm239_vm1, %v3374_v6, 0  ;;  %vm6637_vm15 = vcmask 850944  }
 0x2c0   : > { %4061 = vrot.lane.b32.xlu0 %v4039_v55, %s12201_s10  ;;  %4253 = vst [vmem:[#allocation1] ss:$4 sm:$0xff] %v12268_v0  ;;  %v3601_v60 = vsel %vm3599_vm0, %v3580_v15, %v3582_v52 }
 0x2c1   : > { %v3617_v22 = vsel %vm239_vm1, %v3601_v60, 0 }
 0x2c2   : > { %v3584_v34 = vpop.permute.xlu0 %3583 }
 0x2c3   : > { %v3602_v40 = vsel %vm3599_vm0, %v3582_v52, %v3584_v34 }
 0x2c4   : > { %v2577_v10 = vpop.f32.mrf.mxu2  ;;  %v3620_v53 = vsel %vm239_vm1, %v3602_v40, 0 }
 0x2c5   : > { %v2590_v58 = vpop.f32.mrf.mxu3  ;;  %v2601_v50 = vpop.f32.mrf.mxu0 }
 0x2c6   : > { %v2614_v4 = vpop.f32.mrf.mxu1  ;;  %v13475_v49 = vadd.f32 %v2601_v50, %v13389_v18  ;;  %v3614_v18 = vsel %vm239_vm1, %v3600_v38, 0 }
 0x2c7   : > { %v13478_v23 = vadd.f32 %v2614_v4, %v13392_v37  ;;  %v4256_v37 = vld.sshfl [vmem:[#allocation1] sm:$0xff pattern:$0x73625140]  ;;  %v4258_v29 = vld.sshfl [vmem:[#allocation1 + $0x8] sm:$0xff pattern:$0x73625140]  ;;  %4059 = vrot.lane.b32.xlu2 %v4036_v61, %s12201_s10  ;;  %v3588_v7 = vpop.permute.xlu2 %3587 }
 0x2c8   : > { %11730 = vmatmul.msk.bf16.vlgmr.msrb.gmra.mxu0 %vm235_vm2, %v13471_v21  ;;  %11731 = vmatmul.msk.bf16.vlgmr.msrb.gmra.mxu1 %vm235_vm2, %v13471_v21  ;;  %v4262_v20 = vld.sshfl [vmem:[#allocation1 + $0x18] sm:$0xff pattern:$0x73625140]  ;;  %v4260_v55 = vld.sshfl [vmem:[#allocation1 + $0x10] sm:$0xff pattern:$0x73625140] }
 0x2c9   : > { %11732 = vmatmul.msk.bf16.vlgmr.msrb.gmra.mxu2 %vm235_vm2, %v13471_v21  ;;  %3520 = vmatpush.bf16.msrb.mxu0 %v3404_v13  ;;  %4272 = vst [vmem:[#allocation1] ss:$4 sm:$0xff] %v12274_v2  ;;  %v13551_v13 = vld [vmem:[%s16558_s1 + $0x3c] sm:$0xf] }
 0x2ca   : > { %11733 = vmatmul.msk.bf16.vlgmr.msrb.gmra.mxu3 %vm235_vm2, %v13471_v21  ;;  %3533 = vmatpush.bf16.msrb.mxu1 %v3407_v57  ;;  %v3590_v46 = vpop.permute.xlu0 %3589  ;;  %v4266_v61 = vld.sshfl [vmem:[#allocation1 + $0x28] sm:$0xff pattern:$0x73625140] }
 0x2cb   : > { %4279 = vrot.lane.b32.xlu0 %v4256_v37, %s12202_s15  ;;  %3650 = vmatpush.bf16.msrb.mxu2 %v3614_v18  ;;  %v3605_v47 = vsel %vm3599_vm0, %v3588_v7, %v3590_v46 }
 0x2cc   : > { %v2726_v19 = vpop.f32.mrf.mxu2  ;;  %3663 = vmatpush.bf16.msrb.mxu3 %v3617_v22  ;;  %4281 = vrot.lane.b32.xlu1 %v4258_v29, %s12202_s15  ;;  %v3629_v32 = vsel %vm239_vm1, %v3605_v47, 0 }
 0x2cd   : > { %v2739_v44 = vpop.f32.mrf.mxu3  ;;  %v13497_v33 = vadd.f32 %v2726_v19, %v13401_v35  ;;  %v2603_v54 = vpop.f32.mrf.mxu0 }
 0x2ce   : > { %v13500_v41 = vadd.f32 %v2739_v44, %v13404_v28  ;;  %v2616_v3 = vpop.f32.mrf.mxu1  ;;  %v3586_v17 = vpop.permute.xlu1 %3585 }
 0x2cf   : > { %v3603_v35 = vsel %vm3599_vm0, %v3584_v34, %v3586_v17  ;;  %v3604_v9 = vsel %vm3599_vm0, %v3586_v17, %v3588_v7  ;;  %4065 = vrot.lane.b32.xlu2 %v13460_v63, %s12201_s10  ;;  %v3594_v56 = vpop.permute.xlu2 %3593  ;;  %s12226_s10 = smov 28  }
 0x2d0   : > { %v3623_v27 = vsel %vm239_vm1, %v3603_v35, 0  ;;  %v3626_v31 = vsel %vm239_vm1, %v3604_v9, 0  ;;  %v4275_v4 = vld.sshfl [vmem:[#allocation1 + $0x8] sm:$0xff pattern:$0x73625140] }
 0x2d1   : > { %v4273_v60 = vld.sshfl [vmem:[#allocation1] sm:$0xff pattern:$0x73625140]  ;;  %v4277_v29 = vld.sshfl [vmem:[#allocation1 + $0x10] sm:$0xff pattern:$0x73625140] }
 0x2d2   : > { %v3596_v15 = vpop.permute.xlu0 %3595  ;;  %4487 = vst [vmem:[#allocation1] ss:$4 sm:$0xff] %v12268_v0 }
 0x2d3   : > { %4285 = vrot.lane.b32.xlu0 %v4262_v20, %s12202_s15 }
 0x2d4   : > { %v2728_v12 = vpop.f32.mrf.mxu2  ;;  %4287 = vrot.lane.b32.xlu1 %v4264_v14, %s12202_s15 }
 0x2d5   : > { %v2741_v24 = vpop.f32.mrf.mxu3  ;;  %v2752_v28 = vpop.f32.mrf.mxu0 }
 0x2d6   : > { %v2765_v36 = vpop.f32.mrf.mxu1  ;;  %v13512_v30 = vadd.f32 %v2752_v28, %v13424_v45  ;;  %v4270_v45 = vld.sshfl [vmem:[#allocation1 + $0x38] sm:$0xff pattern:$0x73625140]  ;;  %v3592_v5 = vpop.permute.xlu1 %3591 }
 0x2d7   : > { %v13515_v26 = vadd.f32 %v2765_v36, %v13427_v25  ;;  %v4268_v25 = vld.sshfl [vmem:[#allocation1 + $0x30] sm:$0xff pattern:$0x73625140]  ;;  %4283 = vrot.lane.b32.xlu2 %v4260_v55, %s12202_s15  ;;  %v3606_v6 = vsel %vm3599_vm0, %v3590_v46, %v3592_v5  ;;  %v3607_v42 = vsel %vm3599_vm0, %v3592_v5, %v3594_v56  ;;  %v3812_v37 = vpop.permute.xlu2 %3811 }
 0x2d8   : > { %11734 = vmatmul.msk.bf16.vlgmr.msra.gmra.mxu0 %vm235_vm2, %v13471_v21  ;;  %11735 = vmatmul.msk.bf16.vlgmr.msra.gmra.mxu1 %vm235_vm2, %v13471_v21  ;;  %v3632_v34 = vsel %vm239_vm1, %v3606_v6, 0  ;;  %v3635_v18 = vsel %vm239_vm1, %v3607_v42, 0  ;;  %4489 = vst [vmem:[#allocation1 + $0x20] ss:$4 sm:$0xff] %v12270_v1 }
 0x2d9   : > { %11736 = vmatmul.msk.bf16.vlgmr.msra.gmra.mxu2 %vm235_vm2, %v13471_v21  ;;  %3676 = vmatpush.bf16.msra.mxu0 %v3620_v53  ;;  %v4494_v14 = vld.sshfl [vmem:[#allocation1 + $0x10] sm:$0xff pattern:$0x73625140]  ;;  %v4492_v12 = vld.sshfl [vmem:[#allocation1 + $0x8] sm:$0xff pattern:$0x73625140] }
 0x2da   : > { %11737 = vmatmul.msk.bf16.vlgmr.msra.gmra.mxu3 %vm235_vm2, %v13471_v21  ;;  %3689 = vmatpush.bf16.msra.mxu1 %v3623_v27  ;;  %v3814_v17 = vpop.permute.xlu0 %3813 }
 0x2db   : > { %3702 = vmatpush.bf16.msra.mxu2 %v3626_v31  ;;  %3715 = vmatpush.bf16.msra.mxu3 %v3629_v32  ;;  %v3834_v35 = vsel %vm3833_vm3, %v3812_v37, %v3814_v17 }
 0x2dc   : > { %v2778_v48 = vpop.f32.mrf.mxu2  ;;  %4293 = vrot.lane.b32.xlu1 %v4270_v45, %s12202_s15  ;;  %4291 = vrot.lane.b32.xlu0 %v4268_v25, %s12202_s15  ;;  %v3848_v27 = vsel %vm239_vm1, %v3834_v35, 0 }
 0x2dd   : > { %v2791_v43 = vpop.f32.mrf.mxu3  ;;  %v13532_v11 = vadd.f32 %v2778_v48, %v13435_v39  ;;  %v2754_v16 = vpop.f32.mrf.mxu0 }
 0x2de   : > { %v13535_v51 = vadd.f32 %v2791_v43, %v13438_v8  ;;  %v2767_v63 = vpop.f32.mrf.mxu1  ;;  %v3608_v8 = vsel %vm3599_vm0, %v3594_v56, %v3596_v15  ;;  %v3598_v57 = vpop.permute.xlu1 %3597  ;;  %v4496_v16 = vld.sshfl [vmem:[#allocation1 + $0x18] sm:$0xff pattern:$0x73625140] }
 0x2df   : > { %v3609_v22 = vsel %vm3599_vm0, %v3596_v15, %v3598_v57  ;;  %4289 = vrot.lane.b32.xlu2 %v4266_v61, %s12202_s15  ;;  %v4498_v25 = vld.sshfl [vmem:[#allocation1 + $0x20] sm:$0xff pattern:$0x73625140]  ;;  %v4504_v6 = vld.sshfl [vmem:[#allocation1 + $0x38] sm:$0xff pattern:$0x73625140] }
 0x2e0   : > { %vm6866_vm0 = vcmask 842752  }
 0x2e4   : > { %v2780_v10 = vpop.f32.mrf.mxu2  ;;  %4297 = vrot.lane.b32.xlu0 %v4275_v4, %s12202_s15  ;;  %4299 = vrot.lane.b32.xlu1 %v4277_v29, %s12202_s15 }
 0x2e5   : > { %v2793_v58 = vpop.f32.mrf.mxu3  ;;  %v2804_v39 = vpop.f32.mrf.mxu0  ;;  %v4490_v10 = vld.sshfl [vmem:[#allocation1] sm:$0xff pattern:$0x73625140] }
 0x2e6   : > { %v2817_v50 = vpop.f32.mrf.mxu1  ;;  %v13543_v38 = vadd.f32 %v2804_v39, %v13455_v62  ;;  %v3638_v62 = vsel %vm239_vm1, %v3608_v8, 0  ;;  %v3818_v46 = vpop.permute.xlu2 %3817  ;;  %4506 = vst [vmem:[#allocation1] ss:$4 sm:$0xff] %v12274_v2 }
 0x2e7   : > { %v13546_v52 = vadd.f32 %v2817_v50, %v13458_v59  ;;  %v3641_v59 = vsel %vm239_vm1, %v3609_v22, 0  ;;  %4295 = vrot.lane.b32.xlu2 %v4273_v60, %s12202_s15  ;;  %v3820_v53 = vpop.permute.xlu0 %3819  ;;  %s12227_s15 = smov 27  }
 0x2e8   : > { %11738 = vmatmul.msk.bf16.vlgmr.msrb.gmra.mxu0 %vm235_vm2, %v13471_v21  ;;  %11739 = vmatmul.msk.bf16.vlgmr.msrb.gmra.mxu1 %vm235_vm2, %v13471_v21  ;;  %v3837_v32 = vsel %vm3833_vm3, %v3818_v46, %v3820_v53 }
 0x2e9   : > { %11741 = vmatmul.msk.bf16.vlgmr.msrb.gmra.mxu2 %vm235_vm2, %v13551_v13  ;;  %3728 = vmatpush.bf16.msrb.mxu0 %v3632_v34 }
 0x2ea   : > { %11742 = vmatmul.msk.bf16.vlgmr.msrb.gmra.mxu3 %vm235_vm2, %v13551_v13  ;;  %3741 = vmatpush.bf16.msrb.mxu1 %v3635_v18 }
 0x2eb   : > { %3754 = vmatpush.bf16.msrb.mxu2 %v3638_v62  ;;  %3767 = vmatpush.bf16.msrb.mxu3 %v3641_v59 }
 0x2ec   : > { %v2830_v21 = vpop.f32.mrf.mxu2  ;;  %4515 = vrot.lane.b32.xlu0 %v4492_v12, %s12203_s18  ;;  %4517 = vrot.lane.b32.xlu1 %v4494_v14, %s12203_s18 }
 0x2ed   : > { %v2843_v19 = vpop.f32.mrf.mxu3  ;;  %v13572_v44 = vadd.f32 %v2830_v21, %v13475_v49  ;;  %v2806_v3 = vpop.f32.mrf.mxu0  ;;  %v4507_v37 = vld.sshfl [vmem:[#allocation1] sm:$0xff pattern:$0x73625140]  ;;  %v13636_v61 = vld.sshfl [vmem:[#allocation1 + $0x8] sm:$0xff pattern:$0x73625140] }
 0x2ee   : > { %v13575_v54 = vadd.f32 %v2843_v19, %v13478_v23  ;;  %v2819_v20 = vpop.f32.mrf.mxu1  ;;  %v3816_v7 = vpop.permute.xlu1 %3815 }
 0x2ef   : > { %v3835_v49 = vsel %vm3833_vm3, %v3814_v17, %v3816_v7  ;;  %v3836_v36 = vsel %vm3833_vm3, %v3816_v7, %v3818_v46  ;;  %4513 = vrot.lane.b32.xlu2 %v4490_v10, %s12203_s18  ;;  %v3824_v58 = vpop.permute.xlu2 %3823  ;;  %v4511_v7 = vld.sshfl [vmem:[#allocation1 + $0x10] sm:$0xff pattern:$0x73625140] }
 0x2f0   : > { %v3851_v31 = vsel %vm239_vm1, %v3835_v49, 0  ;;  %v3854_v45 = vsel %vm239_vm1, %v3836_v36, 0  ;;  %4721 = vst [vmem:[#allocation1] ss:$4 sm:$0xff] %v12268_v0 }
 0x2f4   : > { %v2832_v24 = vpop.f32.mrf.mxu2  ;;  %4521 = vrot.lane.b32.xlu0 %v4498_v25, %s12203_s18 }
 0x2f5   : > { %v2845_v40 = vpop.f32.mrf.mxu3  ;;  %v2955_v23 = vpop.f32.mrf.mxu0 }
 0x2f6   : > { %v2968_v28 = vpop.f32.mrf.mxu1  ;;  %v13584_v9 = vadd.f32 %v2955_v23, %v13497_v33  ;;  %v3857_v33 = vsel %vm239_vm1, %v3837_v32, 0  ;;  %v3822_v5 = vpop.permute.xlu1 %3821 }
 0x2f7   : > { %v13587_v47 = vadd.f32 %v2968_v28, %v13500_v41  ;;  %v4500_v41 = vld.sshfl [vmem:[#allocation1 + $0x28] sm:$0xff pattern:$0x73625140]  ;;  %v3838_v8 = vsel %vm3833_vm3, %v3820_v53, %v3822_v5  ;;  %4519 = vrot.lane.b32.xlu2 %v4496_v16, %s12203_s18  ;;  %v3830_v29 = vpop.permute.xlu2 %3829  ;;  %v4724_v23 = vld.sshfl [vmem:[#allocation1] sm:$0xff pattern:$0x73625140] }
 0x2f8   : > { %11743 = vmatmul.msk.bf16.vlgmr.msra.gmra.mxu0 %vm235_vm2, %v13551_v13  ;;  %11744 = vmatmul.msk.bf16.vlgmr.msra.gmra.mxu1 %vm235_vm2, %v13551_v13  ;;  %v3860_v22 = vsel %vm239_vm1, %v3838_v8, 0  ;;  %v4728_v25 = vld.sshfl [vmem:[#allocation1 + $0x10] sm:$0xff pattern:$0x73625140] }
 0x2f9   : > { %11745 = vmatmul.msk.bf16.vlgmr.msra.gmra.mxu2 %vm235_vm2, %v13551_v13  ;;  %3884 = vmatpush.bf16.msra.mxu0 %v3848_v27  ;;  %v3826_v42 = vpop.permute.xlu0 %3825 }
 0x2fa   : > { %11746 = vmatmul.msk.bf16.vlgmr.msra.gmra.mxu3 %vm235_vm2, %v13551_v13  ;;  %3897 = vmatpush.bf16.msra.mxu1 %v3851_v31  ;;  %v3840_v57 = vsel %vm3833_vm3, %v3824_v58, %v3826_v42 }
 0x2fb   : > { %3910 = vmatpush.bf16.msra.mxu2 %v3854_v45  ;;  %3923 = vmatpush.bf16.msra.mxu3 %v3857_v33 }
 0x2fc   : > { %v2981_v48 = vpop.f32.mrf.mxu2  ;;  %4523 = vrot.lane.b32.xlu1 %v4500_v41, %s12203_s18  ;;  %4527 = vrot.lane.b32.xlu0 %v4504_v6, %s12203_s18  ;;  %v4502_v41 = vld.sshfl [vmem:[#allocation1 + $0x30] sm:$0xff pattern:$0x73625140] }
 0x2fd   : > { %v2994_v43 = vpop.f32.mrf.mxu3  ;;  %v13605_v63 = vadd.f32 %v2981_v48, %v13512_v30  ;;  %v2957_v56 = vpop.f32.mrf.mxu0  ;;  %v3839_v30 = vsel %vm3833_vm3, %v3822_v5, %v3824_v58  ;;  %4723 = vst [vmem:[#allocation1 + $0x20] ss:$4 sm:$0xff] %v12270_v1  ;;  %v4730_v5 = vld.sshfl [vmem:[#allocation1 + $0x18] sm:$0xff pattern:$0x73625140] }
 0x2fe   : > { %v13608_v55 = vadd.f32 %v2994_v43, %v13515_v26  ;;  %v2970_v15 = vpop.f32.mrf.mxu1  ;;  %v3863_v62 = vsel %vm239_vm1, %v3839_v30, 0 }
 0x2ff   : > { %4525 = vrot.lane.b32.xlu2 %v4502_v41, %s12203_s18 }
 0x302   : > { %v3828_v18 = vpop.permute.xlu1 %3827 }
 0x303   : > { %v3841_v59 = vsel %vm3833_vm3, %v3826_v42, %v3828_v18  ;;  %v3832_v14 = vpop.permute.xlu0 %3831  ;;  %v3842_v40 = vsel %vm3833_vm3, %v3828_v18, %v3830_v29 }
 0x304   : > { %v2983_v39 = vpop.f32.mrf.mxu2  ;;  %4529 = vrot.lane.b32.xlu1 %v4507_v37, %s12203_s18  ;;  %4533 = vrot.lane.b32.xlu0 %v4511_v7, %s12203_s18  ;;  %v3843_v35 = vsel %vm3833_vm3, %v3830_v29, %v3832_v14  ;;  %v3872_v31 = vsel %vm239_vm1, %v3842_v40, 0  ;;  %v4734_v42 = vld.sshfl [vmem:[#allocation1 + $0x28] sm:$0xff pattern:$0x73625140]  ;;  %vm7095_vm3 = vcmask 834560  }
 0x305   : > { %v2996_v50 = vpop.f32.mrf.mxu3  ;;  %v3007_v26 = vpop.f32.mrf.mxu0  ;;  %v3875_v32 = vsel %vm239_vm1, %v3843_v35, 0  ;;  %v4736_v29 = vld.sshfl [vmem:[#allocation1 + $0x30] sm:$0xff pattern:$0x73625140] }
 0x306   : > { %v3020_v4 = vpop.f32.mrf.mxu1  ;;  %v13617_v60 = vadd.f32 %v3007_v26, %v13532_v11  ;;  %v3866_v11 = vsel %vm239_vm1, %v3840_v57, 0  ;;  %v4732_v41 = vld.sshfl [vmem:[#allocation1 + $0x20] sm:$0xff pattern:$0x73625140] }
 0x307   : > { %v13620_v34 = vadd.f32 %v3020_v4, %v13535_v51  ;;  %v3869_v51 = vsel %vm239_vm1, %v3841_v59, 0  ;;  %4531 = vrot.lane.b32.xlu2 %v13636_v61, %s12203_s18  ;;  %s12228_s18 = smov 26  }
 0x308   : > { %11747 = vmatmul.msk.bf16.vlgmr.msrb.gmra.mxu0 %vm235_vm2, %v13551_v13  ;;  %11748 = vmatmul.msk.bf16.vlgmr.msrb.gmra.mxu1 %vm235_vm2, %v13551_v13 }
 0x309   : > { %11749 = vmatmul.msk.bf16.vlgmr.msrb.gmra.mxu2 %vm235_vm2, %v13551_v13  ;;  %3936 = vmatpush.bf16.msrb.mxu0 %v3860_v22 }
 0x30a   : > { %11750 = vmatmul.msk.bf16.vlgmr.msrb.gmra.mxu3 %vm235_vm2, %v13551_v13  ;;  %3949 = vmatpush.bf16.msrb.mxu1 %v3863_v62 }
 0x30b   : > { %3962 = vmatpush.bf16.msrb.mxu2 %v3866_v11  ;;  %3975 = vmatpush.bf16.msrb.mxu3 %v3869_v51 }
 0x30c   : > { %v3033_v21 = vpop.f32.mrf.mxu2  ;;  %4747 = vrot.lane.b32.xlu1 %v4724_v23, %s12204_s21  ;;  %4751 = vrot.lane.b32.xlu0 %v4728_v25, %s12204_s21 }
 0x30d   : > { %v3046_v19 = vpop.f32.mrf.mxu3  ;;  %v13640_v3 = vadd.f32 %v3033_v21, %v13543_v38  ;;  %v3009_v17 = vpop.f32.mrf.mxu0 }
 0x30e   : > { %v13643_v20 = vadd.f32 %v3046_v19, %v13546_v52  ;;  %v3022_v13 = vpop.f32.mrf.mxu1  ;;  %v4046_v46 = vpop.permute.xlu1 %4045  ;;  %v13652_v52 = vld [vmem:[%s16558_s1 + $0x40] sm:$0xf] }
 0x30f   : > { %v4050_v53 = vpop.permute.xlu0 %4049 }
 0x311   : > { %v4048_v27 = vpop.permute.xlu2 %4047 }
 0x312   : > { %v4068_v45 = vsel %vm4067_vm4, %v4046_v46, %v4048_v27  ;;  %v4069_v33 = vsel %vm4067_vm4, %v4048_v27, %v4050_v53 }
 0x314   : > { %v3035_v12 = vpop.f32.mrf.mxu2  ;;  %4753 = vrot.lane.b32.xlu1 %v4730_v5, %s12204_s21  ;;  %4757 = vrot.lane.b32.xlu0 %v4734_v42, %s12204_s21 }
 0x315   : > { %v3048_v24 = vpop.f32.mrf.mxu3  ;;  %v3059_v38 = vpop.f32.mrf.mxu0 }
 0x316   : > { %v3072_v49 = vpop.f32.mrf.mxu1  ;;  %v13655_v28 = vadd.f32 %v3059_v38, %v13572_v44  ;;  %v4082_v44 = vsel %vm239_vm1, %v4068_v45, 0 }
 0x317   : > { %v13658_v36 = vadd.f32 %v3072_v49, %v13575_v54  ;;  %v4085_v54 = vsel %vm239_vm1, %v4069_v33, 0  ;;  %v4056_v39 = vpop.permute.xlu0 %4055 }
 0x318   : > { %11752 = vmatmul.msk.bf16.vlgmr.msra.gmra.mxu0 %vm235_vm2, %v13652_v52  ;;  %11753 = vmatmul.msk.bf16.vlgmr.msra.gmra.mxu1 %vm235_vm2, %v13652_v52 }
 0x319   : > { %11754 = vmatmul.msk.bf16.vlgmr.msra.gmra.mxu2 %vm235_vm2, %v13652_v52  ;;  %3988 = vmatpush.bf16.msra.mxu0 %v3872_v31  ;;  %v4054_v6 = vpop.permute.xlu2 %4053  ;;  %v13735_v31 = vld [vmem:[%s16558_s1 + $0x44] sm:$0xf] }
 0x31a   : > { %11755 = vmatmul.msk.bf16.vlgmr.msra.gmra.mxu3 %vm235_vm2, %v13652_v52  ;;  %4001 = vmatpush.bf16.msra.mxu1 %v3875_v32  ;;  %v4072_v4 = vsel %vm4067_vm4, %v4054_v6, %v4056_v39 }
 0x31b   : > { %4118 = vmatpush.bf16.msra.mxu2 %v4082_v44  ;;  %4131 = vmatpush.bf16.msra.mxu3 %v4085_v54  ;;  %v4094_v51 = vsel %vm239_vm1, %v4072_v4, 0 }
 0x31c   : > { %v3184_v48 = vpop.f32.mrf.mxu2  ;;  %4759 = vrot.lane.b32.xlu1 %v4736_v29, %s12204_s21 }
 0x31d   : > { %v3197_v43 = vpop.f32.mrf.mxu3  ;;  %v13679_v16 = vadd.f32 %v3184_v48, %v13584_v9  ;;  %v3061_v15 = vpop.f32.mrf.mxu0 }
 0x31e   : > { %v13682_v56 = vadd.f32 %v3197_v43, %v13587_v47  ;;  %v3074_v10 = vpop.f32.mrf.mxu1  ;;  %v4052_v58 = vpop.permute.xlu1 %4051 }
 0x31f   : > { %v4070_v30 = vsel %vm4067_vm4, %v4050_v53, %v4052_v58  ;;  %v4071_v26 = vsel %vm4067_vm4, %v4052_v58, %v4054_v6  ;;  %v4738_v6 = vld.sshfl [vmem:[#allocation1 + $0x38] sm:$0xff pattern:$0x73625140] }
 0x320   : > { %v4088_v62 = vsel %vm239_vm1, %v4070_v30, 0  ;;  %v4091_v59 = vsel %vm239_vm1, %v4071_v26, 0  ;;  %4957 = vst [vmem:[#allocation1 + $0x20] ss:$4 sm:$0xff] %v12270_v1 }
 0x324   : > { %v3186_v50 = vpop.f32.mrf.mxu2 }
 0x325   : > { %v3199_v8 = vpop.f32.mrf.mxu3  ;;  %v3210_v9 = vpop.f32.mrf.mxu0 }
 0x326   : > { %v3223_v47 = vpop.f32.mrf.mxu1  ;;  %v13692_v57 = vadd.f32 %v3210_v9, %v13605_v63  ;;  %v4058_v22 = vpop.permute.xlu1 %4057 }
 0x327   : > { %v13695_v18 = vadd.f32 %v3223_v47, %v13608_v55  ;;  %v4073_v11 = vsel %vm4067_vm4, %v4056_v39, %v4058_v22  ;;  %v4060_v63 = vpop.permute.xlu2 %4059  ;;  %v4726_v55 = vld.sshfl [vmem:[#allocation1 + $0x8] sm:$0xff pattern:$0x73625140]  ;;  %v4966_v29 = vld.sshfl [vmem:[#allocation1 + $0x20] sm:$0xff pattern:$0x73625140] }
 0x328   : > { %11756 = vmatmul.msk.bf16.vlgmr.msrb.gmra.mxu0 %vm235_vm2, %v13652_v52  ;;  %11757 = vmatmul.msk.bf16.vlgmr.msrb.gmra.mxu1 %vm235_vm2, %v13652_v52  ;;  %v4097_v37 = vsel %vm239_vm1, %v4073_v11, 0  ;;  %4740 = vst [vmem:[#allocation1] ss:$4 sm:$0xff] %v12274_v2 }
 0x329   : > { %11758 = vmatmul.msk.bf16.vlgmr.msrb.gmra.mxu2 %vm235_vm2, %v13652_v52  ;;  %4144 = vmatpush.bf16.msrb.mxu0 %v4088_v62 }
 0x32a   : > { %11759 = vmatmul.msk.bf16.vlgmr.msrb.gmra.mxu3 %vm235_vm2, %v13652_v52  ;;  %4157 = vmatpush.bf16.msrb.mxu1 %v4091_v59 }
 0x32b   : > { %4170 = vmatpush.bf16.msrb.mxu2 %v4094_v51  ;;  %4183 = vmatpush.bf16.msrb.mxu3 %v4097_v37 }
 0x32c   : > { %v3236_v61 = vpop.f32.mrf.mxu2  ;;  %4749 = vrot.lane.b32.xlu2 %v4726_v55, %s12204_s21 }
 0x32d   : > { %v3249_v21 = vpop.f32.mrf.mxu3  ;;  %v13714_v19 = vadd.f32 %v3236_v61, %v13617_v60  ;;  %v3212_v13 = vpop.f32.mrf.mxu0  ;;  %v4074_v60 = vsel %vm4067_vm4, %v4058_v22, %v4060_v63 }
 0x32e   : > { %v13717_v17 = vadd.f32 %v3249_v21, %v13620_v34  ;;  %v3225_v7 = vpop.f32.mrf.mxu1  ;;  %v4100_v45 = vsel %vm239_vm1, %v4074_v60, 0 }
 0x32f   : > { %v4741_v14 = vld.sshfl [vmem:[#allocation1] sm:$0xff pattern:$0x73625140]  ;;  %v13719_v46 = vld.sshfl [vmem:[#allocation1 + $0x10] sm:$0xff pattern:$0x73625140]  ;;  %v4066_v24 = vpop.permute.xlu2 %4065 }
 0x330   : > { %4763 = vrot.lane.b32.xlu0 %v4741_v14, %s12204_s21  ;;  %v4743_v12 = vld.sshfl [vmem:[#allocation1 + $0x8] sm:$0xff pattern:$0x73625140] }
 0x331   : > { %4955 = vst [vmem:[#allocation1] ss:$4 sm:$0xff] %v12268_v0  ;;  %v4064_v40 = vpop.permute.xlu1 %4063  ;;  %4765 = vrot.lane.b32.xlu1 %v4743_v12, %s12204_s21 }
 0x332   : > { %v4077_v23 = vsel %vm4067_vm4, %v4064_v40, %v4066_v24  ;;  %v4062_v32 = vpop.permute.xlu0 %4061  ;;  %v4970_v24 = vld.sshfl [vmem:[#allocation1 + $0x30] sm:$0xff pattern:$0x73625140] }
 0x333   : > { %v4075_v33 = vsel %vm4067_vm4, %v4060_v63, %v4062_v32  ;;  %v4076_v44 = vsel %vm4067_vm4, %v4062_v32, %v4064_v40  ;;  %v4109_v54 = vsel %vm239_vm1, %v4077_v23, 0  ;;  %vm7324_vm4 = vcmask 826368  }
 0x334   : > { %v3238_v35 = vpop.f32.mrf.mxu2  ;;  %4755 = vrot.lane.b32.xlu2 %v4732_v41, %s12204_s21 }
 0x335   : > { %v3251_v38 = vpop.f32.mrf.mxu3  ;;  %v3262_v34 = vpop.f32.mrf.mxu0  ;;  %v4972_v35 = vld.sshfl [vmem:[#allocation1 + $0x38] sm:$0xff pattern:$0x73625140] }
 0x336   : > { %v3275_v49 = vpop.f32.mrf.mxu1  ;;  %v13727_v53 = vadd.f32 %v3262_v34, %v13640_v3  ;;  %v4103_v3 = vsel %vm239_vm1, %v4075_v33, 0 }
 0x337   : > { %v13730_v27 = vadd.f32 %v3275_v49, %v13643_v20  ;;  %v4106_v20 = vsel %vm239_vm1, %v4076_v44, 0  ;;  %v4284_v5 = vpop.permute.xlu2 %4283 }
 0x338   : > { %11760 = vmatmul.msk.bf16.vlgmr.msra.gmra.mxu0 %vm235_vm2, %v13652_v52  ;;  %11761 = vmatmul.msk.bf16.vlgmr.msra.gmra.mxu1 %vm235_vm2, %v13652_v52  ;;  %v4958_v25 = vld.sshfl [vmem:[#allocation1] sm:$0xff pattern:$0x73625140]  ;;  %v4960_v42 = vld.sshfl [vmem:[#allocation1 + $0x8] sm:$0xff pattern:$0x73625140] }
 0x339   : > { %11763 = vmatmul.msk.bf16.vlgmr.msra.gmra.mxu2 %vm235_vm2, %v13735_v31  ;;  %4196 = vmatpush.bf16.msra.mxu0 %v4100_v45  ;;  %v4964_v8 = vld.sshfl [vmem:[#allocation1 + $0x18] sm:$0xff pattern:$0x73625140] }
 0x33a   : > { %11764 = vmatmul.msk.bf16.vlgmr.msra.gmra.mxu3 %vm235_vm2, %v13735_v31  ;;  %4209 = vmatpush.bf16.msra.mxu1 %v4103_v3 }
 0x33b   : > { %4222 = vmatpush.bf16.msra.mxu2 %v4106_v20  ;;  %4235 = vmatpush.bf16.msra.mxu3 %v4109_v54 }
 0x33c   : > { %v3288_v52 = vpop.f32.mrf.mxu2  ;;  %4981 = vrot.lane.b32.xlu0 %v4958_v25, %s12205_s24  ;;  %4983 = vrot.lane.b32.xlu1 %v4960_v42, %s12205_s24  ;;  %v4962_v25 = vld.sshfl [vmem:[#allocation1 + $0x10] sm:$0xff pattern:$0x73625140] }
 0x33d   : > { %v3301_v48 = vpop.f32.mrf.mxu3  ;;  %v13754_v43 = vadd.f32 %v3288_v52, %v13655_v28  ;;  %v3264_v10 = vpop.f32.mrf.mxu0  ;;  %4761 = vrot.lane.b32.xlu2 %v4738_v6, %s12204_s21  ;;  %4974 = vst [vmem:[#allocation1] ss:$4 sm:$0xff] %v12274_v2 }
 0x33e   : > { %v13757_v15 = vadd.f32 %v3301_v48, %v13658_v36  ;;  %v3277_v58 = vpop.f32.mrf.mxu1  ;;  %v4280_v39 = vpop.permute.xlu0 %4279 }
 0x33f   : > { %v4282_v50 = vpop.permute.xlu1 %4281 }
 0x340   : > { %v4302_v28 = vsel %vm4301_vm5, %v4280_v39, %v4282_v50  ;;  %v4303_v9 = vsel %vm4301_vm5, %v4282_v50, %v4284_v5 }
 0x341   : > { %v4316_v51 = vsel %vm239_vm1, %v4302_v28, 0  ;;  %v4319_v63 = vsel %vm239_vm1, %v4303_v9, 0 }
 0x344   : > { %v3290_v30 = vpop.f32.mrf.mxu2  ;;  %4987 = vrot.lane.b32.xlu0 %v4964_v8, %s12205_s24  ;;  %4989 = vrot.lane.b32.xlu1 %v4966_v29, %s12205_s24  ;;  %v4977_v42 = vld.sshfl [vmem:[#allocation1 + $0x8] sm:$0xff pattern:$0x73625140]  ;;  %v4975_v39 = vld.sshfl [vmem:[#allocation1] sm:$0xff pattern:$0x73625140] }
 0x345   : > { %v3303_v26 = vpop.f32.mrf.mxu3  ;;  %v3418_v36 = vpop.f32.mrf.mxu0  ;;  %4767 = vrot.lane.b32.xlu2 %v13719_v46, %s12204_s21  ;;  %v4979_v8 = vld.sshfl [vmem:[#allocation1 + $0x10] sm:$0xff pattern:$0x73625140]  ;;  %s12229_s21 = smov 25  }
 0x346   : > { %v3431_v47 = vpop.f32.mrf.mxu1  ;;  %v13766_v4 = vadd.f32 %v3418_v36, %v13679_v16  ;;  %v4286_v62 = vpop.permute.xlu0 %4285  ;;  %5189 = vst [vmem:[#allocation1] ss:$4 sm:$0xff] %v12268_v0  ;;  %v13836_v36 = vld [vmem:[%s16558_s1 + $0x48] sm:$0xf] }
 0x347   : > { %v13769_v22 = vadd.f32 %v3431_v47, %v13682_v56  ;;  %v4288_v59 = vpop.permute.xlu1 %4287  ;;  %v4304_v11 = vsel %vm4301_vm5, %v4284_v5, %v4286_v62  ;;  %v4290_v56 = vpop.permute.xlu2 %4289 }
 0x348   : > { %v4305_v37 = vsel %vm4301_vm5, %v4286_v62, %v4288_v59  ;;  %11765 = vmatmul.msk.bf16.vlgmr.msrb.gmra.mxu0 %vm235_vm2, %v13735_v31  ;;  %11766 = vmatmul.msk.bf16.vlgmr.msrb.gmra.mxu1 %vm235_vm2, %v13735_v31  ;;  %v4322_v16 = vsel %vm239_vm1, %v4304_v11, 0  ;;  %v4306_v23 = vsel %vm4301_vm5, %v4288_v59, %v4290_v56 }
 0x349   : > { %v4325_v55 = vsel %vm239_vm1, %v4305_v37, 0  ;;  %11767 = vmatmul.msk.bf16.vlgmr.msrb.gmra.mxu2 %vm235_vm2, %v13735_v31  ;;  %4352 = vmatpush.bf16.msrb.mxu0 %v4316_v51  ;;  %v4328_v3 = vsel %vm239_vm1, %v4306_v23, 0 }
 0x34a   : > { %11768 = vmatmul.msk.bf16.vlgmr.msrb.gmra.mxu3 %vm235_vm2, %v13735_v31  ;;  %4365 = vmatpush.bf16.msrb.mxu1 %v4319_v63 }
 0x34b   : > { %4378 = vmatpush.bf16.msrb.mxu2 %v4322_v16  ;;  %4391 = vmatpush.bf16.msrb.mxu3 %v4325_v55 }
 0x34c   : > { %v3444_v61 = vpop.f32.mrf.mxu2  ;;  %4993 = vrot.lane.b32.xlu0 %v4970_v24, %s12205_s24  ;;  %4995 = vrot.lane.b32.xlu1 %v4972_v35, %s12205_s24 }
 0x34d   : > { %v3457_v21 = vpop.f32.mrf.mxu3  ;;  %v13789_v13 = vadd.f32 %v3444_v61, %v13692_v57  ;;  %v3420_v14 = vpop.f32.mrf.mxu0  ;;  %4985 = vrot.lane.b32.xlu2 %v4962_v25, %s12205_s24  ;;  %v5194_v55 = vld.sshfl [vmem:[#allocation1 + $0x8] sm:$0xff pattern:$0x73625140] }
 0x34e   : > { %v13792_v7 = vadd.f32 %v3457_v21, %v13695_v18  ;;  %v3433_v12 = vpop.f32.mrf.mxu1  ;;  %v4292_v40 = vpop.permute.xlu0 %4291 }
 0x34f   : > { %v4294_v38 = vpop.permute.xlu1 %4293  ;;  %v4296_v60 = vpop.permute.xlu2 %4295  ;;  %v4307_v46 = vsel %vm4301_vm5, %v4290_v56, %v4292_v40  ;;  %v5196_v56 = vld.sshfl [vmem:[#allocation1 + $0x10] sm:$0xff pattern:$0x73625140] }
 0x350   : > { %v4308_v32 = vsel %vm4301_vm5, %v4292_v40, %v4294_v38  ;;  %v4309_v45 = vsel %vm4301_vm5, %v4294_v38, %v4296_v60  ;;  %v4331_v20 = vsel %vm239_vm1, %v4307_v46, 0 }
 0x351   : > { %v4334_v54 = vsel %vm239_vm1, %v4308_v32, 0  ;;  %v4337_v41 = vsel %vm239_vm1, %v4309_v45, 0 }
 0x354   : > { %v3446_v34 = vpop.f32.mrf.mxu2  ;;  %4999 = vrot.lane.b32.xlu0 %v4977_v42, %s12205_s24  ;;  %5001 = vrot.lane.b32.xlu1 %v4979_v8, %s12205_s24 }
 0x355   : > { %v3459_v49 = vpop.f32.mrf.mxu3  ;;  %v3470_v57 = vpop.f32.mrf.mxu0 }
 0x356   : > { %v3483_v18 = vpop.f32.mrf.mxu1  ;;  %v13801_v33 = vadd.f32 %v3470_v57, %v13714_v19  ;;  %v4298_v19 = vpop.permute.xlu0 %4297 }
 0x357   : > { %v13804_v44 = vadd.f32 %v3483_v18, %v13717_v17  ;;  %v4300_v6 = vpop.permute.xlu1 %4299  ;;  %v4514_v50 = vpop.permute.xlu2 %4513 }
 0x358   : > { %11769 = vmatmul.msk.bf16.vlgmr.msra.gmra.mxu0 %vm235_vm2, %v13735_v31  ;;  %11770 = vmatmul.msk.bf16.vlgmr.msra.gmra.mxu1 %vm235_vm2, %v13735_v31  ;;  %v4311_v26 = vsel %vm4301_vm5, %v4298_v19, %v4300_v6 }
 0x359   : > { %11771 = vmatmul.msk.bf16.vlgmr.msra.gmra.mxu2 %vm235_vm2, %v13735_v31  ;;  %4404 = vmatpush.bf16.msra.mxu0 %v4328_v3  ;;  %v4343_v63 = vsel %vm239_vm1, %v4311_v26, 0 }
 0x35a   : > { %11772 = vmatmul.msk.bf16.vlgmr.msra.gmra.mxu3 %vm235_vm2, %v13735_v31  ;;  %4417 = vmatpush.bf16.msra.mxu1 %v4331_v20  ;;  %v4968_v31 = vld.sshfl [vmem:[#allocation1 + $0x28] sm:$0xff pattern:$0x73625140] }
 0x35b   : > { %4430 = vmatpush.bf16.msra.mxu2 %v4334_v54  ;;  %4443 = vmatpush.bf16.msra.mxu3 %v4337_v41  ;;  %5191 = vst [vmem:[#allocation1 + $0x20] ss:$4 sm:$0xff] %v12270_v1 }
 0x35c   : > { %v3496_v17 = vpop.f32.mrf.mxu2  ;;  %4991 = vrot.lane.b32.xlu2 %v4968_v31, %s12205_s24  ;;  %5219 = vrot.lane.b32.xlu1 %v5196_v56, %s12206_s27 }
 0x35d   : > { %v3509_v5 = vpop.f32.mrf.mxu3  ;;  %v13821_v52 = vadd.f32 %v3496_v17, %v13727_v53  ;;  %v3472_v10 = vpop.f32.mrf.mxu0  ;;  %5217 = vrot.lane.b32.xlu0 %v5194_v55, %s12206_s27 }
 0x35e   : > { %v13824_v48 = vadd.f32 %v3509_v5, %v13730_v27  ;;  %v3485_v58 = vpop.f32.mrf.mxu1  ;;  %v4310_v27 = vsel %vm4301_vm5, %v4296_v60, %v4298_v19  ;;  %v4516_v11 = vpop.permute.xlu0 %4515  ;;  %v5198_v5 = vld.sshfl [vmem:[#allocation1 + $0x18] sm:$0xff pattern:$0x73625140]  ;;  %vm7553_vm5 = vcmask 818176  }
 0x35f   : > { %v4518_v59 = vpop.permute.xlu1 %4517  ;;  %v4340_v51 = vsel %vm239_vm1, %v4310_v27, 0  ;;  %v4536_v37 = vsel %vm4535_vm6, %v4514_v50, %v4516_v11  ;;  %v4520_v29 = vpop.permute.xlu2 %4519 }
 0x360   : > { %v4537_v16 = vsel %vm4535_vm6, %v4516_v11, %v4518_v59  ;;  %v4538_v46 = vsel %vm4535_vm6, %v4518_v59, %v4520_v29 }
 0x361   : > { %v4556_v20 = vsel %vm239_vm1, %v4538_v46, 0 }
 0x362   : > { %v5200_v38 = vld.sshfl [vmem:[#allocation1 + $0x20] sm:$0xff pattern:$0x73625140]  ;;  %v5202_v60 = vld.sshfl [vmem:[#allocation1 + $0x28] sm:$0xff pattern:$0x73625140] }
 0x363   : > { %v5206_v17 = vld.sshfl [vmem:[#allocation1 + $0x38] sm:$0xff pattern:$0x73625140] }
 0x364   : > { %v3498_v53 = vpop.f32.mrf.mxu2  ;;  %4997 = vrot.lane.b32.xlu2 %v4975_v39, %s12205_s24  ;;  %5225 = vrot.lane.b32.xlu1 %v5202_v60, %s12206_s27  ;;  %s12214_s24 = smov 102  }
 0x365   : > { %v3511_v30 = vpop.f32.mrf.mxu3  ;;  %v3522_v28 = vpop.f32.mrf.mxu0  ;;  %5223 = vrot.lane.b32.xlu0 %v5200_v38, %s12206_s27  ;;  %v5204_v38 = vld.sshfl [vmem:[#allocation1 + $0x30] sm:$0xff pattern:$0x73625140] }
 0x366   : > { %v3535_v9 = vpop.f32.mrf.mxu1  ;;  %v13839_v47 = vadd.f32 %v3522_v28, %v13754_v43  ;;  %v4550_v43 = vsel %vm239_vm1, %v4536_v37, 0  ;;  %v4522_v35 = vpop.permute.xlu0 %4521  ;;  %v13915_v37 = vld [vmem:[%s16558_s1 + $0x4c] sm:$0xf]  ;;  %5425 = vst [vmem:[#allocation1 + $0x20] ss:$4 sm:$0xff] %v12270_v1 }
 0x367   : > { %v13842_v62 = vadd.f32 %v3535_v9, %v13757_v15  ;;  %v4553_v15 = vsel %vm239_vm1, %v4537_v16, 0  ;;  %v4539_v57 = vsel %vm4535_vm6, %v4520_v29, %v4522_v35  ;;  %v4526_v3 = vpop.permute.xlu2 %4525 }
 0x368   : > { %11774 = vmatmul.msk.bf16.vlgmr.msrb.gmra.mxu0 %vm235_vm2, %v13836_v36  ;;  %11775 = vmatmul.msk.bf16.vlgmr.msrb.gmra.mxu1 %vm235_vm2, %v13836_v36  ;;  %v4559_v54 = vsel %vm239_vm1, %v4539_v57, 0 }
 0x369   : > { %11776 = vmatmul.msk.bf16.vlgmr.msrb.gmra.mxu2 %vm235_vm2, %v13836_v36  ;;  %4456 = vmatpush.bf16.msrb.mxu0 %v4340_v51 }
 0x36a   : > { %11777 = vmatmul.msk.bf16.vlgmr.msrb.gmra.mxu3 %vm235_vm2, %v13836_v36  ;;  %4469 = vmatpush.bf16.msrb.mxu1 %v4343_v63 }
 0x36b   : > { %4586 = vmatpush.bf16.msrb.mxu2 %v4550_v43  ;;  %4599 = vmatpush.bf16.msrb.mxu3 %v4553_v15 }
 0x36c   : > { %v3652_v61 = vpop.f32.mrf.mxu2 }
 0x36d   : > { %v3665_v21 = vpop.f32.mrf.mxu3  ;;  %v13861_v14 = vadd.f32 %v3652_v61, %v13766_v4  ;;  %v3524_v24 = vpop.f32.mrf.mxu0  ;;  %5229 = vrot.lane.b32.xlu0 %v5206_v17, %s12206_s27  ;;  %v5436_v17 = vld.sshfl [vmem:[#allocation1 + $0x28] sm:$0xff pattern:$0x73625140] }
 0x36e   : > { %v13864_v12 = vadd.f32 %v3665_v21, %v13769_v22  ;;  %v3537_v40 = vpop.f32.mrf.mxu1  ;;  %v4524_v34 = vpop.permute.xlu1 %4523 }
 0x36f   : > { %v4540_v18 = vsel %vm4535_vm6, %v4522_v35, %v4524_v34  ;;  %v4541_v41 = vsel %vm4535_vm6, %v4524_v34, %v4526_v3  ;;  %v4532_v8 = vpop.permute.xlu2 %4531 }
 0x370   : > { %v4562_v25 = vsel %vm239_vm1, %v4540_v18, 0  ;;  %v4565_v19 = vsel %vm239_vm1, %v4541_v41, 0 }
 0x374   : > { %v3654_v49 = vpop.f32.mrf.mxu2 }
 0x375   : > { %v3667_v23 = vpop.f32.mrf.mxu3  ;;  %v3678_v4 = vpop.f32.mrf.mxu0 }
 0x376   : > { %v3691_v22 = vpop.f32.mrf.mxu1  ;;  %v13873_v32 = vadd.f32 %v3678_v4, %v13789_v13  ;;  %v4528_v13 = vpop.permute.xlu0 %4527 }
 0x377   : > { %v13876_v45 = vadd.f32 %v3691_v22, %v13792_v7  ;;  %v5192_v7 = vld.sshfl [vmem:[#allocation1] sm:$0xff pattern:$0x73625140]  ;;  %v4530_v50 = vpop.permute.xlu1 %4529  ;;  %v4542_v28 = vsel %vm4535_vm6, %v4526_v3, %v4528_v13 }
 0x378   : > { %11778 = vmatmul.msk.bf16.vlgmr.msra.gmra.mxu0 %vm235_vm2, %v13836_v36  ;;  %11779 = vmatmul.msk.bf16.vlgmr.msra.gmra.mxu1 %vm235_vm2, %v13836_v36  ;;  %5208 = vst [vmem:[#allocation1] ss:$4 sm:$0xff] %v12274_v2  ;;  %v4543_v9 = vsel %vm4535_vm6, %v4528_v13, %v4530_v50  ;;  %v4568_v43 = vsel %vm239_vm1, %v4542_v28, 0 }
 0x379   : > { %11780 = vmatmul.msk.bf16.vlgmr.msra.gmra.mxu2 %vm235_vm2, %v13836_v36  ;;  %4612 = vmatpush.bf16.msra.mxu0 %v4556_v20  ;;  %v4571_v15 = vsel %vm239_vm1, %v4543_v9, 0 }
 0x37a   : > { %11781 = vmatmul.msk.bf16.vlgmr.msra.gmra.mxu3 %vm235_vm2, %v13836_v36  ;;  %4625 = vmatpush.bf16.msra.mxu1 %v4559_v54 }
 0x37b   : > { %4638 = vmatpush.bf16.msra.mxu2 %v4562_v25  ;;  %4651 = vmatpush.bf16.msra.mxu3 %v4565_v19 }
 0x37c   : > { %v3704_v10 = vpop.f32.mrf.mxu2  ;;  %5215 = vrot.lane.b32.xlu2 %v5192_v7, %s12206_s27 }
 0x37d   : > { %v3717_v58 = vpop.f32.mrf.mxu3  ;;  %v13895_v31 = vadd.f32 %v3704_v10, %v13801_v33  ;;  %v3680_v42 = vpop.f32.mrf.mxu0 }
 0x37e   : > { %v13898_v6 = vadd.f32 %v3717_v58, %v13804_v44  ;;  %v3693_v39 = vpop.f32.mrf.mxu1  ;;  %v4534_v30 = vpop.permute.xlu0 %4533  ;;  %v4544_v44 = vsel %vm4535_vm6, %v4530_v50, %v4532_v8 }
 0x37f   : > { %v5209_v53 = vld.sshfl [vmem:[#allocation1] sm:$0xff pattern:$0x73625140]  ;;  %v4545_v11 = vsel %vm4535_vm6, %v4532_v8, %v4534_v30  ;;  %v5211_v16 = vld.sshfl [vmem:[#allocation1 + $0x8] sm:$0xff pattern:$0x73625140]  ;;  %v4748_v56 = vpop.permute.xlu1 %4747 }
 0x380   : > { %5231 = vrot.lane.b32.xlu1 %v5209_v53, %s12206_s27  ;;  %v5213_v55 = vld.sshfl [vmem:[#allocation1 + $0x10] sm:$0xff pattern:$0x73625140]  ;;  %vm7782_vm6 = vcmask 809984  }
 0x381   : > { %5423 = vst [vmem:[#allocation1] ss:$4 sm:$0xff] %v12268_v0  ;;  %5235 = vrot.lane.b32.xlu0 %v5213_v55, %s12206_s27  ;;  %v5438_v53 = vld.sshfl [vmem:[#allocation1 + $0x30] sm:$0xff pattern:$0x73625140] }
 0x384   : > { %v3706_v27 = vpop.f32.mrf.mxu2  ;;  %5221 = vrot.lane.b32.xlu2 %v5198_v5, %s12206_s27 }
 0x385   : > { %v3719_v26 = vpop.f32.mrf.mxu3  ;;  %v3730_v33 = vpop.f32.mrf.mxu0 }
 0x386   : > { %v3743_v59 = vpop.f32.mrf.mxu1  ;;  %v13907_v51 = vadd.f32 %v3730_v33, %v13821_v52  ;;  %v4574_v52 = vsel %vm239_vm1, %v4544_v44, 0  ;;  %v4750_v29 = vpop.permute.xlu2 %4749 }
 0x387   : > { %v13910_v63 = vadd.f32 %v3743_v59, %v13824_v48  ;;  %v4577_v48 = vsel %vm239_vm1, %v4545_v11, 0  ;;  %v4752_v60 = vpop.permute.xlu0 %4751  ;;  %v4754_v23 = vpop.permute.xlu1 %4753 }
 0x388   : > { %11782 = vmatmul.msk.bf16.vlgmr.msrb.gmra.mxu0 %vm235_vm2, %v13836_v36  ;;  %11783 = vmatmul.msk.bf16.vlgmr.msrb.gmra.mxu1 %vm235_vm2, %v13836_v36  ;;  %v5426_v34 = vld.sshfl [vmem:[#allocation1] sm:$0xff pattern:$0x73625140]  ;;  %v5430_v49 = vld.sshfl [vmem:[#allocation1 + $0x10] sm:$0xff pattern:$0x73625140]  ;;  %v4771_v57 = vsel %vm4769_vm7, %v4750_v29, %v4752_v60  ;;  %v4772_v18 = vsel %vm4769_vm7, %v4752_v60, %v4754_v23 }
 0x389   : > { %11785 = vmatmul.msk.bf16.vlgmr.msrb.gmra.mxu2 %vm235_vm2, %v13915_v37  ;;  %4664 = vmatpush.bf16.msrb.mxu0 %v4568_v43  ;;  %v4787_v25 = vsel %vm239_vm1, %v4771_v57, 0  ;;  %v5432_v19 = vld.sshfl [vmem:[#allocation1 + $0x18] sm:$0xff pattern:$0x73625140] }
 0x38a   : > { %11786 = vmatmul.msk.bf16.vlgmr.msrb.gmra.mxu3 %vm235_vm2, %v13915_v37  ;;  %4677 = vmatpush.bf16.msrb.mxu1 %v4571_v15 }
 0x38b   : > { %4690 = vmatpush.bf16.msrb.mxu2 %v4574_v52  ;;  %4703 = vmatpush.bf16.msrb.mxu3 %v4577_v48 }
 0x38c   : > { %v3756_v36 = vpop.f32.mrf.mxu2  ;;  %5227 = vrot.lane.b32.xlu2 %v5204_v38, %s12206_s27  ;;  %5449 = vrot.lane.b32.xlu1 %v5426_v34, %s12207_s30 }
 0x38d   : > { %v3769_v61 = vpop.f32.mrf.mxu3  ;;  %v13932_v21 = vadd.f32 %v3756_v36, %v13839_v47  ;;  %v3732_v40 = vpop.f32.mrf.mxu0  ;;  %5453 = vrot.lane.b32.xlu0 %v5430_v49, %s12207_s30  ;;  %v5434_v49 = vld.sshfl [vmem:[#allocation1 + $0x20] sm:$0xff pattern:$0x73625140] }
 0x38e   : > { %v13935_v24 = vadd.f32 %v3769_v61, %v13842_v62  ;;  %v3745_v35 = vpop.f32.mrf.mxu1  ;;  %v4770_v62 = vsel %vm4769_vm7, %v4748_v56, %v4750_v29  ;;  %v4756_v54 = vpop.permute.xlu2 %4755 }
 0x38f   : > { %v4784_v41 = vsel %vm239_vm1, %v4770_v62, 0  ;;  %v4773_v13 = vsel %vm4769_vm7, %v4754_v23, %v4756_v54  ;;  %v4760_v8 = vpop.permute.xlu1 %4759 }
 0x390   : > { %v4793_v7 = vsel %vm239_vm1, %v4773_v13, 0 }
 0x394   : > { %v3758_v47 = vpop.f32.mrf.mxu2  ;;  %5233 = vrot.lane.b32.xlu2 %v5211_v16, %s12206_s27  ;;  %5455 = vrot.lane.b32.xlu1 %v5432_v19, %s12207_s30  ;;  %s12231_s27 = smov 23  }
 0x395   : > { %v3771_v46 = vpop.f32.mrf.mxu3  ;;  %v3886_v4 = vpop.f32.mrf.mxu0  ;;  %5459 = vrot.lane.b32.xlu0 %v5436_v17, %s12207_s30  ;;  %v5440_v17 = vld.sshfl [vmem:[#allocation1 + $0x38] sm:$0xff pattern:$0x73625140] }
 0x396   : > { %v3899_v22 = vpop.f32.mrf.mxu1  ;;  %v13945_v3 = vadd.f32 %v3886_v4, %v13861_v14  ;;  %v4790_v14 = vsel %vm239_vm1, %v4772_v18, 0  ;;  %v14014_v4 = vld [vmem:[%s16558_s1 + $0x50] sm:$0xf]  ;;  %5659 = vst [vmem:[#allocation1 + $0x20] ss:$4 sm:$0xff] %v12270_v1 }
 0x397   : > { %v13948_v20 = vadd.f32 %v3899_v22, %v13864_v12  ;;  %v4758_v12 = vpop.permute.xlu0 %4757  ;;  %v4762_v30 = vpop.permute.xlu2 %4761 }
 0x398   : > { %11787 = vmatmul.msk.bf16.vlgmr.msra.gmra.mxu0 %vm235_vm2, %v13915_v37  ;;  %11788 = vmatmul.msk.bf16.vlgmr.msra.gmra.mxu1 %vm235_vm2, %v13915_v37  ;;  %v4774_v9 = vsel %vm4769_vm7, %v4756_v54, %v4758_v12  ;;  %v4775_v33 = vsel %vm4769_vm7, %v4758_v12, %v4760_v8  ;;  %v4776_v44 = vsel %vm4769_vm7, %v4760_v8, %v4762_v30 }
 0x399   : > { %11789 = vmatmul.msk.bf16.vlgmr.msra.gmra.mxu2 %vm235_vm2, %v13915_v37  ;;  %4820 = vmatpush.bf16.msra.mxu0 %v4784_v41  ;;  %v4796_v43 = vsel %vm239_vm1, %v4774_v9, 0  ;;  %v4799_v15 = vsel %vm239_vm1, %v4775_v33, 0  ;;  %v4802_v52 = vsel %vm239_vm1, %v4776_v44, 0 }
 0x39a   : > { %11790 = vmatmul.msk.bf16.vlgmr.msra.gmra.mxu3 %vm235_vm2, %v13915_v37  ;;  %4833 = vmatpush.bf16.msra.mxu1 %v4787_v25 }
 0x39b   : > { %4846 = vmatpush.bf16.msra.mxu2 %v4790_v14  ;;  %4859 = vmatpush.bf16.msra.mxu3 %v4793_v7 }
 0x39c   : > { %v3912_v5 = vpop.f32.mrf.mxu2  ;;  %5461 = vrot.lane.b32.xlu1 %v5438_v53, %s12207_s30 }
 0x39d   : > { %v3925_v10 = vpop.f32.mrf.mxu3  ;;  %v13967_v58 = vadd.f32 %v3912_v5, %v13873_v32  ;;  %v3888_v39 = vpop.f32.mrf.mxu0 }
 0x39e   : > { %v13970_v42 = vadd.f32 %v3925_v10, %v13876_v45  ;;  %v3901_v50 = vpop.f32.mrf.mxu1 }
 0x3a2   : > { %v4764_v27 = vpop.permute.xlu0 %4763 }
 0x3a3   : > { %v4777_v45 = vsel %vm4769_vm7, %v4762_v30, %v4764_v27  ;;  %v4766_v48 = vpop.permute.xlu1 %4765 }
 0x3a4   : > { %v3914_v26 = vpop.f32.mrf.mxu2  ;;  %v4805_v56 = vsel %vm239_vm1, %v4777_v45, 0 }
 0x3a5   : > { %v3927_v28 = vpop.f32.mrf.mxu3  ;;  %v3938_v59 = vpop.f32.mrf.mxu0 }
 0x3a6   : > { %v3951_v32 = vpop.f32.mrf.mxu1  ;;  %v13978_v11 = vadd.f32 %v3938_v59, %v13895_v31  ;;  %v5428_v31 = vld.sshfl [vmem:[#allocation1 + $0x8] sm:$0xff pattern:$0x73625140]  ;;  %v5668_v28 = vld.sshfl [vmem:[#allocation1 + $0x20] sm:$0xff pattern:$0x73625140] }
 0x3a7   : > { %v13981_v16 = vadd.f32 %v3951_v32, %v13898_v6  ;;  %5442 = vst [vmem:[#allocation1] ss:$4 sm:$0xff] %v12274_v2  ;;  %v4768_v6 = vpop.permute.xlu2 %4767  ;;  %5451 = vrot.lane.b32.xlu2 %v5428_v31, %s12207_s30 }
 0x3a8   : > { %11791 = vmatmul.msk.bf16.vlgmr.msrb.gmra.mxu0 %vm235_vm2, %v13915_v37  ;;  %11792 = vmatmul.msk.bf16.vlgmr.msrb.gmra.mxu1 %vm235_vm2, %v13915_v37  ;;  %v4779_v46 = vsel %vm4769_vm7, %v4766_v48, %v4768_v6 }
 0x3a9   : > { %11793 = vmatmul.msk.bf16.vlgmr.msrb.gmra.mxu2 %vm235_vm2, %v13915_v37  ;;  %4872 = vmatpush.bf16.msrb.mxu0 %v4796_v43  ;;  %v4811_v13 = vsel %vm239_vm1, %v4779_v46, 0 }
 0x3aa   : > { %11794 = vmatmul.msk.bf16.vlgmr.msrb.gmra.mxu3 %vm235_vm2, %v13915_v37  ;;  %4885 = vmatpush.bf16.msrb.mxu1 %v4799_v15 }
 0x3ab   : > { %4898 = vmatpush.bf16.msrb.mxu2 %v4802_v52  ;;  %4911 = vmatpush.bf16.msrb.mxu3 %v4805_v56 }
 0x3ac   : > { %v3964_v55 = vpop.f32.mrf.mxu2 }
 0x3ad   : > { %v3977_v29 = vpop.f32.mrf.mxu3  ;;  %v13998_v36 = vadd.f32 %v3964_v55, %v13907_v51  ;;  %v3940_v40 = vpop.f32.mrf.mxu0 }
 0x3ae   : > { %v14001_v61 = vadd.f32 %v3977_v29, %v13910_v63  ;;  %v3953_v35 = vpop.f32.mrf.mxu1  ;;  %v4982_v37 = vpop.permute.xlu0 %4981  ;;  %v5445_v38 = vld.sshfl [vmem:[#allocation1 + $0x8] sm:$0xff pattern:$0x73625140]  ;;  %v14003_v60 = vld.sshfl [vmem:[#allocation1 + $0x10] sm:$0xff pattern:$0x73625140]  ;;  %v4778_v63 = vsel %vm4769_vm7, %v4764_v27, %v4766_v48 }
 0x3af   : > { %5467 = vrot.lane.b32.xlu1 %v5445_v38, %s12207_s30  ;;  %v5443_v34 = vld.sshfl [vmem:[#allocation1] sm:$0xff pattern:$0x73625140]  ;;  %v4984_v51 = vpop.permute.xlu1 %4983  ;;  %5457 = vrot.lane.b32.xlu2 %v5434_v49, %s12207_s30  ;;  %v4986_v41 = vpop.permute.xlu2 %4985  ;;  %v4808_v25 = vsel %vm239_vm1, %v4778_v63, 0  ;;  %vm8011_vm7 = vcmask 801792  }
 0x3b0   : > { %5465 = vrot.lane.b32.xlu0 %v5443_v34, %s12207_s30  ;;  %5657 = vst [vmem:[#allocation1] ss:$4 sm:$0xff] %v12268_v0  ;;  %v5004_v22 = vsel %vm5003_vm8, %v4982_v37, %v4984_v51  ;;  %v5005_v14 = vsel %vm5003_vm8, %v4984_v51, %v4986_v41 }
 0x3b1   : > { %v5021_v12 = vsel %vm239_vm1, %v5005_v14, 0 }
 0x3b4   : > { %v3966_v23 = vpop.f32.mrf.mxu2 }
 0x3b5   : > { %v3979_v47 = vpop.f32.mrf.mxu3  ;;  %v3990_v62 = vpop.f32.mrf.mxu0 }
 0x3b6   : > { %v4003_v57 = vpop.f32.mrf.mxu1  ;;  %v14018_v18 = vadd.f32 %v3990_v62, %v13932_v21  ;;  %v4988_v19 = vpop.permute.xlu0 %4987  ;;  %v5018_v21 = vsel %vm239_vm1, %v5004_v22, 0 }
 0x3b7   : > { %v14021_v54 = vadd.f32 %v4003_v57, %v13935_v24  ;;  %v5660_v24 = vld.sshfl [vmem:[#allocation1] sm:$0xff pattern:$0x73625140]  ;;  %v5662_v7 = vld.sshfl [vmem:[#allocation1 + $0x8] sm:$0xff pattern:$0x73625140]  ;;  %5463 = vrot.lane.b32.xlu2 %v5440_v17, %s12207_s30  ;;  %v4990_v27 = vpop.permute.xlu1 %4989  ;;  %v4992_v26 = vpop.permute.xlu2 %4991  ;;  %v5006_v32 = vsel %vm5003_vm8, %v4986_v41, %v4988_v19 }
 0x3b8   : > { %11796 = vmatmul.msk.bf16.vlgmr.msra.gmra.mxu0 %vm235_vm2, %v14014_v4  ;;  %11797 = vmatmul.msk.bf16.vlgmr.msra.gmra.mxu1 %vm235_vm2, %v14014_v4  ;;  %v5666_v30 = vld.sshfl [vmem:[#allocation1 + $0x18] sm:$0xff pattern:$0x73625140]  ;;  %v5008_v45 = vsel %vm5003_vm8, %v4990_v27, %v4992_v26  ;;  %v5024_v48 = vsel %vm239_vm1, %v5006_v32, 0 }
 0x3b9   : > { %11798 = vmatmul.msk.bf16.vlgmr.msra.gmra.mxu2 %vm235_vm2, %v14014_v4  ;;  %4924 = vmatpush.bf16.msra.mxu0 %v4808_v25  ;;  %v5030_v31 = vsel %vm239_vm1, %v5008_v45, 0  ;;  %v5664_v34 = vld.sshfl [vmem:[#allocation1 + $0x10] sm:$0xff pattern:$0x73625140] }
 0x3ba   : > { %11799 = vmatmul.msk.bf16.vlgmr.msra.gmra.mxu3 %vm235_vm2, %v14014_v4  ;;  %4937 = vmatpush.bf16.msra.mxu1 %v4811_v13  ;;  %5676 = vst [vmem:[#allocation1] ss:$4 sm:$0xff] %v12274_v2  ;;  %v14094_v25 = vld [vmem:[%s16558_s1 + $0x54] sm:$0xf] }
 0x3bb   : > { %5683 = vrot.lane.b32.xlu0 %v5660_v24, %s12208_s6  ;;  %5054 = vmatpush.bf16.msra.mxu2 %v5018_v21  ;;  %v5670_v17 = vld.sshfl [vmem:[#allocation1 + $0x28] sm:$0xff pattern:$0x73625140] }
 0x3bc   : > { %v4120_v5 = vpop.f32.mrf.mxu2  ;;  %5067 = vmatpush.bf16.msra.mxu3 %v5021_v12  ;;  %5685 = vrot.lane.b32.xlu1 %v5662_v7, %s12208_s6 }
 0x3bd   : > { %v4133_v10 = vpop.f32.mrf.mxu3  ;;  %v14040_v39 = vadd.f32 %v4120_v5, %v13945_v3  ;;  %v3992_v8 = vpop.f32.mrf.mxu0  ;;  %v5007_v3 = vsel %vm5003_vm8, %v4988_v19, %v4990_v27 }
 0x3be   : > { %v14043_v50 = vadd.f32 %v4133_v10, %v13948_v20  ;;  %v4005_v53 = vpop.f32.mrf.mxu1  ;;  %v4994_v9 = vpop.permute.xlu0 %4993  ;;  %v5027_v56 = vsel %vm239_vm1, %v5007_v3, 0 }
 0x3bf   : > { %v5009_v43 = vsel %vm5003_vm8, %v4992_v26, %v4994_v9  ;;  %5469 = vrot.lane.b32.xlu2 %v14003_v60, %s12207_s30  ;;  %v4996_v55 = vpop.permute.xlu1 %4995  ;;  %v4998_v49 = vpop.permute.xlu2 %4997  ;;  %s12216_s30 = smov 100  }
 0x3c0   : > { %v5033_v6 = vsel %vm239_vm1, %v5009_v43, 0  ;;  %v5010_v63 = vsel %vm5003_vm8, %v4994_v9, %v4996_v55  ;;  %v5011_v46 = vsel %vm5003_vm8, %v4996_v55, %v4998_v49 }
 0x3c1   : > { %v5679_v57 = vld.sshfl [vmem:[#allocation1 + $0x8] sm:$0xff pattern:$0x73625140]  ;;  %v5677_v14 = vld.sshfl [vmem:[#allocation1] sm:$0xff pattern:$0x73625140] }
 0x3c2   : > { %v5036_v19 = vsel %vm239_vm1, %v5010_v63, 0  ;;  %v5039_v21 = vsel %vm239_vm1, %v5011_v46, 0  ;;  %v5681_v7 = vld.sshfl [vmem:[#allocation1 + $0x10] sm:$0xff pattern:$0x73625140] }
 0x3c3   : > { %5689 = vrot.lane.b32.xlu0 %v5666_v30, %s12208_s6  ;;  %5891 = vst [vmem:[#allocation1] ss:$4 sm:$0xff] %v12268_v0 }
 0x3c4   : > { %v4122_v33 = vpop.f32.mrf.mxu2  ;;  %5691 = vrot.lane.b32.xlu1 %v5668_v28, %s12208_s6 }
 0x3c5   : > { %v4135_v59 = vpop.f32.mrf.mxu3  ;;  %v4146_v20 = vpop.f32.mrf.mxu0 }
 0x3c6   : > { %v4159_v44 = vpop.f32.mrf.mxu1  ;;  %v14055_v15 = vadd.f32 %v4146_v20, %v13967_v58  ;;  %v5674_v58 = vld.sshfl [vmem:[#allocation1 + $0x38] sm:$0xff pattern:$0x73625140]  ;;  %v5000_v51 = vpop.permute.xlu0 %4999 }
 0x3c7   : > { %v14058_v52 = vadd.f32 %v4159_v44, %v13970_v42  ;;  %v5672_v42 = vld.sshfl [vmem:[#allocation1 + $0x30] sm:$0xff pattern:$0x73625140]  ;;  %5687 = vrot.lane.b32.xlu2 %v5664_v34, %s12208_s6  ;;  %v5002_v13 = vpop.permute.xlu1 %5001 }
 0x3c8   : > { %11800 = vmatmul.msk.bf16.vlgmr.msrb.gmra.mxu0 %vm235_vm2, %v14014_v4  ;;  %11801 = vmatmul.msk.bf16.vlgmr.msrb.gmra.mxu1 %vm235_vm2, %v14014_v4  ;;  %v5013_v12 = vsel %vm5003_vm8, %v5000_v51, %v5002_v13  ;;  %5893 = vst [vmem:[#allocation1 + $0x20] ss:$4 sm:$0xff] %v12270_v1 }
 0x3c9   : > { %11802 = vmatmul.msk.bf16.vlgmr.msrb.gmra.mxu2 %vm235_vm2, %v14014_v4  ;;  %5080 = vmatpush.bf16.msrb.mxu0 %v5024_v48 }
 0x3ca   : > { %11803 = vmatmul.msk.bf16.vlgmr.msrb.gmra.mxu3 %vm235_vm2, %v14014_v4  ;;  %5093 = vmatpush.bf16.msrb.mxu1 %v5027_v56  ;;  %v5898_v28 = vld.sshfl [vmem:[#allocation1 + $0x10] sm:$0xff pattern:$0x73625140]  ;;  %v5896_v33 = vld.sshfl [vmem:[#allocation1 + $0x8] sm:$0xff pattern:$0x73625140] }
 0x3cb   : > { %5106 = vmatpush.bf16.msrb.mxu2 %v5030_v31  ;;  %5119 = vmatpush.bf16.msrb.mxu3 %v5033_v6 }
 0x3cc   : > { %v4172_v29 = vpop.f32.mrf.mxu2  ;;  %5697 = vrot.lane.b32.xlu1 %v5674_v58, %s12208_s6  ;;  %5695 = vrot.lane.b32.xlu0 %v5672_v42, %s12208_s6 }
 0x3cd   : > { %v4185_v40 = vpop.f32.mrf.mxu3  ;;  %v14075_v35 = vadd.f32 %v4172_v29, %v13978_v11  ;;  %v4148_v38 = vpop.f32.mrf.mxu0 }
 0x3ce   : > { %v14078_v37 = vadd.f32 %v4185_v40, %v13981_v16  ;;  %v4161_v60 = vpop.f32.mrf.mxu1  ;;  %v5012_v16 = vsel %vm5003_vm8, %v4998_v49, %v5000_v51  ;;  %v5900_v38 = vld.sshfl [vmem:[#allocation1 + $0x18] sm:$0xff pattern:$0x73625140]  ;;  %vm8240_vm8 = vcmask 539648  }
 0x3cf   : > { %5693 = vrot.lane.b32.xlu2 %v5670_v17, %s12208_s6  ;;  %v5218_v27 = vpop.permute.xlu0 %5217  ;;  %v5220_v26 = vpop.permute.xlu1 %5219  ;;  %v5902_v42 = vld.sshfl [vmem:[#allocation1 + $0x20] sm:$0xff pattern:$0x73625140]  ;;  %v5908_v63 = vld.sshfl [vmem:[#allocation1 + $0x38] sm:$0xff pattern:$0x73625140] }
 0x3d4   : > { %v4174_v23 = vpop.f32.mrf.mxu2  ;;  %5701 = vrot.lane.b32.xlu0 %v5679_v57, %s12208_s6  ;;  %5703 = vrot.lane.b32.xlu1 %v5681_v7, %s12208_s6 }
 0x3d5   : > { %v4187_v47 = vpop.f32.mrf.mxu3  ;;  %v4198_v11 = vpop.f32.mrf.mxu0  ;;  %v5894_v23 = vld.sshfl [vmem:[#allocation1] sm:$0xff pattern:$0x73625140] }
 0x3d6   : > { %v4211_v62 = vpop.f32.mrf.mxu1  ;;  %v14086_v22 = vadd.f32 %v4198_v11, %v13998_v36  ;;  %v5042_v36 = vsel %vm239_vm1, %v5012_v16, 0  ;;  %v5216_v24 = vpop.permute.xlu2 %5215  ;;  %5910 = vst [vmem:[#allocation1] ss:$4 sm:$0xff] %v12274_v2 }
 0x3d7   : > { %v14089_v41 = vadd.f32 %v4211_v62, %v14001_v61  ;;  %v5045_v61 = vsel %vm239_vm1, %v5013_v12, 0  ;;  %v5238_v3 = vsel %vm5237_vm9, %v5216_v24, %v5218_v27  ;;  %5699 = vrot.lane.b32.xlu2 %v5677_v14, %s12208_s6  ;;  %v5224_v48 = vpop.permute.xlu0 %5223  ;;  %v5226_v55 = vpop.permute.xlu1 %5225 }
 0x3d8   : > { %11804 = vmatmul.msk.bf16.vlgmr.msra.gmra.mxu0 %vm235_vm2, %v14014_v4  ;;  %11805 = vmatmul.msk.bf16.vlgmr.msra.gmra.mxu1 %vm235_vm2, %v14014_v4  ;;  %v5252_v56 = vsel %vm239_vm1, %v5238_v3, 0  ;;  %v5242_v16 = vsel %vm5237_vm9, %v5224_v48, %v5226_v55 }
 0x3d9   : > { %11807 = vmatmul.msk.bf16.vlgmr.msra.gmra.mxu2 %vm235_vm2, %v14094_v25  ;;  %5132 = vmatpush.bf16.msra.mxu0 %v5036_v19  ;;  %v5264_v12 = vsel %vm239_vm1, %v5242_v16, 0 }
 0x3da   : > { %11808 = vmatmul.msk.bf16.vlgmr.msra.gmra.mxu3 %vm235_vm2, %v14094_v25  ;;  %5145 = vmatpush.bf16.msra.mxu1 %v5039_v21 }
 0x3db   : > { %5158 = vmatpush.bf16.msra.mxu2 %v5042_v36  ;;  %5171 = vmatpush.bf16.msra.mxu3 %v5045_v61 }
 0x3dc   : > { %v4224_v4 = vpop.f32.mrf.mxu2  ;;  %5919 = vrot.lane.b32.xlu0 %v5896_v33, %s12209_s9  ;;  %5921 = vrot.lane.b32.xlu1 %v5898_v28, %s12209_s9 }
 0x3dd   : > { %v4237_v5 = vpop.f32.mrf.mxu3  ;;  %v14115_v10 = vadd.f32 %v4224_v4, %v14018_v18  ;;  %v4200_v53 = vpop.f32.mrf.mxu0  ;;  %v5239_v18 = vsel %vm5237_vm9, %v5218_v27, %v5220_v26  ;;  %v5911_v24 = vld.sshfl [vmem:[#allocation1] sm:$0xff pattern:$0x73625140]  ;;  %v14179_v17 = vld.sshfl [vmem:[#allocation1 + $0x8] sm:$0xff pattern:$0x73625140] }
 0x3de   : > { %v14118_v8 = vadd.f32 %v4237_v5, %v14021_v54  ;;  %v4213_v30 = vpop.f32.mrf.mxu1  ;;  %v5222_v9 = vpop.permute.xlu2 %5221  ;;  %v5255_v31 = vsel %vm239_vm1, %v5239_v18, 0 }
 0x3df   : > { %v5240_v44 = vsel %vm5237_vm9, %v5220_v26, %v5222_v9  ;;  %v5241_v6 = vsel %vm5237_vm9, %v5222_v9, %v5224_v48  ;;  %5917 = vrot.lane.b32.xlu2 %v5894_v23, %s12209_s9  ;;  %v5230_v46 = vpop.permute.xlu0 %5229  ;;  %v5915_v26 = vld.sshfl [vmem:[#allocation1 + $0x10] sm:$0xff pattern:$0x73625140] }
 0x3e0   : > { %v5258_v58 = vsel %vm239_vm1, %v5240_v44, 0  ;;  %6125 = vst [vmem:[#allocation1] ss:$4 sm:$0xff] %v12268_v0 }
 0x3e4   : > { %v4226_v59 = vpop.f32.mrf.mxu2  ;;  %5925 = vrot.lane.b32.xlu0 %v5902_v42, %s12209_s9 }
 0x3e5   : > { %v4239_v32 = vpop.f32.mrf.mxu3  ;;  %v4354_v54 = vpop.f32.mrf.mxu0 }
 0x3e6   : > { %v4367_v20 = vpop.f32.mrf.mxu1  ;;  %v14127_v45 = vadd.f32 %v4354_v54, %v14040_v39  ;;  %v5261_v39 = vsel %vm239_vm1, %v5241_v6, 0  ;;  %v5228_v47 = vpop.permute.xlu2 %5227 }
 0x3e7   : > { %v14130_v43 = vadd.f32 %v4367_v20, %v14043_v50  ;;  %v5904_v50 = vld.sshfl [vmem:[#allocation1 + $0x28] sm:$0xff pattern:$0x73625140]  ;;  %v5244_v13 = vsel %vm5237_vm9, %v5228_v47, %v5230_v46  ;;  %5923 = vrot.lane.b32.xlu2 %v5900_v38, %s12209_s9  ;;  %v6128_v54 = vld.sshfl [vmem:[#allocation1] sm:$0xff pattern:$0x73625140] }
 0x3e8   : > { %11809 = vmatmul.msk.bf16.vlgmr.msrb.gmra.mxu0 %vm235_vm2, %v14094_v25  ;;  %11810 = vmatmul.msk.bf16.vlgmr.msrb.gmra.mxu1 %vm235_vm2, %v14094_v25  ;;  %v6132_v42 = vld.sshfl [vmem:[#allocation1 + $0x10] sm:$0xff pattern:$0x73625140] }
 0x3e9   : > { %11811 = vmatmul.msk.bf16.vlgmr.msrb.gmra.mxu2 %vm235_vm2, %v14094_v25  ;;  %5288 = vmatpush.bf16.msrb.mxu0 %v5252_v56 }
 0x3ea   : > { %11812 = vmatmul.msk.bf16.vlgmr.msrb.gmra.mxu3 %vm235_vm2, %v14094_v25  ;;  %5301 = vmatpush.bf16.msrb.mxu1 %v5255_v31 }
 0x3eb   : > { %5314 = vmatpush.bf16.msrb.mxu2 %v5258_v58  ;;  %5327 = vmatpush.bf16.msrb.mxu3 %v5261_v39 }
 0x3ec   : > { %v4380_v29 = vpop.f32.mrf.mxu2  ;;  %5927 = vrot.lane.b32.xlu1 %v5904_v50, %s12209_s9  ;;  %5931 = vrot.lane.b32.xlu0 %v5908_v63, %s12209_s9  ;;  %v5906_v50 = vld.sshfl [vmem:[#allocation1 + $0x30] sm:$0xff pattern:$0x73625140] }
 0x3ed   : > { %v4393_v40 = vpop.f32.mrf.mxu3  ;;  %v14148_v60 = vadd.f32 %v4380_v29, %v14055_v15  ;;  %v4356_v49 = vpop.f32.mrf.mxu0  ;;  %v5243_v15 = vsel %vm5237_vm9, %v5226_v55, %v5228_v47  ;;  %6127 = vst [vmem:[#allocation1 + $0x20] ss:$4 sm:$0xff] %v12270_v1  ;;  %v6134_v55 = vld.sshfl [vmem:[#allocation1 + $0x18] sm:$0xff pattern:$0x73625140] }
 0x3ee   : > { %v14151_v34 = vadd.f32 %v4393_v40, %v14058_v52  ;;  %v4369_v51 = vpop.f32.mrf.mxu1  ;;  %v5267_v36 = vsel %vm239_vm1, %v5243_v15, 0  ;;  %v5234_v7 = vpop.permute.xlu2 %5233 }
 0x3ef   : > { %5929 = vrot.lane.b32.xlu2 %v5906_v50, %s12209_s9 }
 0x3f2   : > { %v5232_v21 = vpop.permute.xlu1 %5231 }
 0x3f3   : > { %v5245_v61 = vsel %vm5237_vm9, %v5230_v46, %v5232_v21  ;;  %v5236_v28 = vpop.permute.xlu0 %5235  ;;  %v5246_v32 = vsel %vm5237_vm9, %v5232_v21, %v5234_v7 }
 0x3f4   : > { %v4382_v11 = vpop.f32.mrf.mxu2  ;;  %5933 = vrot.lane.b32.xlu1 %v5911_v24, %s12209_s9  ;;  %5937 = vrot.lane.b32.xlu0 %v5915_v26, %s12209_s9  ;;  %v5247_v3 = vsel %vm5237_vm9, %v5234_v7, %v5236_v28  ;;  %v5276_v31 = vsel %vm239_vm1, %v5246_v32, 0  ;;  %v6138_v46 = vld.sshfl [vmem:[#allocation1 + $0x28] sm:$0xff pattern:$0x73625140]  ;;  %vm8469_vm9 = vcmask 531456  }
 0x3f5   : > { %v4395_v62 = vpop.f32.mrf.mxu3  ;;  %v4406_v52 = vpop.f32.mrf.mxu0  ;;  %v5279_v6 = vsel %vm239_vm1, %v5247_v3, 0  ;;  %v6140_v7 = vld.sshfl [vmem:[#allocation1 + $0x30] sm:$0xff pattern:$0x73625140] }
 0x3f6   : > { %v4419_v57 = vpop.f32.mrf.mxu1  ;;  %v14160_v14 = vadd.f32 %v4406_v52, %v14075_v35  ;;  %v5270_v35 = vsel %vm239_vm1, %v5244_v13, 0  ;;  %v6136_v50 = vld.sshfl [vmem:[#allocation1 + $0x20] sm:$0xff pattern:$0x73625140] }
 0x3f7   : > { %v14163_v19 = vadd.f32 %v4419_v57, %v14078_v37  ;;  %v5273_v37 = vsel %vm239_vm1, %v5245_v61, 0  ;;  %5935 = vrot.lane.b32.xlu2 %v14179_v17, %s12209_s9 }
 0x3f8   : > { %11813 = vmatmul.msk.bf16.vlgmr.msra.gmra.mxu0 %vm235_vm2, %v14094_v25  ;;  %11814 = vmatmul.msk.bf16.vlgmr.msra.gmra.mxu1 %vm235_vm2, %v14094_v25 }
 0x3f9   : > { %11815 = vmatmul.msk.bf16.vlgmr.msra.gmra.mxu2 %vm235_vm2, %v14094_v25  ;;  %5340 = vmatpush.bf16.msra.mxu0 %v5264_v12 }
 0x3fa   : > { %11816 = vmatmul.msk.bf16.vlgmr.msra.gmra.mxu3 %vm235_vm2, %v14094_v25  ;;  %5353 = vmatpush.bf16.msra.mxu1 %v5267_v36 }
 0x3fb   : > { %5366 = vmatpush.bf16.msra.mxu2 %v5270_v35  ;;  %5379 = vmatpush.bf16.msra.mxu3 %v5273_v37 }
 0x3fc   : > { %v4432_v4 = vpop.f32.mrf.mxu2  ;;  %6151 = vrot.lane.b32.xlu1 %v6128_v54, %s12210_s14  ;;  %6155 = vrot.lane.b32.xlu0 %v6132_v42, %s12210_s14 }
 0x3fd   : > { %v4445_v5 = vpop.f32.mrf.mxu3  ;;  %v14183_v53 = vadd.f32 %v4432_v4, %v14086_v22  ;;  %v4408_v27 = vpop.f32.mrf.mxu0 }
 0x3fe   : > { %v14186_v30 = vadd.f32 %v4445_v5, %v14089_v41  ;;  %v4421_v25 = vpop.f32.mrf.mxu1  ;;  %v5450_v9 = vpop.permute.xlu1 %5449  ;;  %v14195_v41 = vld [vmem:[%s16558_s1 + $0x58] sm:$0xf] }
 0x3ff   : > { %v5454_v48 = vpop.permute.xlu0 %5453 }
 0x401   : > { %v5452_v56 = vpop.permute.xlu2 %5451 }
 0x402   : > { %v5472_v58 = vsel %vm5471_vm10, %v5450_v9, %v5452_v56  ;;  %v5473_v39 = vsel %vm5471_vm10, %v5452_v56, %v5454_v48 }
 0x404   : > { %v4434_v33 = vpop.f32.mrf.mxu2  ;;  %6157 = vrot.lane.b32.xlu1 %v6134_v55, %s12210_s14  ;;  %6161 = vrot.lane.b32.xlu0 %v6138_v46, %s12210_s14 }
 0x405   : > { %v4447_v59 = vpop.f32.mrf.mxu3  ;;  %v4458_v22 = vpop.f32.mrf.mxu0 }
 0x406   : > { %v4471_v18 = vpop.f32.mrf.mxu1  ;;  %v14198_v20 = vadd.f32 %v4458_v22, %v14115_v10  ;;  %v5486_v10 = vsel %vm239_vm1, %v5472_v58, 0  ;;  %v5456_v47 = vpop.permute.xlu1 %5455 }
 0x407   : > { %v14201_v44 = vadd.f32 %v4471_v18, %v14118_v8  ;;  %v5489_v8 = vsel %vm239_vm1, %v5473_v39, 0  ;;  %v5460_v11 = vpop.permute.xlu0 %5459  ;;  %v5474_v15 = vsel %vm5471_vm10, %v5454_v48, %v5456_v47 }
 0x408   : > { %11818 = vmatmul.msk.bf16.vlgmr.msrb.gmra.mxu0 %vm235_vm2, %v14195_v41  ;;  %11819 = vmatmul.msk.bf16.vlgmr.msrb.gmra.mxu1 %vm235_vm2, %v14195_v41  ;;  %v5492_v36 = vsel %vm239_vm1, %v5474_v15, 0 }
 0x409   : > { %11820 = vmatmul.msk.bf16.vlgmr.msrb.gmra.mxu2 %vm235_vm2, %v14195_v41  ;;  %5392 = vmatpush.bf16.msrb.mxu0 %v5276_v31  ;;  %v5458_v63 = vpop.permute.xlu2 %5457  ;;  %v14278_v31 = vld [vmem:[%s16558_s1 + $0x5c] sm:$0xf] }
 0x40a   : > { %11821 = vmatmul.msk.bf16.vlgmr.msrb.gmra.mxu3 %vm235_vm2, %v14195_v41  ;;  %5405 = vmatpush.bf16.msrb.mxu1 %v5279_v6  ;;  %v5475_v52 = vsel %vm5471_vm10, %v5456_v47, %v5458_v63  ;;  %v5476_v57 = vsel %vm5471_vm10, %v5458_v63, %v5460_v11  ;;  %v6142_v63 = vld.sshfl [vmem:[#allocation1 + $0x38] sm:$0xff pattern:$0x73625140] }
 0x40b   : > { %5522 = vmatpush.bf16.msrb.mxu2 %v5486_v10  ;;  %5535 = vmatpush.bf16.msrb.mxu3 %v5489_v8  ;;  %v5495_v61 = vsel %vm239_vm1, %v5475_v52, 0  ;;  %v5498_v37 = vsel %vm239_vm1, %v5476_v57, 0  ;;  %6361 = vst [vmem:[#allocation1 + $0x20] ss:$4 sm:$0xff] %v12270_v1 }
 0x40c   : > { %v4588_v29 = vpop.f32.mrf.mxu2  ;;  %6163 = vrot.lane.b32.xlu1 %v6140_v7, %s12210_s14 }
 0x40d   : > { %v4601_v40 = vpop.f32.mrf.mxu3  ;;  %v14222_v38 = vadd.f32 %v4588_v29, %v14127_v45  ;;  %v4460_v51 = vpop.f32.mrf.mxu0 }
 0x40e   : > { %v14225_v49 = vadd.f32 %v4601_v40, %v14130_v43  ;;  %v4473_v23 = vpop.f32.mrf.mxu1  ;;  %v5462_v12 = vpop.permute.xlu1 %5461 }
 0x40f   : > { %v5477_v35 = vsel %vm5471_vm10, %v5460_v11, %v5462_v12 }
 0x410   : > { %v5501_v24 = vsel %vm239_vm1, %v5477_v35, 0 }
 0x412   : > { %v6370_v7 = vld.sshfl [vmem:[#allocation1 + $0x20] sm:$0xff pattern:$0x73625140] }
 0x414   : > { %v4590_v62 = vpop.f32.mrf.mxu2 }
 0x415   : > { %v4603_v16 = vpop.f32.mrf.mxu3  ;;  %v4614_v45 = vpop.f32.mrf.mxu0 }
 0x416   : > { %v4627_v43 = vpop.f32.mrf.mxu1  ;;  %v14235_v13 = vadd.f32 %v4614_v45, %v14148_v60  ;;  %v5464_v60 = vpop.permute.xlu2 %5463 }
 0x417   : > { %v14238_v21 = vadd.f32 %v4627_v43, %v14151_v34  ;;  %v6130_v34 = vld.sshfl [vmem:[#allocation1 + $0x8] sm:$0xff pattern:$0x73625140] }
 0x418   : > { %11822 = vmatmul.msk.bf16.vlgmr.msra.gmra.mxu0 %vm235_vm2, %v14195_v41  ;;  %11823 = vmatmul.msk.bf16.vlgmr.msra.gmra.mxu1 %vm235_vm2, %v14195_v41  ;;  %6144 = vst [vmem:[#allocation1] ss:$4 sm:$0xff] %v12274_v2 }
 0x419   : > { %11824 = vmatmul.msk.bf16.vlgmr.msra.gmra.mxu2 %vm235_vm2, %v14195_v41  ;;  %5548 = vmatpush.bf16.msra.mxu0 %v5492_v36 }
 0x41a   : > { %11825 = vmatmul.msk.bf16.vlgmr.msra.gmra.mxu3 %vm235_vm2, %v14195_v41  ;;  %5561 = vmatpush.bf16.msra.mxu1 %v5495_v61 }
 0x41b   : > { %5574 = vmatpush.bf16.msra.mxu2 %v5498_v37  ;;  %5587 = vmatpush.bf16.msra.mxu3 %v5501_v24 }
 0x41c   : > { %v4640_v17 = vpop.f32.mrf.mxu2  ;;  %6153 = vrot.lane.b32.xlu2 %v6130_v34, %s12210_s14 }
 0x41d   : > { %v4653_v4 = vpop.f32.mrf.mxu3  ;;  %v14257_v5 = vadd.f32 %v4640_v17, %v14160_v14  ;;  %v4616_v25 = vpop.f32.mrf.mxu0  ;;  %v5478_v14 = vsel %vm5471_vm10, %v5462_v12, %v5464_v60 }
 0x41e   : > { %v14260_v27 = vadd.f32 %v4653_v4, %v14163_v19  ;;  %v4629_v26 = vpop.f32.mrf.mxu1  ;;  %v5470_v59 = vpop.permute.xlu2 %5469  ;;  %v5504_v58 = vsel %vm239_vm1, %v5478_v14, 0 }
 0x41f   : > { %v6145_v28 = vld.sshfl [vmem:[#allocation1] sm:$0xff pattern:$0x73625140]  ;;  %v14262_v9 = vld.sshfl [vmem:[#allocation1 + $0x10] sm:$0xff pattern:$0x73625140] }
 0x420   : > { %6167 = vrot.lane.b32.xlu0 %v6145_v28, %s12210_s14  ;;  %v6147_v33 = vld.sshfl [vmem:[#allocation1 + $0x8] sm:$0xff pattern:$0x73625140] }
 0x421   : > { %6359 = vst [vmem:[#allocation1] ss:$4 sm:$0xff] %v12268_v0  ;;  %v5468_v32 = vpop.permute.xlu1 %5467  ;;  %6169 = vrot.lane.b32.xlu1 %v6147_v33, %s12210_s14 }
 0x422   : > { %v5481_v54 = vsel %vm5471_vm10, %v5468_v32, %v5470_v59  ;;  %v5466_v6 = vpop.permute.xlu0 %5465  ;;  %v6374_v59 = vld.sshfl [vmem:[#allocation1 + $0x30] sm:$0xff pattern:$0x73625140] }
 0x423   : > { %v5479_v39 = vsel %vm5471_vm10, %v5464_v60, %v5466_v6  ;;  %v5480_v10 = vsel %vm5471_vm10, %v5466_v6, %v5468_v32  ;;  %v5513_v8 = vsel %vm239_vm1, %v5481_v54, 0  ;;  %vm8698_vm10 = vcmask 523264  }
 0x424   : > { %v4642_v3 = vpop.f32.mrf.mxu2  ;;  %6159 = vrot.lane.b32.xlu2 %v6136_v50, %s12210_s14 }
 0x425   : > { %v4655_v22 = vpop.f32.mrf.mxu3  ;;  %v4666_v19 = vpop.f32.mrf.mxu0  ;;  %v6376_v3 = vld.sshfl [vmem:[#allocation1 + $0x38] sm:$0xff pattern:$0x73625140] }
 0x426   : > { %v4679_v18 = vpop.f32.mrf.mxu1  ;;  %v14270_v48 = vadd.f32 %v4666_v19, %v14183_v53  ;;  %v5507_v53 = vsel %vm239_vm1, %v5479_v39, 0  ;;  %v5688_v55 = vpop.permute.xlu2 %5687 }
 0x427   : > { %v14273_v56 = vadd.f32 %v4679_v18, %v14186_v30  ;;  %v5510_v30 = vsel %vm239_vm1, %v5480_v10, 0 }
 0x428   : > { %11826 = vmatmul.msk.bf16.vlgmr.msrb.gmra.mxu0 %vm235_vm2, %v14195_v41  ;;  %11827 = vmatmul.msk.bf16.vlgmr.msrb.gmra.mxu1 %vm235_vm2, %v14195_v41  ;;  %v6362_v42 = vld.sshfl [vmem:[#allocation1] sm:$0xff pattern:$0x73625140]  ;;  %v6364_v46 = vld.sshfl [vmem:[#allocation1 + $0x8] sm:$0xff pattern:$0x73625140] }
 0x429   : > { %11829 = vmatmul.msk.bf16.vlgmr.msrb.gmra.mxu2 %vm235_vm2, %v14278_v31  ;;  %5600 = vmatpush.bf16.msrb.mxu0 %v5504_v58  ;;  %v6368_v16 = vld.sshfl [vmem:[#allocation1 + $0x18] sm:$0xff pattern:$0x73625140] }
 0x42a   : > { %11830 = vmatmul.msk.bf16.vlgmr.msrb.gmra.mxu3 %vm235_vm2, %v14278_v31  ;;  %5613 = vmatpush.bf16.msrb.mxu1 %v5507_v53 }
 0x42b   : > { %5626 = vmatpush.bf16.msrb.mxu2 %v5510_v30  ;;  %5639 = vmatpush.bf16.msrb.mxu3 %v5513_v8 }
 0x42c   : > { %v4692_v41 = vpop.f32.mrf.mxu2  ;;  %6385 = vrot.lane.b32.xlu0 %v6362_v42, %s12211_s17  ;;  %6387 = vrot.lane.b32.xlu1 %v6364_v46, %s12211_s17  ;;  %v6366_v42 = vld.sshfl [vmem:[#allocation1 + $0x10] sm:$0xff pattern:$0x73625140] }
 0x42d   : > { %v4705_v29 = vpop.f32.mrf.mxu3  ;;  %v14297_v40 = vadd.f32 %v4692_v41, %v14198_v20  ;;  %v4668_v23 = vpop.f32.mrf.mxu0  ;;  %6165 = vrot.lane.b32.xlu2 %v6142_v63, %s12210_s14  ;;  %6378 = vst [vmem:[#allocation1] ss:$4 sm:$0xff] %v12274_v2 }
 0x42e   : > { %v14300_v51 = vadd.f32 %v4705_v29, %v14201_v44  ;;  %v4681_v47 = vpop.f32.mrf.mxu1  ;;  %v5684_v11 = vpop.permute.xlu0 %5683 }
 0x42f   : > { %v5686_v62 = vpop.permute.xlu1 %5685 }
 0x430   : > { %v5706_v20 = vsel %vm5705_vm11, %v5684_v11, %v5686_v62  ;;  %v5707_v45 = vsel %vm5705_vm11, %v5686_v62, %v5688_v55 }
 0x431   : > { %v5720_v37 = vsel %vm239_vm1, %v5706_v20, 0  ;;  %v5723_v60 = vsel %vm239_vm1, %v5707_v45, 0 }
 0x434   : > { %v4694_v15 = vpop.f32.mrf.mxu2  ;;  %6391 = vrot.lane.b32.xlu0 %v6368_v16, %s12211_s17  ;;  %6393 = vrot.lane.b32.xlu1 %v6370_v7, %s12211_s17  ;;  %v6381_v46 = vld.sshfl [vmem:[#allocation1 + $0x8] sm:$0xff pattern:$0x73625140]  ;;  %v6379_v11 = vld.sshfl [vmem:[#allocation1] sm:$0xff pattern:$0x73625140] }
 0x435   : > { %v4707_v52 = vpop.f32.mrf.mxu3  ;;  %v4822_v44 = vpop.f32.mrf.mxu0  ;;  %6171 = vrot.lane.b32.xlu2 %v14262_v9, %s12210_s14  ;;  %v6383_v16 = vld.sshfl [vmem:[#allocation1 + $0x10] sm:$0xff pattern:$0x73625140] }
 0x436   : > { %v4835_v43 = vpop.f32.mrf.mxu1  ;;  %v14309_v57 = vadd.f32 %v4822_v44, %v14222_v38  ;;  %v5690_v36 = vpop.permute.xlu0 %5689  ;;  %6593 = vst [vmem:[#allocation1] ss:$4 sm:$0xff] %v12268_v0  ;;  %v14379_v44 = vld [vmem:[%s16558_s1 + $0x60] sm:$0xf] }
 0x437   : > { %v14312_v12 = vadd.f32 %v4835_v43, %v14225_v49  ;;  %v5692_v61 = vpop.permute.xlu1 %5691  ;;  %v5708_v35 = vsel %vm5705_vm11, %v5688_v55, %v5690_v36  ;;  %v5694_v49 = vpop.permute.xlu2 %5693 }
 0x438   : > { %v5709_v24 = vsel %vm5705_vm11, %v5690_v36, %v5692_v61  ;;  %11831 = vmatmul.msk.bf16.vlgmr.msra.gmra.mxu0 %vm235_vm2, %v14278_v31  ;;  %11832 = vmatmul.msk.bf16.vlgmr.msra.gmra.mxu1 %vm235_vm2, %v14278_v31  ;;  %v5726_v38 = vsel %vm239_vm1, %v5708_v35, 0  ;;  %v5710_v54 = vsel %vm5705_vm11, %v5692_v61, %v5694_v49 }
 0x439   : > { %v5729_v34 = vsel %vm239_vm1, %v5709_v24, 0  ;;  %11833 = vmatmul.msk.bf16.vlgmr.msra.gmra.mxu2 %vm235_vm2, %v14278_v31  ;;  %5756 = vmatpush.bf16.msra.mxu0 %v5720_v37  ;;  %v5732_v53 = vsel %vm239_vm1, %v5710_v54, 0 }
 0x43a   : > { %11834 = vmatmul.msk.bf16.vlgmr.msra.gmra.mxu3 %vm235_vm2, %v14278_v31  ;;  %5769 = vmatpush.bf16.msra.mxu1 %v5723_v60 }
 0x43b   : > { %5782 = vmatpush.bf16.msra.mxu2 %v5726_v38  ;;  %5795 = vmatpush.bf16.msra.mxu3 %v5729_v34 }
 0x43c   : > { %v4848_v17 = vpop.f32.mrf.mxu2  ;;  %6397 = vrot.lane.b32.xlu0 %v6374_v59, %s12211_s17  ;;  %6399 = vrot.lane.b32.xlu1 %v6376_v3, %s12211_s17 }
 0x43d   : > { %v4861_v4 = vpop.f32.mrf.mxu3  ;;  %v14332_v25 = vadd.f32 %v4848_v17, %v14235_v13  ;;  %v4824_v28 = vpop.f32.mrf.mxu0  ;;  %6389 = vrot.lane.b32.xlu2 %v6366_v42, %s12211_s17  ;;  %v6598_v34 = vld.sshfl [vmem:[#allocation1 + $0x10] sm:$0xff pattern:$0x73625140] }
 0x43e   : > { %v14335_v26 = vadd.f32 %v4861_v4, %v14238_v21  ;;  %v4837_v33 = vpop.f32.mrf.mxu1  ;;  %v5696_v32 = vpop.permute.xlu0 %5695 }
 0x43f   : > { %v5698_v22 = vpop.permute.xlu1 %5697  ;;  %v5700_v14 = vpop.permute.xlu2 %5699  ;;  %v5711_v9 = vsel %vm5705_vm11, %v5694_v49, %v5696_v32  ;;  %v6600_v49 = vld.sshfl [vmem:[#allocation1 + $0x18] sm:$0xff pattern:$0x73625140] }
 0x440   : > { %v5712_v6 = vsel %vm5705_vm11, %v5696_v32, %v5698_v22  ;;  %v5713_v58 = vsel %vm5705_vm11, %v5698_v22, %v5700_v14  ;;  %v5735_v30 = vsel %vm239_vm1, %v5711_v9, 0 }
 0x441   : > { %v5738_v8 = vsel %vm239_vm1, %v5712_v6, 0  ;;  %v5741_v50 = vsel %vm239_vm1, %v5713_v58, 0 }
 0x444   : > { %v4850_v19 = vpop.f32.mrf.mxu2  ;;  %6403 = vrot.lane.b32.xlu0 %v6381_v46, %s12211_s17  ;;  %6405 = vrot.lane.b32.xlu1 %v6383_v16, %s12211_s17 }
 0x445   : > { %v4863_v18 = vpop.f32.mrf.mxu3  ;;  %v4874_v13 = vpop.f32.mrf.mxu0 }
 0x446   : > { %v4887_v21 = vpop.f32.mrf.mxu1  ;;  %v14344_v39 = vadd.f32 %v4874_v13, %v14257_v5  ;;  %v5702_v5 = vpop.permute.xlu0 %5701 }
 0x447   : > { %v14347_v10 = vadd.f32 %v4887_v21, %v14260_v27  ;;  %v5704_v63 = vpop.permute.xlu1 %5703  ;;  %v5918_v62 = vpop.permute.xlu2 %5917 }
 0x448   : > { %11835 = vmatmul.msk.bf16.vlgmr.msrb.gmra.mxu0 %vm235_vm2, %v14278_v31  ;;  %11836 = vmatmul.msk.bf16.vlgmr.msrb.gmra.mxu1 %vm235_vm2, %v14278_v31  ;;  %v5715_v52 = vsel %vm5705_vm11, %v5702_v5, %v5704_v63 }
 0x449   : > { %11837 = vmatmul.msk.bf16.vlgmr.msrb.gmra.mxu2 %vm235_vm2, %v14278_v31  ;;  %5808 = vmatpush.bf16.msrb.mxu0 %v5732_v53  ;;  %v5747_v60 = vsel %vm239_vm1, %v5715_v52, 0 }
 0x44a   : > { %11838 = vmatmul.msk.bf16.vlgmr.msrb.gmra.mxu3 %vm235_vm2, %v14278_v31  ;;  %5821 = vmatpush.bf16.msrb.mxu1 %v5735_v30  ;;  %v6372_v31 = vld.sshfl [vmem:[#allocation1 + $0x28] sm:$0xff pattern:$0x73625140] }
 0x44b   : > { %5834 = vmatpush.bf16.msrb.mxu2 %v5738_v8  ;;  %5847 = vmatpush.bf16.msrb.mxu3 %v5741_v50  ;;  %6595 = vst [vmem:[#allocation1 + $0x20] ss:$4 sm:$0xff] %v12270_v1 }
 0x44c   : > { %v4900_v27 = vpop.f32.mrf.mxu2  ;;  %6395 = vrot.lane.b32.xlu2 %v6372_v31, %s12211_s17  ;;  %6621 = vrot.lane.b32.xlu1 %v6600_v49, %s12212_s20 }
 0x44d   : > { %v4913_v55 = vpop.f32.mrf.mxu3  ;;  %v14364_v41 = vadd.f32 %v4900_v27, %v14270_v48  ;;  %v4876_v23 = vpop.f32.mrf.mxu0  ;;  %6619 = vrot.lane.b32.xlu0 %v6598_v34, %s12212_s20 }
 0x44e   : > { %v14367_v29 = vadd.f32 %v4913_v55, %v14273_v56  ;;  %v4889_v47 = vpop.f32.mrf.mxu1  ;;  %v5714_v56 = vsel %vm5705_vm11, %v5700_v14, %v5702_v5  ;;  %v5920_v35 = vpop.permute.xlu0 %5919  ;;  %vm8931_vm11 = vcmask 515072  }
 0x44f   : > { %v5922_v61 = vpop.permute.xlu1 %5921  ;;  %v5744_v37 = vsel %vm239_vm1, %v5714_v56, 0  ;;  %v5940_v24 = vsel %vm5939_vm12, %v5918_v62, %v5920_v35  ;;  %v5924_v7 = vpop.permute.xlu2 %5923 }
 0x450   : > { %v5941_v38 = vsel %vm5939_vm12, %v5920_v35, %v5922_v61  ;;  %v5942_v9 = vsel %vm5939_vm12, %v5922_v61, %v5924_v7 }
 0x451   : > { %v5960_v30 = vsel %vm239_vm1, %v5942_v9, 0 }
 0x452   : > { %v6604_v22 = vld.sshfl [vmem:[#allocation1 + $0x28] sm:$0xff pattern:$0x73625140]  ;;  %v6606_v14 = vld.sshfl [vmem:[#allocation1 + $0x30] sm:$0xff pattern:$0x73625140] }
 0x454   : > { %v4902_v48 = vpop.f32.mrf.mxu2  ;;  %6401 = vrot.lane.b32.xlu2 %v6379_v11, %s12211_s17  ;;  %6627 = vrot.lane.b32.xlu1 %v6606_v14, %s12212_s20  ;;  %v6608_v14 = vld.sshfl [vmem:[#allocation1 + $0x38] sm:$0xff pattern:$0x73625140]  ;;  %s12220_s17 = smov 65  }
 0x455   : > { %v4915_v15 = vpop.f32.mrf.mxu3  ;;  %v4926_v20 = vpop.f32.mrf.mxu0  ;;  %6625 = vrot.lane.b32.xlu0 %v6604_v22, %s12212_s20  ;;  %v6602_v48 = vld.sshfl [vmem:[#allocation1 + $0x20] sm:$0xff pattern:$0x73625140] }
 0x456   : > { %v4939_v45 = vpop.f32.mrf.mxu1  ;;  %v14382_v43 = vadd.f32 %v4926_v20, %v14297_v40  ;;  %v5954_v40 = vsel %vm239_vm1, %v5940_v24, 0  ;;  %v5926_v3 = vpop.permute.xlu0 %5925  ;;  %6824 = vst [vmem:[#allocation1 + $0x20] ss:$4 sm:$0xff] %v12270_v1 }
 0x457   : > { %v14385_v36 = vadd.f32 %v4939_v45, %v14300_v51  ;;  %v5957_v51 = vsel %vm239_vm1, %v5941_v38, 0  ;;  %v5943_v13 = vsel %vm5939_vm12, %v5924_v7, %v5926_v3  ;;  %v5930_v53 = vpop.permute.xlu2 %5929  ;;  %v14461_v38 = vld [vmem:[%s16558_s1 + $0x64] sm:$0xf] }
 0x458   : > { %11840 = vmatmul.msk.bf16.vlgmr.msra.gmra.mxu0 %vm235_vm2, %v14379_v44  ;;  %11841 = vmatmul.msk.bf16.vlgmr.msra.gmra.mxu1 %vm235_vm2, %v14379_v44  ;;  %v5963_v8 = vsel %vm239_vm1, %v5943_v13, 0 }
 0x459   : > { %11842 = vmatmul.msk.bf16.vlgmr.msra.gmra.mxu2 %vm235_vm2, %v14379_v44  ;;  %5860 = vmatpush.bf16.msra.mxu0 %v5744_v37 }
 0x45a   : > { %11843 = vmatmul.msk.bf16.vlgmr.msra.gmra.mxu3 %vm235_vm2, %v14379_v44  ;;  %5873 = vmatpush.bf16.msra.mxu1 %v5747_v60 }
 0x45b   : > { %5990 = vmatpush.bf16.msra.mxu2 %v5954_v40  ;;  %6003 = vmatpush.bf16.msra.mxu3 %v5957_v51 }
 0x45c   : > { %v5056_v17 = vpop.f32.mrf.mxu2 }
 0x45d   : > { %v5069_v4 = vpop.f32.mrf.mxu3  ;;  %v14404_v28 = vadd.f32 %v5056_v17, %v14309_v57  ;;  %v4928_v59 = vpop.f32.mrf.mxu0 }
 0x45e   : > { %v14407_v33 = vadd.f32 %v5069_v4, %v14312_v12  ;;  %v4941_v32 = vpop.f32.mrf.mxu1  ;;  %v5928_v19 = vpop.permute.xlu1 %5927 }
 0x45f   : > { %v5944_v21 = vsel %vm5939_vm12, %v5926_v3, %v5928_v19  ;;  %v5945_v50 = vsel %vm5939_vm12, %v5928_v19, %v5930_v53  ;;  %v5936_v16 = vpop.permute.xlu2 %5935 }
 0x460   : > { %v5966_v42 = vsel %vm239_vm1, %v5944_v21, 0  ;;  %v5969_v5 = vsel %vm239_vm1, %v5945_v50, 0 }
 0x464   : > { %v5058_v18 = vpop.f32.mrf.mxu2 }
 0x465   : > { %v5071_v54 = vpop.f32.mrf.mxu3  ;;  %v5082_v57 = vpop.f32.mrf.mxu0 }
 0x466   : > { %v5095_v12 = vpop.f32.mrf.mxu1  ;;  %v14416_v6 = vadd.f32 %v5082_v57, %v14332_v25  ;;  %v5932_v25 = vpop.permute.xlu0 %5931 }
 0x467   : > { %v14419_v58 = vadd.f32 %v5095_v12, %v14335_v26  ;;  %v6596_v26 = vld.sshfl [vmem:[#allocation1 + $0x8] sm:$0xff pattern:$0x73625140]  ;;  %v5934_v46 = vpop.permute.xlu1 %5933 }
 0x468   : > { %11844 = vmatmul.msk.bf16.vlgmr.msrb.gmra.mxu0 %vm235_vm2, %v14379_v44  ;;  %11845 = vmatmul.msk.bf16.vlgmr.msrb.gmra.mxu1 %vm235_vm2, %v14379_v44  ;;  %6610 = vst [vmem:[#allocation1] ss:$4 sm:$0xff] %v12274_v2  ;;  %v5947_v20 = vsel %vm5939_vm12, %v5932_v25, %v5934_v46  ;;  %v5948_v35 = vsel %vm5939_vm12, %v5934_v46, %v5936_v16 }
 0x469   : > { %11846 = vmatmul.msk.bf16.vlgmr.msrb.gmra.mxu2 %vm235_vm2, %v14379_v44  ;;  %6016 = vmatpush.bf16.msrb.mxu0 %v5960_v30  ;;  %v5975_v51 = vsel %vm239_vm1, %v5947_v20, 0 }
 0x46a   : > { %11847 = vmatmul.msk.bf16.vlgmr.msrb.gmra.mxu3 %vm235_vm2, %v14379_v44  ;;  %6029 = vmatpush.bf16.msrb.mxu1 %v5963_v8 }
 0x46b   : > { %6042 = vmatpush.bf16.msrb.mxu2 %v5966_v42  ;;  %6055 = vmatpush.bf16.msrb.mxu3 %v5969_v5 }
 0x46c   : > { %v5108_v27 = vpop.f32.mrf.mxu2  ;;  %6617 = vrot.lane.b32.xlu2 %v6596_v26, %s12212_s20 }
 0x46d   : > { %v5121_v55 = vpop.f32.mrf.mxu3  ;;  %v14437_v23 = vadd.f32 %v5108_v27, %v14344_v39  ;;  %v5084_v31 = vpop.f32.mrf.mxu0  ;;  %v6833_v27 = vld.sshfl [vmem:[#allocation1 + $0x28] sm:$0xff pattern:$0x73625140] }
 0x46e   : > { %v14440_v47 = vadd.f32 %v5121_v55, %v14347_v10  ;;  %v5097_v63 = vpop.f32.mrf.mxu1  ;;  %v5938_v39 = vpop.permute.xlu0 %5937  ;;  %v5946_v10 = vsel %vm5939_vm12, %v5930_v53, %v5932_v25  ;;  %v6831_v53 = vld.sshfl [vmem:[#allocation1 + $0x20] sm:$0xff pattern:$0x73625140] }
 0x46f   : > { %v6611_v11 = vld.sshfl [vmem:[#allocation1] sm:$0xff pattern:$0x73625140]  ;;  %v14442_v62 = vld.sshfl [vmem:[#allocation1 + $0x10] sm:$0xff pattern:$0x73625140]  ;;  %v5949_v37 = vsel %vm5939_vm12, %v5936_v16, %v5938_v39  ;;  %v6152_v49 = vpop.permute.xlu1 %6151 }
 0x470   : > { %6631 = vrot.lane.b32.xlu0 %v6611_v11, %s12212_s20  ;;  %v6613_v15 = vld.sshfl [vmem:[#allocation1 + $0x8] sm:$0xff pattern:$0x73625140]  ;;  %v5972_v40 = vsel %vm239_vm1, %v5946_v10, 0  ;;  %vm9165_vm12 = vcmask 506880  }
 0x471   : > { %6633 = vrot.lane.b32.xlu1 %v6613_v15, %s12212_s20  ;;  %6822 = vst [vmem:[#allocation1] ss:$4 sm:$0xff] %v12268_v0  ;;  %v6837_v16 = vld.sshfl [vmem:[#allocation1 + $0x38] sm:$0xff pattern:$0x73625140] }
 0x474   : > { %v5110_v56 = vpop.f32.mrf.mxu2  ;;  %6623 = vrot.lane.b32.xlu2 %v6602_v48, %s12212_s20 }
 0x475   : > { %v5123_v52 = vpop.f32.mrf.mxu3  ;;  %v5134_v45 = vpop.f32.mrf.mxu0 }
 0x476   : > { %v5147_v61 = vpop.f32.mrf.mxu1  ;;  %v14453_v60 = vadd.f32 %v5134_v45, %v14364_v41  ;;  %v5978_v41 = vsel %vm239_vm1, %v5948_v35, 0  ;;  %v6154_v7 = vpop.permute.xlu2 %6153 }
 0x477   : > { %v14456_v24 = vadd.f32 %v5147_v61, %v14367_v29  ;;  %v5981_v29 = vsel %vm239_vm1, %v5949_v37, 0  ;;  %v6156_v18 = vpop.permute.xlu0 %6155  ;;  %v6158_v54 = vpop.permute.xlu1 %6157 }
 0x478   : > { %11848 = vmatmul.msk.bf16.vlgmr.msra.gmra.mxu0 %vm235_vm2, %v14379_v44  ;;  %11849 = vmatmul.msk.bf16.vlgmr.msra.gmra.mxu1 %vm235_vm2, %v14379_v44  ;;  %v6825_v34 = vld.sshfl [vmem:[#allocation1 + $0x8] sm:$0xff pattern:$0x73625140]  ;;  %v6829_v44 = vld.sshfl [vmem:[#allocation1 + $0x18] sm:$0xff pattern:$0x73625140]  ;;  %v6175_v13 = vsel %vm6173_vm13, %v6154_v7, %v6156_v18  ;;  %v6176_v21 = vsel %vm6173_vm13, %v6156_v18, %v6158_v54 }
 0x479   : > { %11851 = vmatmul.msk.bf16.vlgmr.msra.gmra.mxu2 %vm235_vm2, %v14461_v38  ;;  %6068 = vmatpush.bf16.msra.mxu0 %v5972_v40  ;;  %v6827_v19 = vld.sshfl [vmem:[#allocation1 + $0x10] sm:$0xff pattern:$0x73625140]  ;;  %v6191_v25 = vsel %vm239_vm1, %v6175_v13, 0 }
 0x47a   : > { %11852 = vmatmul.msk.bf16.vlgmr.msra.gmra.mxu3 %vm235_vm2, %v14461_v38  ;;  %6081 = vmatpush.bf16.msra.mxu1 %v5975_v51  ;;  %6839 = vst [vmem:[#allocation1] ss:$4 sm:$0xff] %v12274_v2 }
 0x47b   : > { %6094 = vmatpush.bf16.msra.mxu2 %v5978_v41  ;;  %6107 = vmatpush.bf16.msra.mxu3 %v5981_v29 }
 0x47c   : > { %v5160_v17 = vpop.f32.mrf.mxu2  ;;  %6846 = vrot.lane.b32.xlu0 %v6825_v34, %s12213_s23  ;;  %6629 = vrot.lane.b32.xlu2 %v6608_v14, %s12212_s20  ;;  %v6835_v14 = vld.sshfl [vmem:[#allocation1 + $0x30] sm:$0xff pattern:$0x73625140] }
 0x47d   : > { %v5173_v4 = vpop.f32.mrf.mxu3  ;;  %v14477_v59 = vadd.f32 %v5160_v17, %v14382_v43  ;;  %v5136_v3 = vpop.f32.mrf.mxu0  ;;  %6848 = vrot.lane.b32.xlu1 %v6827_v19, %s12213_s23  ;;  %7053 = vst [vmem:[#allocation1 + $0x20] ss:$4 sm:$0xff] %v12270_v1 }
 0x47e   : > { %v14480_v32 = vadd.f32 %v5173_v4, %v14385_v36  ;;  %v5149_v22 = vpop.f32.mrf.mxu1  ;;  %v6174_v36 = vsel %vm6173_vm13, %v6152_v49, %v6154_v7  ;;  %v6160_v50 = vpop.permute.xlu2 %6159 }
 0x47f   : > { %v6188_v42 = vsel %vm239_vm1, %v6174_v36, 0  ;;  %v6177_v5 = vsel %vm6173_vm13, %v6158_v54, %v6160_v50  ;;  %v6162_v26 = vpop.permute.xlu0 %6161  ;;  %v6164_v48 = vpop.permute.xlu1 %6163 }
 0x480   : > { %v6178_v20 = vsel %vm6173_vm13, %v6160_v50, %v6162_v26 }
 0x481   : > { %v6840_v39 = vld.sshfl [vmem:[#allocation1] sm:$0xff pattern:$0x73625140]  ;;  %v6200_v51 = vsel %vm239_vm1, %v6178_v20, 0 }
 0x482   : > { %v6842_v29 = vld.sshfl [vmem:[#allocation1 + $0x8] sm:$0xff pattern:$0x73625140] }
 0x484   : > { %v5162_v43 = vpop.f32.mrf.mxu2  ;;  %6852 = vrot.lane.b32.xlu0 %v6831_v53, %s12213_s23  ;;  %6635 = vrot.lane.b32.xlu2 %v14442_v62, %s12212_s20 }
 0x485   : > { %v5175_v9 = vpop.f32.mrf.mxu3  ;;  %v5290_v57 = vpop.f32.mrf.mxu0  ;;  %6854 = vrot.lane.b32.xlu1 %v6833_v27, %s12213_s23 }
 0x486   : > { %v5303_v12 = vpop.f32.mrf.mxu1  ;;  %v14490_v30 = vadd.f32 %v5290_v57, %v14404_v28  ;;  %v6194_v28 = vsel %vm239_vm1, %v6176_v21, 0  ;;  %v14559_v57 = vld [vmem:[%s16558_s1 + $0x68] sm:$0xf] }
 0x487   : > { %v14493_v8 = vadd.f32 %v5303_v12, %v14407_v33  ;;  %v6197_v33 = vsel %vm239_vm1, %v6177_v5, 0  ;;  %v6166_v15 = vpop.permute.xlu2 %6165 }
 0x488   : > { %11853 = vmatmul.msk.bf16.vlgmr.msrb.gmra.mxu0 %vm235_vm2, %v14461_v38  ;;  %11854 = vmatmul.msk.bf16.vlgmr.msrb.gmra.mxu1 %vm235_vm2, %v14461_v38  ;;  %v6180_v61 = vsel %vm6173_vm13, %v6164_v48, %v6166_v15 }
 0x489   : > { %11855 = vmatmul.msk.bf16.vlgmr.msrb.gmra.mxu2 %vm235_vm2, %v14461_v38  ;;  %6224 = vmatpush.bf16.msrb.mxu0 %v6188_v42  ;;  %v6206_v49 = vsel %vm239_vm1, %v6180_v61, 0 }
 0x48a   : > { %11856 = vmatmul.msk.bf16.vlgmr.msrb.gmra.mxu3 %vm235_vm2, %v14461_v38  ;;  %6237 = vmatpush.bf16.msrb.mxu1 %v6191_v25 }
 0x48b   : > { %6250 = vmatpush.bf16.msrb.mxu2 %v6194_v28  ;;  %6263 = vmatpush.bf16.msrb.mxu3 %v6197_v33 }
 0x48c   : > { %v5316_v55 = vpop.f32.mrf.mxu2  ;;  %6858 = vrot.lane.b32.xlu0 %v6837_v16, %s12213_s23  ;;  %6850 = vrot.lane.b32.xlu2 %v6829_v44, %s12213_s23 }
 0x48d   : > { %v5329_v31 = vpop.f32.mrf.mxu3  ;;  %v14513_v63 = vadd.f32 %v5316_v55, %v14416_v6  ;;  %v5292_v11 = vpop.f32.mrf.mxu0  ;;  %v6179_v6 = vsel %vm6173_vm13, %v6162_v26, %v6164_v48  ;;  %6860 = vrot.lane.b32.xlu1 %v6840_v39, %s12213_s23  ;;  %v7060_v26 = vld.sshfl [vmem:[#allocation1 + $0x20] sm:$0xff pattern:$0x73625140] }
 0x48e   : > { %v14516_v46 = vadd.f32 %v5329_v31, %v14419_v58  ;;  %v5305_v62 = vpop.f32.mrf.mxu1  ;;  %v6203_v41 = vsel %vm239_vm1, %v6179_v6, 0 }
 0x48f   : > { %v6172_v7 = vpop.permute.xlu2 %6171 }
 0x492   : > { %v6168_v56 = vpop.permute.xlu0 %6167 }
 0x493   : > { %v6181_v35 = vsel %vm6173_vm13, %v6166_v15, %v6168_v56  ;;  %v6170_v34 = vpop.permute.xlu1 %6169  ;;  %v7064_v15 = vld.sshfl [vmem:[#allocation1 + $0x30] sm:$0xff pattern:$0x73625140] }
 0x494   : > { %v5318_v52 = vpop.f32.mrf.mxu2  ;;  %6856 = vrot.lane.b32.xlu2 %v6835_v14, %s12213_s23  ;;  %v6182_v9 = vsel %vm6173_vm13, %v6168_v56, %v6170_v34 }
 0x495   : > { %v5331_v10 = vpop.f32.mrf.mxu3  ;;  %v5342_v58 = vpop.f32.mrf.mxu0  ;;  %v6212_v42 = vsel %vm239_vm1, %v6182_v9, 0 }
 0x496   : > { %v5355_v45 = vpop.f32.mrf.mxu1  ;;  %v14526_v37 = vadd.f32 %v5342_v58, %v14437_v23  ;;  %v6209_v23 = vsel %vm239_vm1, %v6181_v35, 0 }
 0x497   : > { %v14529_v40 = vadd.f32 %v5355_v45, %v14440_v47  ;;  %v6844_v47 = vld.sshfl [vmem:[#allocation1 + $0x10] sm:$0xff pattern:$0x73625140]  ;;  %v6390_v50 = vpop.permute.xlu2 %6389 }
 0x498   : > { %11857 = vmatmul.msk.bf16.vlgmr.msra.gmra.mxu0 %vm235_vm2, %v14461_v38  ;;  %11858 = vmatmul.msk.bf16.vlgmr.msra.gmra.mxu1 %vm235_vm2, %v14461_v38  ;;  %7051 = vst [vmem:[#allocation1] ss:$4 sm:$0xff] %v12268_v0 }
 0x499   : > { %11859 = vmatmul.msk.bf16.vlgmr.msra.gmra.mxu2 %vm235_vm2, %v14461_v38  ;;  %6276 = vmatpush.bf16.msra.mxu0 %v6200_v51 }
 0x49a   : > { %11860 = vmatmul.msk.bf16.vlgmr.msra.gmra.mxu3 %vm235_vm2, %v14461_v38  ;;  %6289 = vmatpush.bf16.msra.mxu1 %v6203_v41 }
 0x49b   : > { %6302 = vmatpush.bf16.msra.mxu2 %v6206_v49  ;;  %6315 = vmatpush.bf16.msra.mxu3 %v6209_v23 }
 0x49c   : > { %v5368_v17 = vpop.f32.mrf.mxu2  ;;  %6864 = vrot.lane.b32.xlu0 %v6844_v47, %s12213_s23  ;;  %6862 = vrot.lane.b32.xlu2 %v6842_v29, %s12213_s23  ;;  %s12222_s23 = smov 63  }
 0x49d   : > { %v5381_v4 = vpop.f32.mrf.mxu3  ;;  %v14546_v44 = vadd.f32 %v5368_v17, %v14453_v60  ;;  %v5344_v22 = vpop.f32.mrf.mxu0 }
 0x49e   : > { %v14549_v3 = vadd.f32 %v5381_v4, %v14456_v24  ;;  %v5357_v38 = vpop.f32.mrf.mxu1  ;;  %v6386_v19 = vpop.permute.xlu0 %6385  ;;  %v6183_v24 = vsel %vm6173_vm13, %v6170_v34, %v6172_v7  ;;  %vm9399_vm13 = vcmask 498688  }
 0x49f   : > { %v7054_v18 = vld.sshfl [vmem:[#allocation1 + $0x8] sm:$0xff pattern:$0x73625140]  ;;  %v6388_v54 = vpop.permute.xlu1 %6387  ;;  %v6215_v25 = vsel %vm239_vm1, %v6183_v24, 0 }
 0x4a0   : > { %7075 = vrot.lane.b32.xlu1 %v7054_v18, %s12214_s24  ;;  %v6408_v12 = vsel %vm6407_vm14, %v6386_v19, %v6388_v54  ;;  %v6409_v5 = vsel %vm6407_vm14, %v6388_v54, %v6390_v50  ;;  %v7058_v33 = vld.sshfl [vmem:[#allocation1 + $0x18] sm:$0xff pattern:$0x73625140]  ;;  %v7056_v34 = vld.sshfl [vmem:[#allocation1 + $0x10] sm:$0xff pattern:$0x73625140] }
 0x4a1   : > { %v6422_v28 = vsel %vm239_vm1, %v6408_v12, 0  ;;  %7068 = vst [vmem:[#allocation1] ss:$4 sm:$0xff] %v12274_v2  ;;  %v14636_v12 = vld [vmem:[%s16558_s1 + $0x6c] sm:$0xf] }
 0x4a4   : > { %v5370_v43 = vpop.f32.mrf.mxu2  ;;  %7079 = vrot.lane.b32.xlu0 %v7058_v33, %s12214_s24  ;;  %7077 = vrot.lane.b32.xlu2 %v7056_v34, %s12214_s24 }
 0x4a5   : > { %v5383_v60 = vpop.f32.mrf.mxu3  ;;  %v5394_v36 = vpop.f32.mrf.mxu0 }
 0x4a6   : > { %v5407_v13 = vpop.f32.mrf.mxu1  ;;  %v14563_v21 = vadd.f32 %v5394_v36, %v14477_v59  ;;  %v6392_v59 = vpop.permute.xlu0 %6391 }
 0x4a7   : > { %v14566_v53 = vadd.f32 %v5407_v13, %v14480_v32  ;;  %v6425_v32 = vsel %vm239_vm1, %v6409_v5, 0  ;;  %v6394_v48 = vpop.permute.xlu1 %6393  ;;  %v6396_v39 = vpop.permute.xlu2 %6395  ;;  %v6410_v20 = vsel %vm6407_vm14, %v6390_v50, %v6392_v59 }
 0x4a8   : > { %11862 = vmatmul.msk.bf16.vlgmr.msrb.gmra.mxu0 %vm235_vm2, %v14559_v57  ;;  %11863 = vmatmul.msk.bf16.vlgmr.msrb.gmra.mxu1 %vm235_vm2, %v14559_v57  ;;  %v6411_v6 = vsel %vm6407_vm14, %v6392_v59, %v6394_v48  ;;  %v6412_v45 = vsel %vm6407_vm14, %v6394_v48, %v6396_v39  ;;  %v6428_v51 = vsel %vm239_vm1, %v6410_v20, 0  ;;  %v7071_v14 = vld.sshfl [vmem:[#allocation1 + $0x8] sm:$0xff pattern:$0x73625140] }
 0x4a9   : > { %11864 = vmatmul.msk.bf16.vlgmr.msrb.gmra.mxu2 %vm235_vm2, %v14559_v57  ;;  %6328 = vmatpush.bf16.msrb.mxu0 %v6212_v42  ;;  %v6431_v41 = vsel %vm239_vm1, %v6411_v6, 0  ;;  %v6434_v29 = vsel %vm239_vm1, %v6412_v45, 0  ;;  %v7073_v19 = vld.sshfl [vmem:[#allocation1 + $0x10] sm:$0xff pattern:$0x73625140] }
 0x4aa   : > { %11865 = vmatmul.msk.bf16.vlgmr.msrb.gmra.mxu3 %vm235_vm2, %v14559_v57  ;;  %6341 = vmatpush.bf16.msrb.mxu1 %v6215_v25 }
 0x4ab   : > { %6458 = vmatpush.bf16.msrb.mxu2 %v6422_v28  ;;  %6471 = vmatpush.bf16.msrb.mxu3 %v6425_v32  ;;  %v7062_v28 = vld.sshfl [vmem:[#allocation1 + $0x28] sm:$0xff pattern:$0x73625140]  ;;  %v7069_v32 = vld.sshfl [vmem:[#allocation1] sm:$0xff pattern:$0x73625140] }
 0x4ac   : > { %v5524_v27 = vpop.f32.mrf.mxu2  ;;  %7081 = vrot.lane.b32.xlu1 %v7060_v26, %s12214_s24  ;;  %7085 = vrot.lane.b32.xlu0 %v7064_v15, %s12214_s24  ;;  %7280 = vst [vmem:[#allocation1] ss:$4 sm:$0xff] %v12268_v0 }
 0x4ad   : > { %v5537_v55 = vpop.f32.mrf.mxu3  ;;  %v14585_v31 = vadd.f32 %v5524_v27, %v14490_v30  ;;  %v5396_v62 = vpop.f32.mrf.mxu0  ;;  %7083 = vrot.lane.b32.xlu2 %v7062_v28, %s12214_s24 }
 0x4ae   : > { %v14588_v11 = vadd.f32 %v5537_v55, %v14493_v8  ;;  %v5409_v16 = vpop.f32.mrf.mxu1  ;;  %v6398_v56 = vpop.permute.xlu0 %6397 }
 0x4af   : > { %v6413_v8 = vsel %vm6407_vm14, %v6396_v39, %v6398_v56  ;;  %v6402_v38 = vpop.permute.xlu2 %6401 }
 0x4b0   : > { %v6437_v49 = vsel %vm239_vm1, %v6413_v8, 0 }
 0x4b3   : > { %v7287_v15 = vld.sshfl [vmem:[#allocation1 + $0x18] sm:$0xff pattern:$0x73625140] }
 0x4b4   : > { %v5526_v52 = vpop.f32.mrf.mxu2  ;;  %7091 = vrot.lane.b32.xlu0 %v7071_v14, %s12214_s24  ;;  %v7283_v14 = vld.sshfl [vmem:[#allocation1 + $0x8] sm:$0xff pattern:$0x73625140] }
 0x4b5   : > { %v5539_v10 = vpop.f32.mrf.mxu3  ;;  %v5550_v58 = vpop.f32.mrf.mxu0  ;;  %7089 = vrot.lane.b32.xlu2 %v7069_v32, %s12214_s24 }
 0x4b6   : > { %v5563_v30 = vpop.f32.mrf.mxu1  ;;  %v14596_v61 = vadd.f32 %v5550_v58, %v14513_v63  ;;  %v7066_v63 = vld.sshfl [vmem:[#allocation1 + $0x38] sm:$0xff pattern:$0x73625140]  ;;  %v6404_v18 = vpop.permute.xlu0 %6403 }
 0x4b7   : > { %v14599_v35 = vadd.f32 %v5563_v30, %v14516_v46  ;;  %v6400_v46 = vpop.permute.xlu1 %6399  ;;  %7087 = vrot.lane.b32.xlu1 %v7066_v63, %s12214_s24  ;;  %7282 = vst [vmem:[#allocation1 + $0x20] ss:$4 sm:$0xff] %v12270_v1 }
 0x4b8   : > { %11866 = vmatmul.msk.bf16.vlgmr.msra.gmra.mxu0 %vm235_vm2, %v14559_v57  ;;  %11867 = vmatmul.msk.bf16.vlgmr.msra.gmra.mxu1 %vm235_vm2, %v14559_v57  ;;  %v6414_v60 = vsel %vm6407_vm14, %v6398_v56, %v6400_v46  ;;  %v6415_v9 = vsel %vm6407_vm14, %v6400_v46, %v6402_v38  ;;  %v7285_v56 = vld.sshfl [vmem:[#allocation1 + $0x10] sm:$0xff pattern:$0x73625140] }
 0x4b9   : > { %11868 = vmatmul.msk.bf16.vlgmr.msra.gmra.mxu2 %vm235_vm2, %v14559_v57  ;;  %6484 = vmatpush.bf16.msra.mxu0 %v6428_v51  ;;  %v6440_v42 = vsel %vm239_vm1, %v6414_v60, 0  ;;  %v6443_v25 = vsel %vm239_vm1, %v6415_v9, 0  ;;  %7297 = vst [vmem:[#allocation1] ss:$4 sm:$0xff] %v12274_v2 }
 0x4ba   : > { %11869 = vmatmul.msk.bf16.vlgmr.msra.gmra.mxu3 %vm235_vm2, %v14559_v57  ;;  %6497 = vmatpush.bf16.msra.mxu1 %v6431_v41 }
 0x4bb   : > { %6510 = vmatpush.bf16.msra.mxu2 %v6434_v29  ;;  %6523 = vmatpush.bf16.msra.mxu3 %v6437_v49 }
 0x4bc   : > { %v5576_v23 = vpop.f32.mrf.mxu2  ;;  %7306 = vrot.lane.b32.xlu0 %v7285_v56, %s12215_s29 }
 0x4bd   : > { %v5589_v47 = vpop.f32.mrf.mxu3  ;;  %v14617_v7 = vadd.f32 %v5576_v23, %v14526_v37  ;;  %v5552_v4 = vpop.f32.mrf.mxu0  ;;  %7304 = vrot.lane.b32.xlu2 %v7283_v14, %s12215_s29 }
 0x4be   : > { %v14620_v17 = vadd.f32 %v5589_v47, %v14529_v40  ;;  %v5565_v22 = vpop.f32.mrf.mxu1  ;;  %v6416_v40 = vsel %vm6407_vm14, %v6402_v38, %v6404_v18  ;;  %v7291_v34 = vld.sshfl [vmem:[#allocation1 + $0x28] sm:$0xff pattern:$0x73625140]  ;;  %v7289_v32 = vld.sshfl [vmem:[#allocation1 + $0x20] sm:$0xff pattern:$0x73625140] }
 0x4bf   : > { %7093 = vrot.lane.b32.xlu1 %v7073_v19, %s12214_s24  ;;  %v6406_v50 = vpop.permute.xlu1 %6405  ;;  %v6620_v16 = vpop.permute.xlu0 %6619  ;;  %s12230_s24 = smov 24  }
 0x4c0   : > { %v6417_v5 = vsel %vm6407_vm14, %v6404_v18, %v6406_v50  ;;  %v7300_v28 = vld.sshfl [vmem:[#allocation1 + $0x8] sm:$0xff pattern:$0x73625140]  ;;  %vm9633_vm14 = vcmask 490496  }
 0x4c4   : > { %v5578_v54 = vpop.f32.mrf.mxu2  ;;  %7312 = vrot.lane.b32.xlu0 %v7291_v34, %s12215_s29 }
 0x4c5   : > { %v5591_v43 = vpop.f32.mrf.mxu3  ;;  %v5602_v37 = vpop.f32.mrf.mxu0  ;;  %7310 = vrot.lane.b32.xlu2 %v7289_v32, %s12215_s29 }
 0x4c6   : > { %v5615_v24 = vpop.f32.mrf.mxu1  ;;  %v14628_v36 = vadd.f32 %v5602_v37, %v14546_v44  ;;  %v6446_v44 = vsel %vm239_vm1, %v6416_v40, 0  ;;  %v6618_v59 = vpop.permute.xlu2 %6617 }
 0x4c7   : > { %v14631_v13 = vadd.f32 %v5615_v24, %v14549_v3  ;;  %v6449_v3 = vsel %vm239_vm1, %v6417_v5, 0  ;;  %v6622_v48 = vpop.permute.xlu1 %6621  ;;  %7308 = vrot.lane.b32.xlu1 %v7287_v15, %s12215_s29  ;;  %v6626_v8 = vpop.permute.xlu0 %6625  ;;  %v7298_v24 = vld.sshfl [vmem:[#allocation1] sm:$0xff pattern:$0x73625140] }
 0x4c8   : > { %11870 = vmatmul.msk.bf16.vlgmr.msrb.gmra.mxu0 %vm235_vm2, %v14559_v57  ;;  %11871 = vmatmul.msk.bf16.vlgmr.msrb.gmra.mxu1 %vm235_vm2, %v14559_v57 }
 0x4c9   : > { %11873 = vmatmul.msk.bf16.vlgmr.msrb.gmra.mxu2 %vm235_vm2, %v14636_v12  ;;  %6536 = vmatpush.bf16.msrb.mxu0 %v6440_v42 }
 0x4ca   : > { %11874 = vmatmul.msk.bf16.vlgmr.msrb.gmra.mxu3 %vm235_vm2, %v14636_v12  ;;  %6549 = vmatpush.bf16.msrb.mxu1 %v6443_v25 }
 0x4cb   : > { %6562 = vmatpush.bf16.msrb.mxu2 %v6446_v44  ;;  %6575 = vmatpush.bf16.msrb.mxu3 %v6449_v3  ;;  %v14708_v3 = vld.sshfl [vmem:[#allocation1 + $0x10] sm:$0xff pattern:$0x73625140] }
 0x4cc   : > { %v5628_v57 = vpop.f32.mrf.mxu2  ;;  %7318 = vrot.lane.b32.xlu0 %v7298_v24, %s12215_s29  ;;  %7509 = vst [vmem:[#allocation1] ss:$4 sm:$0xff] %v12268_v0 }
 0x4cd   : > { %v5641_v33 = vpop.f32.mrf.mxu3  ;;  %v14655_v26 = vadd.f32 %v5628_v57, %v14563_v21  ;;  %v5604_v55 = vpop.f32.mrf.mxu0  ;;  %v6638_v21 = vsel %vm6637_vm15, %v6618_v59, %v6620_v16 }
 0x4ce   : > { %v14658_v27 = vadd.f32 %v5641_v33, %v14566_v53  ;;  %v5617_v62 = vpop.f32.mrf.mxu1  ;;  %v6624_v39 = vpop.permute.xlu2 %6623  ;;  %v6639_v53 = vsel %vm6637_vm15, %v6620_v16, %v6622_v48  ;;  %v6651_v51 = vsel %vm239_vm1, %v6638_v21, 0 }
 0x4cf   : > { %v6640_v58 = vsel %vm6637_vm15, %v6622_v48, %v6624_v39  ;;  %v6654_v41 = vsel %vm239_vm1, %v6639_v53, 0  ;;  %v6641_v29 = vsel %vm6637_vm15, %v6624_v39, %v6626_v8  ;;  %v6628_v63 = vpop.permute.xlu1 %6627 }
 0x4d0   : > { %v6657_v49 = vsel %vm239_vm1, %v6640_v58, 0  ;;  %v6642_v60 = vsel %vm6637_vm15, %v6626_v8, %v6628_v63 }
 0x4d1   : > { %v6663_v25 = vsel %vm239_vm1, %v6642_v60, 0 }
 0x4d3   : > { %v7512_v15 = vld.sshfl [vmem:[#allocation1 + $0x8] sm:$0xff pattern:$0x73625140] }
 0x4d4   : > { %v5630_v52 = vpop.f32.mrf.mxu2  ;;  %7533 = vrot.lane.b32.xlu0 %v7512_v15, %s12216_s30 }
 0x4d5   : > { %v5643_v10 = vpop.f32.mrf.mxu3  ;;  %v5758_v20 = vpop.f32.mrf.mxu0 }
 0x4d6   : > { %v5771_v6 = vpop.f32.mrf.mxu1  ;;  %v14667_v30 = vadd.f32 %v5758_v20, %v14585_v31  ;;  %v6660_v31 = vsel %vm239_vm1, %v6641_v29, 0  ;;  %v6630_v19 = vpop.permute.xlu2 %6629  ;;  %v14746_v29 = vld.sshfl [vmem:[#allocation1 + $0x18] sm:$0xff pattern:$0x73625140] }
 0x4d7   : > { %v14670_v45 = vadd.f32 %v5771_v6, %v14588_v11  ;;  %v7293_v11 = vld.sshfl [vmem:[#allocation1 + $0x30] sm:$0xff pattern:$0x73625140]  ;;  %v6643_v9 = vsel %vm6637_vm15, %v6628_v63, %v6630_v19 }
 0x4d8   : > { %11875 = vmatmul.msk.bf16.vlgmr.msra.gmra.mxu0 %vm235_vm2, %v14636_v12  ;;  %11876 = vmatmul.msk.bf16.vlgmr.msra.gmra.mxu1 %vm235_vm2, %v14636_v12  ;;  %v6666_v5 = vsel %vm239_vm1, %v6643_v9, 0 }
 0x4d9   : > { %11877 = vmatmul.msk.bf16.vlgmr.msra.gmra.mxu2 %vm235_vm2, %v14636_v12  ;;  %6687 = vmatpush.bf16.msra.mxu0 %v6651_v51 }
 0x4da   : > { %11878 = vmatmul.msk.bf16.vlgmr.msra.gmra.mxu3 %vm235_vm2, %v14636_v12  ;;  %6700 = vmatpush.bf16.msra.mxu1 %v6654_v41 }
 0x4db   : > { %6713 = vmatpush.bf16.msra.mxu2 %v6657_v49  ;;  %6726 = vmatpush.bf16.msra.mxu3 %v6660_v31 }
 0x4dc   : > { %v5784_v46 = vpop.f32.mrf.mxu2  ;;  %7314 = vrot.lane.b32.xlu1 %v7293_v11, %s12215_s29  ;;  %v7295_v11 = vld.sshfl [vmem:[#allocation1 + $0x38] sm:$0xff pattern:$0x73625140] }
 0x4dd   : > { %v5797_v23 = vpop.f32.mrf.mxu3  ;;  %v14688_v47 = vadd.f32 %v5784_v46, %v14596_v61  ;;  %v5760_v22 = vpop.f32.mrf.mxu0  ;;  %7511 = vst [vmem:[#allocation1 + $0x20] ss:$4 sm:$0xff] %v12270_v1  ;;  %7316 = vrot.lane.b32.xlu2 %v7295_v11, %s12215_s29 }
 0x4de   : > { %v14691_v4 = vadd.f32 %v5797_v23, %v14599_v35  ;;  %v5773_v38 = vpop.f32.mrf.mxu1 }
 0x4e2   : > { %v6632_v18 = vpop.permute.xlu0 %6631 }
 0x4e3   : > { %v6644_v35 = vsel %vm6637_vm15, %v6630_v19, %v6632_v18  ;;  %v6634_v42 = vpop.permute.xlu1 %6633 }
 0x4e4   : > { %v5786_v54 = vpop.f32.mrf.mxu2  ;;  %v6645_v44 = vsel %vm6637_vm15, %v6632_v18, %v6634_v42  ;;  %7320 = vrot.lane.b32.xlu1 %v7300_v28, %s12215_s29  ;;  %v7518_v14 = vld.sshfl [vmem:[#allocation1 + $0x20] sm:$0xff pattern:$0x73625140]  ;;  %v7520_v18 = vld.sshfl [vmem:[#allocation1 + $0x28] sm:$0xff pattern:$0x73625140] }
 0x4e5   : > { %v5799_v43 = vpop.f32.mrf.mxu3  ;;  %v5810_v61 = vpop.f32.mrf.mxu0  ;;  %v6672_v59 = vsel %vm239_vm1, %v6645_v44, 0  ;;  %7539 = vrot.lane.b32.xlu0 %v7518_v14, %s12216_s30  ;;  %7322 = vrot.lane.b32.xlu2 %v14708_v3, %s12215_s29 }
 0x4e6   : > { %v5823_v37 = vpop.f32.mrf.mxu1  ;;  %v14699_v40 = vadd.f32 %v5810_v61, %v14617_v7  ;;  %v6669_v7 = vsel %vm239_vm1, %v6644_v35, 0 }
 0x4e7   : > { %v14702_v50 = vadd.f32 %v5823_v37, %v14620_v17  ;;  %v6636_v17 = vpop.permute.xlu2 %6635 }
 0x4e8   : > { %11879 = vmatmul.msk.bf16.vlgmr.msrb.gmra.mxu0 %vm235_vm2, %v14636_v12  ;;  %11880 = vmatmul.msk.bf16.vlgmr.msrb.gmra.mxu1 %vm235_vm2, %v14636_v12  ;;  %v6646_v21 = vsel %vm6637_vm15, %v6634_v42, %v6636_v17  ;;  %v6678_v41 = vsel %vm239_vm1, %v6636_v17, 0  ;;  %vm9867_vm15 = vcmask 228352  }
 0x4e9   : > { %11881 = vmatmul.msk.bf16.vlgmr.msrb.gmra.mxu2 %vm235_vm2, %v14636_v12  ;;  %6739 = vmatpush.bf16.msrb.mxu0 %v6663_v25  ;;  %v6675_v51 = vsel %vm239_vm1, %v6646_v21, 0 }
 0x4ea   : > { %11882 = vmatmul.msk.bf16.vlgmr.msrb.gmra.mxu3 %vm235_vm2, %v14636_v12  ;;  %6752 = vmatpush.bf16.msrb.mxu1 %v6666_v5 }
 0x4eb   : > { %6765 = vmatpush.bf16.msrb.mxu2 %v6669_v7  ;;  %6778 = vmatpush.bf16.msrb.mxu3 %v6672_v59 }
 0x4ec   : > { %v5836_v57 = vpop.f32.mrf.mxu2 }
 0x4ed   : > { %v5849_v33 = vpop.f32.mrf.mxu3  ;;  %v14724_v55 = vadd.f32 %v5836_v57, %v14628_v36  ;;  %v5812_v12 = vpop.f32.mrf.mxu0  ;;  %7537 = vrot.lane.b32.xlu2 %v14746_v29, %s12216_s30 }
 0x4ee   : > { %v14727_v62 = vadd.f32 %v5849_v33, %v14631_v13  ;;  %v5825_v16 = vpop.f32.mrf.mxu1  ;;  %v6847_v48 = vpop.permute.xlu0 %6846  ;;  %v14734_v13 = vld [vmem:[%s16558_s1 + $0x70] sm:$0xf] }
 0x4ef   : > { %v6851_v39 = vpop.permute.xlu2 %6850  ;;  %v6849_v56 = vpop.permute.xlu1 %6848 }
 0x4f0   : > { %v6867_v20 = vsel %vm6866_vm0, %v6847_v48, %v6849_v56  ;;  %v6868_v6 = vsel %vm6866_vm0, %v6849_v56, %v6851_v39 }
 0x4f1   : > { %v6880_v31 = vsel %vm239_vm1, %v6867_v20, 0 }
 0x4f4   : > { %v5838_v52 = vpop.f32.mrf.mxu2 }
 0x4f5   : > { %v5851_v10 = vpop.f32.mrf.mxu3  ;;  %v5862_v53 = vpop.f32.mrf.mxu0 }
 0x4f6   : > { %v5875_v36 = vpop.f32.mrf.mxu1  ;;  %v14739_v58 = vadd.f32 %v5862_v53, %v14655_v26  ;;  %v6853_v49 = vpop.permute.xlu0 %6852  ;;  %v6883_v26 = vsel %vm239_vm1, %v6868_v6, 0  ;;  %v14820_v6 = vld [vmem:[%s16558_s1 + $0x74] sm:$0xf] }
 0x4f7   : > { %v14742_v8 = vadd.f32 %v5875_v36, %v14658_v27  ;;  %v7514_v27 = vld.sshfl [vmem:[#allocation1 + $0x10] sm:$0xff pattern:$0x73625140]  ;;  %v6855_v19 = vpop.permute.xlu1 %6854  ;;  %v6857_v54 = vpop.permute.xlu2 %6856  ;;  %v6869_v61 = vsel %vm6866_vm0, %v6851_v39, %v6853_v49 }
 0x4f8   : > { %11884 = vmatmul.msk.bf16.vlgmr.msra.gmra.mxu0 %vm235_vm2, %v14734_v13  ;;  %11885 = vmatmul.msk.bf16.vlgmr.msra.gmra.mxu1 %vm235_vm2, %v14734_v13  ;;  %7526 = vst [vmem:[#allocation1] ss:$4 sm:$0xff] %v12274_v2  ;;  %v6870_v37 = vsel %vm6866_vm0, %v6853_v49, %v6855_v19  ;;  %v6871_v35 = vsel %vm6866_vm0, %v6855_v19, %v6857_v54  ;;  %v6886_v5 = vsel %vm239_vm1, %v6869_v61, 0  ;;  %v7522_v49 = vld.sshfl [vmem:[#allocation1 + $0x30] sm:$0xff pattern:$0x73625140] }
 0x4f9   : > { %11886 = vmatmul.msk.bf16.vlgmr.msra.gmra.mxu2 %vm235_vm2, %v14734_v13  ;;  %6791 = vmatpush.bf16.msra.mxu0 %v6675_v51  ;;  %v6889_v44 = vsel %vm239_vm1, %v6870_v37, 0  ;;  %v6892_v3 = vsel %vm239_vm1, %v6871_v35, 0 }
 0x4fa   : > { %11887 = vmatmul.msk.bf16.vlgmr.msra.gmra.mxu3 %vm235_vm2, %v14734_v13  ;;  %6804 = vmatpush.bf16.msra.mxu1 %v6678_v41 }
 0x4fb   : > { %6916 = vmatpush.bf16.msra.mxu2 %v6880_v31  ;;  %6929 = vmatpush.bf16.msra.mxu3 %v6883_v26 }
 0x4fc   : > { %v5992_v34 = vpop.f32.mrf.mxu2  ;;  %7535 = vrot.lane.b32.xlu1 %v7514_v27, %s12216_s30  ;;  %7543 = vrot.lane.b32.xlu2 %v7522_v49, %s12216_s30 }
 0x4fd   : > { %v6005_v63 = vpop.f32.mrf.mxu3  ;;  %v14763_v46 = vadd.f32 %v5992_v34, %v14667_v30  ;;  %v5864_v22 = vpop.f32.mrf.mxu0 }
 0x4fe   : > { %v14766_v23 = vadd.f32 %v6005_v63, %v14670_v45  ;;  %v5877_v38 = vpop.f32.mrf.mxu1  ;;  %v6859_v43 = vpop.permute.xlu0 %6858 }
 0x4ff   : > { %v6872_v24 = vsel %vm6866_vm0, %v6857_v54, %v6859_v43  ;;  %v14794_v17 = vld.sshfl [vmem:[#allocation1 + $0x8] sm:$0xff pattern:$0x73625140]  ;;  %v7531_v16 = vld.sshfl [vmem:[#allocation1 + $0x10] sm:$0xff pattern:$0x73625140]  ;;  %v6861_v48 = vpop.permute.xlu1 %6860  ;;  %v6863_v15 = vpop.permute.xlu2 %6862 }
 0x500   : > { %v6895_v7 = vsel %vm239_vm1, %v6872_v24, 0  ;;  %v6873_v10 = vsel %vm6866_vm0, %v6859_v43, %v6861_v48 }
 0x501   : > { %v6898_v51 = vsel %vm239_vm1, %v6873_v10, 0 }
 0x504   : > { %v5994_v60 = vpop.f32.mrf.mxu2  ;;  %7541 = vrot.lane.b32.xlu1 %v7520_v18, %s12216_s30  ;;  %7549 = vrot.lane.b32.xlu2 %v14794_v17, %s12216_s30 }
 0x505   : > { %v6007_v9 = vpop.f32.mrf.mxu3  ;;  %v6018_v30 = vpop.f32.mrf.mxu0 }
 0x506   : > { %v6031_v45 = vpop.f32.mrf.mxu1  ;;  %v14777_v42 = vadd.f32 %v6018_v30, %v14688_v47  ;;  %v7524_v47 = vld.sshfl [vmem:[#allocation1 + $0x38] sm:$0xff pattern:$0x73625140] }
 0x507   : > { %v14780_v25 = vadd.f32 %v6031_v45, %v14691_v4  ;;  %v7527_v4 = vld.sshfl [vmem:[#allocation1] sm:$0xff pattern:$0x73625140]  ;;  %7545 = vrot.lane.b32.xlu0 %v7524_v47, %s12216_s30  ;;  %7740 = vst [vmem:[#allocation1 + $0x20] ss:$4 sm:$0xff] %v12270_v1 }
 0x508   : > { %11888 = vmatmul.msk.bf16.vlgmr.msrb.gmra.mxu0 %vm235_vm2, %v14734_v13  ;;  %11889 = vmatmul.msk.bf16.vlgmr.msrb.gmra.mxu1 %vm235_vm2, %v14734_v13  ;;  %7738 = vst [vmem:[#allocation1] ss:$4 sm:$0xff] %v12268_v0 }
 0x509   : > { %11890 = vmatmul.msk.bf16.vlgmr.msrb.gmra.mxu2 %vm235_vm2, %v14734_v13  ;;  %6942 = vmatpush.bf16.msrb.mxu0 %v6886_v5 }
 0x50a   : > { %11891 = vmatmul.msk.bf16.vlgmr.msrb.gmra.mxu3 %vm235_vm2, %v14734_v13  ;;  %6955 = vmatpush.bf16.msrb.mxu1 %v6889_v44 }
 0x50b   : > { %6968 = vmatpush.bf16.msrb.mxu2 %v6892_v3  ;;  %6981 = vmatpush.bf16.msrb.mxu3 %v6895_v7 }
 0x50c   : > { %v6044_v59 = vpop.f32.mrf.mxu2  ;;  %7547 = vrot.lane.b32.xlu1 %v7527_v4, %s12216_s30 }
 0x50d   : > { %v6057_v28 = vpop.f32.mrf.mxu3  ;;  %v14799_v32 = vadd.f32 %v6044_v59, %v14699_v40  ;;  %v6020_v33 = vpop.f32.mrf.mxu0  ;;  %v6874_v40 = vsel %vm6866_vm0, %v6861_v48, %v6863_v15 }
 0x50e   : > { %v14802_v57 = vadd.f32 %v6057_v28, %v14702_v50  ;;  %v6033_v12 = vpop.f32.mrf.mxu1  ;;  %v6865_v39 = vpop.permute.xlu0 %6864  ;;  %v6901_v41 = vsel %vm239_vm1, %v6874_v40, 0  ;;  %v7747_v19 = vld.sshfl [vmem:[#allocation1 + $0x20] sm:$0xff pattern:$0x73625140] }
 0x50f   : > { %7551 = vrot.lane.b32.xlu0 %v7531_v16, %s12216_s30  ;;  %v6875_v53 = vsel %vm6866_vm0, %v6863_v15, %v6865_v39  ;;  %v7741_v31 = vld.sshfl [vmem:[#allocation1 + $0x8] sm:$0xff pattern:$0x73625140]  ;;  %v7745_v38 = vld.sshfl [vmem:[#allocation1 + $0x18] sm:$0xff pattern:$0x73625140] }
 0x510   : > { %v7751_v3 = vld.sshfl [vmem:[#allocation1 + $0x30] sm:$0xff pattern:$0x73625140]  ;;  %v7753_v33 = vld.sshfl [vmem:[#allocation1 + $0x38] sm:$0xff pattern:$0x73625140] }
 0x511   : > { %vm10101_vm0 = vcmask 220160   ;;  %s12232_s30 = smov 22  }
 0x512   : > { %v7076_v29 = vpop.permute.xlu1 %7075 }
 0x514   : > { %v6046_v56 = vpop.f32.mrf.mxu2  ;;  %7762 = vrot.lane.b32.xlu1 %v7741_v31, %s12217_s8 }
 0x515   : > { %v6059_v52 = vpop.f32.mrf.mxu3  ;;  %v6070_v50 = vpop.f32.mrf.mxu0 }
 0x516   : > { %v6083_v21 = vpop.f32.mrf.mxu1  ;;  %v14812_v36 = vadd.f32 %v6070_v50, %v14724_v55  ;;  %v6904_v55 = vsel %vm239_vm1, %v6875_v53, 0  ;;  %v7080_v14 = vpop.permute.xlu0 %7079 }
 0x517   : > { %v14815_v20 = vadd.f32 %v6083_v21, %v14727_v62  ;;  %v6907_v62 = vsel %vm239_vm1, %v6865_v39, 0  ;;  %7766 = vrot.lane.b32.xlu0 %v7745_v38, %s12217_s8 }
 0x518   : > { %11892 = vmatmul.msk.bf16.vlgmr.msra.gmra.mxu0 %vm235_vm2, %v14734_v13  ;;  %11893 = vmatmul.msk.bf16.vlgmr.msra.gmra.mxu1 %vm235_vm2, %v14734_v13  ;;  %v7078_v13 = vpop.permute.xlu2 %7077 }
 0x519   : > { %11895 = vmatmul.msk.bf16.vlgmr.msra.gmra.mxu2 %vm235_vm2, %v14820_v6  ;;  %6994 = vmatpush.bf16.msra.mxu0 %v6898_v51  ;;  %v7096_v60 = vsel %vm7095_vm3, %v7076_v29, %v7078_v13  ;;  %v7097_v9 = vsel %vm7095_vm3, %v7078_v13, %v7080_v14  ;;  %v7743_v29 = vld.sshfl [vmem:[#allocation1 + $0x10] sm:$0xff pattern:$0x73625140] }
 0x51a   : > { %11896 = vmatmul.msk.bf16.vlgmr.msra.gmra.mxu3 %vm235_vm2, %v14820_v6  ;;  %7007 = vmatpush.bf16.msra.mxu1 %v6901_v41  ;;  %v7109_v35 = vsel %vm239_vm1, %v7096_v60, 0  ;;  %v7112_v24 = vsel %vm239_vm1, %v7097_v9, 0  ;;  %7755 = vst [vmem:[#allocation1] ss:$4 sm:$0xff] %v12274_v2 }
 0x51b   : > { %7020 = vmatpush.bf16.msra.mxu2 %v6904_v55  ;;  %7033 = vmatpush.bf16.msra.mxu3 %v6907_v62 }
 0x51c   : > { %v6096_v26 = vpop.f32.mrf.mxu2  ;;  %7768 = vrot.lane.b32.xlu1 %v7747_v19, %s12217_s8  ;;  %7764 = vrot.lane.b32.xlu2 %v7743_v29, %s12217_s8 }
 0x51d   : > { %v6109_v11 = vpop.f32.mrf.mxu3  ;;  %v14838_v27 = vadd.f32 %v6096_v26, %v14739_v58  ;;  %v6072_v63 = vpop.f32.mrf.mxu0 }
 0x51e   : > { %v14841_v34 = vadd.f32 %v6109_v11, %v14742_v8  ;;  %v6085_v22 = vpop.f32.mrf.mxu1  ;;  %v7082_v18 = vpop.permute.xlu1 %7081 }
 0x51f   : > { %v7098_v61 = vsel %vm7095_vm3, %v7080_v14, %v7082_v18  ;;  %7772 = vrot.lane.b32.xlu0 %v7751_v3, %s12217_s8 }
 0x520   : > { %v7084_v45 = vpop.permute.xlu2 %7083  ;;  %v7115_v44 = vsel %vm239_vm1, %v7098_v61, 0 }
 0x521   : > { %v7099_v5 = vsel %vm7095_vm3, %v7082_v18, %v7084_v45  ;;  %v7760_v11 = vld.sshfl [vmem:[#allocation1 + $0x10] sm:$0xff pattern:$0x73625140]  ;;  %v7756_v63 = vld.sshfl [vmem:[#allocation1] sm:$0xff pattern:$0x73625140] }
 0x522   : > { %v7758_v22 = vld.sshfl [vmem:[#allocation1 + $0x8] sm:$0xff pattern:$0x73625140] }
 0x523   : > { %7967 = vst [vmem:[#allocation1] ss:$4 sm:$0xff] %v12268_v0 }
 0x524   : > { %v6098_v54 = vpop.f32.mrf.mxu2  ;;  %7774 = vrot.lane.b32.xlu1 %v7753_v33, %s12217_s8 }
 0x525   : > { %v6111_v43 = vpop.f32.mrf.mxu3  ;;  %v6226_v58 = vpop.f32.mrf.mxu0  ;;  %v14916_v54 = vld [vmem:[%s16558_s1 + $0x78] sm:$0xf] }
 0x526   : > { %v6239_v8 = vpop.f32.mrf.mxu1  ;;  %v14851_v37 = vadd.f32 %v6226_v58, %v14763_v46  ;;  %v7118_v46 = vsel %vm239_vm1, %v7099_v5, 0 }
 0x527   : > { %v14854_v30 = vadd.f32 %v6239_v8, %v14766_v23  ;;  %v7086_v23 = vpop.permute.xlu0 %7085  ;;  %7778 = vrot.lane.b32.xlu0 %v7758_v22, %s12217_s8 }
 0x528   : > { %11897 = vmatmul.msk.bf16.vlgmr.msrb.gmra.mxu0 %vm235_vm2, %v14820_v6  ;;  %11898 = vmatmul.msk.bf16.vlgmr.msrb.gmra.mxu1 %vm235_vm2, %v14820_v6  ;;  %v7090_v16 = vpop.permute.xlu2 %7089  ;;  %v7100_v56 = vsel %vm7095_vm3, %v7084_v45, %v7086_v23 }
 0x529   : > { %11899 = vmatmul.msk.bf16.vlgmr.msrb.gmra.mxu2 %vm235_vm2, %v14820_v6  ;;  %7145 = vmatpush.bf16.msrb.mxu0 %v7109_v35  ;;  %v7088_v12 = vpop.permute.xlu1 %7087  ;;  %v7121_v53 = vsel %vm239_vm1, %v7100_v56, 0 }
 0x52a   : > { %11900 = vmatmul.msk.bf16.vlgmr.msrb.gmra.mxu3 %vm235_vm2, %v14820_v6  ;;  %7158 = vmatpush.bf16.msrb.mxu1 %v7112_v24  ;;  %v7101_v52 = vsel %vm7095_vm3, %v7086_v23, %v7088_v12  ;;  %v7102_v40 = vsel %vm7095_vm3, %v7088_v12, %v7090_v16  ;;  %v7974_v24 = vld.sshfl [vmem:[#allocation1 + $0x18] sm:$0xff pattern:$0x73625140]  ;;  %v7972_v5 = vld.sshfl [vmem:[#allocation1 + $0x10] sm:$0xff pattern:$0x73625140] }
 0x52b   : > { %7171 = vmatpush.bf16.msrb.mxu2 %v7115_v44  ;;  %7184 = vmatpush.bf16.msrb.mxu3 %v7118_v46  ;;  %v7124_v51 = vsel %vm239_vm1, %v7101_v52, 0  ;;  %v7127_v41 = vsel %vm239_vm1, %v7102_v40, 0 }
 0x52c   : > { %v6252_v7 = vpop.f32.mrf.mxu2  ;;  %7780 = vrot.lane.b32.xlu1 %v7760_v11, %s12217_s8 }
 0x52d   : > { %v6265_v47 = vpop.f32.mrf.mxu3  ;;  %v14871_v4 = vadd.f32 %v6252_v7, %v14777_v42  ;;  %v6228_v59 = vpop.f32.mrf.mxu0 }
 0x52e   : > { %v14874_v17 = vadd.f32 %v6265_v47, %v14780_v25  ;;  %v6241_v28 = vpop.f32.mrf.mxu1 }
 0x52f   : > { %v7092_v48 = vpop.permute.xlu0 %7091  ;;  %7993 = vrot.lane.b32.xlu0 %v7972_v5, %s12218_s11 }
 0x530   : > { %v7103_v25 = vsel %vm7095_vm3, %v7090_v16, %v7092_v48  ;;  %v7305_v38 = vpop.permute.xlu2 %7304 }
 0x531   : > { %v7130_v55 = vsel %vm239_vm1, %v7103_v25, 0 }
 0x534   : > { %v6254_v15 = vpop.f32.mrf.mxu2  ;;  %7995 = vrot.lane.b32.xlu1 %v7974_v24, %s12218_s11 }
 0x535   : > { %v6267_v39 = vpop.f32.mrf.mxu3  ;;  %v6278_v10 = vpop.f32.mrf.mxu0 }
 0x536   : > { %v6291_v42 = vpop.f32.mrf.mxu1  ;;  %v14882_v50 = vadd.f32 %v6278_v10, %v14799_v32  ;;  %v7094_v32 = vpop.permute.xlu1 %7093 }
 0x537   : > { %v14885_v21 = vadd.f32 %v6291_v42, %v14802_v57  ;;  %v7307_v58 = vpop.permute.xlu0 %7306  ;;  %v7136_v61 = vsel %vm239_vm1, %v7094_v32, 0 }
 0x538   : > { %11901 = vmatmul.msk.bf16.vlgmr.msra.gmra.mxu0 %vm235_vm2, %v14820_v6  ;;  %11902 = vmatmul.msk.bf16.vlgmr.msra.gmra.mxu1 %vm235_vm2, %v14820_v6  ;;  %v7325_v45 = vsel %vm7324_vm4, %v7305_v38, %v7307_v58  ;;  %v7311_v44 = vpop.permute.xlu2 %7310 }
 0x539   : > { %11903 = vmatmul.msk.bf16.vlgmr.msra.gmra.mxu2 %vm235_vm2, %v14820_v6  ;;  %7197 = vmatpush.bf16.msra.mxu0 %v7121_v53 }
 0x53a   : > { %11904 = vmatmul.msk.bf16.vlgmr.msra.gmra.mxu3 %vm235_vm2, %v14820_v6  ;;  %7210 = vmatpush.bf16.msra.mxu1 %v7124_v51  ;;  %v7749_v6 = vld.sshfl [vmem:[#allocation1 + $0x28] sm:$0xff pattern:$0x73625140] }
 0x53b   : > { %7223 = vmatpush.bf16.msra.mxu2 %v7127_v41  ;;  %7236 = vmatpush.bf16.msra.mxu3 %v7130_v55  ;;  %7969 = vst [vmem:[#allocation1 + $0x20] ss:$4 sm:$0xff] %v12270_v1  ;;  %v7970_v55 = vld.sshfl [vmem:[#allocation1 + $0x8] sm:$0xff pattern:$0x73625140] }
 0x53c   : > { %v6304_v57 = vpop.f32.mrf.mxu2  ;;  %7770 = vrot.lane.b32.xlu2 %v7749_v6, %s12217_s8  ;;  %7984 = vst [vmem:[#allocation1] ss:$4 sm:$0xff] %v12274_v2 }
 0x53d   : > { %v6317_v62 = vpop.f32.mrf.mxu3  ;;  %v14902_v49 = vadd.f32 %v6304_v57, %v14812_v36  ;;  %v6280_v13 = vpop.f32.mrf.mxu0 }
 0x53e   : > { %v14905_v31 = vadd.f32 %v6317_v62, %v14815_v20  ;;  %v6293_v26 = vpop.f32.mrf.mxu1  ;;  %v7104_v20 = vsel %vm7095_vm3, %v7092_v48, %v7094_v32  ;;  %v7309_v9 = vpop.permute.xlu1 %7308  ;;  %vm10335_vm3 = vcmask 211968  }
 0x53f   : > { %v7133_v8 = vsel %vm239_vm1, %v7104_v20, 0  ;;  %v7326_v35 = vsel %vm7324_vm4, %v7307_v58, %v7309_v9  ;;  %v7313_v28 = vpop.permute.xlu0 %7312  ;;  %v7327_v39 = vsel %vm7324_vm4, %v7309_v9, %v7311_v44 }
 0x540   : > { %v7328_v56 = vsel %vm7324_vm4, %v7311_v44, %v7313_v28  ;;  %v7317_v40 = vpop.permute.xlu2 %7316  ;;  %v7344_v25 = vsel %vm239_vm1, %v7327_v39, 0 }
 0x541   : > { %v7347_v53 = vsel %vm239_vm1, %v7328_v56, 0 }
 0x542   : > { %v7978_v33 = vld.sshfl [vmem:[#allocation1 + $0x28] sm:$0xff pattern:$0x73625140]  ;;  %v7980_v12 = vld.sshfl [vmem:[#allocation1 + $0x30] sm:$0xff pattern:$0x73625140] }
 0x543   : > { %7999 = vrot.lane.b32.xlu0 %v7978_v33, %s12218_s11  ;;  %8001 = vrot.lane.b32.xlu1 %v7980_v12, %s12218_s11  ;;  %v7985_v26 = vld.sshfl [vmem:[#allocation1] sm:$0xff pattern:$0x73625140]  ;;  %v14979_v6 = vld.sshfl [vmem:[#allocation1 + $0x10] sm:$0xff pattern:$0x73625140] }
 0x544   : > { %v6306_v36 = vpop.f32.mrf.mxu2  ;;  %7776 = vrot.lane.b32.xlu2 %v7756_v63, %s12217_s8  ;;  %v7976_v22 = vld.sshfl [vmem:[#allocation1 + $0x20] sm:$0xff pattern:$0x73625140]  ;;  %v7987_v38 = vld.sshfl [vmem:[#allocation1 + $0x8] sm:$0xff pattern:$0x73625140] }
 0x545   : > { %v6319_v14 = vpop.f32.mrf.mxu3  ;;  %v6330_v19 = vpop.f32.mrf.mxu0  ;;  %8196 = vst [vmem:[#allocation1] ss:$4 sm:$0xff] %v12268_v0 }
 0x546   : > { %v6343_v18 = vpop.f32.mrf.mxu1  ;;  %v14919_v43 = vadd.f32 %v6330_v19, %v14838_v27  ;;  %v7338_v27 = vsel %vm239_vm1, %v7325_v45, 0 }
 0x547   : > { %v14922_v60 = vadd.f32 %v6343_v18, %v14841_v34  ;;  %v7341_v34 = vsel %vm239_vm1, %v7326_v35, 0  ;;  %v7319_v11 = vpop.permute.xlu0 %7318 }
 0x548   : > { %11906 = vmatmul.msk.bf16.vlgmr.msrb.gmra.mxu0 %vm235_vm2, %v14916_v54  ;;  %11907 = vmatmul.msk.bf16.vlgmr.msrb.gmra.mxu1 %vm235_vm2, %v14916_v54  ;;  %v7323_v36 = vpop.permute.xlu2 %7322 }
 0x549   : > { %11908 = vmatmul.msk.bf16.vlgmr.msrb.gmra.mxu2 %vm235_vm2, %v14916_v54  ;;  %7249 = vmatpush.bf16.msrb.mxu0 %v7133_v8 }
 0x54a   : > { %11909 = vmatmul.msk.bf16.vlgmr.msrb.gmra.mxu3 %vm235_vm2, %v14916_v54  ;;  %7262 = vmatpush.bf16.msrb.mxu1 %v7136_v61  ;;  %v14997_v61 = vld [vmem:[%s16558_s1 + $0x7c] sm:$0xf] }
 0x54b   : > { %7374 = vmatpush.bf16.msrb.mxu2 %v7338_v27  ;;  %7387 = vmatpush.bf16.msrb.mxu3 %v7341_v34 }
 0x54c   : > { %v6460_v46 = vpop.f32.mrf.mxu2  ;;  %7991 = vrot.lane.b32.xlu2 %v7970_v55, %s12218_s11  ;;  %8005 = vrot.lane.b32.xlu0 %v7985_v26, %s12218_s11  ;;  %v8199_v34 = vld.sshfl [vmem:[#allocation1 + $0x8] sm:$0xff pattern:$0x73625140]  ;;  %v8203_v44 = vld.sshfl [vmem:[#allocation1 + $0x18] sm:$0xff pattern:$0x73625140] }
 0x54d   : > { %v6473_v23 = vpop.f32.mrf.mxu3  ;;  %v14941_v3 = vadd.f32 %v6460_v46, %v14851_v37  ;;  %v6332_v47 = vpop.f32.mrf.mxu0  ;;  %8007 = vrot.lane.b32.xlu1 %v7987_v38, %s12218_s11 }
 0x54e   : > { %v14944_v7 = vadd.f32 %v6473_v23, %v14854_v30  ;;  %v6345_v59 = vpop.f32.mrf.mxu1  ;;  %v7315_v16 = vpop.permute.xlu1 %7314 }
 0x54f   : > { %v7329_v52 = vsel %vm7324_vm4, %v7313_v28, %v7315_v16  ;;  %v7330_v51 = vsel %vm7324_vm4, %v7315_v16, %v7317_v40  ;;  %v7534_v27 = vpop.permute.xlu0 %7533  ;;  %v7982_v59 = vld.sshfl [vmem:[#allocation1 + $0x38] sm:$0xff pattern:$0x73625140]  ;;  %v8201_v28 = vld.sshfl [vmem:[#allocation1 + $0x10] sm:$0xff pattern:$0x73625140] }
 0x550   : > { %v7350_v41 = vsel %vm239_vm1, %v7329_v52, 0  ;;  %v7538_v33 = vpop.permute.xlu2 %7537  ;;  %8198 = vst [vmem:[#allocation1 + $0x20] ss:$4 sm:$0xff] %v12270_v1 }
 0x551   : > { %8213 = vst [vmem:[#allocation1] ss:$4 sm:$0xff] %v12274_v2 }
 0x554   : > { %v6462_v48 = vpop.f32.mrf.mxu2  ;;  %7997 = vrot.lane.b32.xlu2 %v7976_v22, %s12218_s11  ;;  %8220 = vrot.lane.b32.xlu0 %v8199_v34, %s12219_s16 }
 0x555   : > { %v6475_v15 = vpop.f32.mrf.mxu3  ;;  %v6486_v37 = vpop.f32.mrf.mxu0  ;;  %8222 = vrot.lane.b32.xlu1 %v8201_v28, %s12219_s16 }
 0x556   : > { %v6499_v30 = vpop.f32.mrf.mxu1  ;;  %v14953_v10 = vadd.f32 %v6486_v37, %v14871_v4  ;;  %v7353_v4 = vsel %vm239_vm1, %v7330_v51, 0  ;;  %v7321_v63 = vpop.permute.xlu1 %7320 }
 0x557   : > { %v14956_v42 = vadd.f32 %v6499_v30, %v14874_v17  ;;  %v7332_v20 = vsel %vm7324_vm4, %v7319_v11, %v7321_v63  ;;  %v7333_v9 = vsel %vm7324_vm4, %v7321_v63, %v7323_v36  ;;  %v8205_v30 = vld.sshfl [vmem:[#allocation1 + $0x20] sm:$0xff pattern:$0x73625140]  ;;  %v8207_v55 = vld.sshfl [vmem:[#allocation1 + $0x28] sm:$0xff pattern:$0x73625140] }
 0x558   : > { %11910 = vmatmul.msk.bf16.vlgmr.msra.gmra.mxu0 %vm235_vm2, %v14916_v54  ;;  %11911 = vmatmul.msk.bf16.vlgmr.msra.gmra.mxu1 %vm235_vm2, %v14916_v54  ;;  %v7359_v35 = vsel %vm239_vm1, %v7332_v20, 0  ;;  %v8214_v22 = vld.sshfl [vmem:[#allocation1] sm:$0xff pattern:$0x73625140] }
 0x559   : > { %11912 = vmatmul.msk.bf16.vlgmr.msra.gmra.mxu2 %vm235_vm2, %v14916_v54  ;;  %7400 = vmatpush.bf16.msra.mxu0 %v7344_v25 }
 0x55a   : > { %11913 = vmatmul.msk.bf16.vlgmr.msra.gmra.mxu3 %vm235_vm2, %v14916_v54  ;;  %7413 = vmatpush.bf16.msra.mxu1 %v7347_v53 }
 0x55b   : > { %7426 = vmatpush.bf16.msra.mxu2 %v7350_v41  ;;  %7439 = vmatpush.bf16.msra.mxu3 %v7353_v4 }
 0x55c   : > { %v6512_v17 = vpop.f32.mrf.mxu2  ;;  %8003 = vrot.lane.b32.xlu2 %v7982_v59, %s12218_s11  ;;  %8226 = vrot.lane.b32.xlu0 %v8205_v30, %s12219_s16  ;;  %v8209_v59 = vld.sshfl [vmem:[#allocation1 + $0x30] sm:$0xff pattern:$0x73625140] }
 0x55d   : > { %v6525_v29 = vpop.f32.mrf.mxu3  ;;  %v14974_v32 = vadd.f32 %v6512_v17, %v14882_v50  ;;  %v6488_v62 = vpop.f32.mrf.mxu0  ;;  %8228 = vrot.lane.b32.xlu1 %v8207_v55, %s12219_s16 }
 0x55e   : > { %v14977_v57 = vadd.f32 %v6525_v29, %v14885_v21  ;;  %v6501_v13 = vpop.f32.mrf.mxu1  ;;  %v7331_v21 = vsel %vm7324_vm4, %v7317_v40, %v7319_v11  ;;  %v8211_v11 = vld.sshfl [vmem:[#allocation1 + $0x38] sm:$0xff pattern:$0x73625140]  ;;  %vm10569_vm4 = vcmask 203776  }
 0x55f   : > { %v7356_v45 = vsel %vm239_vm1, %v7331_v21, 0  ;;  %8427 = vst [vmem:[#allocation1 + $0x20] ss:$4 sm:$0xff] %v12270_v1 }
 0x564   : > { %v6514_v50 = vpop.f32.mrf.mxu2  ;;  %8009 = vrot.lane.b32.xlu2 %v14979_v6, %s12218_s11  ;;  %8232 = vrot.lane.b32.xlu0 %v8211_v11, %s12219_s16 }
 0x565   : > { %v6527_v14 = vpop.f32.mrf.mxu3  ;;  %v6538_v19 = vpop.f32.mrf.mxu0  ;;  %8234 = vrot.lane.b32.xlu1 %v8214_v22, %s12219_s16 }
 0x566   : > { %v6551_v18 = vpop.f32.mrf.mxu1  ;;  %v14989_v58 = vadd.f32 %v6538_v19, %v14902_v49  ;;  %v7362_v49 = vsel %vm239_vm1, %v7333_v9, 0  ;;  %v8438_v11 = vld.sshfl [vmem:[#allocation1 + $0x30] sm:$0xff pattern:$0x73625140] }
 0x567   : > { %v14992_v8 = vadd.f32 %v6551_v18, %v14905_v31  ;;  %v7365_v31 = vsel %vm239_vm1, %v7323_v36, 0 }
 0x568   : > { %11914 = vmatmul.msk.bf16.vlgmr.msrb.gmra.mxu0 %vm235_vm2, %v14916_v54  ;;  %11915 = vmatmul.msk.bf16.vlgmr.msrb.gmra.mxu1 %vm235_vm2, %v14916_v54 }
 0x569   : > { %11917 = vmatmul.msk.bf16.vlgmr.msrb.gmra.mxu2 %vm235_vm2, %v14997_v61  ;;  %7452 = vmatpush.bf16.msrb.mxu0 %v7356_v45 }
 0x56a   : > { %11918 = vmatmul.msk.bf16.vlgmr.msrb.gmra.mxu3 %vm235_vm2, %v14997_v61  ;;  %7465 = vmatpush.bf16.msrb.mxu1 %v7359_v35 }
 0x56b   : > { %7478 = vmatpush.bf16.msrb.mxu2 %v7362_v49  ;;  %7491 = vmatpush.bf16.msrb.mxu3 %v7365_v31  ;;  %v8216_v31 = vld.sshfl [vmem:[#allocation1 + $0x8] sm:$0xff pattern:$0x73625140] }
 0x56c   : > { %v6564_v24 = vpop.f32.mrf.mxu2  ;;  %8224 = vrot.lane.b32.xlu2 %v8203_v44, %s12219_s16 }
 0x56d   : > { %v6577_v5 = vpop.f32.mrf.mxu3  ;;  %v15013_v54 = vadd.f32 %v6564_v24, %v14919_v43  ;;  %v6540_v23 = vpop.f32.mrf.mxu0 }
 0x56e   : > { %v15016_v46 = vadd.f32 %v6577_v5, %v14922_v60  ;;  %v6553_v47 = vpop.f32.mrf.mxu1  ;;  %v7536_v12 = vpop.permute.xlu1 %7535 }
 0x56f   : > { %v7540_v43 = vpop.permute.xlu0 %7539  ;;  %v7554_v60 = vsel %vm7553_vm5, %v7534_v27, %v7536_v12  ;;  %v7555_v15 = vsel %vm7553_vm5, %v7536_v12, %v7538_v33 }
 0x570   : > { %v7556_v37 = vsel %vm7553_vm5, %v7538_v33, %v7540_v43  ;;  %v7567_v53 = vsel %vm239_vm1, %v7554_v60, 0  ;;  %v7570_v51 = vsel %vm239_vm1, %v7555_v15, 0  ;;  %v15094_v60 = vld [vmem:[%s16558_s1 + $0x80] sm:$0xf] }
 0x574   : > { %v6566_v16 = vpop.f32.mrf.mxu2  ;;  %8230 = vrot.lane.b32.xlu2 %v8209_v59, %s12219_s16 }
 0x575   : > { %v6579_v48 = vpop.f32.mrf.mxu3  ;;  %v6689_v39 = vpop.f32.mrf.mxu0 }
 0x576   : > { %v6702_v56 = vpop.f32.mrf.mxu1  ;;  %v15026_v52 = vadd.f32 %v6689_v39, %v14941_v3  ;;  %v7542_v25 = vpop.permute.xlu1 %7541  ;;  %v7573_v3 = vsel %vm239_vm1, %v7556_v37, 0 }
 0x577   : > { %v15029_v40 = vadd.f32 %v6702_v56, %v14944_v7  ;;  %v7557_v41 = vsel %vm7553_vm5, %v7540_v43, %v7542_v25  ;;  %v7544_v7 = vpop.permute.xlu2 %7543 }
 0x578   : > { %11919 = vmatmul.msk.bf16.vlgmr.msra.gmra.mxu0 %vm235_vm2, %v14997_v61  ;;  %11920 = vmatmul.msk.bf16.vlgmr.msra.gmra.mxu1 %vm235_vm2, %v14997_v61  ;;  %v7576_v4 = vsel %vm239_vm1, %v7557_v41, 0  ;;  %v7558_v21 = vsel %vm7553_vm5, %v7542_v25, %v7544_v7 }
 0x579   : > { %11921 = vmatmul.msk.bf16.vlgmr.msra.gmra.mxu2 %vm235_vm2, %v14997_v61  ;;  %7603 = vmatpush.bf16.msra.mxu0 %v7567_v53  ;;  %v7546_v63 = vpop.permute.xlu0 %7545  ;;  %v7579_v35 = vsel %vm239_vm1, %v7558_v21, 0 }
 0x57a   : > { %11922 = vmatmul.msk.bf16.vlgmr.msra.gmra.mxu3 %vm235_vm2, %v14997_v61  ;;  %7616 = vmatpush.bf16.msra.mxu1 %v7570_v51 }
 0x57b   : > { %7629 = vmatpush.bf16.msra.mxu2 %v7573_v3  ;;  %7642 = vmatpush.bf16.msra.mxu3 %v7576_v4  ;;  %v8434_v3 = vld.sshfl [vmem:[#allocation1 + $0x20] sm:$0xff pattern:$0x73625140] }
 0x57c   : > { %v6715_v17 = vpop.f32.mrf.mxu2  ;;  %8236 = vrot.lane.b32.xlu2 %v8216_v31, %s12219_s16 }
 0x57d   : > { %v6728_v29 = vpop.f32.mrf.mxu3  ;;  %v15049_v62 = vadd.f32 %v6715_v17, %v14953_v10  ;;  %v6691_v26 = vpop.f32.mrf.mxu0  ;;  %v7559_v10 = vsel %vm7553_vm5, %v7544_v7, %v7546_v63 }
 0x57e   : > { %v15052_v13 = vadd.f32 %v6728_v29, %v14956_v42  ;;  %v6704_v6 = vpop.f32.mrf.mxu1  ;;  %v7548_v38 = vpop.permute.xlu1 %7547  ;;  %v7582_v49 = vsel %vm239_vm1, %v7559_v10, 0 }
 0x57f   : > { %v7550_v36 = vpop.permute.xlu2 %7549  ;;  %v7560_v19 = vsel %vm7553_vm5, %v7546_v63, %v7548_v38 }
 0x580   : > { %v7561_v18 = vsel %vm7553_vm5, %v7548_v38, %v7550_v36  ;;  %v7585_v27 = vsel %vm239_vm1, %v7560_v19, 0 }
 0x581   : > { %v7588_v34 = vsel %vm239_vm1, %v7561_v18, 0 }
 0x584   : > { %v6717_v50 = vpop.f32.mrf.mxu2 }
 0x585   : > { %v6730_v14 = vpop.f32.mrf.mxu3  ;;  %v6741_v42 = vpop.f32.mrf.mxu0 }
 0x586   : > { %v6754_v20 = vpop.f32.mrf.mxu1  ;;  %v15062_v9 = vadd.f32 %v6741_v42, %v14974_v32  ;;  %v7552_v32 = vpop.permute.xlu0 %7551 }
 0x587   : > { %v15065_v45 = vadd.f32 %v6754_v20, %v14977_v57  ;;  %v8218_v57 = vld.sshfl [vmem:[#allocation1 + $0x10] sm:$0xff pattern:$0x73625140]  ;;  %v7763_v28 = vpop.permute.xlu1 %7762  ;;  %v7765_v56 = vpop.permute.xlu2 %7764  ;;  %v7594_v30 = vsel %vm239_vm1, %v7552_v32, 0 }
 0x588   : > { %11923 = vmatmul.msk.bf16.vlgmr.msrb.gmra.mxu0 %vm235_vm2, %v14997_v61  ;;  %11924 = vmatmul.msk.bf16.vlgmr.msrb.gmra.mxu1 %vm235_vm2, %v14997_v61  ;;  %8425 = vst [vmem:[#allocation1] ss:$4 sm:$0xff] %v12268_v0  ;;  %v7783_v25 = vsel %vm7782_vm6, %v7763_v28, %v7765_v56 }
 0x589   : > { %11925 = vmatmul.msk.bf16.vlgmr.msrb.gmra.mxu2 %vm235_vm2, %v14997_v61  ;;  %7655 = vmatpush.bf16.msrb.mxu0 %v7579_v35 }
 0x58a   : > { %11926 = vmatmul.msk.bf16.vlgmr.msrb.gmra.mxu3 %vm235_vm2, %v14997_v61  ;;  %7668 = vmatpush.bf16.msrb.mxu1 %v7582_v49 }
 0x58b   : > { %7681 = vmatpush.bf16.msrb.mxu2 %v7585_v27  ;;  %7694 = vmatpush.bf16.msrb.mxu3 %v7588_v34 }
 0x58c   : > { %v6767_v24 = vpop.f32.mrf.mxu2  ;;  %8238 = vrot.lane.b32.xlu0 %v8218_v57, %s12219_s16  ;;  %s12117_s16 = smul.u32 40, %s16562_s13 }
 0x58d   : > { %v6780_v5 = vpop.f32.mrf.mxu3  ;;  %v15082_v44 = vadd.f32 %v6767_v24, %v14989_v58  ;;  %v6743_v47 = vpop.f32.mrf.mxu0  ;;  %v7562_v58 = vsel %vm7553_vm5, %v7550_v36, %v7552_v32  ;;  %vm10803_vm5 = vcmask 195584  }
 0x58e   : > { %v15085_v23 = vadd.f32 %v6780_v5, %v14992_v8  ;;  %v6756_v61 = vpop.f32.mrf.mxu1  ;;  %v7767_v12 = vpop.permute.xlu0 %7766  ;;  %v7591_v37 = vsel %vm239_vm1, %v7562_v58, 0  ;;  %v15169_v58 = vld [vmem:[%s16558_s1 + $0x84] sm:$0xf]  ;;  %s16531_s19 = scalar_lea.vmem %s16560_s3, %s12117_s16 }
 0x58f   : > { %v8428_v33 = vld.sshfl [vmem:[#allocation1 + $0x8] sm:$0xff pattern:$0x73625140]  ;;  %v7784_v53 = vsel %vm7782_vm6, %v7765_v56, %v7767_v12  ;;  %v8432_v41 = vld.sshfl [vmem:[#allocation1 + $0x18] sm:$0xff pattern:$0x73625140] }
 0x590   : > { %8449 = vrot.lane.b32.xlu1 %v8428_v33, %s12220_s17  ;;  %v7799_v51 = vsel %vm239_vm1, %v7784_v53, 0  ;;  %v8430_v31 = vld.sshfl [vmem:[#allocation1 + $0x10] sm:$0xff pattern:$0x73625140] }
 0x591   : > { %8442 = vst [vmem:[#allocation1] ss:$4 sm:$0xff] %v12274_v2  ;;  %8451 = vrot.lane.b32.xlu2 %v8430_v31, %s12220_s17  ;;  %v8436_v53 = vld.sshfl [vmem:[#allocation1 + $0x28] sm:$0xff pattern:$0x73625140] }
 0x594   : > { %v6769_v43 = vpop.f32.mrf.mxu2  ;;  %8453 = vrot.lane.b32.xlu0 %v8432_v41, %s12220_s17 }
 0x595   : > { %v6782_v16 = vpop.f32.mrf.mxu3  ;;  %v6793_v8 = vpop.f32.mrf.mxu0 }
 0x596   : > { %v6806_v48 = vpop.f32.mrf.mxu1  ;;  %v15097_v15 = vadd.f32 %v6793_v8, %v15013_v54  ;;  %v7769_v54 = vpop.permute.xlu1 %7768 }
 0x597   : > { %v15100_v39 = vadd.f32 %v6806_v48, %v15016_v46  ;;  %v7796_v46 = vsel %vm239_vm1, %v7783_v25, 0  ;;  %v7771_v6 = vpop.permute.xlu2 %7770  ;;  %v7773_v63 = vpop.permute.xlu0 %7772  ;;  %v7785_v50 = vsel %vm7782_vm6, %v7767_v12, %v7769_v54 }
 0x598   : > { %11928 = vmatmul.msk.bf16.vlgmr.msra.gmra.mxu0 %vm235_vm2, %v15094_v60  ;;  %11929 = vmatmul.msk.bf16.vlgmr.msra.gmra.mxu1 %vm235_vm2, %v15094_v60  ;;  %v7786_v14 = vsel %vm7782_vm6, %v7769_v54, %v7771_v6  ;;  %v7787_v10 = vsel %vm7782_vm6, %v7771_v6, %v7773_v63  ;;  %v7802_v19 = vsel %vm239_vm1, %v7785_v50, 0  ;;  %v8445_v47 = vld.sshfl [vmem:[#allocation1 + $0x8] sm:$0xff pattern:$0x73625140] }
 0x599   : > { %11930 = vmatmul.msk.bf16.vlgmr.msra.gmra.mxu2 %vm235_vm2, %v15094_v60  ;;  %7707 = vmatpush.bf16.msra.mxu0 %v7591_v37  ;;  %v7805_v18 = vsel %vm239_vm1, %v7786_v14, 0  ;;  %v7808_v35 = vsel %vm239_vm1, %v7787_v10, 0  ;;  %v8447_v61 = vld.sshfl [vmem:[#allocation1 + $0x10] sm:$0xff pattern:$0x73625140] }
 0x59a   : > { %11931 = vmatmul.msk.bf16.vlgmr.msra.gmra.mxu3 %vm235_vm2, %v15094_v60  ;;  %7720 = vmatpush.bf16.msra.mxu1 %v7594_v30  ;;  %v8443_v54 = vld.sshfl [vmem:[#allocation1] sm:$0xff pattern:$0x73625140] }
 0x59b   : > { %7832 = vmatpush.bf16.msra.mxu2 %v7796_v46  ;;  %7845 = vmatpush.bf16.msra.mxu3 %v7799_v51  ;;  %8654 = vst [vmem:[#allocation1] ss:$4 sm:$0xff] %v12268_v0 }
 0x59c   : > { %v6918_v7 = vpop.f32.mrf.mxu2  ;;  %8455 = vrot.lane.b32.xlu1 %v8434_v3, %s12220_s17  ;;  %8459 = vrot.lane.b32.xlu0 %v8438_v11, %s12220_s17 }
 0x59d   : > { %v6931_v4 = vpop.f32.mrf.mxu3  ;;  %v15120_v55 = vadd.f32 %v6918_v7, %v15026_v52  ;;  %v6795_v29 = vpop.f32.mrf.mxu0  ;;  %8457 = vrot.lane.b32.xlu2 %v8436_v53, %s12220_s17 }
 0x59e   : > { %v15123_v17 = vadd.f32 %v6931_v4, %v15029_v40  ;;  %v6808_v26 = vpop.f32.mrf.mxu1  ;;  %v7775_v22 = vpop.permute.xlu1 %7774 }
 0x59f   : > { %v7788_v40 = vsel %vm7782_vm6, %v7773_v63, %v7775_v22  ;;  %v7777_v5 = vpop.permute.xlu2 %7776  ;;  %v7779_v8 = vpop.permute.xlu0 %7778 }
 0x5a0   : > { %v7811_v49 = vsel %vm239_vm1, %v7788_v40, 0  ;;  %v7789_v12 = vsel %vm7782_vm6, %v7775_v22, %v7777_v5  ;;  %v7790_v56 = vsel %vm7782_vm6, %v7777_v5, %v7779_v8 }
 0x5a1   : > { %v7814_v48 = vsel %vm239_vm1, %v7789_v12, 0 }
 0x5a2   : > { %v8661_v26 = vld.sshfl [vmem:[#allocation1 + $0x18] sm:$0xff pattern:$0x73625140]  ;;  %v8659_v11 = vld.sshfl [vmem:[#allocation1 + $0x10] sm:$0xff pattern:$0x73625140] }
 0x5a3   : > { %v8657_v5 = vld.sshfl [vmem:[#allocation1 + $0x8] sm:$0xff pattern:$0x73625140] }
 0x5a4   : > { %v6920_v38 = vpop.f32.mrf.mxu2  ;;  %8465 = vrot.lane.b32.xlu0 %v8445_v47, %s12220_s17  ;;  %8671 = vst [vmem:[#allocation1] ss:$4 sm:$0xff] %v12274_v2 }
 0x5a5   : > { %v6933_v36 = vpop.f32.mrf.mxu3  ;;  %v6944_v21 = vpop.f32.mrf.mxu0  ;;  %8463 = vrot.lane.b32.xlu2 %v8443_v54, %s12220_s17 }
 0x5a6   : > { %v6957_v52 = vpop.f32.mrf.mxu1  ;;  %v15131_v42 = vadd.f32 %v6944_v21, %v15049_v62  ;;  %v8440_v62 = vld.sshfl [vmem:[#allocation1 + $0x38] sm:$0xff pattern:$0x73625140]  ;;  %v7781_v59 = vpop.permute.xlu1 %7780 }
 0x5a7   : > { %v15134_v20 = vadd.f32 %v6957_v52, %v15052_v13  ;;  %8461 = vrot.lane.b32.xlu1 %v8440_v62, %s12220_s17  ;;  %v7791_v37 = vsel %vm7782_vm6, %v7779_v8, %v7781_v59  ;;  %v7992_v30 = vpop.permute.xlu2 %7991  ;;  %v7823_v25 = vsel %vm239_vm1, %v7781_v59, 0  ;;  %8656 = vst [vmem:[#allocation1 + $0x20] ss:$4 sm:$0xff] %v12270_v1  ;;  %v7994_v4 = vpop.permute.xlu0 %7993  ;;  %vm11037_vm6 = vcmask 187392  }
 0x5a8   : > { %11932 = vmatmul.msk.bf16.vlgmr.msrb.gmra.mxu0 %vm235_vm2, %v15094_v60  ;;  %11933 = vmatmul.msk.bf16.vlgmr.msrb.gmra.mxu1 %vm235_vm2, %v15094_v60 }
 0x5a9   : > { %11934 = vmatmul.msk.bf16.vlgmr.msrb.gmra.mxu2 %vm235_vm2, %v15094_v60  ;;  %7858 = vmatpush.bf16.msrb.mxu0 %v7802_v19 }
 0x5aa   : > { %11935 = vmatmul.msk.bf16.vlgmr.msrb.gmra.mxu3 %vm235_vm2, %v15094_v60  ;;  %7871 = vmatpush.bf16.msrb.mxu1 %v7805_v18 }
 0x5ab   : > { %7884 = vmatpush.bf16.msrb.mxu2 %v7808_v35  ;;  %7897 = vmatpush.bf16.msrb.mxu3 %v7811_v49  ;;  %v8674_v53 = vld.sshfl [vmem:[#allocation1 + $0x8] sm:$0xff pattern:$0x73625140] }
 0x5ac   : > { %v6970_v13 = vpop.f32.mrf.mxu2  ;;  %8680 = vrot.lane.b32.xlu0 %v8659_v11, %s12221_s22 }
 0x5ad   : > { %v6983_v27 = vpop.f32.mrf.mxu3  ;;  %v15152_v34 = vadd.f32 %v6970_v13, %v15062_v9  ;;  %v6946_v57 = vpop.f32.mrf.mxu0  ;;  %8678 = vrot.lane.b32.xlu2 %v8657_v5, %s12221_s22 }
 0x5ae   : > { %v15155_v32 = vadd.f32 %v6983_v27, %v15065_v45  ;;  %v6959_v24 = vpop.f32.mrf.mxu1  ;;  %v7996_v29 = vpop.permute.xlu1 %7995  ;;  %v8665_v35 = vld.sshfl [vmem:[#allocation1 + $0x28] sm:$0xff pattern:$0x73625140]  ;;  %v8663_v54 = vld.sshfl [vmem:[#allocation1 + $0x20] sm:$0xff pattern:$0x73625140] }
 0x5af   : > { %8467 = vrot.lane.b32.xlu1 %v8447_v61, %s12220_s17  ;;  %v7998_v6 = vpop.permute.xlu2 %7997 }
 0x5b0   : > { %v8014_v50 = vsel %vm8011_vm7, %v7996_v29, %v7998_v6 }
 0x5b1   : > { %v8031_v18 = vsel %vm239_vm1, %v8014_v50, 0 }
 0x5b4   : > { %v6972_v28 = vpop.f32.mrf.mxu2  ;;  %8686 = vrot.lane.b32.xlu0 %v8665_v35, %s12221_s22 }
 0x5b5   : > { %v6985_v33 = vpop.f32.mrf.mxu3  ;;  %v6996_v43 = vpop.f32.mrf.mxu0  ;;  %8684 = vrot.lane.b32.xlu2 %v8663_v54, %s12221_s22 }
 0x5b6   : > { %v7009_v9 = vpop.f32.mrf.mxu1  ;;  %v15161_v16 = vadd.f32 %v6996_v43, %v15082_v44  ;;  %v7817_v44 = vsel %vm239_vm1, %v7790_v56, 0  ;;  %v8000_v52 = vpop.permute.xlu0 %7999 }
 0x5b7   : > { %v15164_v45 = vadd.f32 %v7009_v9, %v15085_v23  ;;  %v7820_v23 = vsel %vm239_vm1, %v7791_v37, 0  ;;  %8682 = vrot.lane.b32.xlu1 %v8661_v26, %s12221_s22  ;;  %v8015_v19 = vsel %vm8011_vm7, %v7998_v6, %v8000_v52  ;;  %v8002_v49 = vpop.permute.xlu1 %8001  ;;  %v8004_v47 = vpop.permute.xlu2 %8003  ;;  %v8672_v9 = vld.sshfl [vmem:[#allocation1] sm:$0xff pattern:$0x73625140] }
 0x5b8   : > { %11936 = vmatmul.msk.bf16.vlgmr.msra.gmra.mxu0 %vm235_vm2, %v15094_v60  ;;  %11937 = vmatmul.msk.bf16.vlgmr.msra.gmra.mxu1 %vm235_vm2, %v15094_v60  ;;  %v8016_v33 = vsel %vm8011_vm7, %v8000_v52, %v8002_v49  ;;  %v8017_v12 = vsel %vm8011_vm7, %v8002_v49, %v8004_v47 }
 0x5b9   : > { %11939 = vmatmul.msk.bf16.vlgmr.msra.gmra.mxu2 %vm235_vm2, %v15169_v58  ;;  %7910 = vmatpush.bf16.msra.mxu0 %v7814_v48  ;;  %v8037_v37 = vsel %vm239_vm1, %v8016_v33, 0 }
 0x5ba   : > { %11940 = vmatmul.msk.bf16.vlgmr.msra.gmra.mxu3 %vm235_vm2, %v15169_v58  ;;  %7923 = vmatpush.bf16.msra.mxu1 %v7817_v44  ;;  %v8040_v44 = vsel %vm239_vm1, %v8017_v12, 0 }
 0x5bb   : > { %7936 = vmatpush.bf16.msra.mxu2 %v7820_v23  ;;  %7949 = vmatpush.bf16.msra.mxu3 %v7823_v25 }
 0x5bc   : > { %v7022_v60 = vpop.f32.mrf.mxu2  ;;  %8692 = vrot.lane.b32.xlu0 %v8672_v9, %s12221_s22 }
 0x5bd   : > { %v7035_v46 = vpop.f32.mrf.mxu3  ;;  %v15189_v51 = vadd.f32 %v7022_v60, %v15097_v15  ;;  %v6998_v3 = vpop.f32.mrf.mxu0  ;;  %v8012_v15 = vsel %vm8011_vm7, %v7992_v30, %v7994_v4  ;;  %v15242_v30 = vld.sshfl [vmem:[#allocation1 + $0x10] sm:$0xff pattern:$0x73625140] }
 0x5be   : > { %v15192_v41 = vadd.f32 %v7035_v46, %v15100_v39  ;;  %v7011_v7 = vpop.f32.mrf.mxu1  ;;  %v8013_v39 = vsel %vm8011_vm7, %v7994_v4, %v7996_v29  ;;  %v8025_v10 = vsel %vm239_vm1, %v8012_v15, 0  ;;  %v8006_v61 = vpop.permute.xlu0 %8005  ;;  %8883 = vst [vmem:[#allocation1] ss:$4 sm:$0xff] %v12268_v0 }
 0x5bf   : > { %v8028_v40 = vsel %vm239_vm1, %v8013_v39, 0  ;;  %v8008_v56 = vpop.permute.xlu1 %8007 }
 0x5c0   : > { %v8019_v23 = vsel %vm8011_vm7, %v8006_v61, %v8008_v56 }
 0x5c1   : > { %v8046_v25 = vsel %vm239_vm1, %v8019_v23, 0 }
 0x5c4   : > { %v7024_v63 = vpop.f32.mrf.mxu2 }
 0x5c5   : > { %v7037_v22 = vpop.f32.mrf.mxu3  ;;  %v7147_v38 = vpop.f32.mrf.mxu0  ;;  %v8886_v26 = vld.sshfl [vmem:[#allocation1 + $0x8] sm:$0xff pattern:$0x73625140] }
 0x5c6   : > { %v7160_v36 = vpop.f32.mrf.mxu1  ;;  %v15201_v14 = vadd.f32 %v7147_v38, %v15120_v55  ;;  %v8034_v55 = vsel %vm239_vm1, %v8015_v19, 0  ;;  %v8221_v29 = vpop.permute.xlu0 %8220  ;;  %8909 = vrot.lane.b32.xlu0 %v8886_v26, %s12222_s23  ;;  %v15280_v19 = vld.sshfl [vmem:[#allocation1 + $0x18] sm:$0xff pattern:$0x73625140] }
 0x5c7   : > { %v15204_v21 = vadd.f32 %v7160_v36, %v15123_v17  ;;  %v8667_v17 = vld.sshfl [vmem:[#allocation1 + $0x30] sm:$0xff pattern:$0x73625140]  ;;  %v8223_v11 = vpop.permute.xlu1 %8222 }
 0x5c8   : > { %11941 = vmatmul.msk.bf16.vlgmr.msrb.gmra.mxu0 %vm235_vm2, %v15169_v58  ;;  %11942 = vmatmul.msk.bf16.vlgmr.msrb.gmra.mxu1 %vm235_vm2, %v15169_v58  ;;  %v8241_v38 = vsel %vm8240_vm8, %v8221_v29, %v8223_v11 }
 0x5c9   : > { %11943 = vmatmul.msk.bf16.vlgmr.msrb.gmra.mxu2 %vm235_vm2, %v15169_v58  ;;  %8061 = vmatpush.bf16.msrb.mxu0 %v8025_v10 }
 0x5ca   : > { %11944 = vmatmul.msk.bf16.vlgmr.msrb.gmra.mxu3 %vm235_vm2, %v15169_v58  ;;  %8074 = vmatpush.bf16.msrb.mxu1 %v8028_v40 }
 0x5cb   : > { %8087 = vmatpush.bf16.msrb.mxu2 %v8031_v18  ;;  %8100 = vmatpush.bf16.msrb.mxu3 %v8034_v55  ;;  %v8254_v55 = vsel %vm239_vm1, %v8241_v38, 0  ;;  %v15351_v38 = vld [vmem:[%s16558_s1 + $0x8c] sm:$0xf] }
 0x5cc   : > { %v7173_v31 = vpop.f32.mrf.mxu2  ;;  %8688 = vrot.lane.b32.xlu1 %v8667_v17, %s12221_s22  ;;  %v8669_v17 = vld.sshfl [vmem:[#allocation1 + $0x38] sm:$0xff pattern:$0x73625140] }
 0x5cd   : > { %v7186_v62 = vpop.f32.mrf.mxu3  ;;  %v15222_v13 = vadd.f32 %v7173_v31, %v15131_v42  ;;  %v7149_v57 = vpop.f32.mrf.mxu0  ;;  %8885 = vst [vmem:[#allocation1 + $0x20] ss:$4 sm:$0xff] %v12270_v1  ;;  %8690 = vrot.lane.b32.xlu2 %v8669_v17, %s12221_s22 }
 0x5ce   : > { %v15225_v27 = vadd.f32 %v7186_v62, %v15134_v20  ;;  %v7162_v24 = vpop.f32.mrf.mxu1  ;;  %v8018_v20 = vsel %vm8011_vm7, %v8004_v47, %v8006_v61  ;;  %v8227_v18 = vpop.permute.xlu0 %8226 }
 0x5cf   : > { %v8229_v47 = vpop.permute.xlu1 %8228 }
 0x5d4   : > { %v7175_v59 = vpop.f32.mrf.mxu2  ;;  %8694 = vrot.lane.b32.xlu1 %v8674_v53, %s12221_s22  ;;  %v8892_v5 = vld.sshfl [vmem:[#allocation1 + $0x20] sm:$0xff pattern:$0x73625140]  ;;  %v8894_v61 = vld.sshfl [vmem:[#allocation1 + $0x28] sm:$0xff pattern:$0x73625140] }
 0x5d5   : > { %v7188_v28 = vpop.f32.mrf.mxu3  ;;  %v7199_v42 = vpop.f32.mrf.mxu0  ;;  %8915 = vrot.lane.b32.xlu0 %v8892_v5, %s12222_s23  ;;  %8696 = vrot.lane.b32.xlu2 %v15242_v30, %s12221_s22 }
 0x5d6   : > { %v7212_v43 = vpop.f32.mrf.mxu1  ;;  %v15233_v8 = vadd.f32 %v7199_v42, %v15152_v34  ;;  %v8043_v34 = vsel %vm239_vm1, %v8018_v20, 0  ;;  %v8233_v28 = vpop.permute.xlu0 %8232 }
 0x5d7   : > { %v15236_v48 = vadd.f32 %v7212_v43, %v15155_v32  ;;  %v8010_v32 = vpop.permute.xlu2 %8009  ;;  %v8244_v43 = vsel %vm8240_vm8, %v8227_v18, %v8229_v47 }
 0x5d8   : > { %11945 = vmatmul.msk.bf16.vlgmr.msra.gmra.mxu0 %vm235_vm2, %v15169_v58  ;;  %11946 = vmatmul.msk.bf16.vlgmr.msra.gmra.mxu1 %vm235_vm2, %v15169_v58  ;;  %v8020_v15 = vsel %vm8011_vm7, %v8008_v56, %v8010_v32  ;;  %v8052_v40 = vsel %vm239_vm1, %v8010_v32, 0  ;;  %v8263_v23 = vsel %vm239_vm1, %v8244_v43, 0  ;;  %vm11271_vm7 = vcmask 179200  }
 0x5d9   : > { %11947 = vmatmul.msk.bf16.vlgmr.msra.gmra.mxu2 %vm235_vm2, %v15169_v58  ;;  %8113 = vmatpush.bf16.msra.mxu0 %v8037_v37  ;;  %v8049_v10 = vsel %vm239_vm1, %v8020_v15, 0 }
 0x5da   : > { %11948 = vmatmul.msk.bf16.vlgmr.msra.gmra.mxu3 %vm235_vm2, %v15169_v58  ;;  %8126 = vmatpush.bf16.msra.mxu1 %v8040_v44 }
 0x5db   : > { %8139 = vmatpush.bf16.msra.mxu2 %v8043_v34  ;;  %8152 = vmatpush.bf16.msra.mxu3 %v8046_v25 }
 0x5dc   : > { %v7225_v60 = vpop.f32.mrf.mxu2 }
 0x5dd   : > { %v7238_v46 = vpop.f32.mrf.mxu3  ;;  %v15258_v3 = vadd.f32 %v7225_v60, %v15161_v16  ;;  %v7201_v58 = vpop.f32.mrf.mxu0  ;;  %8913 = vrot.lane.b32.xlu2 %v15280_v19, %s12222_s23 }
 0x5de   : > { %v15261_v7 = vadd.f32 %v7238_v46, %v15164_v45  ;;  %v7214_v4 = vpop.f32.mrf.mxu1  ;;  %v15268_v45 = vld [vmem:[%s16558_s1 + $0x88] sm:$0xf]  ;;  %v8235_v58 = vpop.permute.xlu1 %8234 }
 0x5df   : > { %v8225_v6 = vpop.permute.xlu2 %8224 }
 0x5e0   : > { %v8242_v36 = vsel %vm8240_vm8, %v8223_v11, %v8225_v6  ;;  %v8243_v42 = vsel %vm8240_vm8, %v8225_v6, %v8227_v18 }
 0x5e1   : > { %v8260_v44 = vsel %vm239_vm1, %v8243_v42, 0 }
 0x5e4   : > { %v7227_v63 = vpop.f32.mrf.mxu2 }
 0x5e5   : > { %v7240_v22 = vpop.f32.mrf.mxu3  ;;  %v7251_v39 = vpop.f32.mrf.mxu0  ;;  %v8247_v63 = vsel %vm8240_vm8, %v8233_v28, %v8235_v58 }
 0x5e6   : > { %v7264_v16 = vpop.f32.mrf.mxu1  ;;  %v15273_v50 = vadd.f32 %v7251_v39, %v15189_v51  ;;  %v8257_v51 = vsel %vm239_vm1, %v8242_v36, 0 }
 0x5e7   : > { %v15276_v52 = vadd.f32 %v7264_v16, %v15192_v41  ;;  %v8888_v41 = vld.sshfl [vmem:[#allocation1 + $0x10] sm:$0xff pattern:$0x73625140]  ;;  %v8231_v59 = vpop.permute.xlu2 %8230 }
 0x5e8   : > { %11950 = vmatmul.msk.bf16.vlgmr.msrb.gmra.mxu0 %vm235_vm2, %v15268_v45  ;;  %11951 = vmatmul.msk.bf16.vlgmr.msrb.gmra.mxu1 %vm235_vm2, %v15268_v45  ;;  %8900 = vst [vmem:[#allocation1] ss:$4 sm:$0xff] %v12274_v2  ;;  %v8245_v20 = vsel %vm8240_vm8, %v8229_v47, %v8231_v59  ;;  %v8246_v9 = vsel %vm8240_vm8, %v8231_v59, %v8233_v28 }
 0x5e9   : > { %11952 = vmatmul.msk.bf16.vlgmr.msrb.gmra.mxu2 %vm235_vm2, %v15268_v45  ;;  %8165 = vmatpush.bf16.msrb.mxu0 %v8049_v10  ;;  %v8266_v30 = vsel %vm239_vm1, %v8245_v20, 0  ;;  %v8269_v34 = vsel %vm239_vm1, %v8246_v9, 0  ;;  %v8272_v10 = vsel %vm239_vm1, %v8247_v63, 0 }
 0x5ea   : > { %11953 = vmatmul.msk.bf16.vlgmr.msrb.gmra.mxu3 %vm235_vm2, %v15268_v45  ;;  %8178 = vmatpush.bf16.msrb.mxu1 %v8052_v40 }
 0x5eb   : > { %8290 = vmatpush.bf16.msrb.mxu2 %v8254_v55  ;;  %8303 = vmatpush.bf16.msrb.mxu3 %v8257_v51  ;;  %v8896_v55 = vld.sshfl [vmem:[#allocation1 + $0x30] sm:$0xff pattern:$0x73625140] }
 0x5ec   : > { %v7376_v35 = vpop.f32.mrf.mxu2  ;;  %8911 = vrot.lane.b32.xlu1 %v8888_v41, %s12222_s23  ;;  %8919 = vrot.lane.b32.xlu2 %v8896_v55, %s12222_s23 }
 0x5ed   : > { %v7389_v49 = vpop.f32.mrf.mxu3  ;;  %v15297_v31 = vadd.f32 %v7376_v35, %v15201_v14  ;;  %v7253_v57 = vpop.f32.mrf.mxu0 }
 0x5ee   : > { %v15300_v62 = vadd.f32 %v7389_v49, %v15204_v21  ;;  %v7266_v24 = vpop.f32.mrf.mxu1 }
 0x5ef   : > { %v8237_v4 = vpop.permute.xlu2 %8236  ;;  %v8905_v29 = vld.sshfl [vmem:[#allocation1 + $0x10] sm:$0xff pattern:$0x73625140]  ;;  %v8903_v36 = vld.sshfl [vmem:[#allocation1 + $0x8] sm:$0xff pattern:$0x73625140] }
 0x5f0   : > { %v8248_v22 = vsel %vm8240_vm8, %v8235_v58, %v8237_v4  ;;  %v8907_v18 = vld.sshfl [vmem:[#allocation1 + $0x18] sm:$0xff pattern:$0x73625140] }
 0x5f1   : > { %v8275_v40 = vsel %vm239_vm1, %v8248_v22, 0 }
 0x5f4   : > { %v7378_v33 = vpop.f32.mrf.mxu2  ;;  %8917 = vrot.lane.b32.xlu1 %v8894_v61, %s12222_s23  ;;  %8925 = vrot.lane.b32.xlu2 %v8903_v36, %s12222_s23 }
 0x5f5   : > { %v7391_v12 = vpop.f32.mrf.mxu3  ;;  %v7402_v14 = vpop.f32.mrf.mxu0 }
 0x5f6   : > { %v7415_v21 = vpop.f32.mrf.mxu1  ;;  %v15311_v56 = vadd.f32 %v7402_v14, %v15222_v13  ;;  %v8898_v13 = vld.sshfl [vmem:[#allocation1 + $0x38] sm:$0xff pattern:$0x73625140] }
 0x5f7   : > { %v15314_v37 = vadd.f32 %v7415_v21, %v15225_v27  ;;  %v8901_v27 = vld.sshfl [vmem:[#allocation1] sm:$0xff pattern:$0x73625140]  ;;  %8921 = vrot.lane.b32.xlu0 %v8898_v13, %s12222_s23  ;;  %9119 = vst [vmem:[#allocation1 + $0x20] ss:$4 sm:$0xff] %v12270_v1 }
 0x5f8   : > { %11954 = vmatmul.msk.bf16.vlgmr.msra.gmra.mxu0 %vm235_vm2, %v15268_v45  ;;  %11955 = vmatmul.msk.bf16.vlgmr.msra.gmra.mxu1 %vm235_vm2, %v15268_v45  ;;  %9117 = vst [vmem:[#allocation1] ss:$4 sm:$0xff] %v12268_v0 }
 0x5f9   : > { %11956 = vmatmul.msk.bf16.vlgmr.msra.gmra.mxu2 %vm235_vm2, %v15268_v45  ;;  %8316 = vmatpush.bf16.msra.mxu0 %v8260_v44 }
 0x5fa   : > { %11957 = vmatmul.msk.bf16.vlgmr.msra.gmra.mxu3 %vm235_vm2, %v15268_v45  ;;  %8329 = vmatpush.bf16.msra.mxu1 %v8263_v23 }
 0x5fb   : > { %8342 = vmatpush.bf16.msra.mxu2 %v8266_v30  ;;  %8355 = vmatpush.bf16.msra.mxu3 %v8269_v34 }
 0x5fc   : > { %v7428_v32 = vpop.f32.mrf.mxu2  ;;  %8923 = vrot.lane.b32.xlu1 %v8901_v27, %s12222_s23 }
 0x5fd   : > { %v7441_v25 = vpop.f32.mrf.mxu3  ;;  %v15331_v53 = vadd.f32 %v7428_v32, %v15233_v8  ;;  %v7404_v60 = vpop.f32.mrf.mxu0 }
 0x5fe   : > { %v15334_v54 = vadd.f32 %v7441_v25, %v15236_v48  ;;  %v7417_v46 = vpop.f32.mrf.mxu1  ;;  %v8239_v26 = vpop.permute.xlu0 %8238  ;;  %v9130_v30 = vld.sshfl [vmem:[#allocation1 + $0x30] sm:$0xff pattern:$0x73625140]  ;;  %v9128_v34 = vld.sshfl [vmem:[#allocation1 + $0x28] sm:$0xff pattern:$0x73625140] }
 0x5ff   : > { %8927 = vrot.lane.b32.xlu0 %v8905_v29, %s12222_s23  ;;  %v8249_v15 = vsel %vm8240_vm8, %v8237_v4, %v8239_v26  ;;  %v9124_v5 = vld.sshfl [vmem:[#allocation1 + $0x18] sm:$0xff pattern:$0x73625140]  ;;  %v9122_v47 = vld.sshfl [vmem:[#allocation1 + $0x10] sm:$0xff pattern:$0x73625140] }
 0x600   : > { %v9120_v58 = vld.sshfl [vmem:[#allocation1 + $0x8] sm:$0xff pattern:$0x73625140] }
 0x601   : > { %9143 = vrot.lane.b32.xlu2 %v9120_v58, %s12223_s28  ;;  %9134 = vst [vmem:[#allocation1] ss:$4 sm:$0xff] %v12274_v2 }
 0x602   : > { %v8450_v19 = vpop.permute.xlu1 %8449 }
 0x604   : > { %v7430_v6 = vpop.f32.mrf.mxu2  ;;  %8929 = vrot.lane.b32.xlu1 %v8907_v18, %s12222_s23 }
 0x605   : > { %v7443_v11 = vpop.f32.mrf.mxu3  ;;  %v7454_v8 = vpop.f32.mrf.mxu0 }
 0x606   : > { %v7467_v48 = vpop.f32.mrf.mxu1  ;;  %v15343_v39 = vadd.f32 %v7454_v8, %v15258_v3  ;;  %v8281_v3 = vsel %vm239_vm1, %v8239_v26, 0  ;;  %v8454_v24 = vpop.permute.xlu0 %8453 }
 0x607   : > { %v15346_v16 = vadd.f32 %v7467_v48, %v15261_v7  ;;  %v8278_v7 = vsel %vm239_vm1, %v8249_v15, 0  ;;  %9145 = vrot.lane.b32.xlu0 %v9122_v47, %s12223_s28 }
 0x608   : > { %11958 = vmatmul.msk.bf16.vlgmr.msrb.gmra.mxu0 %vm235_vm2, %v15268_v45  ;;  %11959 = vmatmul.msk.bf16.vlgmr.msrb.gmra.mxu1 %vm235_vm2, %v15268_v45  ;;  %v8452_v45 = vpop.permute.xlu2 %8451  ;;  %v9135_v15 = vld.sshfl [vmem:[#allocation1] sm:$0xff pattern:$0x73625140]  ;;  %v15433_v18 = vld.sshfl [vmem:[#allocation1 + $0x10] sm:$0xff pattern:$0x73625140] }
 0x609   : > { %11961 = vmatmul.msk.bf16.vlgmr.msrb.gmra.mxu2 %vm235_vm2, %v15351_v38  ;;  %8368 = vmatpush.bf16.msrb.mxu0 %v8272_v10  ;;  %v8470_v33 = vsel %vm8469_vm9, %v8450_v19, %v8452_v45  ;;  %v9126_v19 = vld.sshfl [vmem:[#allocation1 + $0x20] sm:$0xff pattern:$0x73625140] }
 0x60a   : > { %11962 = vmatmul.msk.bf16.vlgmr.msrb.gmra.mxu3 %vm235_vm2, %v15351_v38  ;;  %8381 = vmatpush.bf16.msrb.mxu1 %v8275_v40  ;;  %v8483_v20 = vsel %vm239_vm1, %v8470_v33, 0 }
 0x60b   : > { %8394 = vmatpush.bf16.msrb.mxu2 %v8278_v7  ;;  %8407 = vmatpush.bf16.msrb.mxu3 %v8281_v3 }
 0x60c   : > { %v7480_v51 = vpop.f32.mrf.mxu2  ;;  %9147 = vrot.lane.b32.xlu1 %v9124_v5, %s12223_s28  ;;  %9149 = vrot.lane.b32.xlu2 %v9126_v19, %s12223_s28 }
 0x60d   : > { %v7493_v17 = vpop.f32.mrf.mxu3  ;;  %v15370_v41 = vadd.f32 %v7480_v51, %v15273_v50  ;;  %v7456_v49 = vpop.f32.mrf.mxu0  ;;  %v8471_v50 = vsel %vm8469_vm9, %v8452_v45, %v8454_v24 }
 0x60e   : > { %v15373_v35 = vadd.f32 %v7493_v17, %v15276_v52  ;;  %v7469_v57 = vpop.f32.mrf.mxu1  ;;  %v8456_v61 = vpop.permute.xlu1 %8455  ;;  %v8486_v9 = vsel %vm239_vm1, %v8471_v50, 0 }
 0x60f   : > { %v8472_v42 = vsel %vm8469_vm9, %v8454_v24, %v8456_v61  ;;  %9151 = vrot.lane.b32.xlu0 %v9128_v34, %s12223_s28  ;;  %v9141_v24 = vld.sshfl [vmem:[#allocation1 + $0x18] sm:$0xff pattern:$0x73625140] }
 0x610   : > { %v8458_v21 = vpop.permute.xlu2 %8457  ;;  %v8489_v23 = vsel %vm239_vm1, %v8472_v42, 0 }
 0x611   : > { %v8473_v44 = vsel %vm8469_vm9, %v8456_v61, %v8458_v21 }
 0x614   : > { %v7482_v59 = vpop.f32.mrf.mxu2  ;;  %9153 = vrot.lane.b32.xlu1 %v9130_v30, %s12223_s28 }
 0x615   : > { %v7495_v28 = vpop.f32.mrf.mxu3  ;;  %v7605_v52 = vpop.f32.mrf.mxu0 }
 0x616   : > { %v7618_v12 = vpop.f32.mrf.mxu1  ;;  %v15382_v43 = vadd.f32 %v7605_v52, %v15297_v31  ;;  %v8492_v31 = vsel %vm239_vm1, %v8473_v44, 0 }
 0x617   : > { %v15385_v14 = vadd.f32 %v7618_v12, %v15300_v62  ;;  %v8460_v62 = vpop.permute.xlu0 %8459  ;;  %9157 = vrot.lane.b32.xlu0 %v9135_v15, %s12223_s28 }
 0x618   : > { %11963 = vmatmul.msk.bf16.vlgmr.msra.gmra.mxu0 %vm235_vm2, %v15351_v38  ;;  %11964 = vmatmul.msk.bf16.vlgmr.msra.gmra.mxu1 %vm235_vm2, %v15351_v38  ;;  %v8464_v29 = vpop.permute.xlu2 %8463  ;;  %v8474_v63 = vsel %vm8469_vm9, %v8458_v21, %v8460_v62 }
 0x619   : > { %11965 = vmatmul.msk.bf16.vlgmr.msra.gmra.mxu2 %vm235_vm2, %v15351_v38  ;;  %8519 = vmatpush.bf16.msra.mxu0 %v8483_v20  ;;  %v8462_v4 = vpop.permute.xlu1 %8461  ;;  %v8495_v40 = vsel %vm239_vm1, %v8474_v63, 0 }
 0x61a   : > { %11966 = vmatmul.msk.bf16.vlgmr.msra.gmra.mxu3 %vm235_vm2, %v15351_v38  ;;  %8532 = vmatpush.bf16.msra.mxu1 %v8486_v9 }
 0x61b   : > { %8545 = vmatpush.bf16.msra.mxu2 %v8489_v23  ;;  %8558 = vmatpush.bf16.msra.mxu3 %v8492_v31  ;;  %v9132_v23 = vld.sshfl [vmem:[#allocation1 + $0x38] sm:$0xff pattern:$0x73625140] }
 0x61c   : > { %v7631_v13 = vpop.f32.mrf.mxu2  ;;  %9353 = vst [vmem:[#allocation1 + $0x20] ss:$4 sm:$0xff] %v12270_v1  ;;  %9155 = vrot.lane.b32.xlu2 %v9132_v23, %s12223_s28 }
 0x61d   : > { %v7644_v27 = vpop.f32.mrf.mxu3  ;;  %v15403_v32 = vadd.f32 %v7631_v13, %v15311_v56  ;;  %v7607_v60 = vpop.f32.mrf.mxu0  ;;  %v8475_v56 = vsel %vm8469_vm9, %v8460_v62, %v8462_v4 }
 0x61e   : > { %v15406_v25 = vadd.f32 %v7644_v27, %v15314_v37  ;;  %v7620_v46 = vpop.f32.mrf.mxu1  ;;  %v8476_v37 = vsel %vm8469_vm9, %v8462_v4, %v8464_v29  ;;  %v8498_v3 = vsel %vm239_vm1, %v8475_v56, 0 }
 0x61f   : > { %v8466_v26 = vpop.permute.xlu0 %8465  ;;  %v8501_v7 = vsel %vm239_vm1, %v8476_v37, 0  ;;  %9163 = vrot.lane.b32.xlu0 %v9141_v24, %s12223_s28 }
 0x620   : > { %v8477_v48 = vsel %vm8469_vm9, %v8464_v29, %v8466_v26  ;;  %v8679_v5 = vpop.permute.xlu2 %8678 }
 0x621   : > { %v8468_v55 = vpop.permute.xlu1 %8467 }
 0x622   : > { %v8478_v59 = vsel %vm8469_vm9, %v8466_v26, %v8468_v55  ;;  %v8510_v20 = vsel %vm239_vm1, %v8468_v55, 0 }
 0x623   : > { %v8507_v21 = vsel %vm239_vm1, %v8478_v59, 0  ;;  %v9360_v58 = vld.sshfl [vmem:[#allocation1 + $0x20] sm:$0xff pattern:$0x73625140] }
 0x624   : > { %v7633_v6 = vpop.f32.mrf.mxu2  ;;  %v9364_v29 = vld.sshfl [vmem:[#allocation1 + $0x30] sm:$0xff pattern:$0x73625140]  ;;  %9161 = vrot.lane.b32.xlu2 %v15433_v18, %s12223_s28 }
 0x625   : > { %v7646_v11 = vpop.f32.mrf.mxu3  ;;  %v7657_v22 = vpop.f32.mrf.mxu0 }
 0x626   : > { %v7670_v8 = vpop.f32.mrf.mxu1  ;;  %v15415_v36 = vadd.f32 %v7657_v22, %v15331_v53  ;;  %v8504_v53 = vsel %vm239_vm1, %v8477_v48, 0 }
 0x627   : > { %v15418_v10 = vadd.f32 %v7670_v8, %v15334_v54  ;;  %v9137_v54 = vld.sshfl [vmem:[#allocation1 + $0x8] sm:$0xff pattern:$0x73625140]  ;;  %v8681_v42 = vpop.permute.xlu0 %8680 }
 0x628   : > { %11967 = vmatmul.msk.bf16.vlgmr.msrb.gmra.mxu0 %vm235_vm2, %v15351_v38  ;;  %11968 = vmatmul.msk.bf16.vlgmr.msrb.gmra.mxu1 %vm235_vm2, %v15351_v38  ;;  %9351 = vst [vmem:[#allocation1] ss:$4 sm:$0xff] %v12268_v0  ;;  %v8699_v9 = vsel %vm8698_vm10, %v8679_v5, %v8681_v42  ;;  %v8685_v62 = vpop.permute.xlu2 %8684 }
 0x629   : > { %11969 = vmatmul.msk.bf16.vlgmr.msrb.gmra.mxu2 %vm235_vm2, %v15351_v38  ;;  %8571 = vmatpush.bf16.msrb.mxu0 %v8495_v40  ;;  %v8683_v12 = vpop.permute.xlu1 %8682 }
 0x62a   : > { %11970 = vmatmul.msk.bf16.vlgmr.msrb.gmra.mxu3 %vm235_vm2, %v15351_v38  ;;  %8584 = vmatpush.bf16.msrb.mxu1 %v8498_v3  ;;  %v8700_v44 = vsel %vm8698_vm10, %v8681_v42, %v8683_v12  ;;  %v8701_v63 = vsel %vm8698_vm10, %v8683_v12, %v8685_v62 }
 0x62b   : > { %8597 = vmatpush.bf16.msrb.mxu2 %v8501_v7  ;;  %8610 = vmatpush.bf16.msrb.mxu3 %v8504_v53  ;;  %v8718_v15 = vsel %vm239_vm1, %v8701_v63, 0 }
 0x62c   : > { %v7683_v45 = vpop.f32.mrf.mxu2  ;;  %9159 = vrot.lane.b32.xlu1 %v9137_v54, %s12223_s28 }
 0x62d   : > { %v7696_v51 = vpop.f32.mrf.mxu3  ;;  %v15438_v17 = vadd.f32 %v7683_v45, %v15343_v39  ;;  %v7659_v49 = vpop.f32.mrf.mxu0  ;;  %v15449_v39 = vld [vmem:[%s16558_s1 + $0x90] sm:$0xf] }
 0x62e   : > { %v15441_v38 = vadd.f32 %v7696_v51, %v15346_v16  ;;  %v7672_v57 = vpop.f32.mrf.mxu1 }
 0x62f   : > { %v9354_v16 = vld.sshfl [vmem:[#allocation1 + $0x8] sm:$0xff pattern:$0x73625140]  ;;  %v9358_v31 = vld.sshfl [vmem:[#allocation1 + $0x18] sm:$0xff pattern:$0x73625140]  ;;  %v8687_v4 = vpop.permute.xlu0 %8686 }
 0x630   : > { %9381 = vrot.lane.b32.xlu0 %v9358_v31, %s12224_s4  ;;  %v8702_v56 = vsel %vm8698_vm10, %v8685_v62, %v8687_v4  ;;  %v8691_v48 = vpop.permute.xlu2 %8690  ;;  %v9356_v53 = vld.sshfl [vmem:[#allocation1 + $0x10] sm:$0xff pattern:$0x73625140] }
 0x631   : > { %v8721_v40 = vsel %vm239_vm1, %v8702_v56, 0  ;;  %9368 = vst [vmem:[#allocation1] ss:$4 sm:$0xff] %v12274_v2  ;;  %9379 = vrot.lane.b32.xlu2 %v9356_v53, %s12224_s4 }
 0x634   : > { %v7685_v47 = vpop.f32.mrf.mxu2  ;;  %9377 = vrot.lane.b32.xlu1 %v9354_v16, %s12224_s4 }
 0x635   : > { %v7698_v61 = vpop.f32.mrf.mxu3  ;;  %v7709_v28 = vpop.f32.mrf.mxu0 }
 0x636   : > { %v7722_v33 = vpop.f32.mrf.mxu1  ;;  %v15452_v50 = vadd.f32 %v7709_v28, %v15370_v41  ;;  %v8712_v41 = vsel %vm239_vm1, %v8699_v9, 0  ;;  %v15533_v9 = vld [vmem:[%s16558_s1 + $0x94] sm:$0xf] }
 0x637   : > { %v15455_v52 = vadd.f32 %v7722_v33, %v15373_v35  ;;  %v8715_v35 = vsel %vm239_vm1, %v8700_v44, 0  ;;  %v8693_v57 = vpop.permute.xlu0 %8692 }
 0x638   : > { %11972 = vmatmul.msk.bf16.vlgmr.msra.gmra.mxu0 %vm235_vm2, %v15449_v39  ;;  %11973 = vmatmul.msk.bf16.vlgmr.msra.gmra.mxu1 %vm235_vm2, %v15449_v39  ;;  %v9371_v49 = vld.sshfl [vmem:[#allocation1 + $0x8] sm:$0xff pattern:$0x73625140]  ;;  %v15516_v5 = vld.sshfl [vmem:[#allocation1 + $0x18] sm:$0xff pattern:$0x73625140]  ;;  %v8697_v61 = vpop.permute.xlu2 %8696  ;;  %v8705_v33 = vsel %vm8698_vm10, %v8691_v48, %v8693_v57 }
 0x639   : > { %11974 = vmatmul.msk.bf16.vlgmr.msra.gmra.mxu2 %vm235_vm2, %v15449_v39  ;;  %8623 = vmatpush.bf16.msra.mxu0 %v8507_v21  ;;  %v9369_v47 = vld.sshfl [vmem:[#allocation1] sm:$0xff pattern:$0x73625140]  ;;  %v9373_v59 = vld.sshfl [vmem:[#allocation1 + $0x10] sm:$0xff pattern:$0x73625140] }
 0x63a   : > { %11975 = vmatmul.msk.bf16.vlgmr.msra.gmra.mxu3 %vm235_vm2, %v15449_v39  ;;  %8636 = vmatpush.bf16.msra.mxu1 %v8510_v20  ;;  %9585 = vst [vmem:[#allocation1] ss:$4 sm:$0xff] %v12268_v0  ;;  %v8730_v44 = vsel %vm239_vm1, %v8705_v33, 0 }
 0x63b   : > { %8748 = vmatpush.bf16.msra.mxu2 %v8712_v41  ;;  %8761 = vmatpush.bf16.msra.mxu3 %v8715_v35  ;;  %v9362_v35 = vld.sshfl [vmem:[#allocation1 + $0x28] sm:$0xff pattern:$0x73625140] }
 0x63c   : > { %v7834_v30 = vpop.f32.mrf.mxu2  ;;  %9383 = vrot.lane.b32.xlu1 %v9360_v58, %s12224_s4  ;;  %9387 = vrot.lane.b32.xlu0 %v9364_v29, %s12224_s4 }
 0x63d   : > { %v7847_v34 = vpop.f32.mrf.mxu3  ;;  %v15476_v13 = vadd.f32 %v7834_v30, %v15382_v43  ;;  %v7711_v60 = vpop.f32.mrf.mxu0  ;;  %9385 = vrot.lane.b32.xlu2 %v9362_v35, %s12224_s4 }
 0x63e   : > { %v15479_v27 = vadd.f32 %v7847_v34, %v15385_v14  ;;  %v7724_v46 = vpop.f32.mrf.mxu1  ;;  %v8689_v26 = vpop.permute.xlu1 %8688 }
 0x63f   : > { %v8703_v22 = vsel %vm8698_vm10, %v8687_v4, %v8689_v26  ;;  %v8704_v3 = vsel %vm8698_vm10, %v8689_v26, %v8691_v48  ;;  %v8910_v23 = vpop.permute.xlu0 %8909 }
 0x640   : > { %v8724_v7 = vsel %vm239_vm1, %v8703_v22, 0  ;;  %v8914_v29 = vpop.permute.xlu2 %8913 }
 0x641   : > { %v9588_v31 = vld.sshfl [vmem:[#allocation1 + $0x8] sm:$0xff pattern:$0x73625140]  ;;  %v9590_v4 = vld.sshfl [vmem:[#allocation1 + $0x10] sm:$0xff pattern:$0x73625140] }
 0x644   : > { %v7836_v6 = vpop.f32.mrf.mxu2  ;;  %9393 = vrot.lane.b32.xlu0 %v9371_v49, %s12224_s4 }
 0x645   : > { %v7849_v11 = vpop.f32.mrf.mxu3  ;;  %v7860_v43 = vpop.f32.mrf.mxu0  ;;  %9391 = vrot.lane.b32.xlu2 %v9369_v47, %s12224_s4 }
 0x646   : > { %v7873_v14 = vpop.f32.mrf.mxu1  ;;  %v15489_v8 = vadd.f32 %v7860_v43, %v15403_v32  ;;  %v8727_v32 = vsel %vm239_vm1, %v8704_v3, 0  ;;  %v8695_v24 = vpop.permute.xlu1 %8694 }
 0x647   : > { %v15492_v37 = vadd.f32 %v7873_v14, %v15406_v25  ;;  %v9366_v25 = vld.sshfl [vmem:[#allocation1 + $0x38] sm:$0xff pattern:$0x73625140]  ;;  %v8707_v42 = vsel %vm8698_vm10, %v8695_v24, %v8697_v61  ;;  %v8916_v11 = vpop.permute.xlu0 %8915 }
 0x648   : > { %11976 = vmatmul.msk.bf16.vlgmr.msrb.gmra.mxu0 %vm235_vm2, %v15449_v39  ;;  %11977 = vmatmul.msk.bf16.vlgmr.msrb.gmra.mxu1 %vm235_vm2, %v15449_v39  ;;  %9587 = vst [vmem:[#allocation1 + $0x20] ss:$4 sm:$0xff] %v12270_v1  ;;  %v8934_v22 = vsel %vm8931_vm11, %v8914_v29, %v8916_v11 }
 0x649   : > { %11978 = vmatmul.msk.bf16.vlgmr.msrb.gmra.mxu2 %vm235_vm2, %v15449_v39  ;;  %8774 = vmatpush.bf16.msrb.mxu0 %v8718_v15  ;;  %v8952_v53 = vsel %vm239_vm1, %v8934_v22, 0 }
 0x64a   : > { %11979 = vmatmul.msk.bf16.vlgmr.msrb.gmra.mxu3 %vm235_vm2, %v15449_v39  ;;  %8787 = vmatpush.bf16.msrb.mxu1 %v8721_v40 }
 0x64b   : > { %8800 = vmatpush.bf16.msrb.mxu2 %v8724_v7  ;;  %8813 = vmatpush.bf16.msrb.mxu3 %v8727_v32 }
 0x64c   : > { %v7886_v54 = vpop.f32.mrf.mxu2  ;;  %9389 = vrot.lane.b32.xlu1 %v9366_v25, %s12224_s4  ;;  %9611 = vrot.lane.b32.xlu0 %v9588_v31, %s12225_s7  ;;  %v8920_v25 = vpop.permute.xlu2 %8919 }
 0x64d   : > { %v7899_v19 = vpop.f32.mrf.mxu3  ;;  %v15511_v18 = vadd.f32 %v7886_v54, %v15415_v36  ;;  %v7862_v45 = vpop.f32.mrf.mxu0  ;;  %9397 = vrot.lane.b32.xlu2 %v15516_v5, %s12224_s4 }
 0x64e   : > { %v15514_v55 = vadd.f32 %v7899_v19, %v15418_v10  ;;  %v7875_v51 = vpop.f32.mrf.mxu1  ;;  %v8706_v10 = vsel %vm8698_vm10, %v8693_v57, %v8695_v24 }
 0x64f   : > { %v8733_v41 = vsel %vm239_vm1, %v8706_v10, 0  ;;  %v9594_v6 = vld.sshfl [vmem:[#allocation1 + $0x20] sm:$0xff pattern:$0x73625140] }
 0x650   : > { %v9600_v24 = vld.sshfl [vmem:[#allocation1 + $0x38] sm:$0xff pattern:$0x73625140] }
 0x654   : > { %v7888_v28 = vpop.f32.mrf.mxu2  ;;  %9395 = vrot.lane.b32.xlu1 %v9373_v59, %s12224_s4  ;;  %9617 = vrot.lane.b32.xlu0 %v9594_v6, %s12225_s7 }
 0x655   : > { %v7901_v36 = vpop.f32.mrf.mxu3  ;;  %v7912_v16 = vpop.f32.mrf.mxu0 }
 0x656   : > { %v7925_v12 = vpop.f32.mrf.mxu1  ;;  %v15525_v21 = vadd.f32 %v7912_v16, %v15438_v17  ;;  %v8739_v17 = vsel %vm239_vm1, %v8697_v61, 0  ;;  %v8926_v28 = vpop.permute.xlu2 %8925 }
 0x657   : > { %v15528_v20 = vadd.f32 %v7925_v12, %v15441_v38  ;;  %v8736_v38 = vsel %vm239_vm1, %v8707_v42, 0 }
 0x658   : > { %11980 = vmatmul.msk.bf16.vlgmr.msra.gmra.mxu0 %vm235_vm2, %v15449_v39  ;;  %11981 = vmatmul.msk.bf16.vlgmr.msra.gmra.mxu1 %vm235_vm2, %v15449_v39  ;;  %v15548_v39 = vld.sshfl [vmem:[#allocation1 + $0x18] sm:$0xff pattern:$0x73625140] }
 0x659   : > { %11983 = vmatmul.msk.bf16.vlgmr.msra.gmra.mxu2 %vm235_vm2, %v15533_v9  ;;  %8826 = vmatpush.bf16.msra.mxu0 %v8730_v44  ;;  %9602 = vst [vmem:[#allocation1] ss:$4 sm:$0xff] %v12274_v2 }
 0x65a   : > { %11984 = vmatmul.msk.bf16.vlgmr.msra.gmra.mxu3 %vm235_vm2, %v15533_v9  ;;  %8839 = vmatpush.bf16.msra.mxu1 %v8733_v41 }
 0x65b   : > { %8852 = vmatpush.bf16.msra.mxu2 %v8736_v38  ;;  %8865 = vmatpush.bf16.msra.mxu3 %v8739_v17 }
 0x65c   : > { %v7938_v62 = vpop.f32.mrf.mxu2  ;;  %9613 = vrot.lane.b32.xlu1 %v9590_v4, %s12225_s7  ;;  %9623 = vrot.lane.b32.xlu0 %v9600_v24, %s12225_s7 }
 0x65d   : > { %v7951_v30 = vpop.f32.mrf.mxu3  ;;  %v15553_v34 = vadd.f32 %v7938_v62, %v15452_v50  ;;  %v7914_v46 = vpop.f32.mrf.mxu0  ;;  %9615 = vrot.lane.b32.xlu2 %v15548_v39, %s12225_s7 }
 0x65e   : > { %v15556_v60 = vadd.f32 %v7951_v30, %v15455_v52  ;;  %v7927_v58 = vpop.f32.mrf.mxu1  ;;  %v8912_v26 = vpop.permute.xlu1 %8911 }
 0x65f   : > { %v8932_v50 = vsel %vm8931_vm11, %v8910_v23, %v8912_v26  ;;  %v8933_v43 = vsel %vm8931_vm11, %v8912_v26, %v8914_v29  ;;  %v9144_v26 = vpop.permute.xlu2 %9143 }
 0x660   : > { %v8946_v3 = vsel %vm239_vm1, %v8932_v50, 0  ;;  %v8949_v7 = vsel %vm239_vm1, %v8933_v43, 0  ;;  %v9603_v61 = vld.sshfl [vmem:[#allocation1] sm:$0xff pattern:$0x73625140] }
 0x661   : > { %v9605_v39 = vld.sshfl [vmem:[#allocation1 + $0x8] sm:$0xff pattern:$0x73625140]  ;;  %v9609_v4 = vld.sshfl [vmem:[#allocation1 + $0x18] sm:$0xff pattern:$0x73625140] }
 0x662   : > { %v15635_v50 = vld [vmem:[%s16558_s1 + $0x98] sm:$0xf] }
 0x664   : > { %v7940_v63 = vpop.f32.mrf.mxu2 }
 0x665   : > { %v7953_v56 = vpop.f32.mrf.mxu3  ;;  %v8063_v52 = vpop.f32.mrf.mxu0 }
 0x666   : > { %v8076_v14 = vpop.f32.mrf.mxu1  ;;  %v15566_v48 = vadd.f32 %v8063_v52, %v15476_v13  ;;  %v8918_v40 = vpop.permute.xlu1 %8917 }
 0x667   : > { %v15569_v15 = vadd.f32 %v8076_v14, %v15479_v27  ;;  %v8935_v32 = vsel %vm8931_vm11, %v8916_v11, %v8918_v40  ;;  %v9596_v27 = vld.sshfl [vmem:[#allocation1 + $0x28] sm:$0xff pattern:$0x73625140]  ;;  %v8936_v10 = vsel %vm8931_vm11, %v8918_v40, %v8920_v25 }
 0x668   : > { %11985 = vmatmul.msk.bf16.vlgmr.msrb.gmra.mxu0 %vm235_vm2, %v15533_v9  ;;  %11986 = vmatmul.msk.bf16.vlgmr.msrb.gmra.mxu1 %vm235_vm2, %v15533_v9  ;;  %v8955_v13 = vsel %vm239_vm1, %v8935_v32, 0  ;;  %v8958_v41 = vsel %vm239_vm1, %v8936_v10, 0 }
 0x669   : > { %11987 = vmatmul.msk.bf16.vlgmr.msrb.gmra.mxu2 %vm235_vm2, %v15533_v9  ;;  %8982 = vmatpush.bf16.msrb.mxu0 %v8946_v3  ;;  %v8922_v47 = vpop.permute.xlu0 %8921 }
 0x66a   : > { %11988 = vmatmul.msk.bf16.vlgmr.msrb.gmra.mxu3 %vm235_vm2, %v15533_v9  ;;  %8995 = vmatpush.bf16.msrb.mxu1 %v8949_v7  ;;  %v8937_v5 = vsel %vm8931_vm11, %v8920_v25, %v8922_v47  ;;  %v9150_v25 = vpop.permute.xlu2 %9149 }
 0x66b   : > { %9008 = vmatpush.bf16.msrb.mxu2 %v8952_v53  ;;  %9021 = vmatpush.bf16.msrb.mxu3 %v8955_v13  ;;  %v8961_v17 = vsel %vm239_vm1, %v8937_v5, 0 }
 0x66c   : > { %v8089_v54 = vpop.f32.mrf.mxu2  ;;  %9619 = vrot.lane.b32.xlu1 %v9596_v27, %s12225_s7 }
 0x66d   : > { %v8102_v19 = vpop.f32.mrf.mxu3  ;;  %v15588_v45 = vadd.f32 %v8089_v54, %v15489_v8  ;;  %v8065_v49 = vpop.f32.mrf.mxu0 }
 0x66e   : > { %v15591_v51 = vadd.f32 %v8102_v19, %v15492_v37  ;;  %v8078_v57 = vpop.f32.mrf.mxu1  ;;  %v8924_v59 = vpop.permute.xlu1 %8923 }
 0x66f   : > { %v8938_v16 = vsel %vm8931_vm11, %v8922_v47, %v8924_v59  ;;  %v8939_v12 = vsel %vm8931_vm11, %v8924_v59, %v8926_v28 }
 0x670   : > { %v8964_v38 = vsel %vm239_vm1, %v8938_v16, 0  ;;  %v8967_v35 = vsel %vm239_vm1, %v8939_v12, 0 }
 0x674   : > { %v8091_v36 = vpop.f32.mrf.mxu2  ;;  %9625 = vrot.lane.b32.xlu1 %v9603_v61, %s12225_s7 }
 0x675   : > { %v8104_v33 = vpop.f32.mrf.mxu3  ;;  %v8115_v8 = vpop.f32.mrf.mxu0 }
 0x676   : > { %v8128_v37 = vpop.f32.mrf.mxu1  ;;  %v15602_v42 = vadd.f32 %v8115_v8, %v15511_v18  ;;  %v9607_v18 = vld.sshfl [vmem:[#allocation1 + $0x10] sm:$0xff pattern:$0x73625140]  ;;  %v8930_v29 = vpop.permute.xlu1 %8929 }
 0x677   : > { %v15605_v44 = vadd.f32 %v8128_v37, %v15514_v55  ;;  %v8928_v55 = vpop.permute.xlu0 %8927  ;;  %9629 = vrot.lane.b32.xlu0 %v9607_v18, %s12225_s7  ;;  %9819 = vst [vmem:[#allocation1] ss:$4 sm:$0xff] %v12268_v0  ;;  %v9156_v12 = vpop.permute.xlu2 %9155 }
 0x678   : > { %11989 = vmatmul.msk.bf16.vlgmr.msra.gmra.mxu0 %vm235_vm2, %v15533_v9  ;;  %11990 = vmatmul.msk.bf16.vlgmr.msra.gmra.mxu1 %vm235_vm2, %v15533_v9  ;;  %v8940_v11 = vsel %vm8931_vm11, %v8926_v28, %v8928_v55 }
 0x679   : > { %11991 = vmatmul.msk.bf16.vlgmr.msra.gmra.mxu2 %vm235_vm2, %v15533_v9  ;;  %9034 = vmatpush.bf16.msra.mxu0 %v8958_v41  ;;  %v8970_v40 = vsel %vm239_vm1, %v8940_v11, 0 }
 0x67a   : > { %11992 = vmatmul.msk.bf16.vlgmr.msra.gmra.mxu3 %vm235_vm2, %v15533_v9  ;;  %9047 = vmatpush.bf16.msra.mxu1 %v8961_v17  ;;  %v9598_v9 = vld.sshfl [vmem:[#allocation1 + $0x30] sm:$0xff pattern:$0x73625140] }
 0x67b   : > { %9060 = vmatpush.bf16.msra.mxu2 %v8964_v38  ;;  %9073 = vmatpush.bf16.msra.mxu3 %v8967_v35  ;;  %9821 = vst [vmem:[#allocation1 + $0x20] ss:$4 sm:$0xff] %v12270_v1 }
 0x67c   : > { %v8141_v23 = vpop.f32.mrf.mxu2  ;;  %9621 = vrot.lane.b32.xlu2 %v9598_v9, %s12225_s7  ;;  %9631 = vrot.lane.b32.xlu1 %v9609_v4, %s12225_s7 }
 0x67d   : > { %v8154_v31 = vpop.f32.mrf.mxu3  ;;  %v15621_v62 = vadd.f32 %v8141_v23, %v15525_v21  ;;  %v8117_v46 = vpop.f32.mrf.mxu0 }
 0x67e   : > { %v15624_v30 = vadd.f32 %v8154_v31, %v15528_v20  ;;  %v8130_v58 = vpop.f32.mrf.mxu1  ;;  %v8941_v20 = vsel %vm8931_vm11, %v8928_v55, %v8930_v29  ;;  %v9148_v14 = vpop.permute.xlu1 %9147  ;;  %v9826_v53 = vld.sshfl [vmem:[#allocation1 + $0x18] sm:$0xff pattern:$0x73625140]  ;;  %v9824_v13 = vld.sshfl [vmem:[#allocation1 + $0x10] sm:$0xff pattern:$0x73625140] }
 0x67f   : > { %v9146_v22 = vpop.permute.xlu0 %9145  ;;  %v8973_v3 = vsel %vm239_vm1, %v8941_v20, 0  ;;  %9847 = vrot.lane.b32.xlu0 %v9824_v13, %s12226_s10  ;;  %v9168_v10 = vsel %vm9165_vm12, %v9148_v14, %v9150_v25  ;;  %v9162_v4 = vpop.permute.xlu2 %9161 }
 0x680   : > { %v9166_v7 = vsel %vm9165_vm12, %v9144_v26, %v9146_v22  ;;  %v9167_v32 = vsel %vm9165_vm12, %v9146_v22, %v9148_v14  ;;  %v9186_v41 = vsel %vm239_vm1, %v9168_v10, 0 }
 0x682   : > { %v9830_v61 = vld.sshfl [vmem:[#allocation1 + $0x28] sm:$0xff pattern:$0x73625140]  ;;  %v9832_v59 = vld.sshfl [vmem:[#allocation1 + $0x30] sm:$0xff pattern:$0x73625140] }
 0x683   : > { %v9828_v26 = vld.sshfl [vmem:[#allocation1 + $0x20] sm:$0xff pattern:$0x73625140] }
 0x684   : > { %v8143_v6 = vpop.f32.mrf.mxu2  ;;  %9627 = vrot.lane.b32.xlu2 %v9605_v39, %s12225_s7  ;;  %9849 = vrot.lane.b32.xlu1 %v9826_v53, %s12226_s10 }
 0x685   : > { %v8156_v21 = vpop.f32.mrf.mxu3  ;;  %v8167_v63 = vpop.f32.mrf.mxu0 }
 0x686   : > { %v8180_v56 = vpop.f32.mrf.mxu1  ;;  %v15638_v43 = vadd.f32 %v8167_v63, %v15553_v34  ;;  %v9180_v34 = vsel %vm239_vm1, %v9166_v7, 0  ;;  %v9154_v28 = vpop.permute.xlu1 %9153  ;;  %v15714_v7 = vld [vmem:[%s16558_s1 + $0x9c] sm:$0xf] }
 0x687   : > { %v15641_v52 = vadd.f32 %v8180_v56, %v15556_v60  ;;  %v9183_v60 = vsel %vm239_vm1, %v9167_v32, 0  ;;  %v9152_v47 = vpop.permute.xlu0 %9151  ;;  %9853 = vrot.lane.b32.xlu0 %v9830_v61, %s12226_s10  ;;  %v9171_v38 = vsel %vm9165_vm12, %v9154_v28, %v9156_v12  ;;  %v9834_v61 = vld.sshfl [vmem:[#allocation1 + $0x38] sm:$0xff pattern:$0x73625140] }
 0x688   : > { %11994 = vmatmul.msk.bf16.vlgmr.msrb.gmra.mxu0 %vm235_vm2, %v15635_v50  ;;  %11995 = vmatmul.msk.bf16.vlgmr.msrb.gmra.mxu1 %vm235_vm2, %v15635_v50  ;;  %v9169_v5 = vsel %vm9165_vm12, %v9150_v25, %v9152_v47  ;;  %10055 = vst [vmem:[#allocation1 + $0x20] ss:$4 sm:$0xff] %v12270_v1 }
 0x689   : > { %11996 = vmatmul.msk.bf16.vlgmr.msrb.gmra.mxu2 %vm235_vm2, %v15635_v50  ;;  %9086 = vmatpush.bf16.msrb.mxu0 %v8970_v40  ;;  %v9189_v17 = vsel %vm239_vm1, %v9169_v5, 0 }
 0x68a   : > { %11997 = vmatmul.msk.bf16.vlgmr.msrb.gmra.mxu3 %vm235_vm2, %v15635_v50  ;;  %9099 = vmatpush.bf16.msrb.mxu1 %v8973_v3 }
 0x68b   : > { %9216 = vmatpush.bf16.msrb.mxu2 %v9180_v34  ;;  %9229 = vmatpush.bf16.msrb.mxu3 %v9183_v60  ;;  %v9380_v25 = vpop.permute.xlu2 %9379 }
 0x68c   : > { %v8292_v27 = vpop.f32.mrf.mxu2  ;;  %9855 = vrot.lane.b32.xlu1 %v9832_v59, %s12226_s10 }
 0x68d   : > { %v8305_v54 = vpop.f32.mrf.mxu3  ;;  %v15661_v19 = vadd.f32 %v8292_v27, %v15566_v48  ;;  %v8169_v57 = vpop.f32.mrf.mxu0 }
 0x68e   : > { %v15664_v49 = vadd.f32 %v8305_v54, %v15569_v15  ;;  %v8182_v24 = vpop.f32.mrf.mxu1  ;;  %v9170_v15 = vsel %vm9165_vm12, %v9152_v47, %v9154_v28 }
 0x68f   : > { %v9192_v35 = vsel %vm239_vm1, %v9170_v15, 0  ;;  %v9158_v18 = vpop.permute.xlu0 %9157 }
 0x694   : > { %v8294_v36 = vpop.f32.mrf.mxu2 }
 0x695   : > { %v8307_v33 = vpop.f32.mrf.mxu3  ;;  %v8318_v48 = vpop.f32.mrf.mxu0 }
 0x696   : > { %v8331_v8 = vpop.f32.mrf.mxu1  ;;  %v15672_v37 = vadd.f32 %v8318_v48, %v15588_v45  ;;  %v9195_v45 = vsel %vm239_vm1, %v9171_v38, 0 }
 0x697   : > { %v15675_v16 = vadd.f32 %v8331_v8, %v15591_v51  ;;  %v9822_v51 = vld.sshfl [vmem:[#allocation1 + $0x8] sm:$0xff pattern:$0x73625140]  ;;  %v9164_v21 = vpop.permute.xlu0 %9163 }
 0x698   : > { %11998 = vmatmul.msk.bf16.vlgmr.msra.gmra.mxu0 %vm235_vm2, %v15635_v50  ;;  %11999 = vmatmul.msk.bf16.vlgmr.msra.gmra.mxu1 %vm235_vm2, %v15635_v50  ;;  %9836 = vst [vmem:[#allocation1] ss:$4 sm:$0xff] %v12274_v2  ;;  %v9175_v22 = vsel %vm9165_vm12, %v9162_v4, %v9164_v21  ;;  %v10068_v21 = vld.sshfl [vmem:[#allocation1 + $0x38] sm:$0xff pattern:$0x73625140] }
 0x699   : > { %12000 = vmatmul.msk.bf16.vlgmr.msra.gmra.mxu2 %vm235_vm2, %v15635_v50  ;;  %9242 = vmatpush.bf16.msra.mxu0 %v9186_v41  ;;  %v9386_v41 = vpop.permute.xlu2 %9385 }
 0x69a   : > { %12001 = vmatmul.msk.bf16.vlgmr.msra.gmra.mxu3 %vm235_vm2, %v15635_v50  ;;  %9255 = vmatpush.bf16.msra.mxu1 %v9189_v17 }
 0x69b   : > { %9268 = vmatpush.bf16.msra.mxu2 %v9192_v35  ;;  %9281 = vmatpush.bf16.msra.mxu3 %v9195_v45 }
 0x69c   : > { %v8344_v55 = vpop.f32.mrf.mxu2  ;;  %9845 = vrot.lane.b32.xlu2 %v9822_v51, %s12226_s10 }
 0x69d   : > { %v8357_v23 = vpop.f32.mrf.mxu3  ;;  %v15693_v31 = vadd.f32 %v8344_v55, %v15602_v42  ;;  %v8320_v46 = vpop.f32.mrf.mxu0  ;;  %v9172_v42 = vsel %vm9165_vm12, %v9156_v12, %v9158_v18  ;;  %v10066_v55 = vld.sshfl [vmem:[#allocation1 + $0x30] sm:$0xff pattern:$0x73625140] }
 0x69e   : > { %v15696_v39 = vadd.f32 %v8357_v23, %v15605_v44  ;;  %v8333_v58 = vpop.f32.mrf.mxu1  ;;  %v9160_v29 = vpop.permute.xlu1 %9159  ;;  %v9198_v34 = vsel %vm239_vm1, %v9172_v42, 0 }
 0x69f   : > { %v9837_v9 = vld.sshfl [vmem:[#allocation1] sm:$0xff pattern:$0x73625140]  ;;  %v9839_v6 = vld.sshfl [vmem:[#allocation1 + $0x8] sm:$0xff pattern:$0x73625140]  ;;  %v9173_v63 = vsel %vm9165_vm12, %v9158_v18, %v9160_v29  ;;  %v9174_v14 = vsel %vm9165_vm12, %v9160_v29, %v9162_v4 }
 0x6a0   : > { %9859 = vrot.lane.b32.xlu0 %v9837_v9, %s12226_s10  ;;  %9861 = vrot.lane.b32.xlu1 %v9839_v6, %s12226_s10  ;;  %v9841_v32 = vld.sshfl [vmem:[#allocation1 + $0x10] sm:$0xff pattern:$0x73625140]  ;;  %v9201_v60 = vsel %vm239_vm1, %v9173_v63, 0 }
 0x6a1   : > { %v9843_v53 = vld.sshfl [vmem:[#allocation1 + $0x18] sm:$0xff pattern:$0x73625140]  ;;  %v9392_v6 = vpop.permute.xlu2 %9391 }
 0x6a2   : > { %10053 = vst [vmem:[#allocation1] ss:$4 sm:$0xff] %v12268_v0  ;;  %v9382_v59 = vpop.permute.xlu0 %9381 }
 0x6a4   : > { %v8346_v11 = vpop.f32.mrf.mxu2  ;;  %9851 = vrot.lane.b32.xlu2 %v9828_v26, %s12226_s10 }
 0x6a5   : > { %v8359_v20 = vpop.f32.mrf.mxu3  ;;  %v8370_v44 = vpop.f32.mrf.mxu0 }
 0x6a6   : > { %v8383_v56 = vpop.f32.mrf.mxu1  ;;  %v15706_v40 = vadd.f32 %v8370_v44, %v15621_v62  ;;  %v9204_v62 = vsel %vm239_vm1, %v9174_v14, 0  ;;  %v9378_v13 = vpop.permute.xlu1 %9377 }
 0x6a7   : > { %v15709_v3 = vadd.f32 %v8383_v56, %v15624_v30  ;;  %v9207_v30 = vsel %vm239_vm1, %v9175_v22, 0  ;;  %v9400_v10 = vsel %vm9399_vm13, %v9378_v13, %v9380_v25 }
 0x6a8   : > { %12002 = vmatmul.msk.bf16.vlgmr.msrb.gmra.mxu0 %vm235_vm2, %v15635_v50  ;;  %12003 = vmatmul.msk.bf16.vlgmr.msrb.gmra.mxu1 %vm235_vm2, %v15635_v50  ;;  %v9414_v17 = vsel %vm239_vm1, %v9400_v10, 0 }
 0x6a9   : > { %12005 = vmatmul.msk.bf16.vlgmr.msrb.gmra.mxu2 %vm235_vm2, %v15714_v7  ;;  %9294 = vmatpush.bf16.msrb.mxu0 %v9198_v34  ;;  %v10056_v28 = vld.sshfl [vmem:[#allocation1 + $0x8] sm:$0xff pattern:$0x73625140]  ;;  %v10060_v36 = vld.sshfl [vmem:[#allocation1 + $0x18] sm:$0xff pattern:$0x73625140] }
 0x6aa   : > { %12006 = vmatmul.msk.bf16.vlgmr.msrb.gmra.mxu3 %vm235_vm2, %v15714_v7  ;;  %9307 = vmatpush.bf16.msrb.mxu1 %v9201_v60 }
 0x6ab   : > { %9320 = vmatpush.bf16.msrb.mxu2 %v9204_v62  ;;  %9333 = vmatpush.bf16.msrb.mxu3 %v9207_v30 }
 0x6ac   : > { %v8396_v50 = vpop.f32.mrf.mxu2  ;;  %9865 = vrot.lane.b32.xlu0 %v9843_v53, %s12226_s10  ;;  %9857 = vrot.lane.b32.xlu2 %v9834_v61, %s12226_s10 }
 0x6ad   : > { %v8409_v27 = vpop.f32.mrf.mxu3  ;;  %v15731_v54 = vadd.f32 %v8396_v50, %v15638_v43  ;;  %v8372_v24 = vpop.f32.mrf.mxu0  ;;  %10079 = vrot.lane.b32.xlu1 %v10056_v28, %s12227_s15 }
 0x6ae   : > { %v15734_v57 = vadd.f32 %v8409_v27, %v15641_v52  ;;  %v8385_v47 = vpop.f32.mrf.mxu1  ;;  %v9401_v52 = vsel %vm9399_vm13, %v9380_v25, %v9382_v59  ;;  %v9384_v12 = vpop.permute.xlu1 %9383 }
 0x6af   : > { %v9417_v38 = vsel %vm239_vm1, %v9401_v52, 0  ;;  %v9402_v35 = vsel %vm9399_vm13, %v9382_v59, %v9384_v12  ;;  %v9403_v45 = vsel %vm9399_vm13, %v9384_v12, %v9386_v41  ;;  %v9388_v51 = vpop.permute.xlu0 %9387 }
 0x6b0   : > { %v9423_v18 = vsel %vm239_vm1, %v9403_v45, 0  ;;  %v9404_v63 = vsel %vm9399_vm13, %v9386_v41, %v9388_v51  ;;  %v15814_v41 = vld [vmem:[%s16558_s1 + $0xa0] sm:$0xf] }
 0x6b1   : > { %v9426_v34 = vsel %vm239_vm1, %v9404_v63, 0 }
 0x6b4   : > { %v8398_v33 = vpop.f32.mrf.mxu2  ;;  %10083 = vrot.lane.b32.xlu0 %v10060_v36, %s12227_s15  ;;  %9863 = vrot.lane.b32.xlu2 %v9841_v32, %s12226_s10 }
 0x6b5   : > { %v8411_v43 = vpop.f32.mrf.mxu3  ;;  %v8521_v5 = vpop.f32.mrf.mxu0 }
 0x6b6   : > { %v8534_v48 = vpop.f32.mrf.mxu1  ;;  %v15743_v8 = vadd.f32 %v8521_v5, %v15661_v19  ;;  %v9420_v19 = vsel %vm239_vm1, %v9402_v35, 0 }
 0x6b7   : > { %v15746_v15 = vadd.f32 %v8534_v48, %v15664_v49  ;;  %v10062_v49 = vld.sshfl [vmem:[#allocation1 + $0x20] sm:$0xff pattern:$0x73625140]  ;;  %v9394_v11 = vpop.permute.xlu0 %9393 }
 0x6b8   : > { %12007 = vmatmul.msk.bf16.vlgmr.msra.gmra.mxu0 %vm235_vm2, %v15714_v7  ;;  %12008 = vmatmul.msk.bf16.vlgmr.msra.gmra.mxu1 %vm235_vm2, %v15714_v7 }
 0x6b9   : > { %12009 = vmatmul.msk.bf16.vlgmr.msra.gmra.mxu2 %vm235_vm2, %v15714_v7  ;;  %9450 = vmatpush.bf16.msra.mxu0 %v9414_v17 }
 0x6ba   : > { %12010 = vmatmul.msk.bf16.vlgmr.msra.gmra.mxu3 %vm235_vm2, %v15714_v7  ;;  %9463 = vmatpush.bf16.msra.mxu1 %v9417_v38 }
 0x6bb   : > { %9476 = vmatpush.bf16.msra.mxu2 %v9420_v19  ;;  %10085 = vrot.lane.b32.xlu1 %v10062_v49, %s12227_s15 }
 0x6bc   : > { %v8547_v23 = vpop.f32.mrf.mxu2  ;;  %9489 = vmatpush.bf16.msra.mxu3 %v9423_v18  ;;  %10089 = vrot.lane.b32.xlu0 %v10066_v55, %s12227_s15 }
 0x6bd   : > { %v8560_v46 = vpop.f32.mrf.mxu3  ;;  %v15766_v58 = vadd.f32 %v8547_v23, %v15672_v37  ;;  %v8523_v4 = vpop.f32.mrf.mxu0 }
 0x6be   : > { %v15769_v9 = vadd.f32 %v8560_v46, %v15675_v16  ;;  %v8536_v29 = vpop.f32.mrf.mxu1  ;;  %v9390_v26 = vpop.permute.xlu1 %9389  ;;  %v9407_v16 = vsel %vm9399_vm13, %v9392_v6, %v9394_v11 }
 0x6bf   : > { %v9405_v44 = vsel %vm9399_vm13, %v9388_v51, %v9390_v26  ;;  %v9406_v14 = vsel %vm9399_vm13, %v9390_v26, %v9392_v6  ;;  %v9435_v30 = vsel %vm239_vm1, %v9407_v16, 0  ;;  %v9612_v61 = vpop.permute.xlu0 %9611 }
 0x6c0   : > { %v9429_v60 = vsel %vm239_vm1, %v9405_v44, 0  ;;  %v9432_v62 = vsel %vm239_vm1, %v9406_v14, 0 }
 0x6c3   : > { %10091 = vrot.lane.b32.xlu1 %v10068_v21, %s12227_s15 }
 0x6c4   : > { %v8549_v20 = vpop.f32.mrf.mxu2 }
 0x6c5   : > { %v8562_v42 = vpop.f32.mrf.mxu3  ;;  %v8573_v56 = vpop.f32.mrf.mxu0 }
 0x6c6   : > { %v8586_v37 = vpop.f32.mrf.mxu1  ;;  %v15777_v22 = vadd.f32 %v8573_v56, %v15693_v31  ;;  %v9396_v53 = vpop.permute.xlu1 %9395  ;;  %v10058_v31 = vld.sshfl [vmem:[#allocation1 + $0x10] sm:$0xff pattern:$0x73625140] }
 0x6c7   : > { %v15780_v32 = vadd.f32 %v8586_v37, %v15696_v39  ;;  %10070 = vst [vmem:[#allocation1] ss:$4 sm:$0xff] %v12274_v2  ;;  %v9398_v39 = vpop.permute.xlu2 %9397  ;;  %10081 = vrot.lane.b32.xlu2 %v10058_v31, %s12227_s15  ;;  %v9408_v52 = vsel %vm9399_vm13, %v9394_v11, %v9396_v53  ;;  %v9618_v55 = vpop.permute.xlu0 %9617 }
 0x6c8   : > { %12011 = vmatmul.msk.bf16.vlgmr.msrb.gmra.mxu0 %vm235_vm2, %v15714_v7  ;;  %12012 = vmatmul.msk.bf16.vlgmr.msrb.gmra.mxu1 %vm235_vm2, %v15714_v7  ;;  %v9409_v5 = vsel %vm9399_vm13, %v9396_v53, %v9398_v39  ;;  %v9438_v19 = vsel %vm239_vm1, %v9408_v52, 0 }
 0x6c9   : > { %12013 = vmatmul.msk.bf16.vlgmr.msrb.gmra.mxu2 %vm235_vm2, %v15714_v7  ;;  %9502 = vmatpush.bf16.msrb.mxu0 %v9426_v34  ;;  %v9441_v49 = vsel %vm239_vm1, %v9409_v5, 0 }
 0x6ca   : > { %12014 = vmatmul.msk.bf16.vlgmr.msrb.gmra.mxu3 %vm235_vm2, %v15714_v7  ;;  %9515 = vmatpush.bf16.msrb.mxu1 %v9429_v60  ;;  %v10064_v7 = vld.sshfl [vmem:[#allocation1 + $0x28] sm:$0xff pattern:$0x73625140] }
 0x6cb   : > { %9528 = vmatpush.bf16.msrb.mxu2 %v9432_v62  ;;  %9541 = vmatpush.bf16.msrb.mxu3 %v9435_v30  ;;  %10289 = vst [vmem:[#allocation1 + $0x20] ss:$4 sm:$0xff] %v12270_v1 }
 0x6cc   : > { %v8599_v13 = vpop.f32.mrf.mxu2 }
 0x6cd   : > { %v8612_v25 = vpop.f32.mrf.mxu3  ;;  %v15797_v50 = vadd.f32 %v8599_v13, %v15706_v40  ;;  %v8575_v24 = vpop.f32.mrf.mxu0 }
 0x6ce   : > { %v15800_v27 = vadd.f32 %v8612_v25, %v15709_v3  ;;  %v8588_v47 = vpop.f32.mrf.mxu1  ;;  %v10075_v59 = vld.sshfl [vmem:[#allocation1 + $0x10] sm:$0xff pattern:$0x73625140]  ;;  %v15803_v28 = vld.sshfl [vmem:[#allocation1 + $0x18] sm:$0xff pattern:$0x73625140]  ;;  %v9614_v3 = vpop.permute.xlu1 %9613 }
 0x6cf   : > { %10097 = vrot.lane.b32.xlu1 %v10075_v59, %s12227_s15  ;;  %v10071_v36 = vld.sshfl [vmem:[#allocation1] sm:$0xff pattern:$0x73625140]  ;;  %v10073_v33 = vld.sshfl [vmem:[#allocation1 + $0x8] sm:$0xff pattern:$0x73625140]  ;;  %v9616_v40 = vpop.permute.xlu2 %9615  ;;  %10087 = vrot.lane.b32.xlu2 %v10064_v7, %s12227_s15  ;;  %v9634_v17 = vsel %vm9633_vm14, %v9612_v61, %v9614_v3  ;;  %v9624_v44 = vpop.permute.xlu0 %9623 }
 0x6d0   : > { %10095 = vrot.lane.b32.xlu0 %v10073_v33, %s12227_s15  ;;  %10287 = vst [vmem:[#allocation1] ss:$4 sm:$0xff] %v12268_v0  ;;  %v9635_v38 = vsel %vm9633_vm14, %v9614_v3, %v9616_v40  ;;  %v9648_v18 = vsel %vm239_vm1, %v9634_v17, 0  ;;  %v9636_v14 = vsel %vm9633_vm14, %v9616_v40, %v9618_v55 }
 0x6d1   : > { %v9651_v51 = vsel %vm239_vm1, %v9635_v38, 0  ;;  %v9654_v53 = vsel %vm239_vm1, %v9636_v14, 0 }
 0x6d2   : > { %v10296_v20 = vld.sshfl [vmem:[#allocation1 + $0x20] sm:$0xff pattern:$0x73625140]  ;;  %v10298_v42 = vld.sshfl [vmem:[#allocation1 + $0x28] sm:$0xff pattern:$0x73625140] }
 0x6d4   : > { %v8601_v43 = vpop.f32.mrf.mxu2 }
 0x6d5   : > { %v8614_v10 = vpop.f32.mrf.mxu3  ;;  %v8625_v48 = vpop.f32.mrf.mxu0 }
 0x6d6   : > { %v8638_v12 = vpop.f32.mrf.mxu1  ;;  %v15819_v35 = vadd.f32 %v8625_v48, %v15731_v54 }
 0x6d7   : > { %v15822_v45 = vadd.f32 %v8638_v12, %v15734_v57  ;;  %v10290_v54 = vld.sshfl [vmem:[#allocation1 + $0x8] sm:$0xff pattern:$0x73625140]  ;;  %v10294_v57 = vld.sshfl [vmem:[#allocation1 + $0x18] sm:$0xff pattern:$0x73625140]  ;;  %10093 = vrot.lane.b32.xlu2 %v10071_v36, %s12227_s15  ;;  %v9622_v63 = vpop.permute.xlu2 %9621 }
 0x6d8   : > { %12016 = vmatmul.msk.bf16.vlgmr.msra.gmra.mxu0 %vm235_vm2, %v15814_v41  ;;  %12017 = vmatmul.msk.bf16.vlgmr.msra.gmra.mxu1 %vm235_vm2, %v15814_v41  ;;  %v10292_v23 = vld.sshfl [vmem:[#allocation1 + $0x10] sm:$0xff pattern:$0x73625140]  ;;  %v9639_v60 = vsel %vm9633_vm14, %v9622_v63, %v9624_v44 }
 0x6d9   : > { %12018 = vmatmul.msk.bf16.vlgmr.msra.gmra.mxu2 %vm235_vm2, %v15814_v41  ;;  %9554 = vmatpush.bf16.msra.mxu0 %v9438_v19  ;;  %10304 = vst [vmem:[#allocation1] ss:$4 sm:$0xff] %v12274_v2  ;;  %v9663_v13 = vsel %vm239_vm1, %v9639_v60, 0  ;;  %v15895_v19 = vld [vmem:[%s16558_s1 + $0xa4] sm:$0xf] }
 0x6da   : > { %12019 = vmatmul.msk.bf16.vlgmr.msra.gmra.mxu3 %vm235_vm2, %v15814_v41  ;;  %9567 = vmatpush.bf16.msra.mxu1 %v9441_v49 }
 0x6db   : > { %10313 = vrot.lane.b32.xlu0 %v10290_v54, %s12228_s18  ;;  %9684 = vmatpush.bf16.msra.mxu2 %v9648_v18 }
 0x6dc   : > { %v8750_v46 = vpop.f32.mrf.mxu2  ;;  %9697 = vmatpush.bf16.msra.mxu3 %v9651_v51  ;;  %10315 = vrot.lane.b32.xlu1 %v10292_v23, %s12228_s18 }
 0x6dd   : > { %v8763_v4 = vpop.f32.mrf.mxu3  ;;  %v15840_v29 = vadd.f32 %v8750_v46, %v15743_v8  ;;  %v8627_v6 = vpop.f32.mrf.mxu0 }
 0x6de   : > { %v15843_v26 = vadd.f32 %v8763_v4, %v15746_v15  ;;  %v8640_v21 = vpop.f32.mrf.mxu1  ;;  %v9620_v11 = vpop.permute.xlu1 %9619 }
 0x6df   : > { %v9637_v8 = vsel %vm9633_vm14, %v9618_v55, %v9620_v11  ;;  %v9638_v34 = vsel %vm9633_vm14, %v9620_v11, %v9622_v63  ;;  %10099 = vrot.lane.b32.xlu2 %v15803_v28, %s12227_s15  ;;  %v9628_v36 = vpop.permute.xlu2 %9627 }
 0x6e0   : > { %v9657_v31 = vsel %vm239_vm1, %v9637_v8, 0  ;;  %v9660_v39 = vsel %vm239_vm1, %v9638_v34, 0  ;;  %v10309_v33 = vld.sshfl [vmem:[#allocation1 + $0x10] sm:$0xff pattern:$0x73625140] }
 0x6e1   : > { %v10307_v49 = vld.sshfl [vmem:[#allocation1 + $0x8] sm:$0xff pattern:$0x73625140]  ;;  %v10311_v54 = vld.sshfl [vmem:[#allocation1 + $0x18] sm:$0xff pattern:$0x73625140] }
 0x6e3   : > { %10319 = vrot.lane.b32.xlu0 %v10296_v20, %s12228_s18 }
 0x6e4   : > { %v8752_v56 = vpop.f32.mrf.mxu2  ;;  %10321 = vrot.lane.b32.xlu1 %v10298_v42, %s12228_s18 }
 0x6e5   : > { %v8765_v37 = vpop.f32.mrf.mxu3  ;;  %v8776_v15 = vpop.f32.mrf.mxu0 }
 0x6e6   : > { %v8789_v16 = vpop.f32.mrf.mxu1  ;;  %v15855_v62 = vadd.f32 %v8776_v15, %v15766_v58  ;;  %v9626_v25 = vpop.permute.xlu1 %9625  ;;  %v10302_v58 = vld.sshfl [vmem:[#allocation1 + $0x38] sm:$0xff pattern:$0x73625140] }
 0x6e7   : > { %v15858_v30 = vadd.f32 %v8789_v16, %v15769_v9  ;;  %v10305_v9 = vld.sshfl [vmem:[#allocation1] sm:$0xff pattern:$0x73625140]  ;;  %10317 = vrot.lane.b32.xlu2 %v10294_v57, %s12228_s18  ;;  %v9640_v52 = vsel %vm9633_vm14, %v9624_v44, %v9626_v25  ;;  %v9641_v5 = vsel %vm9633_vm14, %v9626_v25, %v9628_v36  ;;  %v10300_v57 = vld.sshfl [vmem:[#allocation1 + $0x30] sm:$0xff pattern:$0x73625140] }
 0x6e8   : > { %12020 = vmatmul.msk.bf16.vlgmr.msrb.gmra.mxu0 %vm235_vm2, %v15814_v41  ;;  %12021 = vmatmul.msk.bf16.vlgmr.msrb.gmra.mxu1 %vm235_vm2, %v15814_v41  ;;  %v9666_v18 = vsel %vm239_vm1, %v9640_v52, 0  ;;  %v9669_v51 = vsel %vm239_vm1, %v9641_v5, 0  ;;  %10521 = vst [vmem:[#allocation1] ss:$4 sm:$0xff] %v12268_v0 }
 0x6e9   : > { %12022 = vmatmul.msk.bf16.vlgmr.msrb.gmra.mxu2 %vm235_vm2, %v15814_v41  ;;  %9710 = vmatpush.bf16.msrb.mxu0 %v9654_v53  ;;  %v9630_v40 = vpop.permute.xlu0 %9629  ;;  %10523 = vst [vmem:[#allocation1 + $0x20] ss:$4 sm:$0xff] %v12270_v1 }
 0x6ea   : > { %12023 = vmatmul.msk.bf16.vlgmr.msrb.gmra.mxu3 %vm235_vm2, %v15814_v41  ;;  %9723 = vmatpush.bf16.msrb.mxu1 %v9657_v31 }
 0x6eb   : > { %9736 = vmatpush.bf16.msrb.mxu2 %v9660_v39  ;;  %9749 = vmatpush.bf16.msrb.mxu3 %v9663_v13 }
 0x6ec   : > { %v8802_v24 = vpop.f32.mrf.mxu2  ;;  %10325 = vrot.lane.b32.xlu0 %v10302_v58, %s12228_s18  ;;  %10327 = vrot.lane.b32.xlu1 %v10305_v9, %s12228_s18 }
 0x6ed   : > { %v8815_v47 = vpop.f32.mrf.mxu3  ;;  %v15875_v7 = vadd.f32 %v8802_v24, %v15777_v22  ;;  %v8778_v59 = vpop.f32.mrf.mxu0 }
 0x6ee   : > { %v15878_v61 = vadd.f32 %v8815_v47, %v15780_v32  ;;  %v8791_v28 = vpop.f32.mrf.mxu1  ;;  %v9632_v3 = vpop.permute.xlu1 %9631  ;;  %v9642_v32 = vsel %vm9633_vm14, %v9628_v36, %v9630_v40 }
 0x6ef   : > { %v9643_v12 = vsel %vm9633_vm14, %v9630_v40, %v9632_v3  ;;  %10323 = vrot.lane.b32.xlu2 %v10300_v57, %s12228_s18  ;;  %v10528_v42 = vld.sshfl [vmem:[#allocation1 + $0x18] sm:$0xff pattern:$0x73625140]  ;;  %v10526_v63 = vld.sshfl [vmem:[#allocation1 + $0x10] sm:$0xff pattern:$0x73625140] }
 0x6f0   : > { %v10532_v25 = vld.sshfl [vmem:[#allocation1 + $0x28] sm:$0xff pattern:$0x73625140]  ;;  %vm11510_vm14 = vcmask 1043456  }
 0x6f1   : > { %v9848_v11 = vpop.permute.xlu0 %9847 }
 0x6f4   : > { %v8804_v43 = vpop.f32.mrf.mxu2  ;;  %10331 = vrot.lane.b32.xlu0 %v10309_v33, %s12228_s18  ;;  %10333 = vrot.lane.b32.xlu1 %v10311_v54, %s12228_s18  ;;  %v10524_v33 = vld.sshfl [vmem:[#allocation1 + $0x8] sm:$0xff pattern:$0x73625140] }
 0x6f5   : > { %v8817_v10 = vpop.f32.mrf.mxu3  ;;  %v8828_v22 = vpop.f32.mrf.mxu0  ;;  %10538 = vst [vmem:[#allocation1] ss:$4 sm:$0xff] %v12274_v2 }
 0x6f6   : > { %v8841_v48 = vpop.f32.mrf.mxu1  ;;  %v15887_v17 = vadd.f32 %v8828_v22, %v15797_v50  ;;  %v9672_v50 = vsel %vm239_vm1, %v9642_v32, 0  ;;  %v9846_v55 = vpop.permute.xlu2 %9845 }
 0x6f7   : > { %v15890_v38 = vadd.f32 %v8841_v48, %v15800_v27  ;;  %v9675_v27 = vsel %vm239_vm1, %v9643_v12, 0  ;;  %v9850_v20 = vpop.permute.xlu1 %9849  ;;  %v9868_v14 = vsel %vm9867_vm15, %v9846_v55, %v9848_v11  ;;  %10329 = vrot.lane.b32.xlu2 %v10307_v49, %s12228_s18  ;;  %v10530_v55 = vld.sshfl [vmem:[#allocation1 + $0x20] sm:$0xff pattern:$0x73625140] }
 0x6f8   : > { %12024 = vmatmul.msk.bf16.vlgmr.msra.gmra.mxu0 %vm235_vm2, %v15814_v41  ;;  %12025 = vmatmul.msk.bf16.vlgmr.msra.gmra.mxu1 %vm235_vm2, %v15814_v41  ;;  %v9882_v53 = vsel %vm239_vm1, %v9868_v14, 0 }
 0x6f9   : > { %12027 = vmatmul.msk.bf16.vlgmr.msra.gmra.mxu2 %vm235_vm2, %v15895_v19  ;;  %9762 = vmatpush.bf16.msra.mxu0 %v9666_v18  ;;  %v9854_v60 = vpop.permute.xlu0 %9853 }
 0x6fa   : > { %12028 = vmatmul.msk.bf16.vlgmr.msra.gmra.mxu3 %vm235_vm2, %v15895_v19  ;;  %9775 = vmatpush.bf16.msra.mxu1 %v9669_v51 }
 0x6fb   : > { %9788 = vmatpush.bf16.msra.mxu2 %v9672_v50  ;;  %9801 = vmatpush.bf16.msra.mxu3 %v9675_v27 }
 0x6fc   : > { %v8854_v41 = vpop.f32.mrf.mxu2  ;;  %10549 = vrot.lane.b32.xlu0 %v10526_v63, %s12229_s21  ;;  %10551 = vrot.lane.b32.xlu1 %v10528_v42, %s12229_s21  ;;  %v10539_v48 = vld.sshfl [vmem:[#allocation1] sm:$0xff pattern:$0x73625140]  ;;  %v10541_v27 = vld.sshfl [vmem:[#allocation1 + $0x8] sm:$0xff pattern:$0x73625140] }
 0x6fd   : > { %v8867_v23 = vpop.f32.mrf.mxu3  ;;  %v15914_v46 = vadd.f32 %v8854_v41, %v15819_v35  ;;  %v8830_v6 = vpop.f32.mrf.mxu0  ;;  %v9869_v35 = vsel %vm9867_vm15, %v9848_v11, %v9850_v20  ;;  %v15977_v54 = vld.sshfl [vmem:[#allocation1 + $0x10] sm:$0xff pattern:$0x73625140] }
 0x6fe   : > { %v15917_v4 = vadd.f32 %v8867_v23, %v15822_v45  ;;  %v8843_v21 = vpop.f32.mrf.mxu1  ;;  %v9852_v44 = vpop.permute.xlu2 %9851  ;;  %v9885_v31 = vsel %vm239_vm1, %v9869_v35, 0 }
 0x6ff   : > { %v9870_v15 = vsel %vm9867_vm15, %v9850_v20, %v9852_v44  ;;  %v9871_v39 = vsel %vm9867_vm15, %v9852_v44, %v9854_v60  ;;  %v9856_v58 = vpop.permute.xlu1 %9855  ;;  %10547 = vrot.lane.b32.xlu2 %v10524_v33, %s12229_s21  ;;  %v10545_v20 = vld.sshfl [vmem:[#allocation1 + $0x18] sm:$0xff pattern:$0x73625140] }
 0x700   : > { %v9888_v13 = vsel %vm239_vm1, %v9870_v15, 0  ;;  %v9872_v52 = vsel %vm9867_vm15, %v9854_v60, %v9856_v58  ;;  %10755 = vst [vmem:[#allocation1] ss:$4 sm:$0xff] %v12268_v0 }
 0x701   : > { %v9894_v18 = vsel %vm239_vm1, %v9872_v52, 0 }
 0x704   : > { %v8856_v56 = vpop.f32.mrf.mxu2  ;;  %10555 = vrot.lane.b32.xlu0 %v10532_v25, %s12229_s21 }
 0x705   : > { %v8869_v37 = vpop.f32.mrf.mxu3  ;;  %v8984_v45 = vpop.f32.mrf.mxu0 }
 0x706   : > { %v8997_v8 = vpop.f32.mrf.mxu1  ;;  %v15926_v16 = vadd.f32 %v8984_v45, %v15840_v29  ;;  %v9891_v29 = vsel %vm239_vm1, %v9871_v39, 0  ;;  %v9858_v40 = vpop.permute.xlu2 %9857 }
 0x707   : > { %v15929_v34 = vadd.f32 %v8997_v8, %v15843_v26  ;;  %v10534_v26 = vld.sshfl [vmem:[#allocation1 + $0x30] sm:$0xff pattern:$0x73625140]  ;;  %v9873_v5 = vsel %vm9867_vm15, %v9856_v58, %v9858_v40  ;;  %10553 = vrot.lane.b32.xlu2 %v10530_v55, %s12229_s21  ;;  %v10758_v45 = vld.sshfl [vmem:[#allocation1 + $0x8] sm:$0xff pattern:$0x73625140] }
 0x708   : > { %12029 = vmatmul.msk.bf16.vlgmr.msrb.gmra.mxu0 %vm235_vm2, %v15895_v19  ;;  %12030 = vmatmul.msk.bf16.vlgmr.msrb.gmra.mxu1 %vm235_vm2, %v15895_v19  ;;  %v9897_v51 = vsel %vm239_vm1, %v9873_v5, 0  ;;  %v10762_v25 = vld.sshfl [vmem:[#allocation1 + $0x18] sm:$0xff pattern:$0x73625140] }
 0x709   : > { %12031 = vmatmul.msk.bf16.vlgmr.msrb.gmra.mxu2 %vm235_vm2, %v15895_v19  ;;  %9918 = vmatpush.bf16.msrb.mxu0 %v9882_v53 }
 0x70a   : > { %12032 = vmatmul.msk.bf16.vlgmr.msrb.gmra.mxu3 %vm235_vm2, %v15895_v19  ;;  %9931 = vmatpush.bf16.msrb.mxu1 %v9885_v31 }
 0x70b   : > { %9944 = vmatpush.bf16.msrb.mxu2 %v9888_v13  ;;  %9957 = vmatpush.bf16.msrb.mxu3 %v9891_v29 }
 0x70c   : > { %v9010_v9 = vpop.f32.mrf.mxu2  ;;  %10557 = vrot.lane.b32.xlu1 %v10534_v26, %s12229_s21  ;;  %10561 = vrot.lane.b32.xlu0 %v10539_v48, %s12229_s21  ;;  %v10536_v26 = vld.sshfl [vmem:[#allocation1 + $0x38] sm:$0xff pattern:$0x73625140] }
 0x70d   : > { %v9023_v24 = vpop.f32.mrf.mxu3  ;;  %v15947_v47 = vadd.f32 %v9010_v9, %v15855_v62  ;;  %v8986_v28 = vpop.f32.mrf.mxu0  ;;  %10757 = vst [vmem:[#allocation1 + $0x20] ss:$4 sm:$0xff] %v12270_v1 }
 0x70e   : > { %v15950_v59 = vadd.f32 %v9023_v24, %v15858_v30  ;;  %v8999_v36 = vpop.f32.mrf.mxu1  ;;  %v9864_v57 = vpop.permute.xlu2 %9863 }
 0x70f   : > { %10559 = vrot.lane.b32.xlu2 %v10536_v26, %s12229_s21 }
 0x712   : > { %v9860_v3 = vpop.permute.xlu0 %9859  ;;  %v9862_v49 = vpop.permute.xlu1 %9861 }
 0x713   : > { %v9874_v30 = vsel %vm9867_vm15, %v9858_v40, %v9860_v3  ;;  %v9875_v50 = vsel %vm9867_vm15, %v9860_v3, %v9862_v49  ;;  %v9876_v37 = vsel %vm9867_vm15, %v9862_v49, %v9864_v57 }
 0x714   : > { %v9012_v43 = vpop.f32.mrf.mxu2  ;;  %10563 = vrot.lane.b32.xlu1 %v10541_v27, %s12229_s21  ;;  %10567 = vrot.lane.b32.xlu0 %v10545_v20, %s12229_s21  ;;  %v9906_v31 = vsel %vm239_vm1, %v9876_v37, 0  ;;  %v10768_v52 = vld.sshfl [vmem:[#allocation1 + $0x30] sm:$0xff pattern:$0x73625140] }
 0x715   : > { %v9025_v10 = vpop.f32.mrf.mxu3  ;;  %v9036_v62 = vpop.f32.mrf.mxu0  ;;  %v10764_v43 = vld.sshfl [vmem:[#allocation1 + $0x20] sm:$0xff pattern:$0x73625140] }
 0x716   : > { %v9049_v22 = vpop.f32.mrf.mxu1  ;;  %v15958_v32 = vadd.f32 %v9036_v62, %v15875_v7  ;;  %v9900_v7 = vsel %vm239_vm1, %v9874_v30, 0 }
 0x717   : > { %v15961_v12 = vadd.f32 %v9049_v22, %v15878_v61  ;;  %v9903_v61 = vsel %vm239_vm1, %v9875_v50, 0  ;;  %10565 = vrot.lane.b32.xlu2 %v15977_v54, %s12229_s21  ;;  %v10770_v54 = vld.sshfl [vmem:[#allocation1 + $0x38] sm:$0xff pattern:$0x73625140] }
 0x718   : > { %12033 = vmatmul.msk.bf16.vlgmr.msra.gmra.mxu0 %vm235_vm2, %v15895_v19  ;;  %12034 = vmatmul.msk.bf16.vlgmr.msra.gmra.mxu1 %vm235_vm2, %v15895_v19 }
 0x719   : > { %12035 = vmatmul.msk.bf16.vlgmr.msra.gmra.mxu2 %vm235_vm2, %v15895_v19  ;;  %9970 = vmatpush.bf16.msra.mxu0 %v9894_v18 }
 0x71a   : > { %12036 = vmatmul.msk.bf16.vlgmr.msra.gmra.mxu3 %vm235_vm2, %v15895_v19  ;;  %9983 = vmatpush.bf16.msra.mxu1 %v9897_v51 }
 0x71b   : > { %9996 = vmatpush.bf16.msra.mxu2 %v9900_v7  ;;  %10009 = vmatpush.bf16.msra.mxu3 %v9903_v61 }
 0x71c   : > { %v9062_v41 = vpop.f32.mrf.mxu2  ;;  %10781 = vrot.lane.b32.xlu1 %v10758_v45, %s12230_s24  ;;  %10785 = vrot.lane.b32.xlu0 %v10762_v25, %s12230_s24  ;;  %v10766_v25 = vld.sshfl [vmem:[#allocation1 + $0x28] sm:$0xff pattern:$0x73625140] }
 0x71d   : > { %v9075_v23 = vpop.f32.mrf.mxu3  ;;  %v15982_v6 = vadd.f32 %v9062_v41, %v15887_v17  ;;  %v9038_v21 = vpop.f32.mrf.mxu0  ;;  %10991 = vst [vmem:[#allocation1 + $0x20] ss:$4 sm:$0xff] %v12270_v1 }
 0x71e   : > { %v15985_v19 = vadd.f32 %v9075_v23, %v15890_v38  ;;  %v9051_v11 = vpop.f32.mrf.mxu1  ;;  %v9866_v42 = vpop.permute.xlu0 %9865  ;;  %v15994_v38 = vld [vmem:[%s16558_s1 + $0xa8] sm:$0xf] }
 0x71f   : > { %v10080_v63 = vpop.permute.xlu1 %10079  ;;  %v9877_v14 = vsel %vm9867_vm15, %v9864_v57, %v9866_v42  ;;  %vm11511_vm15 = vcmask 523268  }
 0x720   : > { %v9909_v39 = vsel %vm239_vm1, %v9877_v14, 0 }
 0x721   : > { %v10082_v53 = vpop.permute.xlu2 %10081 }
 0x722   : > { %v10102_v13 = vsel %vm10101_vm0, %v10080_v63, %v10082_v53 }
 0x724   : > { %v9064_v44 = vpop.f32.mrf.mxu2  ;;  %10787 = vrot.lane.b32.xlu1 %v10764_v43, %s12230_s24  ;;  %10791 = vrot.lane.b32.xlu0 %v10768_v52, %s12230_s24 }
 0x725   : > { %v9077_v56 = vpop.f32.mrf.mxu3  ;;  %v9088_v17 = vpop.f32.mrf.mxu0 }
 0x726   : > { %v9101_v35 = vpop.f32.mrf.mxu1  ;;  %v15997_v8 = vadd.f32 %v9088_v17, %v15914_v46  ;;  %v10084_v60 = vpop.permute.xlu0 %10083  ;;  %v10116_v46 = vsel %vm239_vm1, %v10102_v13, 0 }
 0x727   : > { %v16000_v15 = vadd.f32 %v9101_v35, %v15917_v4  ;;  %v10103_v29 = vsel %vm10101_vm0, %v10082_v53, %v10084_v60 }
 0x728   : > { %12038 = vmatmul.msk.bf16.vlgmr.msrb.gmra.mxu0 %vm235_vm2, %v15994_v38  ;;  %12039 = vmatmul.msk.bf16.vlgmr.msrb.gmra.mxu1 %vm235_vm2, %v15994_v38  ;;  %v10119_v4 = vsel %vm239_vm1, %v10103_v29, 0 }
 0x729   : > { %12040 = vmatmul.msk.bf16.vlgmr.msrb.gmra.mxu2 %vm235_vm2, %v15994_v38  ;;  %10022 = vmatpush.bf16.msrb.mxu0 %v9906_v31  ;;  %v10088_v3 = vpop.permute.xlu2 %10087 }
 0x72a   : > { %12041 = vmatmul.msk.bf16.vlgmr.msrb.gmra.mxu3 %vm235_vm2, %v15994_v38  ;;  %10035 = vmatpush.bf16.msrb.mxu1 %v9909_v39  ;;  %v16077_v39 = vld [vmem:[%s16558_s1 + $0xac] sm:$0xf] }
 0x72b   : > { %10152 = vmatpush.bf16.msrb.mxu2 %v10116_v46  ;;  %10165 = vmatpush.bf16.msrb.mxu3 %v10119_v4 }
 0x72c   : > { %v9218_v58 = vpop.f32.mrf.mxu2  ;;  %10793 = vrot.lane.b32.xlu1 %v10770_v54, %s12230_s24 }
 0x72d   : > { %v9231_v9 = vpop.f32.mrf.mxu3  ;;  %v16021_v24 = vadd.f32 %v9218_v58, %v15926_v16  ;;  %v9090_v36 = vpop.f32.mrf.mxu0 }
 0x72e   : > { %v16024_v28 = vadd.f32 %v9231_v9, %v15929_v34  ;;  %v9103_v33 = vpop.f32.mrf.mxu1  ;;  %v10086_v40 = vpop.permute.xlu1 %10085 }
 0x72f   : > { %v10090_v10 = vpop.permute.xlu0 %10089  ;;  %v10104_v22 = vsel %vm10101_vm0, %v10084_v60, %v10086_v40  ;;  %v10105_v30 = vsel %vm10101_vm0, %v10086_v40, %v10088_v3 }
 0x730   : > { %v10106_v48 = vsel %vm10101_vm0, %v10088_v3, %v10090_v10  ;;  %v10122_v50 = vsel %vm239_vm1, %v10104_v22, 0  ;;  %v10125_v7 = vsel %vm239_vm1, %v10105_v30, 0  ;;  %v10998_v22 = vld.sshfl [vmem:[#allocation1 + $0x20] sm:$0xff pattern:$0x73625140] }
 0x731   : > { %v10128_v27 = vsel %vm239_vm1, %v10106_v48, 0  ;;  %v10094_v55 = vpop.permute.xlu2 %10093 }
 0x734   : > { %v9220_v5 = vpop.f32.mrf.mxu2 }
 0x735   : > { %v9233_v62 = vpop.f32.mrf.mxu3  ;;  %v9244_v16 = vpop.f32.mrf.mxu0 }
 0x736   : > { %v9257_v34 = vpop.f32.mrf.mxu1  ;;  %v16034_v49 = vadd.f32 %v9244_v16, %v15947_v47  ;;  %v10092_v51 = vpop.permute.xlu1 %10091 }
 0x737   : > { %v16037_v18 = vadd.f32 %v9257_v34, %v15950_v59  ;;  %v10107_v61 = vsel %vm10101_vm0, %v10090_v10, %v10092_v51  ;;  %v10760_v59 = vld.sshfl [vmem:[#allocation1 + $0x10] sm:$0xff pattern:$0x73625140] }
 0x738   : > { %12042 = vmatmul.msk.bf16.vlgmr.msra.gmra.mxu0 %vm235_vm2, %v15994_v38  ;;  %12043 = vmatmul.msk.bf16.vlgmr.msra.gmra.mxu1 %vm235_vm2, %v15994_v38  ;;  %v10131_v47 = vsel %vm239_vm1, %v10107_v61, 0  ;;  %10772 = vst [vmem:[#allocation1] ss:$4 sm:$0xff] %v12274_v2 }
 0x739   : > { %12044 = vmatmul.msk.bf16.vlgmr.msra.gmra.mxu2 %vm235_vm2, %v15994_v38  ;;  %10178 = vmatpush.bf16.msra.mxu0 %v10122_v50  ;;  %v10100_v37 = vpop.permute.xlu2 %10099 }
 0x73a   : > { %12045 = vmatmul.msk.bf16.vlgmr.msra.gmra.mxu3 %vm235_vm2, %v15994_v38  ;;  %10191 = vmatpush.bf16.msra.mxu1 %v10125_v7 }
 0x73b   : > { %10204 = vmatpush.bf16.msra.mxu2 %v10128_v27  ;;  %10217 = vmatpush.bf16.msra.mxu3 %v10131_v47 }
 0x73c   : > { %v9270_v57 = vpop.f32.mrf.mxu2  ;;  %10783 = vrot.lane.b32.xlu2 %v10760_v59, %s12230_s24 }
 0x73d   : > { %v9283_v41 = vpop.f32.mrf.mxu3  ;;  %v16056_v23 = vadd.f32 %v9270_v57, %v15958_v32  ;;  %v9246_v11 = vpop.f32.mrf.mxu0  ;;  %v10108_v32 = vsel %vm10101_vm0, %v10092_v51, %v10094_v55  ;;  %v11000_v57 = vld.sshfl [vmem:[#allocation1 + $0x28] sm:$0xff pattern:$0x73625140] }
 0x73e   : > { %v16059_v21 = vadd.f32 %v9283_v41, %v15961_v12  ;;  %v9259_v20 = vpop.f32.mrf.mxu1  ;;  %v10134_v29 = vsel %vm239_vm1, %v10108_v32, 0 }
 0x73f   : > { %v10773_v42 = vld.sshfl [vmem:[#allocation1] sm:$0xff pattern:$0x73625140]  ;;  %v16061_v63 = vld.sshfl [vmem:[#allocation1 + $0x18] sm:$0xff pattern:$0x73625140] }
 0x740   : > { %v10775_v44 = vld.sshfl [vmem:[#allocation1 + $0x8] sm:$0xff pattern:$0x73625140]  ;;  %v10777_v56 = vld.sshfl [vmem:[#allocation1 + $0x10] sm:$0xff pattern:$0x73625140] }
 0x741   : > { %10797 = vrot.lane.b32.xlu0 %v10775_v44, %s12230_s24  ;;  %10989 = vst [vmem:[#allocation1] ss:$4 sm:$0xff] %v12268_v0  ;;  %v10098_v14 = vpop.permute.xlu1 %10097  ;;  %10799 = vrot.lane.b32.xlu1 %v10777_v56, %s12230_s24  ;;  %v10318_v9 = vpop.permute.xlu2 %10317 }
 0x742   : > { %v10111_v60 = vsel %vm10101_vm0, %v10098_v14, %v10100_v37  ;;  %v10096_v13 = vpop.permute.xlu0 %10095  ;;  %v11004_v37 = vld.sshfl [vmem:[#allocation1 + $0x38] sm:$0xff pattern:$0x73625140] }
 0x743   : > { %v10109_v46 = vsel %vm10101_vm0, %v10094_v55, %v10096_v13  ;;  %v10110_v4 = vsel %vm10101_vm0, %v10096_v13, %v10098_v14  ;;  %v10143_v26 = vsel %vm239_vm1, %v10111_v60, 0 }
 0x744   : > { %v9272_v17 = vpop.f32.mrf.mxu2  ;;  %10789 = vrot.lane.b32.xlu2 %v10766_v25, %s12230_s24 }
 0x745   : > { %v9285_v35 = vpop.f32.mrf.mxu3  ;;  %v9296_v12 = vpop.f32.mrf.mxu0 }
 0x746   : > { %v9309_v45 = vpop.f32.mrf.mxu1  ;;  %v16069_v53 = vadd.f32 %v9296_v12, %v15982_v6  ;;  %v10137_v6 = vsel %vm239_vm1, %v10109_v46, 0 }
 0x747   : > { %v16072_v31 = vadd.f32 %v9309_v45, %v15985_v19  ;;  %v10140_v19 = vsel %vm239_vm1, %v10110_v4, 0 }
 0x748   : > { %12046 = vmatmul.msk.bf16.vlgmr.msrb.gmra.mxu0 %vm235_vm2, %v15994_v38  ;;  %12047 = vmatmul.msk.bf16.vlgmr.msrb.gmra.mxu1 %vm235_vm2, %v15994_v38  ;;  %v10992_v58 = vld.sshfl [vmem:[#allocation1 + $0x8] sm:$0xff pattern:$0x73625140]  ;;  %v16094_v38 = vld.sshfl [vmem:[#allocation1 + $0x18] sm:$0xff pattern:$0x73625140] }
 0x749   : > { %12049 = vmatmul.msk.bf16.vlgmr.msrb.gmra.mxu2 %vm235_vm2, %v16077_v39  ;;  %10230 = vmatpush.bf16.msrb.mxu0 %v10134_v29  ;;  %v10994_v52 = vld.sshfl [vmem:[#allocation1 + $0x10] sm:$0xff pattern:$0x73625140]  ;;  %v10324_v54 = vpop.permute.xlu2 %10323 }
 0x74a   : > { %12050 = vmatmul.msk.bf16.vlgmr.msrb.gmra.mxu3 %vm235_vm2, %v16077_v39  ;;  %10243 = vmatpush.bf16.msrb.mxu1 %v10137_v6  ;;  %11006 = vst [vmem:[#allocation1] ss:$4 sm:$0xff] %v12274_v2 }
 0x74b   : > { %10256 = vmatpush.bf16.msrb.mxu2 %v10140_v19  ;;  %10269 = vmatpush.bf16.msrb.mxu3 %v10143_v26 }
 0x74c   : > { %v9322_v36 = vpop.f32.mrf.mxu2  ;;  %11015 = vrot.lane.b32.xlu0 %v10992_v58, %s12231_s27  ;;  %11017 = vrot.lane.b32.xlu1 %v10994_v52, %s12231_s27 }
 0x74d   : > { %v9335_v33 = vpop.f32.mrf.mxu3  ;;  %v16099_v40 = vadd.f32 %v9322_v36, %v15997_v8  ;;  %v9298_v43 = vpop.f32.mrf.mxu0  ;;  %10795 = vrot.lane.b32.xlu2 %v10773_v42, %s12230_s24 }
 0x74e   : > { %v16102_v3 = vadd.f32 %v9335_v33, %v16000_v15  ;;  %v9311_v10 = vpop.f32.mrf.mxu1  ;;  %v10314_v5 = vpop.permute.xlu0 %10313 }
 0x74f   : > { %v10316_v62 = vpop.permute.xlu1 %10315 }
 0x750   : > { %v10336_v34 = vsel %vm10335_vm3, %v10314_v5, %v10316_v62  ;;  %v10337_v8 = vsel %vm10335_vm3, %v10316_v62, %v10318_v9 }
 0x751   : > { %v10350_v27 = vsel %vm239_vm1, %v10336_v34, 0  ;;  %v10353_v47 = vsel %vm239_vm1, %v10337_v8, 0  ;;  %v11007_v17 = vld.sshfl [vmem:[#allocation1] sm:$0xff pattern:$0x73625140]  ;;  %v10330_v32 = vpop.permute.xlu2 %10329 }
 0x752   : > { %v11013_v52 = vld.sshfl [vmem:[#allocation1 + $0x18] sm:$0xff pattern:$0x73625140]  ;;  %v16181_v8 = vld [vmem:[%s16558_s1 + $0xb0] sm:$0xf] }
 0x754   : > { %v9324_v30 = vpop.f32.mrf.mxu2  ;;  %11021 = vrot.lane.b32.xlu0 %v10998_v22, %s12231_s27  ;;  %11023 = vrot.lane.b32.xlu1 %v11000_v57, %s12231_s27 }
 0x755   : > { %v9337_v16 = vpop.f32.mrf.mxu3  ;;  %v9452_v15 = vpop.f32.mrf.mxu0  ;;  %10801 = vrot.lane.b32.xlu2 %v16061_v63, %s12230_s24 }
 0x756   : > { %v9465_v48 = vpop.f32.mrf.mxu1  ;;  %v16111_v51 = vadd.f32 %v9452_v15, %v16021_v24  ;;  %v10320_v7 = vpop.permute.xlu0 %10319 }
 0x757   : > { %v16114_v50 = vadd.f32 %v9465_v48, %v16024_v28  ;;  %v10322_v61 = vpop.permute.xlu1 %10321  ;;  %v10338_v55 = vsel %vm10335_vm3, %v10318_v9, %v10320_v7  ;;  %v11009_v9 = vld.sshfl [vmem:[#allocation1 + $0x8] sm:$0xff pattern:$0x73625140] }
 0x758   : > { %v10339_v59 = vsel %vm10335_vm3, %v10320_v7, %v10322_v61  ;;  %12051 = vmatmul.msk.bf16.vlgmr.msra.gmra.mxu0 %vm235_vm2, %v16077_v39  ;;  %12052 = vmatmul.msk.bf16.vlgmr.msra.gmra.mxu1 %vm235_vm2, %v16077_v39  ;;  %v10356_v24 = vsel %vm239_vm1, %v10338_v55, 0  ;;  %v10340_v60 = vsel %vm10335_vm3, %v10322_v61, %v10324_v54 }
 0x759   : > { %v10359_v28 = vsel %vm239_vm1, %v10339_v59, 0  ;;  %12053 = vmatmul.msk.bf16.vlgmr.msra.gmra.mxu2 %vm235_vm2, %v16077_v39  ;;  %10386 = vmatpush.bf16.msra.mxu0 %v10350_v27  ;;  %v10362_v6 = vsel %vm239_vm1, %v10340_v60, 0  ;;  %v10548_v62 = vpop.permute.xlu2 %10547 }
 0x75a   : > { %12054 = vmatmul.msk.bf16.vlgmr.msra.gmra.mxu3 %vm235_vm2, %v16077_v39  ;;  %10399 = vmatpush.bf16.msra.mxu1 %v10353_v47 }
 0x75b   : > { %10412 = vmatpush.bf16.msra.mxu2 %v10356_v24  ;;  %10425 = vmatpush.bf16.msra.mxu3 %v10359_v28 }
 0x75c   : > { %v9478_v41 = vpop.f32.mrf.mxu2  ;;  %11027 = vrot.lane.b32.xlu0 %v11004_v37, %s12231_s27  ;;  %11029 = vrot.lane.b32.xlu1 %v11007_v17, %s12231_s27 }
 0x75d   : > { %v9491_v11 = vpop.f32.mrf.mxu3  ;;  %v16134_v20 = vadd.f32 %v9478_v41, %v16034_v49  ;;  %v9454_v44 = vpop.f32.mrf.mxu0  ;;  %11019 = vrot.lane.b32.xlu2 %v16094_v38, %s12231_s27 }
 0x75e   : > { %v16137_v42 = vadd.f32 %v9491_v11, %v16037_v18  ;;  %v9467_v56 = vpop.f32.mrf.mxu1  ;;  %v10326_v14 = vpop.permute.xlu0 %10325 }
 0x75f   : > { %v10328_v35 = vpop.permute.xlu1 %10327  ;;  %v10341_v63 = vsel %vm10335_vm3, %v10324_v54, %v10326_v14 }
 0x760   : > { %v10342_v13 = vsel %vm10335_vm3, %v10326_v14, %v10328_v35  ;;  %v10343_v29 = vsel %vm10335_vm3, %v10328_v35, %v10330_v32  ;;  %v10365_v19 = vsel %vm239_vm1, %v10341_v63, 0 }
 0x761   : > { %v10368_v26 = vsel %vm239_vm1, %v10342_v13, 0  ;;  %v10371_v25 = vsel %vm239_vm1, %v10343_v29, 0  ;;  %v10554_v24 = vpop.permute.xlu2 %10553 }
 0x764   : > { %v9480_v12 = vpop.f32.mrf.mxu2  ;;  %11035 = vrot.lane.b32.xlu1 %v11013_v52, %s12231_s27 }
 0x765   : > { %v9493_v45 = vpop.f32.mrf.mxu3  ;;  %v9504_v49 = vpop.f32.mrf.mxu0 }
 0x766   : > { %v9517_v18 = vpop.f32.mrf.mxu1  ;;  %v16148_v46 = vadd.f32 %v9504_v49, %v16056_v23  ;;  %v11011_v23 = vld.sshfl [vmem:[#allocation1 + $0x10] sm:$0xff pattern:$0x73625140] }
 0x767   : > { %v16151_v4 = vadd.f32 %v9517_v18, %v16059_v21  ;;  %v10332_v21 = vpop.permute.xlu0 %10331  ;;  %11033 = vrot.lane.b32.xlu0 %v11011_v23, %s12231_s27  ;;  %v10334_v5 = vpop.permute.xlu1 %10333  ;;  %11223 = vst [vmem:[#allocation1] ss:$4 sm:$0xff] %v12268_v0 }
 0x768   : > { %12055 = vmatmul.msk.bf16.vlgmr.msrb.gmra.mxu0 %vm235_vm2, %v16077_v39  ;;  %12056 = vmatmul.msk.bf16.vlgmr.msrb.gmra.mxu1 %vm235_vm2, %v16077_v39  ;;  %v10344_v30 = vsel %vm10335_vm3, %v10330_v32, %v10332_v21 }
 0x769   : > { %12057 = vmatmul.msk.bf16.vlgmr.msrb.gmra.mxu2 %vm235_vm2, %v16077_v39  ;;  %10438 = vmatpush.bf16.msrb.mxu0 %v10362_v6  ;;  %v10374_v7 = vsel %vm239_vm1, %v10344_v30, 0  ;;  %v10560_v18 = vpop.permute.xlu2 %10559 }
 0x76a   : > { %12058 = vmatmul.msk.bf16.vlgmr.msrb.gmra.mxu3 %vm235_vm2, %v16077_v39  ;;  %10451 = vmatpush.bf16.msrb.mxu1 %v10365_v19  ;;  %v11002_v39 = vld.sshfl [vmem:[#allocation1 + $0x30] sm:$0xff pattern:$0x73625140] }
 0x76b   : > { %10464 = vmatpush.bf16.msrb.mxu2 %v10368_v26  ;;  %10477 = vmatpush.bf16.msrb.mxu3 %v10371_v25  ;;  %11225 = vst [vmem:[#allocation1 + $0x20] ss:$4 sm:$0xff] %v12270_v1 }
 0x76c   : > { %v9530_v58 = vpop.f32.mrf.mxu2  ;;  %11025 = vrot.lane.b32.xlu2 %v11002_v39, %s12231_s27 }
 0x76d   : > { %v9543_v38 = vpop.f32.mrf.mxu3  ;;  %v16167_v36 = vadd.f32 %v9530_v58, %v16069_v53  ;;  %v9506_v43 = vpop.f32.mrf.mxu0 }
 0x76e   : > { %v16170_v33 = vadd.f32 %v9543_v38, %v16072_v31  ;;  %v9519_v10 = vpop.f32.mrf.mxu1  ;;  %v10345_v31 = vsel %vm10335_vm3, %v10332_v21, %v10334_v5  ;;  %v11230_v55 = vld.sshfl [vmem:[#allocation1 + $0x18] sm:$0xff pattern:$0x73625140]  ;;  %v11228_v59 = vld.sshfl [vmem:[#allocation1 + $0x10] sm:$0xff pattern:$0x73625140] }
 0x76f   : > { %v10552_v15 = vpop.permute.xlu1 %10551  ;;  %v10550_v48 = vpop.permute.xlu0 %10549  ;;  %v10377_v61 = vsel %vm239_vm1, %v10345_v31, 0  ;;  %11253 = vrot.lane.b32.xlu1 %v11230_v55, %s12232_s30  ;;  %11251 = vrot.lane.b32.xlu0 %v11228_v59, %s12232_s30 }
 0x770   : > { %v10570_v27 = vsel %vm10569_vm4, %v10548_v62, %v10550_v48  ;;  %v10571_v47 = vsel %vm10569_vm4, %v10550_v48, %v10552_v15  ;;  %v10572_v12 = vsel %vm10569_vm4, %v10552_v15, %v10554_v24  ;;  %v16260_v48 = vld [vmem:[%s16558_s1 + $0xb4] sm:$0xf] }
 0x771   : > { %v10590_v13 = vsel %vm239_vm1, %v10572_v12, 0 }
 0x772   : > { %v11234_v37 = vld.sshfl [vmem:[#allocation1 + $0x28] sm:$0xff pattern:$0x73625140]  ;;  %v11236_v14 = vld.sshfl [vmem:[#allocation1 + $0x30] sm:$0xff pattern:$0x73625140] }
 0x773   : > { %v11232_v39 = vld.sshfl [vmem:[#allocation1 + $0x20] sm:$0xff pattern:$0x73625140] }
 0x774   : > { %v9532_v22 = vpop.f32.mrf.mxu2  ;;  %11031 = vrot.lane.b32.xlu2 %v11009_v9, %s12231_s27 }
 0x775   : > { %v9545_v53 = vpop.f32.mrf.mxu3  ;;  %v9556_v16 = vpop.f32.mrf.mxu0 }
 0x776   : > { %v9569_v34 = vpop.f32.mrf.mxu1  ;;  %v16184_v1 = vadd.f32 %v9556_v16, %v16099_v40  ;;  %v10584_v40 = vsel %vm239_vm1, %v10570_v27, 0 }
 0x777   : > { %v16187_v0 = vadd.f32 %v9569_v34, %v16102_v3  ;;  %v10587_v3 = vsel %vm239_vm1, %v10571_v47, 0  ;;  %v10556_v56 = vpop.permute.xlu0 %10555  ;;  %11257 = vrot.lane.b32.xlu0 %v11234_v37, %s12232_s30  ;;  %11259 = vrot.lane.b32.xlu1 %v11236_v14, %s12232_s30 }
 0x778   : > { %12060 = vmatmul.msk.bf16.vlgmr.msra.gmra.mxu0 %vm235_vm2, %v16181_v8  ;;  %12061 = vmatmul.msk.bf16.vlgmr.msra.gmra.mxu1 %vm235_vm2, %v16181_v8  ;;  %v10573_v45 = vsel %vm10569_vm4, %v10554_v24, %v10556_v56 }
 0x779   : > { %12062 = vmatmul.msk.bf16.vlgmr.msra.gmra.mxu2 %vm235_vm2, %v16181_v8  ;;  %10490 = vmatpush.bf16.msra.mxu0 %v10374_v7  ;;  %v10593_v29 = vsel %vm239_vm1, %v10573_v45, 0 }
 0x77a   : > { %12063 = vmatmul.msk.bf16.vlgmr.msra.gmra.mxu3 %vm235_vm2, %v16181_v8  ;;  %10503 = vmatpush.bf16.msra.mxu1 %v10377_v61 }
 0x77b   : > { %10620 = vmatpush.bf16.msra.mxu2 %v10584_v40  ;;  %10633 = vmatpush.bf16.msra.mxu3 %v10587_v3 }
 0x77c   : > { %v9686_v28 = vpop.f32.mrf.mxu2 }
 0x77d   : > { %v9699_v54 = vpop.f32.mrf.mxu3  ;;  %v16207_v57 = vadd.f32 %v9686_v28, %v16111_v51  ;;  %v9558_v11 = vpop.f32.mrf.mxu0 }
 0x77e   : > { %v16210_v41 = vadd.f32 %v9699_v54, %v16114_v50  ;;  %v9571_v44 = vpop.f32.mrf.mxu1  ;;  %v10558_v17 = vpop.permute.xlu1 %10557  ;;  %v11238_v54 = vld.sshfl [vmem:[#allocation1 + $0x38] sm:$0xff pattern:$0x73625140] }
 0x77f   : > { %v10574_v50 = vsel %vm10569_vm4, %v10556_v56, %v10558_v17  ;;  %v10575_v6 = vsel %vm10569_vm4, %v10558_v17, %v10560_v18  ;;  %v10562_v26 = vpop.permute.xlu0 %10561 }
 0x780   : > { %v10596_v19 = vsel %vm239_vm1, %v10574_v50, 0 }
 0x784   : > { %v9688_v35 = vpop.f32.mrf.mxu2 }
 0x785   : > { %v9701_v32 = vpop.f32.mrf.mxu3  ;;  %v9712_v51 = vpop.f32.mrf.mxu0 }
 0x786   : > { %v9725_v60 = vpop.f32.mrf.mxu1  ;;  %v16218_v63 = vadd.f32 %v9712_v51, %v16134_v20  ;;  %v10599_v20 = vsel %vm239_vm1, %v10575_v6, 0  ;;  %v10564_v10 = vpop.permute.xlu1 %10563 }
 0x787   : > { %v16221_v49 = vadd.f32 %v9725_v60, %v16137_v42  ;;  %v11226_v42 = vld.sshfl [vmem:[#allocation1 + $0x8] sm:$0xff pattern:$0x73625140]  ;;  %v10568_v5 = vpop.permute.xlu0 %10567  ;;  %v10577_v53 = vsel %vm10569_vm4, %v10562_v26, %v10564_v10 }
 0x788   : > { %12064 = vmatmul.msk.bf16.vlgmr.msrb.gmra.mxu0 %vm235_vm2, %v16181_v8  ;;  %12065 = vmatmul.msk.bf16.vlgmr.msrb.gmra.mxu1 %vm235_vm2, %v16181_v8  ;;  %11240 = vst [vmem:[#allocation1] ss:$4 sm:$0xff] %v12274_v2  ;;  %v10566_v2 = vpop.permute.xlu2 %10565  ;;  %v10605_v61 = vsel %vm239_vm1, %v10577_v53, 0 }
 0x789   : > { %12066 = vmatmul.msk.bf16.vlgmr.msrb.gmra.mxu2 %vm235_vm2, %v16181_v8  ;;  %10646 = vmatpush.bf16.msrb.mxu0 %v10590_v13  ;;  %v10578_v31 = vsel %vm10569_vm4, %v10564_v10, %v10566_v2  ;;  %v10579_v16 = vsel %vm10569_vm4, %v10566_v2, %v10568_v5 }
 0x78a   : > { %12067 = vmatmul.msk.bf16.vlgmr.msrb.gmra.mxu3 %vm235_vm2, %v16181_v8  ;;  %10659 = vmatpush.bf16.msrb.mxu1 %v10593_v29 }
 0x78b   : > { %10672 = vmatpush.bf16.msrb.mxu2 %v10596_v19  ;;  %10685 = vmatpush.bf16.msrb.mxu3 %v10599_v20 }
 0x78c   : > { %v9738_v25 = vpop.f32.mrf.mxu2  ;;  %11249 = vrot.lane.b32.xlu2 %v11226_v42, %s12232_s30 }
 0x78d   : > { %v9751_v23 = vpop.f32.mrf.mxu3  ;;  %v16239_v21 = vadd.f32 %v9738_v25, %v16148_v46  ;;  %v9714_v38 = vpop.f32.mrf.mxu0  ;;  %v10576_v46 = vsel %vm10569_vm4, %v10560_v18, %v10562_v26  ;;  %vm11512_vm4 = vmor %vm11511_vm15, %vm11510_vm14 }
 0x78e   : > { %v16242_v58 = vadd.f32 %v9751_v23, %v16151_v4  ;;  %v9727_v9 = vpop.f32.mrf.mxu1  ;;  %v10602_v7 = vsel %vm239_vm1, %v10576_v46, 0  ;;  %v10782_v47 = vpop.permute.xlu1 %10781 }
 0x78f   : > { %v11241_v43 = vld.sshfl [vmem:[#allocation1] sm:$0xff pattern:$0x73625140]  ;;  %v11243_v52 = vld.sshfl [vmem:[#allocation1 + $0x8] sm:$0xff pattern:$0x73625140]  ;;  %v10786_v11 = vpop.permute.xlu0 %10785 }
 0x790   : > { %11263 = vrot.lane.b32.xlu0 %v11241_v43, %s12232_s30  ;;  %11265 = vrot.lane.b32.xlu1 %v11243_v52, %s12232_s30  ;;  %v11247_v27 = vld.sshfl [vmem:[#allocation1 + $0x18] sm:$0xff pattern:$0x73625140]  ;;  %v11245_v18 = vld.sshfl [vmem:[#allocation1 + $0x10] sm:$0xff pattern:$0x73625140] }
 0x794   : > { %v9740_v62 = vpop.f32.mrf.mxu2  ;;  %11255 = vrot.lane.b32.xlu2 %v11232_v39, %s12232_s30 }
 0x795   : > { %v9753_v22 = vpop.f32.mrf.mxu3  ;;  %v9764_v4 = vpop.f32.mrf.mxu0 }
 0x796   : > { %v9777_v30 = vpop.f32.mrf.mxu1  ;;  %v16252_v34 = vadd.f32 %v9764_v4, %v16167_v36  ;;  %v10608_v36 = vsel %vm239_vm1, %v10578_v31, 0  ;;  %v10784_v40 = vpop.permute.xlu2 %10783 }
 0x797   : > { %v16255_v15 = vadd.f32 %v9777_v30, %v16170_v33  ;;  %v10611_v33 = vsel %vm239_vm1, %v10579_v16, 0  ;;  %v10804_v37 = vsel %vm10803_vm5, %v10782_v47, %v10784_v40  ;;  %v10805_v14 = vsel %vm10803_vm5, %v10784_v40, %v10786_v11  ;;  %v10788_v32 = vpop.permute.xlu1 %10787  ;;  %v10792_v13 = vpop.permute.xlu0 %10791 }
 0x798   : > { %12068 = vmatmul.msk.bf16.vlgmr.msra.gmra.mxu0 %vm235_vm2, %v16181_v8  ;;  %12069 = vmatmul.msk.bf16.vlgmr.msra.gmra.mxu1 %vm235_vm2, %v16181_v8  ;;  %v10818_v45 = vsel %vm239_vm1, %v10804_v37, 0  ;;  %v10821_v51 = vsel %vm239_vm1, %v10805_v14, 0  ;;  %v10806_v60 = vsel %vm10803_vm5, %v10786_v11, %v10788_v32 }
 0x799   : > { %12071 = vmatmul.msk.bf16.vlgmr.msra.gmra.mxu2 %vm235_vm2, %v16260_v48  ;;  %10698 = vmatpush.bf16.msra.mxu0 %v10602_v7 }
 0x79a   : > { %12072 = vmatmul.msk.bf16.vlgmr.msra.gmra.mxu3 %vm235_vm2, %v16260_v48  ;;  %10711 = vmatpush.bf16.msra.mxu1 %v10605_v61 }
 0x79b   : > { %10724 = vmatpush.bf16.msra.mxu2 %v10608_v36  ;;  %10737 = vmatpush.bf16.msra.mxu3 %v10611_v33 }
 0x79c   : > { %v9790_v3 = vpop.f32.mrf.mxu2  ;;  %11269 = vrot.lane.b32.xlu0 %v11247_v27, %s12232_s30  ;;  %11261 = vrot.lane.b32.xlu2 %v11238_v54, %s12232_s30 }
 0x79d   : > { %v9803_v55 = vpop.f32.mrf.mxu3  ;;  %v16276_v8 = vadd.f32 %v9790_v3, %v16184_v1  ;;  %v9766_v24 = vpop.f32.mrf.mxu0 }
 0x79e   : > { %v16279_v59 = vadd.f32 %v9803_v55, %v16187_v0  ;;  %v9779_v28 = vpop.f32.mrf.mxu1  ;;  %v10790_v12 = vpop.permute.xlu2 %10789 }
 0x79f   : > { %v10807_v50 = vsel %vm10803_vm5, %v10788_v32, %v10790_v12  ;;  %v10794_v25 = vpop.permute.xlu1 %10793  ;;  %v10808_v43 = vsel %vm10803_vm5, %v10790_v12, %v10792_v13 }
 0x7a0   : > { %v10809_v2 = vsel %vm10803_vm5, %v10792_v13, %v10794_v25  ;;  %v10830_v62 = vsel %vm239_vm1, %v10808_v43, 0 }
 0x7a1   : > { %v10833_v22 = vsel %vm239_vm1, %v10809_v2, 0 }
 0x7a4   : > { %v9792_v44 = vpop.f32.mrf.mxu2  ;;  %11267 = vrot.lane.b32.xlu2 %v11245_v18, %s12232_s30 }
 0x7a5   : > { %v9805_v56 = vpop.f32.mrf.mxu3  ;;  %v9920_v17 = vpop.f32.mrf.mxu0 }
 0x7a6   : > { %v9933_v35 = vpop.f32.mrf.mxu1  ;;  %v16285_v1 = vadd.f32 %v9920_v17, %v16207_v57  ;;  %v10824_v57 = vsel %vm239_vm1, %v10806_v60, 0 }
 0x7a7   : > { %v16288_v0 = vadd.f32 %v9933_v35, %v16210_v41  ;;  %v10827_v41 = vsel %vm239_vm1, %v10807_v50, 0  ;;  %v10796_v23 = vpop.permute.xlu2 %10795 }
 0x7a8   : > { %12073 = vmatmul.msk.bf16.vlgmr.msrb.gmra.mxu0 %vm235_vm2, %v16260_v48  ;;  %12074 = vmatmul.msk.bf16.vlgmr.msrb.gmra.mxu1 %vm235_vm2, %v16260_v48  ;;  %v10810_v52 = vsel %vm10803_vm5, %v10794_v25, %v10796_v23 }
 0x7a9   : > { %12075 = vmatmul.msk.bf16.vlgmr.msrb.gmra.mxu2 %vm235_vm2, %v16260_v48  ;;  %10854 = vmatpush.bf16.msrb.mxu0 %v10818_v45  ;;  %v10836_v53 = vsel %vm239_vm1, %v10810_v52, 0 }
 0x7aa   : > { %12076 = vmatmul.msk.bf16.vlgmr.msrb.gmra.mxu3 %vm235_vm2, %v16260_v48  ;;  %10867 = vmatpush.bf16.msrb.mxu1 %v10821_v51 }
 0x7ab   : > { %10880 = vmatpush.bf16.msrb.mxu2 %v10824_v57  ;;  %10893 = vmatpush.bf16.msrb.mxu3 %v10827_v41 }
 0x7ac   : > { %v9946_v29 = vpop.f32.mrf.mxu2 }
 0x7ad   : > { %v9959_v6 = vpop.f32.mrf.mxu3  ;;  %v16306_v19 = vadd.f32 %v9946_v29, %v16218_v63  ;;  %v9922_v26 = vpop.f32.mrf.mxu0 }
 0x7ae   : > { %v16309_v20 = vadd.f32 %v9959_v6, %v16221_v49  ;;  %v9935_v42 = vpop.f32.mrf.mxu1 }
 0x7b3   : > { %v10798_v5 = vpop.permute.xlu0 %10797  ;;  %v10800_v4 = vpop.permute.xlu1 %10799 }
 0x7b4   : > { %v9948_v38 = vpop.f32.mrf.mxu2  ;;  %v10811_v46 = vsel %vm10803_vm5, %v10796_v23, %v10798_v5  ;;  %v10812_v3 = vsel %vm10803_vm5, %v10798_v5, %v10800_v4 }
 0x7b5   : > { %v9961_v9 = vpop.f32.mrf.mxu3  ;;  %v9972_v10 = vpop.f32.mrf.mxu0  ;;  %v10842_v56 = vsel %vm239_vm1, %v10812_v3, 0 }
 0x7b6   : > { %v9985_v39 = vpop.f32.mrf.mxu1  ;;  %v16315_v63 = vadd.f32 %v9972_v10, %v16239_v21  ;;  %v10839_v21 = vsel %vm239_vm1, %v10811_v46, 0 }
 0x7b7   : > { %v16318_v49 = vadd.f32 %v9985_v39, %v16242_v58  ;;  %v10802_v58 = vpop.permute.xlu2 %10801 }
 0x7b8   : > { %12077 = vmatmul.msk.bf16.vlgmr.msra.gmra.mxu0 %vm235_vm2, %v16260_v48  ;;  %12078 = vmatmul.msk.bf16.vlgmr.msra.gmra.mxu1 %vm235_vm2, %v16260_v48  ;;  %v10813_v55 = vsel %vm10803_vm5, %v10800_v4, %v10802_v58 }
 0x7b9   : > { %12079 = vmatmul.msk.bf16.vlgmr.msra.gmra.mxu2 %vm235_vm2, %v16260_v48  ;;  %10906 = vmatpush.bf16.msra.mxu0 %v10830_v62  ;;  %v10845_v37 = vsel %vm239_vm1, %v10813_v55, 0 }
 0x7ba   : > { %12080 = vmatmul.msk.bf16.vlgmr.msra.gmra.mxu3 %vm235_vm2, %v16260_v48  ;;  %10919 = vmatpush.bf16.msra.mxu1 %v10833_v22 }
 0x7bb   : > { %10932 = vmatpush.bf16.msra.mxu2 %v10836_v53  ;;  %10945 = vmatpush.bf16.msra.mxu3 %v10839_v21 }
 0x7bc   : > { %v9998_v30 = vpop.f32.mrf.mxu2 }
 0x7bd   : > { %v10011_v31 = vpop.f32.mrf.mxu3  ;;  %v16334_v16 = vadd.f32 %v9998_v30, %v16252_v34  ;;  %v9974_v61 = vpop.f32.mrf.mxu0  ;;  %v16344_v34 = vld [vmem:[%s16558_s1 + $0xb8] sm:$0xf] }
 0x7be   : > { %v16337_v7 = vadd.f32 %v10011_v31, %v16255_v15  ;;  %v9987_v36 = vpop.f32.mrf.mxu1  ;;  %v11016_v33 = vpop.permute.xlu0 %11015 }
 0x7bf   : > { %v11020_v27 = vpop.permute.xlu2 %11019  ;;  %v11018_v47 = vpop.permute.xlu1 %11017 }
 0x7c0   : > { %v11038_v15 = vsel %vm11037_vm6, %v11016_v33, %v11018_v47  ;;  %v11039_v54 = vsel %vm11037_vm6, %v11018_v47, %v11020_v27  ;;  %v16413_v33 = vld [vmem:[%s16558_s1 + $0xbc] sm:$0xf] }
 0x7c1   : > { %v11052_v14 = vsel %vm239_vm1, %v11038_v15, 0  ;;  %v11055_v17 = vsel %vm239_vm1, %v11039_v54, 0 }
 0x7c4   : > { %v10000_v48 = vpop.f32.mrf.mxu2 }
 0x7c5   : > { %v10013_v40 = vpop.f32.mrf.mxu3  ;;  %v10024_v24 = vpop.f32.mrf.mxu0 }
 0x7c6   : > { %v10037_v28 = vpop.f32.mrf.mxu1  ;;  %v16349_v11 = vadd.f32 %v10024_v24, %v16276_v8  ;;  %v11022_v35 = vpop.permute.xlu0 %11021 }
 0x7c7   : > { %v16352_v44 = vadd.f32 %v10037_v28, %v16279_v59  ;;  %v11024_v60 = vpop.permute.xlu1 %11023  ;;  %v11026_v50 = vpop.permute.xlu2 %11025  ;;  %v11040_v13 = vsel %vm11037_vm6, %v11020_v27, %v11022_v35 }
 0x7c8   : > { %12082 = vmatmul.msk.bf16.vlgmr.msrb.gmra.mxu0 %vm235_vm2, %v16344_v34  ;;  %12083 = vmatmul.msk.bf16.vlgmr.msrb.gmra.mxu1 %vm235_vm2, %v16344_v34  ;;  %v11041_v29 = vsel %vm11037_vm6, %v11022_v35, %v11024_v60  ;;  %v11042_v42 = vsel %vm11037_vm6, %v11024_v60, %v11026_v50  ;;  %v11058_v23 = vsel %vm239_vm1, %v11040_v13, 0 }
 0x7c9   : > { %12084 = vmatmul.msk.bf16.vlgmr.msrb.gmra.mxu2 %vm235_vm2, %v16344_v34  ;;  %10958 = vmatpush.bf16.msrb.mxu0 %v10842_v56  ;;  %v11061_v38 = vsel %vm239_vm1, %v11041_v29, 0  ;;  %v11064_v9 = vsel %vm239_vm1, %v11042_v42, 0 }
 0x7ca   : > { %12085 = vmatmul.msk.bf16.vlgmr.msrb.gmra.mxu3 %vm235_vm2, %v16344_v34  ;;  %10971 = vmatpush.bf16.msrb.mxu1 %v10845_v37 }
 0x7cb   : > { %11088 = vmatpush.bf16.msrb.mxu2 %v11052_v14  ;;  %11101 = vmatpush.bf16.msrb.mxu3 %v11055_v17 }
 0x7cc   : > { %v10154_v8 = vpop.f32.mrf.mxu2 }
 0x7cd   : > { %v10167_v59 = vpop.f32.mrf.mxu3  ;;  %v16367_v32 = vadd.f32 %v10154_v8, %v16285_v1  ;;  %v10026_v45 = vpop.f32.mrf.mxu0 }
 0x7ce   : > { %v16370_v12 = vadd.f32 %v10167_v59, %v16288_v0  ;;  %v10039_v51 = vpop.f32.mrf.mxu1  ;;  %v11028_v57 = vpop.permute.xlu0 %11027 }
 0x7cf   : > { %v11043_v1 = vsel %vm11037_vm6, %v11026_v50, %v11028_v57  ;;  %v11030_v2 = vpop.permute.xlu1 %11029  ;;  %v11032_v62 = vpop.permute.xlu2 %11031 }
 0x7d0   : > { %v11067_v43 = vsel %vm239_vm1, %v11043_v1, 0  ;;  %v11044_v4 = vsel %vm11037_vm6, %v11028_v57, %v11030_v2  ;;  %v11045_v58 = vsel %vm11037_vm6, %v11030_v2, %v11032_v62 }
 0x7d1   : > { %v11070_v27 = vsel %vm239_vm1, %v11044_v4, 0  ;;  %v11073_v47 = vsel %vm239_vm1, %v11045_v58, 0 }
 0x7d4   : > { %v10156_v41 = vpop.f32.mrf.mxu2 }
 0x7d5   : > { %v10169_v18 = vpop.f32.mrf.mxu3  ;;  %v10180_v6 = vpop.f32.mrf.mxu0 }
 0x7d6   : > { %v10193_v26 = vpop.f32.mrf.mxu1  ;;  %v16377_v0 = vadd.f32 %v10180_v6, %v16306_v19 }
 0x7d7   : > { %v16380_v25 = vadd.f32 %v10193_v26, %v16309_v20  ;;  %v11036_v46 = vpop.permute.xlu1 %11035 }
 0x7d8   : > { %12086 = vmatmul.msk.bf16.vlgmr.msra.gmra.mxu0 %vm235_vm2, %v16344_v34  ;;  %12087 = vmatmul.msk.bf16.vlgmr.msra.gmra.mxu1 %vm235_vm2, %v16344_v34 }
 0x7d9   : > { %12088 = vmatmul.msk.bf16.vlgmr.msra.gmra.mxu2 %vm235_vm2, %v16344_v34  ;;  %11114 = vmatpush.bf16.msra.mxu0 %v11058_v23  ;;  %v11034_v22 = vpop.permute.xlu0 %11033 }
 0x7da   : > { %12089 = vmatmul.msk.bf16.vlgmr.msra.gmra.mxu3 %vm235_vm2, %v16344_v34  ;;  %11127 = vmatpush.bf16.msra.mxu1 %v11061_v38  ;;  %v11046_v61 = vsel %vm11037_vm6, %v11032_v62, %v11034_v22 }
 0x7db   : > { %11140 = vmatpush.bf16.msra.mxu2 %v11064_v9  ;;  %11153 = vmatpush.bf16.msra.mxu3 %v11067_v43 }
 0x7dc   : > { %v10206_v19 = vpop.f32.mrf.mxu2 }
 0x7dd   : > { %v10219_v20 = vpop.f32.mrf.mxu3  ;;  %v16395_v10 = vadd.f32 %v10206_v19, %v16315_v63  ;;  %v10182_v52 = vpop.f32.mrf.mxu0  ;;  %v11047_v63 = vsel %vm11037_vm6, %v11034_v22, %v11036_v46 }
 0x7de   : > { %v16398_v39 = vadd.f32 %v10219_v20, %v16318_v49  ;;  %v10195_v5 = vpop.f32.mrf.mxu1 }
 0x7df   : > { %v12233_v5 = vmov 0  }
 0x7e0   : > { %12175 = vset.pattern.permute.xlu1 %v12233_v5  ;;  %12176 = vset.pattern.permute.xlu0 %v12233_v5 }
 0x7e1   : > { %v11252_v15 = vpop.permute.xlu0 %11251  ;;  %v11254_v54 = vpop.permute.xlu1 %11253 }
 0x7e2   : > { %v11273_v35 = vsel %vm11271_vm7, %v11252_v15, %v11254_v54 }
 0x7e3   : > { %v11289_v50 = vsel %vm239_vm1, %v11273_v35, 0 }
 0x7e4   : > { %v10208_v53 = vpop.f32.mrf.mxu2 }
 0x7e5   : > { %v10221_v21 = vpop.f32.mrf.mxu3  ;;  %v10232_v30 = vpop.f32.mrf.mxu0 }
 0x7e6   : > { %v10245_v31 = vpop.f32.mrf.mxu1  ;;  %v16405_v49 = vadd.f32 %v10232_v30, %v16334_v16  ;;  %v11076_v16 = vsel %vm239_vm1, %v11046_v61, 0  ;;  %v11250_v48 = vpop.permute.xlu2 %11249 }
 0x7e7   : > { %v16408_v36 = vadd.f32 %v10245_v31, %v16337_v7  ;;  %v11079_v7 = vsel %vm239_vm1, %v11047_v63, 0  ;;  %v11272_v17 = vsel %vm11271_vm7, %v11250_v48, %v11252_v15 }
 0x7e8   : > { %12090 = vmatmul.msk.bf16.vlgmr.msrb.gmra.mxu0 %vm235_vm2, %v16344_v34  ;;  %12091 = vmatmul.msk.bf16.vlgmr.msrb.gmra.mxu1 %vm235_vm2, %v16344_v34  ;;  %v11286_v60 = vsel %vm239_vm1, %v11272_v17, 0 }
 0x7e9   : > { %12093 = vmatmul.msk.bf16.vlgmr.msrb.gmra.mxu2 %vm235_vm2, %v16413_v33  ;;  %11166 = vmatpush.bf16.msrb.mxu0 %v11070_v27  ;;  %v11258_v51 = vpop.permute.xlu0 %11257 }
 0x7ea   : > { %12094 = vmatmul.msk.bf16.vlgmr.msrb.gmra.mxu3 %vm235_vm2, %v16413_v33  ;;  %11179 = vmatpush.bf16.msrb.mxu1 %v11073_v47 }
 0x7eb   : > { %11192 = vmatpush.bf16.msrb.mxu2 %v11076_v16  ;;  %11205 = vmatpush.bf16.msrb.mxu3 %v11079_v7 }
 0x7ec   : > { %v10258_v40 = vpop.f32.mrf.mxu2 }
 0x7ed   : > { %v10271_v3 = vpop.f32.mrf.mxu3  ;;  %v16428_v55 = vadd.f32 %v10258_v40, %v16349_v11  ;;  %v10234_v28 = vpop.f32.mrf.mxu0 }
 0x7ee   : > { %v16431_v24 = vadd.f32 %v10271_v3, %v16352_v44  ;;  %v10247_v34 = vpop.f32.mrf.mxu1  ;;  %v11256_v56 = vpop.permute.xlu2 %11255  ;;  %v12103_v28 = vld [vmem:[%s16558_s1 + $0xc0] sm:$0xf] }
 0x7ef   : > { %v11274_v11 = vsel %vm11271_vm7, %v11254_v54, %v11256_v56  ;;  %v11275_v57 = vsel %vm11271_vm7, %v11256_v56, %v11258_v51 }
 0x7f0   : > { %v11292_v41 = vsel %vm239_vm1, %v11274_v11, 0 }
 0x7f4   : > { %v10260_v37 = vpop.f32.mrf.mxu2 }
 0x7f5   : > { %v10273_v14 = vpop.f32.mrf.mxu3  ;;  %v10388_v8 = vpop.f32.mrf.mxu0 }
 0x7f6   : > { %v10401_v59 = vpop.f32.mrf.mxu1  ;;  %v16437_v45 = vadd.f32 %v10388_v8, %v16367_v32  ;;  %v11295_v32 = vsel %vm239_vm1, %v11275_v57, 0  ;;  %v11262_v1 = vpop.permute.xlu2 %11261 }
 0x7f7   : > { %v16440_v44 = vadd.f32 %v10401_v59, %v16370_v12  ;;  %v11260_v12 = vpop.permute.xlu1 %11259 }
 0x7f8   : > { %12095 = vmatmul.msk.bf16.vlgmr.msra.gmra.mxu0 %vm235_vm2, %v16413_v33  ;;  %12096 = vmatmul.msk.bf16.vlgmr.msra.gmra.mxu1 %vm235_vm2, %v16413_v33  ;;  %v11276_v43 = vsel %vm11271_vm7, %v11258_v51, %v11260_v12  ;;  %v11277_v2 = vsel %vm11271_vm7, %v11260_v12, %v11262_v1 }
 0x7f9   : > { %12097 = vmatmul.msk.bf16.vlgmr.msra.gmra.mxu2 %vm235_vm2, %v16413_v33  ;;  %11322 = vmatpush.bf16.msra.mxu0 %v11286_v60  ;;  %v11298_v46 = vsel %vm239_vm1, %v11276_v43, 0  ;;  %v11301_v53 = vsel %vm239_vm1, %v11277_v2, 0 }
 0x7fa   : > { %12098 = vmatmul.msk.bf16.vlgmr.msra.gmra.mxu3 %vm235_vm2, %v16413_v33  ;;  %11335 = vmatpush.bf16.msra.mxu1 %v11289_v50 }
 0x7fb   : > { %11348 = vmatpush.bf16.msra.mxu2 %v11292_v41  ;;  %11361 = vmatpush.bf16.msra.mxu3 %v11295_v32 }
 0x7fc   : > { %v10414_v18 = vpop.f32.mrf.mxu2 }
 0x7fd   : > { %v10427_v13 = vpop.f32.mrf.mxu3  ;;  %v16456_v29 = vadd.f32 %v10414_v18, %v16377_v0  ;;  %v10390_v26 = vpop.f32.mrf.mxu0  ;;  %v11455_v0 = vld [vmem:[%s16559_s2] sm:$0xff] }
 0x7fe   : > { %v16459_v6 = vadd.f32 %v10427_v13, %v16380_v25  ;;  %v10403_v42 = vpop.f32.mrf.mxu1  ;;  %11458 = vperm.xlu1 %12175, %v11455_v0   ;;  %v11268_v27 = vpop.permute.xlu2 %11267 }
 0x802   : > { %v11264_v23 = vpop.permute.xlu0 %11263  ;;  %v11266_v22 = vpop.permute.xlu1 %11265 }
 0x803   : > { %v11278_v52 = vsel %vm11271_vm7, %v11262_v1, %v11264_v23  ;;  %v11279_v21 = vsel %vm11271_vm7, %v11264_v23, %v11266_v22  ;;  %v11280_v48 = vsel %vm11271_vm7, %v11266_v22, %v11268_v27 }
 0x804   : > { %v10416_v38 = vpop.f32.mrf.mxu2  ;;  %v11304_v4 = vsel %vm239_vm1, %v11278_v52, 0  ;;  %v11310_v34 = vsel %vm239_vm1, %v11280_v48, 0 }
 0x805   : > { %v10429_v9 = vpop.f32.mrf.mxu3  ;;  %v10440_v19 = vpop.f32.mrf.mxu0 }
 0x806   : > { %v10453_v20 = vpop.f32.mrf.mxu1  ;;  %v10513_v25 = vadd.f32 %v10440_v19, %v16395_v10  ;;  %v11307_v10 = vsel %vm239_vm1, %v11279_v21, 0 }
 0x807   : > { %v10514_v62 = vadd.f32 %v10453_v20, %v16398_v39 }
 0x808   : > { %12099 = vmatmul.msk.bf16.vlgmr.msrb.gmra.mxu0 %vm235_vm2, %v16413_v33  ;;  %12100 = vmatmul.msk.bf16.vlgmr.msrb.gmra.mxu1 %vm235_vm2, %v16413_v33 }
 0x809   : > { %12101 = vmatmul.msk.bf16.vlgmr.msrb.gmra.mxu2 %vm235_vm2, %v16413_v33  ;;  %11374 = vmatpush.bf16.msrb.mxu0 %v11298_v46 }
 0x80a   : > { %12102 = vmatmul.msk.bf16.vlgmr.msrb.gmra.mxu3 %vm235_vm2, %v16413_v33  ;;  %11387 = vmatpush.bf16.msrb.mxu1 %v11301_v53 }
 0x80b   : > { %11400 = vmatpush.bf16.msrb.mxu2 %v11304_v4  ;;  %11413 = vmatpush.bf16.msrb.mxu3 %v11307_v10 }
 0x80c   : > { %v10466_v39 = vpop.f32.mrf.mxu2 }
 0x80d   : > { %v10479_v58 = vpop.f32.mrf.mxu3  ;;  %v10515_v30 = vadd.f32 %v10466_v39, %v16405_v49  ;;  %v10442_v61 = vpop.f32.mrf.mxu0 }
 0x80e   : > { %v10516_v31 = vadd.f32 %v10479_v58, %v16408_v36  ;;  %v10455_v63 = vpop.f32.mrf.mxu1  ;;  %v11270_v47 = vpop.permute.xlu0 %11269 }
 0x80f   : > { %v11281_v33 = vsel %vm11271_vm7, %v11268_v27, %v11270_v47 }
 0x810   : > { %v11313_v15 = vsel %vm239_vm1, %v11281_v33, 0 }
 0x814   : > { %v10468_v16 = vpop.f32.mrf.mxu2 }
 0x815   : > { %v10481_v7 = vpop.f32.mrf.mxu3  ;;  %v10492_v40 = vpop.f32.mrf.mxu0 }
 0x816   : > { %v10505_v3 = vpop.f32.mrf.mxu1  ;;  %v10517_v49 = vadd.f32 %v10492_v40, %v16428_v55 }
 0x817   : > { %v10518_v36 = vadd.f32 %v10505_v3, %v16431_v24 }
 0x818   : > { %12104 = vmatmul.msk.bf16.vlgmr.msra.gmra.mxu0 %vm235_vm2, %v12103_v28  ;;  %12105 = vmatmul.msk.bf16.vlgmr.msra.gmra.mxu1 %vm235_vm2, %v12103_v28 }
 0x819   : > { %12106 = vmatmul.msk.bf16.vlgmr.msra.gmra.mxu2 %vm235_vm2, %v12103_v28  ;;  %11426 = vmatpush.bf16.msra.mxu0 %v11310_v34 }
 0x81a   : > { %12107 = vmatmul.msk.bf16.vlgmr.msra.gmra.mxu3 %vm235_vm2, %v12103_v28  ;;  %11439 = vmatpush.bf16.msra.mxu1 %v11313_v15 }
 0x81c   : > { %v10622_v54 = vpop.f32.mrf.mxu2 }
 0x81d   : > { %v10635_v56 = vpop.f32.mrf.mxu3  ;;  %v10743_v55 = vadd.f32 %v10622_v54, %v16437_v45  ;;  %v10494_v37 = vpop.f32.mrf.mxu0 }
 0x81e   : > { %v10744_v24 = vadd.f32 %v10635_v56, %v16440_v44  ;;  %v10507_v14 = vpop.f32.mrf.mxu1 }
 0x824   : > { %v10624_v17 = vpop.f32.mrf.mxu2 }
 0x825   : > { %v10637_v35 = vpop.f32.mrf.mxu3  ;;  %v10648_v8 = vpop.f32.mrf.mxu0 }
 0x826   : > { %v10661_v59 = vpop.f32.mrf.mxu1  ;;  %v10745_v11 = vadd.f32 %v10648_v8, %v16456_v29 }
 0x827   : > { %v10746_v51 = vadd.f32 %v10661_v59, %v16459_v6 }
 0x828   : > { %12108 = vmatmul.msk.bf16.vlgmr.msrb.gmra.mxu0 %vm235_vm2, %v12103_v28  ;;  %12109 = vmatmul.msk.bf16.vlgmr.msrb.gmra.mxu1 %vm235_vm2, %v12103_v28 }
 0x829   : > { %12110 = vmatmul.msk.bf16.vlgmr.msrb.gmra.mxu2 %vm235_vm2, %v12103_v28 }
 0x82a   : > { %12111 = vmatmul.msk.bf16.vlgmr.msrb.gmra.mxu3 %vm235_vm2, %v12103_v28 }
 0x82c   : > { %v10674_v45 = vpop.f32.mrf.mxu2 }
 0x82d   : > { %v10687_v44 = vpop.f32.mrf.mxu3  ;;  %v10747_v60 = vadd.f32 %v10674_v45, %v10513_v25  ;;  %v10650_v57 = vpop.f32.mrf.mxu0 }
 0x82e   : > { %v10748_v50 = vadd.f32 %v10687_v44, %v10514_v62  ;;  %v10663_v41 = vpop.f32.mrf.mxu1 }
 0x834   : > { %v10676_v32 = vpop.f32.mrf.mxu2 }
 0x835   : > { %v10689_v12 = vpop.f32.mrf.mxu3  ;;  %v10700_v18 = vpop.f32.mrf.mxu0 }
 0x836   : > { %v10713_v13 = vpop.f32.mrf.mxu1  ;;  %v10749_v29 = vadd.f32 %v10700_v18, %v10515_v30 }
 0x837   : > { %v10750_v6 = vadd.f32 %v10713_v13, %v10516_v31 }
 0x838   : > { %12112 = vmatmul.msk.bf16.vlgmr.msra.gmra.mxu0 %vm235_vm2, %v12103_v28  ;;  %12113 = vmatmul.msk.bf16.vlgmr.msra.gmra.mxu1 %vm235_vm2, %v12103_v28 }
 0x83c   : > { %v10726_v26 = vpop.f32.mrf.mxu2 }
 0x83d   : > { %v10739_v42 = vpop.f32.mrf.mxu3  ;;  %v10751_v1 = vadd.f32 %v10726_v26, %v10517_v49  ;;  %v10702_v38 = vpop.f32.mrf.mxu0 }
 0x83e   : > { %v10752_v23 = vadd.f32 %v10739_v42, %v10518_v36  ;;  %v10715_v9 = vpop.f32.mrf.mxu1 }
 0x844   : > { %v10728_v43 = vpop.f32.mrf.mxu2 }
 0x845   : > { %v10741_v2 = vpop.f32.mrf.mxu3  ;;  %v10856_v19 = vpop.f32.mrf.mxu0 }
 0x846   : > { %v10869_v20 = vpop.f32.mrf.mxu1  ;;  %v10977_v52 = vadd.f32 %v10856_v19, %v10743_v55 }
 0x847   : > { %v10978_v5 = vadd.f32 %v10869_v20, %v10744_v24 }
 0x84c   : > { %v10882_v0 = vpop.f32.mrf.mxu2 }
 0x84d   : > { %v10895_v25 = vpop.f32.mrf.mxu3  ;;  %v10979_v62 = vadd.f32 %v10882_v0, %v10745_v11  ;;  %v10858_v46 = vpop.f32.mrf.mxu0 }
 0x84e   : > { %v10980_v22 = vadd.f32 %v10895_v25, %v10746_v51  ;;  %v10871_v53 = vpop.f32.mrf.mxu1 }
 0x854   : > { %v10884_v21 = vpop.f32.mrf.mxu2 }
 0x855   : > { %v10897_v4 = vpop.f32.mrf.mxu3  ;;  %v10908_v10 = vpop.f32.mrf.mxu0 }
 0x856   : > { %v10921_v39 = vpop.f32.mrf.mxu1  ;;  %v16507_v58 = vadd.f32 %v10908_v10, %v10747_v60 }
 0x857   : > { %v16509_v30 = vadd.f32 %v10921_v39, %v10748_v50 }
 0x85c   : > { %v10934_v31 = vpop.f32.mrf.mxu2 }
 0x85d   : > { %v10947_v61 = vpop.f32.mrf.mxu3  ;;  %v16511_v63 = vadd.f32 %v10934_v31, %v10749_v29  ;;  %v10910_v47 = vpop.f32.mrf.mxu0 }
 0x85e   : > { %v16513_v27 = vadd.f32 %v10947_v61, %v10750_v6  ;;  %v10923_v16 = vpop.f32.mrf.mxu1 }
 0x864   : > { %v10936_v7 = vpop.f32.mrf.mxu2 }
 0x865   : > { %v10949_v48 = vpop.f32.mrf.mxu3  ;;  %v10960_v33 = vpop.f32.mrf.mxu0 }
 0x866   : > { %v10973_v40 = vpop.f32.mrf.mxu1  ;;  %v16515_v3 = vadd.f32 %v10960_v33, %v10751_v1 }
 0x867   : > { %v16517_v28 = vadd.f32 %v10973_v40, %v10752_v23 }
 0x86c   : > { %v11090_v49 = vpop.f32.mrf.mxu2 }
 0x86d   : > { %v11103_v36 = vpop.f32.mrf.mxu3  ;;  %v10962_v34 = vpop.f32.mrf.mxu0  ;;  %v11211_v41 = vadd.f32 %v11090_v49, %v10977_v52 }
 0x86e   : > { %v10975_v15 = vpop.f32.mrf.mxu1  ;;  %v11212_v32 = vadd.f32 %v11103_v36, %v10978_v5 }
 0x870   : > { %v16523_v57 = vpop.permute.xlu1 %11458 }
 0x874   : > { %v11092_v54 = vpop.f32.mrf.mxu2 }
 0x875   : > { %v11105_v56 = vpop.f32.mrf.mxu3  ;;  %v11116_v55 = vpop.f32.mrf.mxu0 }
 0x876   : > { %v11129_v24 = vpop.f32.mrf.mxu1  ;;  %v11213_v9 = vadd.f32 %v11116_v55, %v10979_v62 }
 0x877   : > { %v11214_v43 = vadd.f32 %v11129_v24, %v10980_v22 }
 0x87c   : > { %v11142_v37 = vpop.f32.mrf.mxu2 }
 0x87d   : > { %v11155_v14 = vpop.f32.mrf.mxu3  ;;  %v11118_v17 = vpop.f32.mrf.mxu0  ;;  %v11215_v31 = vadd.f32 %v11142_v37, %v16507_v58 }
 0x87e   : > { %v11131_v35 = vpop.f32.mrf.mxu1  ;;  %v11216_v61 = vadd.f32 %v11155_v14, %v16509_v30 }
 0x884   : > { %v11144_v8 = vpop.f32.mrf.mxu2 }
 0x885   : > { %v11157_v59 = vpop.f32.mrf.mxu3  ;;  %v11168_v11 = vpop.f32.mrf.mxu0 }
 0x886   : > { %v11181_v51 = vpop.f32.mrf.mxu1  ;;  %v11217_v58 = vadd.f32 %v11168_v11, %v16511_v63 }
 0x887   : > { %v11218_v30 = vadd.f32 %v11181_v51, %v16513_v27 }
 0x88c   : > { %v16519_v45 = vpop.f32.mrf.mxu2 }
 0x88d   : > { %v16521_v44 = vpop.f32.mrf.mxu3  ;;  %v11170_v60 = vpop.f32.mrf.mxu0  ;;  %v11219_v51 = vadd.f32 %v16519_v45, %v16515_v3 }
 0x88e   : > { %v11183_v50 = vpop.f32.mrf.mxu1 }
 0x894   : > { %v11196_v12 = vpop.f32.mrf.mxu2 }
 0x895   : > { %v11209_v18 = vpop.f32.mrf.mxu3  ;;  %v11324_v13 = vpop.f32.mrf.mxu0 }
 0x896   : > { %v11337_v29 = vpop.f32.mrf.mxu1  ;;  %v11445_v6 = vadd.f32 %v11324_v13, %v11211_v41 }
 0x897   : > { %v11446_v26 = vadd.f32 %v11337_v29, %v11212_v32  ;;  %v11220_v32 = vadd.f32 %v16521_v44, %v16517_v28 }
 0x898   : > { %v11461_v42 = vadd.f32 %v16523_v57, %v11445_v6 }
 0x899   : > { %v11462_v1 = vadd.f32 %v16523_v57, %v11446_v26 }
 0x89a   : > { %v11481_v23 = vmul.f32 0.2, %v11461_v42  ;;  %vm11471_vm1 = vcmp.gt.f32.partialorder %v11461_v42, 0.0 }
 0x89b   : > { %v11482_v38 = vmul.f32 0.2, %v11462_v1  ;;  %vm11472_vm2 = vcmp.gt.f32.partialorder %v11462_v1, 0.0 }
 0x89c   : > { %v11350_v2 = vpop.f32.mrf.mxu2  ;;  %v11491_v20 = vsel %vm11471_vm1, %v11461_v42, %v11481_v23 }
 0x89d   : > { %v11363_v19 = vpop.f32.mrf.mxu3  ;;  %v11492_v52 = vsel %vm11472_vm2, %v11462_v1, %v11482_v38  ;;  %v11447_v5 = vadd.f32 %v11350_v2, %v11213_v9  ;;  %v11326_v46 = vpop.f32.mrf.mxu0 }
 0x89e   : > { %v11448_v0 = vadd.f32 %v11363_v19, %v11214_v43  ;;  %v11501_v25 = vpack.c.bf16 %v11492_v52, %v11491_v20  ;;  %v11339_v53 = vpop.f32.mrf.mxu1 }
 0x89f   : > { %v11463_v21 = vadd.f32 %v16523_v57, %v11447_v5 }
 0x8a0   : > { %v11464_v62 = vadd.f32 %v16523_v57, %v11448_v0  ;;  %11506 = vst [vmem:[%s16531_s19] sm:$0xff] %v11501_v25 }
 0x8a1   : > { %vm11473_vm8 = vcmp.gt.f32.partialorder %v11463_v21, 0.0  ;;  %v11483_v22 = vmul.f32 0.2, %v11463_v21 }
 0x8a2   : > { %vm11474_vm9 = vcmp.gt.f32.partialorder %v11464_v62, 0.0  ;;  %v11484_v4 = vmul.f32 0.2, %v11464_v62 }
 0x8a3   : > { %v11493_v10 = vsel %vm11473_vm8, %v11463_v21, %v11483_v22 }
 0x8a4   : > { %v11494_v39 = vsel %vm11474_vm9, %v11464_v62, %v11484_v4  ;;  %v11352_v16 = vpop.f32.mrf.mxu2 }
 0x8a5   : > { %v11502_v47 = vpack.c.bf16 %v11494_v39, %v11493_v10  ;;  %v11365_v7 = vpop.f32.mrf.mxu3  ;;  %v11376_v48 = vpop.f32.mrf.mxu0 }
 0x8a6   : > { %v11389_v33 = vpop.f32.mrf.mxu1  ;;  %v11449_v40 = vadd.f32 %v11376_v48, %v11215_v31 }
 0x8a7   : > { %11507 = vst [vmem:[%s16531_s19 + $0x8] sm:$0xff] %v11502_v47  ;;  %v11450_v49 = vadd.f32 %v11389_v33, %v11216_v61 }
 0x8a8   : > { %v11465_v36 = vadd.f32 %v16523_v57, %v11449_v40 }
 0x8a9   : > { %v11466_v34 = vadd.f32 %v16523_v57, %v11450_v49 }
 0x8aa   : > { %vm11475_vm10 = vcmp.gt.f32.partialorder %v11465_v36, 0.0  ;;  %v11485_v15 = vmul.f32 0.2, %v11465_v36 }
 0x8ab   : > { %vm11476_vm11 = vcmp.gt.f32.partialorder %v11466_v34, 0.0  ;;  %v11486_v54 = vmul.f32 0.2, %v11466_v34 }
 0x8ac   : > { %v11495_v56 = vsel %vm11475_vm10, %v11465_v36, %v11485_v15  ;;  %v11402_v24 = vpop.f32.mrf.mxu2 }
 0x8ad   : > { %v11496_v55 = vsel %vm11476_vm11, %v11466_v34, %v11486_v54  ;;  %v11415_v37 = vpop.f32.mrf.mxu3  ;;  %v11451_v17 = vadd.f32 %v11402_v24, %v11217_v58  ;;  %v11378_v8 = vpop.f32.mrf.mxu0 }
 0x8ae   : > { %v11503_v14 = vpack.c.bf16 %v11496_v55, %v11495_v56  ;;  %v11452_v35 = vadd.f32 %v11415_v37, %v11218_v30  ;;  %v11391_v59 = vpop.f32.mrf.mxu1 }
 0x8af   : > { %v11467_v60 = vadd.f32 %v16523_v57, %v11451_v17 }
 0x8b0   : > { %11508 = vst [vmem:[%s16531_s19 + $0x10] sm:$0xff] %v11503_v14  ;;  %v11468_v50 = vadd.f32 %v16523_v57, %v11452_v35 }
 0x8b1   : > { %vm11477_vm12 = vcmp.gt.f32.partialorder %v11467_v60, 0.0  ;;  %v11487_v41 = vmul.f32 0.2, %v11467_v60 }
 0x8b2   : > { %vm11478_vm13 = vcmp.gt.f32.partialorder %v11468_v50, 0.0  ;;  %v11488_v63 = vmul.f32 0.2, %v11468_v50 }
 0x8b3   : > { %v11497_v27 = vsel %vm11477_vm12, %v11467_v60, %v11487_v41 }
 0x8b4   : > { %v11498_v11 = vsel %vm11478_vm13, %v11468_v50, %v11488_v63  ;;  %v11404_v18 = vpop.f32.mrf.mxu2 }
 0x8b5   : > { %v11504_v12 = vpack.c.bf16 %v11498_v11, %v11497_v27  ;;  %v11417_v13 = vpop.f32.mrf.mxu3  ;;  %v11428_v29 = vpop.f32.mrf.mxu0 }
 0x8b6   : > { %v11441_v6 = vpop.f32.mrf.mxu1  ;;  %v11453_v26 = vadd.f32 %v11428_v29, %v11219_v51 }
 0x8b7   : > { %11509 = vst [vmem:[%s16531_s19 + $0x18] sm:$0xff] %v11504_v12  ;;  %v11454_v42 = vadd.f32 %v11441_v6, %v11220_v32 }
 0x8b8   : > { %v11469_v1 = vadd.f32 %v16523_v57, %v11453_v26 }
 0x8b9   : > { %v11470_v23 = vadd.f32 %v16523_v57, %v11454_v42 }
 0x8ba   : > { %vm11479_vm0 = vcmp.gt.f32.partialorder %v11469_v1, 0.0  ;;  %v11489_v3 = vmul.f32 0.2, %v11469_v1 }
 0x8bb   : > { %vm11480_vm3 = vcmp.gt.f32.partialorder %v11470_v23, 0.0  ;;  %v11490_v45 = vmul.f32 0.2, %v11470_v23 }
 0x8bc   : > { %v11499_v28 = vsel %vm11479_vm0, %v11469_v1, %v11489_v3 }
 0x8bd   : > { %v11500_v44 = vsel %vm11480_vm3, %v11470_v23, %v11490_v45  ;;  %v11430_v9 = vpop.f32.mrf.mxu0 }
 0x8be   : > { %v11505_v38 = vpack.c.bf16 %v11500_v44, %v11499_v28  ;;  %v11443_v43 = vpop.f32.mrf.mxu1 }
 0x8c0   : > { %11513 = vst.msk [vmem:[%s16531_s19 + $0x20] sm:$0xff] %vm11512_vm4, %v11505_v38 }
 0x8c1 PF: > { %s13_s12 = sadd.s32 1, %s12183_s12  }
 0x8c2   : > { %p10_p4 = scmp.ge.s32.totalorder %s13_s12, 4  }
 0x8c4   :  { %12 = sbr.rel (!%p10_p4) target bundleno = 1 (0x1), region = 159 }

// kernel: forward.8
= control target key start
LH: loop header
LB: loop body
LE: loop exit
PB: predicated region body
PF: predicated region fallthrough
CT: control target
= control target key end

     0   :  { %s652_s12 = smov 0   ;;  %s727_s0 = inlined_call_operand.vmem [shape: bf16[2,64,90], index: 0, kind: input, shape index: {}]   ;;  %s728_s1 = inlined_call_operand.vmem [shape: bf16[4,32,64], index: 1, kind: input, shape index: {}]   ;;  %s729_s2 = inlined_call_operand.vmem [shape: f32[32,1], index: 2, kind: input, shape index: {}]   ;;  %s730_s3 = inlined_call_operand.vmem [shape: bf16[2,32,72], index: 3, kind: output, shape index: {}]  }
   0x1 LB: > { %s512_s13 = sadd.s32 4294967295, %s626_s12   ;;  %p516_p0 = scmp.ge.s32.totalorder %s626_s12, 1  ;;  %s626_s12 = sphi %s652_s12, %s13_s12  }
   0x2   : > { %p137_p1 = scmp.lt.s32.totalorder %s626_s12, 3 }
   0x4   : > { %p138_p2 = pnand %p516_p0, %p137_p1 }
   0x5   : > { %p161_p3 = scmp.lt.s32.totalorder (!%p138_p2), %s512_s13, 1  ;;  %s628_s18 = smov (!%p138_p2), 127  }
   0x6   : > { %141 = sbr.rel (%p138_p2) target bundleno = 325 (0x145), region = 32  ;;  %s629_s19 = smov (!%p138_p2), 119  }
   0x7   : > { %s630_s20 = smov (!%p138_p2), 118  }
   0xb   : > { %s732_s13 = smov (!%p161_p3, %s512_s13), 1  ;;  %vm231_vm0 = vcmask 523264   ;;  %v597_v5 = vld [vmem:[%s728_s1] sm:$0xff]  ;;  %v598_v10 = vld [vmem:[%s728_s1 + $0x8] sm:$0xff]  ;;  %v631_v15 = vmov 0   ;;  %v410_v17 = vld [vmem:[%s729_s2 + $0x10] sm:$0xff] }
   0xc   : > { %s591_s14 = sshll.u32 %s732_s13, 5  ;;  %v408_v14 = vld [vmem:[%s729_s2] sm:$0xff]  ;;  %617 = vset.pattern.permute.xlu0 %v631_v15  ;;  %v409_v16 = vld [vmem:[%s729_s2 + $0x8] sm:$0xff]  ;;  %v599_v18 = vld [vmem:[%s728_s1 + $0x10] sm:$0xff]  ;;  %618 = vset.pattern.permute.xlu1 %v631_v15  ;;  %vm452_vm2 = vcmask 584704  }
   0xd   : > { %s165_s17 = scalar_lea.vmem %s727_s0, %s591_s14  ;;  %619 = vset.pattern.permute.xlu2 %v631_v15  ;;  %v411_v21 = vld [vmem:[%s729_s2 + $0x18] sm:$0xff]  ;;  %v601_v24 = vld [vmem:[%s728_s1 + $0x20] sm:$0xff]  ;;  %v603_v25 = vld [vmem:[%s728_s1 + $0x30] sm:$0xff] }
   0xe   : > { %v596_v0 = vld [vmem:[%s165_s17 + $0x18] sm:$0xff]  ;;  %v595_v1 = vld [vmem:[%s165_s17 + $0x10] sm:$0xff]  ;;  %v594_v2 = vld [vmem:[%s165_s17 + $0x8] sm:$0xff] }
   0xf   : > { %225 = vrot.lane.b32.xlu1 %v596_v0, %s628_s18  ;;  %317 = vrot.lane.b32.xlu0 %v596_v0, %s629_s19  ;;  %v593_v3 = vld [vmem:[%s165_s17] sm:$0xff]  ;;  %v600_v26 = vld [vmem:[%s728_s1 + $0x18] sm:$0xff] }
  0x10   : > { %371 = vrot.lane.b32.xlu2 %v595_v1, %s630_s20  ;;  %281 = vmatpush.bf16.msra.mxu1 %v596_v0  ;;  %v602_v27 = vld [vmem:[%s728_s1 + $0x28] sm:$0xff]  ;;  %v604_v28 = vld [vmem:[%s728_s1 + $0x38] sm:$0xff] }
  0x14   : > { %282 = vmatpush.bf16.msra.mxu1 %v595_v1 }
  0x17   : > { %373 = vrot.lane.b32.xlu0 %v596_v0, %s630_s20  ;;  %315 = vrot.lane.b32.xlu1 %v595_v1, %s629_s19 }
  0x18   : > { %223 = vrot.lane.b32.xlu2 %v595_v1, %s628_s18  ;;  %283 = vmatpush.bf16.msra.mxu1 %v594_v2 }
  0x1c   : > { %284 = vmatpush.bf16.msra.mxu1 %v593_v3 }
  0x1f   : > { %369 = vrot.lane.b32.xlu1 %v594_v2, %s630_s20  ;;  %313 = vrot.lane.b32.xlu0 %v594_v2, %s629_s19 }
  0x20   : > { %221 = vrot.lane.b32.xlu2 %v594_v2, %s628_s18  ;;  %559 = vmatmul.msk.bf16.vlgmr.msra.gmra.mxu1 %vm231_vm0, %v597_v5 }
  0x27   : > { %367 = vrot.lane.b32.xlu1 %v593_v3, %s630_s20  ;;  %311 = vrot.lane.b32.xlu0 %v593_v3, %s629_s19  ;;  %s592_s20 = sshll.u32 %s732_s13, 4 }
  0x28   : > { %219 = vrot.lane.b32.xlu2 %v593_v3, %s628_s18  ;;  %s714_s23 = scalar_lea.vmem %s730_s3, %s592_s20 }
  0x2f   : > { %414 = vperm.xlu0 %617, %v408_v14   ;;  %419 = vperm.xlu1 %618, %v409_v16  }
  0x30   : > { %560 = vmatmul.msk.bf16.gmra.mxu1 %vm231_vm0, %v598_v10  ;;  %424 = vperm.xlu2 %619, %v410_v17  }
  0x37   : > { %429 = vperm.xlu1 %618, %v411_v21  }
  0x6a   : > { %v372_v4 = vpop.permute.xlu2 %371 }
  0x72   : > { %v224_v6 = vpop.permute.xlu2 %223 }
  0x7a   : > { %v222_v9 = vpop.permute.xlu2 %221 }
  0x81   : > { %v226_v7 = vpop.permute.xlu1 %225  ;;  %v318_v8 = vpop.permute.xlu0 %317 }
  0x82   : > { %333 = vmatpush.bf16.msra.mxu2 %v318_v8  ;;  %242 = vmatpush.bf16.msra.mxu0 %v226_v7  ;;  %v220_v13 = vpop.permute.xlu2 %219 }
  0x86   : > { %243 = vmatpush.bf16.msra.mxu0 %v224_v6 }
  0x89   : > { %v374_v11 = vpop.permute.xlu0 %373  ;;  %v316_v12 = vpop.permute.xlu1 %315 }
  0x8a   : > { %389 = vmatpush.bf16.msra.mxu3 %v374_v11  ;;  %334 = vmatpush.bf16.msra.mxu2 %v316_v12  ;;  %v425_v59 = vpop.permute.xlu2 %424 }
  0x8b   : > { %244 = vmatpush.bf16.msra.mxu0 %v222_v9 }
  0x8e   : > { %390 = vmatpush.bf16.msra.mxu3 %v372_v4 }
  0x8f   : > { %245 = vmatpush.bf16.msra.mxu0 %v220_v13 }
  0x91   : > { %v370_v19 = vpop.permute.xlu1 %369  ;;  %v314_v20 = vpop.permute.xlu0 %313 }
  0x92   : > { %335 = vmatpush.bf16.msra.mxu2 %v314_v20  ;;  %391 = vmatpush.bf16.msra.mxu3 %v370_v19 }
  0x93   : > { %549 = vmatmul.msk.bf16.vlgmr.msra.gmra.mxu0 %vm231_vm0, %v599_v18 }
  0x99   : > { %v368_v22 = vpop.permute.xlu1 %367  ;;  %v312_v23 = vpop.permute.xlu0 %311 }
  0x9a   : > { %336 = vmatpush.bf16.msra.mxu2 %v312_v23  ;;  %392 = vmatpush.bf16.msra.mxu3 %v368_v22 }
  0x9d   : > { %573 = vmatmul.msk.bf16.vlgmr.msra.gmra.mxu2 %vm231_vm0, %v601_v24  ;;  %587 = vmatmul.msk.bf16.vlgmr.msra.gmra.mxu3 %vm231_vm0, %v603_v25  ;;  %v286_v30 = vpop.f32.mrf.mxu1 }
  0xa1   : > { %v415_v37 = vpop.permute.xlu0 %414  ;;  %v420_v49 = vpop.permute.xlu1 %419 }
  0xa3   : > { %550 = vmatmul.msk.bf16.gmra.mxu0 %vm231_vm0, %v600_v26 }
  0xa5   : > { %v288_v33 = vpop.f32.mrf.mxu1 }
  0xa9   : > { %v430_v8 = vpop.permute.xlu1 %429 }
  0xad   : > { %574 = vmatmul.msk.bf16.gmra.mxu2 %vm231_vm0, %v602_v27  ;;  %588 = vmatmul.msk.bf16.gmra.mxu3 %vm231_vm0, %v604_v28  ;;  %v291_v45 = vpop.f32.mrf.mxu1 }
  0xb5   : > { %v293_v62 = vpop.f32.mrf.mxu1 }
 0x110   : > { %v247_v29 = vpop.f32.mrf.mxu0 }
 0x111   : > { %v287_v31 = vadd.f32 %v286_v30, %v247_v29 }
 0x118   : > { %v249_v32 = vpop.f32.mrf.mxu0 }
 0x119   : > { %v289_v40 = vadd.f32 %v288_v33, %v249_v32 }
 0x120   : > { %v338_v34 = vpop.f32.mrf.mxu2  ;;  %v394_v35 = vpop.f32.mrf.mxu3 }
 0x121   : > { %v348_v36 = vadd.f32 %v338_v34, %v287_v31  ;;  %v252_v48 = vpop.f32.mrf.mxu0 }
 0x122   : > { %v292_v51 = vadd.f32 %v291_v45, %v252_v48 }
 0x123   : > { %v404_v38 = vadd.f32 %v394_v35, %v348_v36 }
 0x125   : > { %v432_v39 = vadd.f32 %v415_v37, %v404_v38 }
 0x127   : > { %vm436_vm1 = vcmp.gt.f32.partialorder %v432_v39, 0.0  ;;  %v440_v41 = vmul.f32 0.2, %v432_v39 }
 0x128   : > { %v340_v42 = vpop.f32.mrf.mxu2  ;;  %v396_v43 = vpop.f32.mrf.mxu3 }
 0x129   : > { %v444_v44 = vsel %vm436_vm1, %v432_v39, %v440_v41  ;;  %v349_v46 = vadd.f32 %v340_v42, %v289_v40  ;;  %v254_v61 = vpop.f32.mrf.mxu0 }
 0x12a   : > { %v448_v47 = vpack.c.bf16 %v444_v44, %v444_v44  ;;  %v294_v0 = vadd.f32 %v293_v62, %v254_v61 }
 0x12b   : > { %v405_v50 = vadd.f32 %v396_v43, %v349_v46 }
 0x12c   : > { %453 = vst.msk [vmem:[%s714_s23] sm:$0xf] %vm452_vm2, %v448_v47 }
 0x12d   : > { %v433_v52 = vadd.f32 %v420_v49, %v405_v50 }
 0x12f   : > { %vm437_vm3 = vcmp.gt.f32.partialorder %v433_v52, 0.0  ;;  %v441_v53 = vmul.f32 0.2, %v433_v52 }
 0x130   : > { %v343_v54 = vpop.f32.mrf.mxu2  ;;  %v399_v55 = vpop.f32.mrf.mxu3 }
 0x131   : > { %v445_v56 = vsel %vm437_vm3, %v433_v52, %v441_v53  ;;  %v350_v57 = vadd.f32 %v343_v54, %v292_v51 }
 0x132   : > { %v449_v58 = vpack.c.bf16 %v445_v56, %v445_v56 }
 0x133   : > { %v406_v60 = vadd.f32 %v399_v55, %v350_v57 }
 0x134   : > { %454 = vst.msk [vmem:[%s714_s23 + $0x4] sm:$0xf] %vm452_vm2, %v449_v58 }
 0x135   : > { %v434_v63 = vadd.f32 %v425_v59, %v406_v60 }
 0x137   : > { %vm438_vm4 = vcmp.gt.f32.partialorder %v434_v63, 0.0  ;;  %v442_v1 = vmul.f32 0.2, %v434_v63 }
 0x138   : > { %v345_v2 = vpop.f32.mrf.mxu2  ;;  %v401_v6 = vpop.f32.mrf.mxu3 }
 0x139   : > { %v446_v3 = vsel %vm438_vm4, %v434_v63, %v442_v1  ;;  %v351_v4 = vadd.f32 %v345_v2, %v294_v0 }
 0x13a   : > { %v450_v5 = vpack.c.bf16 %v446_v3, %v446_v3 }
 0x13b   : > { %v407_v7 = vadd.f32 %v401_v6, %v351_v4 }
 0x13c   : > { %455 = vst.msk [vmem:[%s714_s23 + $0x8] sm:$0xf] %vm452_vm2, %v450_v5 }
 0x13d   : > { %v435_v9 = vadd.f32 %v430_v8, %v407_v7 }
 0x13f   : > { %vm439_vm5 = vcmp.gt.f32.partialorder %v435_v9, 0.0  ;;  %v443_v10 = vmul.f32 0.2, %v435_v9 }
 0x141   : > { %v447_v11 = vsel %vm439_vm5, %v435_v9, %v443_v10 }
 0x142   : > { %v451_v12 = vpack.c.bf16 %v447_v11, %v447_v11 }
 0x144   : > { %456 = vst.msk [vmem:[%s714_s23 + $0xc] sm:$0xf] %vm452_vm2, %v451_v12 }
 0x145 PF: > { %s13_s12 = sadd.s32 1, %s626_s12  }
 0x146   : > { %p10_p4 = scmp.ge.s32.totalorder %s13_s12, 4  }
 0x148   :  { %12 = sbr.rel (!%p10_p4) target bundleno = 1 (0x1), region = 65 }

// kernel: forward.9
= control target key start
LH: loop header
LB: loop body
LE: loop exit
PB: predicated region body
PF: predicated region fallthrough
CT: control target
= control target key end

     0   :  { %s714_s12 = smov 0   ;;  %s805_s0 = inlined_call_operand.vmem [shape: bf16[2,128,30], index: 0, kind: input, shape index: {}]   ;;  %s806_s1 = inlined_call_operand.vmem [shape: bf16[4,32,128], index: 1, kind: input, shape index: {}]   ;;  %s807_s2 = inlined_call_operand.vmem [shape: f32[32,1], index: 2, kind: input, shape index: {}]   ;;  %s808_s3 = inlined_call_operand.vmem [shape: bf16[2,32,20], index: 3, kind: output, shape index: {}]  }
   0x1 LB: > { %s562_s13 = sadd.s32 4294967295, %s688_s12   ;;  %p566_p0 = scmp.ge.s32.totalorder %s688_s12, 1  ;;  %s688_s12 = sphi %s714_s12, %s13_s12  }
   0x2   : > { %p137_p1 = scmp.lt.s32.totalorder %s688_s12, 3 }
   0x4   : > { %p138_p2 = pnand %p566_p0, %p137_p1 }
   0x5   : > { %p161_p3 = scmp.lt.s32.totalorder (!%p138_p2), %s562_s13, 1  ;;  %s690_s18 = smov (!%p138_p2), 127  }
   0x6   : > { %141 = sbr.rel (%p138_p2) target bundleno = 357 (0x165), region = 32  ;;  %s691_s19 = smov (!%p138_p2), 123  }
   0x7   : > { %s692_s20 = smov (!%p138_p2), 122  }
   0xb   : > { %s810_s13 = smov (!%p161_p3, %s562_s13), 1  ;;  %v659_v20 = vld [vmem:[%s806_s1] sm:$0xff]  ;;  %v661_v27 = vld [vmem:[%s806_s1 + $0x10] sm:$0xff]  ;;  %v660_v28 = vld [vmem:[%s806_s1 + $0x8] sm:$0xff]  ;;  %v693_v33 = vmov 0   ;;  %vm502_vm1 = vcmask 158720  }
   0xc   : > { %s649_s14 = sshll.u32 %s810_s13, 6  ;;  %v458_v31 = vld [vmem:[%s807_s2] sm:$0xff]  ;;  %v459_v32 = vld [vmem:[%s807_s2 + $0x8] sm:$0xff]  ;;  %679 = vset.pattern.permute.xlu0 %v693_v33  ;;  %680 = vset.pattern.permute.xlu1 %v693_v33  ;;  %v460_v34 = vld [vmem:[%s807_s2 + $0x10] sm:$0xff] }
   0xd   : > { %s165_s17 = scalar_lea.vmem %s805_s0, %s649_s14  ;;  %681 = vset.pattern.permute.xlu2 %v693_v33  ;;  %v662_v37 = vld [vmem:[%s806_s1 + $0x18] sm:$0xff]  ;;  %v663_v41 = vld [vmem:[%s806_s1 + $0x20] sm:$0xff]  ;;  %v665_v42 = vld [vmem:[%s806_s1 + $0x30] sm:$0xff] }
   0xe   : > { %v658_v0 = vld [vmem:[%s165_s17 + $0x38] sm:$0xff]  ;;  %v657_v1 = vld [vmem:[%s165_s17 + $0x30] sm:$0xff]  ;;  %v656_v2 = vld [vmem:[%s165_s17 + $0x28] sm:$0xff] }
   0xf   : > { %262 = vrot.lane.b32.xlu1 %v658_v0, %s690_s18  ;;  %361 = vrot.lane.b32.xlu0 %v658_v0, %s691_s19  ;;  %v655_v3 = vld [vmem:[%s165_s17 + $0x20] sm:$0xff]  ;;  %v654_v4 = vld [vmem:[%s165_s17 + $0x18] sm:$0xff] }
  0x10   : > { %423 = vrot.lane.b32.xlu2 %v657_v1, %s692_s20  ;;  %311 = vmatpush.bf16.msra.mxu1 %v658_v0  ;;  %v653_v5 = vld [vmem:[%s165_s17 + $0x10] sm:$0xff]  ;;  %v652_v6 = vld [vmem:[%s165_s17 + $0x8] sm:$0xff]  ;;  %v651_v7 = vld [vmem:[%s165_s17] sm:$0xff] }
  0x11   : > { %v461_v38 = vld [vmem:[%s807_s2 + $0x18] sm:$0xff]  ;;  %v664_v43 = vld [vmem:[%s806_s1 + $0x28] sm:$0xff] }
  0x12   : > { %v666_v44 = vld [vmem:[%s806_s1 + $0x38] sm:$0xff] }
  0x14   : > { %312 = vmatpush.bf16.msra.mxu1 %v657_v1 }
  0x17   : > { %425 = vrot.lane.b32.xlu0 %v658_v0, %s692_s20  ;;  %359 = vrot.lane.b32.xlu1 %v657_v1, %s691_s19 }
  0x18   : > { %260 = vrot.lane.b32.xlu2 %v657_v1, %s690_s18  ;;  %313 = vmatpush.bf16.msra.mxu1 %v656_v2 }
  0x1c   : > { %314 = vmatpush.bf16.msra.mxu1 %v655_v3 }
  0x1f   : > { %421 = vrot.lane.b32.xlu1 %v656_v2, %s692_s20  ;;  %357 = vrot.lane.b32.xlu0 %v656_v2, %s691_s19 }
  0x20   : > { %258 = vrot.lane.b32.xlu2 %v656_v2, %s690_s18  ;;  %315 = vmatpush.bf16.msra.mxu1 %v654_v4 }
  0x24   : > { %316 = vmatpush.bf16.msra.mxu1 %v653_v5 }
  0x27   : > { %419 = vrot.lane.b32.xlu1 %v655_v3, %s692_s20  ;;  %355 = vrot.lane.b32.xlu0 %v655_v3, %s691_s19 }
  0x28   : > { %256 = vrot.lane.b32.xlu2 %v655_v3, %s690_s18  ;;  %317 = vmatpush.bf16.msra.mxu1 %v652_v6 }
  0x2c   : > { %318 = vmatpush.bf16.msra.mxu1 %v651_v7 }
  0x2f   : > { %417 = vrot.lane.b32.xlu1 %v654_v4, %s692_s20  ;;  %353 = vrot.lane.b32.xlu0 %v654_v4, %s691_s19 }
  0x30   : > { %254 = vrot.lane.b32.xlu2 %v654_v4, %s690_s18  ;;  %319 = vmatmul.bf16.vlgmr.msra.gmra.mxu1 %v659_v20 }
  0x37   : > { %415 = vrot.lane.b32.xlu1 %v653_v5, %s692_s20  ;;  %351 = vrot.lane.b32.xlu0 %v653_v5, %s691_s19 }
  0x38   : > { %252 = vrot.lane.b32.xlu2 %v653_v5, %s690_s18 }
  0x3f   : > { %413 = vrot.lane.b32.xlu1 %v652_v6, %s692_s20  ;;  %349 = vrot.lane.b32.xlu0 %v652_v6, %s691_s19 }
  0x40   : > { %250 = vrot.lane.b32.xlu2 %v652_v6, %s690_s18  ;;  %324 = vmatmul.bf16.gmra.mxu1 %v660_v28 }
  0x47   : > { %411 = vrot.lane.b32.xlu1 %v651_v7, %s692_s20  ;;  %347 = vrot.lane.b32.xlu0 %v651_v7, %s691_s19  ;;  %s650_s20 = sshll.u32 %s810_s13, 4 }
  0x48   : > { %248 = vrot.lane.b32.xlu2 %v651_v7, %s690_s18  ;;  %s792_s23 = scalar_lea.vmem %s808_s3, %s650_s20 }
  0x4f   : > { %464 = vperm.xlu0 %679, %v458_v31   ;;  %469 = vperm.xlu1 %680, %v459_v32  }
  0x50   : > { %474 = vperm.xlu2 %681, %v460_v34  }
  0x57   : > { %479 = vperm.xlu1 %680, %v461_v38  }
  0x6a   : > { %v424_v8 = vpop.permute.xlu2 %423 }
  0x72   : > { %v261_v9 = vpop.permute.xlu2 %260 }
  0x7a   : > { %v259_v10 = vpop.permute.xlu2 %258 }
  0x81   : > { %v263_v11 = vpop.permute.xlu1 %262  ;;  %v362_v12 = vpop.permute.xlu0 %361 }
  0x82   : > { %371 = vmatpush.bf16.msra.mxu2 %v362_v12  ;;  %272 = vmatpush.bf16.msra.mxu0 %v263_v11  ;;  %v257_v13 = vpop.permute.xlu2 %256 }
  0x86   : > { %273 = vmatpush.bf16.msra.mxu0 %v261_v9 }
  0x89   : > { %v426_v14 = vpop.permute.xlu0 %425  ;;  %v360_v15 = vpop.permute.xlu1 %359 }
  0x8a   : > { %435 = vmatpush.bf16.msra.mxu3 %v426_v14  ;;  %372 = vmatpush.bf16.msra.mxu2 %v360_v15  ;;  %v255_v16 = vpop.permute.xlu2 %254 }
  0x8b   : > { %274 = vmatpush.bf16.msra.mxu0 %v259_v10 }
  0x8e   : > { %436 = vmatpush.bf16.msra.mxu3 %v424_v8 }
  0x8f   : > { %275 = vmatpush.bf16.msra.mxu0 %v257_v13 }
  0x91   : > { %v422_v17 = vpop.permute.xlu1 %421  ;;  %v358_v18 = vpop.permute.xlu0 %357 }
  0x92   : > { %373 = vmatpush.bf16.msra.mxu2 %v358_v18  ;;  %437 = vmatpush.bf16.msra.mxu3 %v422_v17  ;;  %v253_v19 = vpop.permute.xlu2 %252 }
  0x93   : > { %276 = vmatpush.bf16.msra.mxu0 %v255_v16 }
  0x97   : > { %277 = vmatpush.bf16.msra.mxu0 %v253_v19 }
  0x99   : > { %v420_v21 = vpop.permute.xlu1 %419  ;;  %v356_v22 = vpop.permute.xlu0 %355 }
  0x9a   : > { %374 = vmatpush.bf16.msra.mxu2 %v356_v22  ;;  %438 = vmatpush.bf16.msra.mxu3 %v420_v21  ;;  %v251_v23 = vpop.permute.xlu2 %250 }
  0x9b   : > { %278 = vmatpush.bf16.msra.mxu0 %v251_v23 }
  0xa1   : > { %v418_v24 = vpop.permute.xlu1 %417  ;;  %v354_v25 = vpop.permute.xlu0 %353 }
  0xa2   : > { %375 = vmatpush.bf16.msra.mxu2 %v354_v25  ;;  %439 = vmatpush.bf16.msra.mxu3 %v418_v24  ;;  %v249_v26 = vpop.permute.xlu2 %248 }
  0xa3   : > { %279 = vmatpush.bf16.msra.mxu0 %v249_v26 }
  0xa6   : > { %280 = vmatmul.bf16.vlgmr.msra.gmra.mxu0 %v661_v27 }
  0xa9   : > { %v416_v29 = vpop.permute.xlu1 %415  ;;  %v352_v30 = vpop.permute.xlu0 %351 }
  0xaa   : > { %376 = vmatpush.bf16.msra.mxu2 %v352_v30  ;;  %440 = vmatpush.bf16.msra.mxu3 %v416_v29  ;;  %v475_v11 = vpop.permute.xlu2 %474 }
  0xad   : > { %v320_v46 = vpop.f32.mrf.mxu1 }
  0xb1   : > { %v414_v35 = vpop.permute.xlu1 %413  ;;  %v350_v36 = vpop.permute.xlu0 %349 }
  0xb2   : > { %377 = vmatpush.bf16.msra.mxu2 %v350_v36  ;;  %441 = vmatpush.bf16.msra.mxu3 %v414_v35 }
  0xb5   : > { %v322_v49 = vpop.f32.mrf.mxu1 }
  0xb6   : > { %285 = vmatmul.bf16.gmra.mxu0 %v662_v37 }
  0xb9   : > { %v412_v39 = vpop.permute.xlu1 %411  ;;  %v348_v40 = vpop.permute.xlu0 %347 }
  0xba   : > { %378 = vmatpush.bf16.msra.mxu2 %v348_v40  ;;  %442 = vmatpush.bf16.msra.mxu3 %v412_v39 }
  0xbd   : > { %379 = vmatmul.bf16.vlgmr.msra.gmra.mxu2 %v663_v41  ;;  %443 = vmatmul.bf16.vlgmr.msra.gmra.mxu3 %v665_v42  ;;  %v325_v61 = vpop.f32.mrf.mxu1 }
  0xc1   : > { %v465_v53 = vpop.permute.xlu0 %464  ;;  %v470_v1 = vpop.permute.xlu1 %469 }
  0xc5   : > { %v327_v14 = vpop.f32.mrf.mxu1 }
  0xc9   : > { %v480_v24 = vpop.permute.xlu1 %479 }
  0xcd   : > { %384 = vmatmul.bf16.gmra.mxu2 %v664_v43  ;;  %448 = vmatmul.bf16.gmra.mxu3 %v666_v44 }
 0x123   : > { %v281_v45 = vpop.f32.mrf.mxu0 }
 0x124   : > { %v321_v47 = vadd.f32 %v320_v46, %v281_v45 }
 0x12b   : > { %v283_v48 = vpop.f32.mrf.mxu0 }
 0x12c   : > { %v323_v56 = vadd.f32 %v322_v49, %v283_v48 }
 0x133   : > { %v286_v0 = vpop.f32.mrf.mxu0 }
 0x134   : > { %v326_v3 = vadd.f32 %v325_v61, %v286_v0 }
 0x13b   : > { %v288_v13 = vpop.f32.mrf.mxu0 }
 0x13c   : > { %v328_v16 = vadd.f32 %v327_v14, %v288_v13 }
 0x140   : > { %v380_v50 = vpop.f32.mrf.mxu2  ;;  %v444_v51 = vpop.f32.mrf.mxu3 }
 0x141   : > { %v390_v52 = vadd.f32 %v380_v50, %v321_v47 }
 0x143   : > { %v454_v54 = vadd.f32 %v444_v51, %v390_v52 }
 0x145   : > { %v482_v55 = vadd.f32 %v465_v53, %v454_v54 }
 0x147   : > { %vm486_vm0 = vcmp.gt.f32.partialorder %v482_v55, 0.0  ;;  %v490_v57 = vmul.f32 0.2, %v482_v55 }
 0x148   : > { %v382_v58 = vpop.f32.mrf.mxu2  ;;  %v446_v59 = vpop.f32.mrf.mxu3 }
 0x149   : > { %v494_v60 = vsel %vm486_vm0, %v482_v55, %v490_v57  ;;  %v391_v62 = vadd.f32 %v382_v58, %v323_v56 }
 0x14a   : > { %v498_v63 = vpack.c.bf16 %v494_v60, %v494_v60 }
 0x14b   : > { %v455_v2 = vadd.f32 %v446_v59, %v391_v62 }
 0x14c   : > { %503 = vst.msk [vmem:[%s792_s23] sm:$0xf] %vm502_vm1, %v498_v63 }
 0x14d   : > { %v483_v4 = vadd.f32 %v470_v1, %v455_v2 }
 0x14f   : > { %vm487_vm2 = vcmp.gt.f32.partialorder %v483_v4, 0.0  ;;  %v491_v5 = vmul.f32 0.2, %v483_v4 }
 0x150   : > { %v385_v6 = vpop.f32.mrf.mxu2  ;;  %v449_v7 = vpop.f32.mrf.mxu3 }
 0x151   : > { %v495_v8 = vsel %vm487_vm2, %v483_v4, %v491_v5  ;;  %v392_v9 = vadd.f32 %v385_v6, %v326_v3 }
 0x152   : > { %v499_v10 = vpack.c.bf16 %v495_v8, %v495_v8 }
 0x153   : > { %v456_v12 = vadd.f32 %v449_v7, %v392_v9 }
 0x154   : > { %504 = vst.msk [vmem:[%s792_s23 + $0x4] sm:$0xf] %vm502_vm1, %v499_v10 }
 0x155   : > { %v484_v15 = vadd.f32 %v475_v11, %v456_v12 }
 0x157   : > { %vm488_vm3 = vcmp.gt.f32.partialorder %v484_v15, 0.0  ;;  %v492_v17 = vmul.f32 0.2, %v484_v15 }
 0x158   : > { %v387_v18 = vpop.f32.mrf.mxu2  ;;  %v451_v22 = vpop.f32.mrf.mxu3 }
 0x159   : > { %v496_v19 = vsel %vm488_vm3, %v484_v15, %v492_v17  ;;  %v393_v20 = vadd.f32 %v387_v18, %v328_v16 }
 0x15a   : > { %v500_v21 = vpack.c.bf16 %v496_v19, %v496_v19 }
 0x15b   : > { %v457_v23 = vadd.f32 %v451_v22, %v393_v20 }
 0x15c   : > { %505 = vst.msk [vmem:[%s792_s23 + $0x8] sm:$0xf] %vm502_vm1, %v500_v21 }
 0x15d   : > { %v485_v25 = vadd.f32 %v480_v24, %v457_v23 }
 0x15f   : > { %vm489_vm4 = vcmp.gt.f32.partialorder %v485_v25, 0.0  ;;  %v493_v26 = vmul.f32 0.2, %v485_v25 }
 0x161   : > { %v497_v27 = vsel %vm489_vm4, %v485_v25, %v493_v26 }
 0x162   : > { %v501_v28 = vpack.c.bf16 %v497_v27, %v497_v27 }
 0x164   : > { %506 = vst.msk [vmem:[%s792_s23 + $0xc] sm:$0xf] %vm502_vm1, %v501_v28 }
 0x165 PF: > { %s13_s12 = sadd.s32 1, %s688_s12  }
 0x166   : > { %p10_p4 = scmp.ge.s32.totalorder %s13_s12, 4  }
 0x168   :  { %12 = sbr.rel (!%p10_p4) target bundleno = 1 (0x1), region = 65 }

// kernel: forward.10
= control target key start
LH: loop header
LB: loop body
LE: loop exit
PB: predicated region body
PF: predicated region fallthrough
CT: control target
= control target key end

     0   :  { %s714_s12 = smov 0   ;;  %s805_s0 = inlined_call_operand.vmem [shape: bf16[2,128,12], index: 0, kind: input, shape index: {}]   ;;  %s806_s1 = inlined_call_operand.vmem [shape: bf16[4,32,128], index: 1, kind: input, shape index: {}]   ;;  %s807_s2 = inlined_call_operand.vmem [shape: f32[32,1], index: 2, kind: input, shape index: {}]   ;;  %s808_s3 = inlined_call_operand.vmem [shape: bf16[2,32,6], index: 3, kind: output, shape index: {}]  }
   0x1 LB: > { %s562_s13 = sadd.s32 4294967295, %s688_s12   ;;  %p566_p0 = scmp.ge.s32.totalorder %s688_s12, 1  ;;  %s688_s12 = sphi %s714_s12, %s13_s12  }
   0x2   : > { %p137_p1 = scmp.lt.s32.totalorder %s688_s12, 3 }
   0x4   : > { %p138_p2 = pnand %p566_p0, %p137_p1 }
   0x5   : > { %p161_p3 = scmp.lt.s32.totalorder (!%p138_p2), %s562_s13, 1  ;;  %s690_s18 = smov (!%p138_p2), 127  }
   0x6   : > { %141 = sbr.rel (%p138_p2) target bundleno = 357 (0x165), region = 32  ;;  %s691_s19 = smov (!%p138_p2), 125  }
   0x7   : > { %s692_s20 = smov (!%p138_p2), 124  }
   0xb   : > { %s810_s13 = smov (!%p161_p3, %s562_s13), 1  ;;  %v659_v20 = vld [vmem:[%s806_s1] sm:$0xff]  ;;  %v661_v27 = vld [vmem:[%s806_s1 + $0x10] sm:$0xff]  ;;  %v660_v28 = vld [vmem:[%s806_s1 + $0x8] sm:$0xff]  ;;  %v693_v33 = vmov 0   ;;  %vm502_vm1 = vcmask 44032  }
   0xc   : > { %s649_s14 = sshll.u32 %s810_s13, 6  ;;  %v458_v31 = vld [vmem:[%s807_s2] sm:$0xff]  ;;  %v459_v32 = vld [vmem:[%s807_s2 + $0x8] sm:$0xff]  ;;  %679 = vset.pattern.permute.xlu0 %v693_v33  ;;  %680 = vset.pattern.permute.xlu1 %v693_v33  ;;  %v460_v34 = vld [vmem:[%s807_s2 + $0x10] sm:$0xff] }
   0xd   : > { %s165_s17 = scalar_lea.vmem %s805_s0, %s649_s14  ;;  %681 = vset.pattern.permute.xlu2 %v693_v33  ;;  %v662_v37 = vld [vmem:[%s806_s1 + $0x18] sm:$0xff]  ;;  %v663_v41 = vld [vmem:[%s806_s1 + $0x20] sm:$0xff]  ;;  %v665_v42 = vld [vmem:[%s806_s1 + $0x30] sm:$0xff] }
   0xe   : > { %v658_v0 = vld [vmem:[%s165_s17 + $0x38] sm:$0xff]  ;;  %v657_v1 = vld [vmem:[%s165_s17 + $0x30] sm:$0xff]  ;;  %v656_v2 = vld [vmem:[%s165_s17 + $0x28] sm:$0xff] }
   0xf   : > { %262 = vrot.lane.b32.xlu1 %v658_v0, %s690_s18  ;;  %361 = vrot.lane.b32.xlu0 %v658_v0, %s691_s19  ;;  %v655_v3 = vld [vmem:[%s165_s17 + $0x20] sm:$0xff]  ;;  %v654_v4 = vld [vmem:[%s165_s17 + $0x18] sm:$0xff] }
  0x10   : > { %423 = vrot.lane.b32.xlu2 %v657_v1, %s692_s20  ;;  %311 = vmatpush.bf16.msra.mxu1 %v658_v0  ;;  %v653_v5 = vld [vmem:[%s165_s17 + $0x10] sm:$0xff]  ;;  %v652_v6 = vld [vmem:[%s165_s17 + $0x8] sm:$0xff]  ;;  %v651_v7 = vld [vmem:[%s165_s17] sm:$0xff] }
  0x11   : > { %v461_v38 = vld [vmem:[%s807_s2 + $0x18] sm:$0xff]  ;;  %v664_v43 = vld [vmem:[%s806_s1 + $0x28] sm:$0xff] }
  0x12   : > { %v666_v44 = vld [vmem:[%s806_s1 + $0x38] sm:$0xff] }
  0x14   : > { %312 = vmatpush.bf16.msra.mxu1 %v657_v1 }
  0x17   : > { %425 = vrot.lane.b32.xlu0 %v658_v0, %s692_s20  ;;  %359 = vrot.lane.b32.xlu1 %v657_v1, %s691_s19 }
  0x18   : > { %260 = vrot.lane.b32.xlu2 %v657_v1, %s690_s18  ;;  %313 = vmatpush.bf16.msra.mxu1 %v656_v2 }
  0x1c   : > { %314 = vmatpush.bf16.msra.mxu1 %v655_v3 }
  0x1f   : > { %421 = vrot.lane.b32.xlu1 %v656_v2, %s692_s20  ;;  %357 = vrot.lane.b32.xlu0 %v656_v2, %s691_s19 }
  0x20   : > { %258 = vrot.lane.b32.xlu2 %v656_v2, %s690_s18  ;;  %315 = vmatpush.bf16.msra.mxu1 %v654_v4 }
  0x24   : > { %316 = vmatpush.bf16.msra.mxu1 %v653_v5 }
  0x27   : > { %419 = vrot.lane.b32.xlu1 %v655_v3, %s692_s20  ;;  %355 = vrot.lane.b32.xlu0 %v655_v3, %s691_s19 }
  0x28   : > { %256 = vrot.lane.b32.xlu2 %v655_v3, %s690_s18  ;;  %317 = vmatpush.bf16.msra.mxu1 %v652_v6 }
  0x2c   : > { %318 = vmatpush.bf16.msra.mxu1 %v651_v7 }
  0x2f   : > { %417 = vrot.lane.b32.xlu1 %v654_v4, %s692_s20  ;;  %353 = vrot.lane.b32.xlu0 %v654_v4, %s691_s19 }
  0x30   : > { %254 = vrot.lane.b32.xlu2 %v654_v4, %s690_s18  ;;  %319 = vmatmul.bf16.vlgmr.msra.gmra.mxu1 %v659_v20 }
  0x37   : > { %415 = vrot.lane.b32.xlu1 %v653_v5, %s692_s20  ;;  %351 = vrot.lane.b32.xlu0 %v653_v5, %s691_s19 }
  0x38   : > { %252 = vrot.lane.b32.xlu2 %v653_v5, %s690_s18 }
  0x3f   : > { %413 = vrot.lane.b32.xlu1 %v652_v6, %s692_s20  ;;  %349 = vrot.lane.b32.xlu0 %v652_v6, %s691_s19 }
  0x40   : > { %250 = vrot.lane.b32.xlu2 %v652_v6, %s690_s18  ;;  %324 = vmatmul.bf16.gmra.mxu1 %v660_v28 }
  0x47   : > { %411 = vrot.lane.b32.xlu1 %v651_v7, %s692_s20  ;;  %347 = vrot.lane.b32.xlu0 %v651_v7, %s691_s19  ;;  %s650_s20 = sshll.u32 %s810_s13, 4 }
  0x48   : > { %248 = vrot.lane.b32.xlu2 %v651_v7, %s690_s18  ;;  %s792_s23 = scalar_lea.vmem %s808_s3, %s650_s20 }
  0x4f   : > { %464 = vperm.xlu0 %679, %v458_v31   ;;  %469 = vperm.xlu1 %680, %v459_v32  }
  0x50   : > { %474 = vperm.xlu2 %681, %v460_v34  }
  0x57   : > { %479 = vperm.xlu1 %680, %v461_v38  }
  0x6a   : > { %v424_v8 = vpop.permute.xlu2 %423 }
  0x72   : > { %v261_v9 = vpop.permute.xlu2 %260 }
  0x7a   : > { %v259_v10 = vpop.permute.xlu2 %258 }
  0x81   : > { %v263_v11 = vpop.permute.xlu1 %262  ;;  %v362_v12 = vpop.permute.xlu0 %361 }
  0x82   : > { %371 = vmatpush.bf16.msra.mxu2 %v362_v12  ;;  %272 = vmatpush.bf16.msra.mxu0 %v263_v11  ;;  %v257_v13 = vpop.permute.xlu2 %256 }
  0x86   : > { %273 = vmatpush.bf16.msra.mxu0 %v261_v9 }
  0x89   : > { %v426_v14 = vpop.permute.xlu0 %425  ;;  %v360_v15 = vpop.permute.xlu1 %359 }
  0x8a   : > { %435 = vmatpush.bf16.msra.mxu3 %v426_v14  ;;  %372 = vmatpush.bf16.msra.mxu2 %v360_v15  ;;  %v255_v16 = vpop.permute.xlu2 %254 }
  0x8b   : > { %274 = vmatpush.bf16.msra.mxu0 %v259_v10 }
  0x8e   : > { %436 = vmatpush.bf16.msra.mxu3 %v424_v8 }
  0x8f   : > { %275 = vmatpush.bf16.msra.mxu0 %v257_v13 }
  0x91   : > { %v422_v17 = vpop.permute.xlu1 %421  ;;  %v358_v18 = vpop.permute.xlu0 %357 }
  0x92   : > { %373 = vmatpush.bf16.msra.mxu2 %v358_v18  ;;  %437 = vmatpush.bf16.msra.mxu3 %v422_v17  ;;  %v253_v19 = vpop.permute.xlu2 %252 }
  0x93   : > { %276 = vmatpush.bf16.msra.mxu0 %v255_v16 }
  0x97   : > { %277 = vmatpush.bf16.msra.mxu0 %v253_v19 }
  0x99   : > { %v420_v21 = vpop.permute.xlu1 %419  ;;  %v356_v22 = vpop.permute.xlu0 %355 }
  0x9a   : > { %374 = vmatpush.bf16.msra.mxu2 %v356_v22  ;;  %438 = vmatpush.bf16.msra.mxu3 %v420_v21  ;;  %v251_v23 = vpop.permute.xlu2 %250 }
  0x9b   : > { %278 = vmatpush.bf16.msra.mxu0 %v251_v23 }
  0xa1   : > { %v418_v24 = vpop.permute.xlu1 %417  ;;  %v354_v25 = vpop.permute.xlu0 %353 }
  0xa2   : > { %375 = vmatpush.bf16.msra.mxu2 %v354_v25  ;;  %439 = vmatpush.bf16.msra.mxu3 %v418_v24  ;;  %v249_v26 = vpop.permute.xlu2 %248 }
  0xa3   : > { %279 = vmatpush.bf16.msra.mxu0 %v249_v26 }
  0xa6   : > { %280 = vmatmul.bf16.vlgmr.msra.gmra.mxu0 %v661_v27 }
  0xa9   : > { %v416_v29 = vpop.permute.xlu1 %415  ;;  %v352_v30 = vpop.permute.xlu0 %351 }
  0xaa   : > { %376 = vmatpush.bf16.msra.mxu2 %v352_v30  ;;  %440 = vmatpush.bf16.msra.mxu3 %v416_v29  ;;  %v475_v11 = vpop.permute.xlu2 %474 }
  0xad   : > { %v320_v46 = vpop.f32.mrf.mxu1 }
  0xb1   : > { %v414_v35 = vpop.permute.xlu1 %413  ;;  %v350_v36 = vpop.permute.xlu0 %349 }
  0xb2   : > { %377 = vmatpush.bf16.msra.mxu2 %v350_v36  ;;  %441 = vmatpush.bf16.msra.mxu3 %v414_v35 }
  0xb5   : > { %v322_v49 = vpop.f32.mrf.mxu1 }
  0xb6   : > { %285 = vmatmul.bf16.gmra.mxu0 %v662_v37 }
  0xb9   : > { %v412_v39 = vpop.permute.xlu1 %411  ;;  %v348_v40 = vpop.permute.xlu0 %347 }
  0xba   : > { %378 = vmatpush.bf16.msra.mxu2 %v348_v40  ;;  %442 = vmatpush.bf16.msra.mxu3 %v412_v39 }
  0xbd   : > { %379 = vmatmul.bf16.vlgmr.msra.gmra.mxu2 %v663_v41  ;;  %443 = vmatmul.bf16.vlgmr.msra.gmra.mxu3 %v665_v42  ;;  %v325_v61 = vpop.f32.mrf.mxu1 }
  0xc1   : > { %v465_v53 = vpop.permute.xlu0 %464  ;;  %v470_v1 = vpop.permute.xlu1 %469 }
  0xc5   : > { %v327_v14 = vpop.f32.mrf.mxu1 }
  0xc9   : > { %v480_v24 = vpop.permute.xlu1 %479 }
  0xcd   : > { %384 = vmatmul.bf16.gmra.mxu2 %v664_v43  ;;  %448 = vmatmul.bf16.gmra.mxu3 %v666_v44 }
 0x123   : > { %v281_v45 = vpop.f32.mrf.mxu0 }
 0x124   : > { %v321_v47 = vadd.f32 %v320_v46, %v281_v45 }
 0x12b   : > { %v283_v48 = vpop.f32.mrf.mxu0 }
 0x12c   : > { %v323_v56 = vadd.f32 %v322_v49, %v283_v48 }
 0x133   : > { %v286_v0 = vpop.f32.mrf.mxu0 }
 0x134   : > { %v326_v3 = vadd.f32 %v325_v61, %v286_v0 }
 0x13b   : > { %v288_v13 = vpop.f32.mrf.mxu0 }
 0x13c   : > { %v328_v16 = vadd.f32 %v327_v14, %v288_v13 }
 0x140   : > { %v380_v50 = vpop.f32.mrf.mxu2  ;;  %v444_v51 = vpop.f32.mrf.mxu3 }
 0x141   : > { %v390_v52 = vadd.f32 %v380_v50, %v321_v47 }
 0x143   : > { %v454_v54 = vadd.f32 %v444_v51, %v390_v52 }
 0x145   : > { %v482_v55 = vadd.f32 %v465_v53, %v454_v54 }
 0x147   : > { %vm486_vm0 = vcmp.gt.f32.partialorder %v482_v55, 0.0  ;;  %v490_v57 = vmul.f32 0.2, %v482_v55 }
 0x148   : > { %v382_v58 = vpop.f32.mrf.mxu2  ;;  %v446_v59 = vpop.f32.mrf.mxu3 }
 0x149   : > { %v494_v60 = vsel %vm486_vm0, %v482_v55, %v490_v57  ;;  %v391_v62 = vadd.f32 %v382_v58, %v323_v56 }
 0x14a   : > { %v498_v63 = vpack.c.bf16 %v494_v60, %v494_v60 }
 0x14b   : > { %v455_v2 = vadd.f32 %v446_v59, %v391_v62 }
 0x14c   : > { %503 = vst.msk [vmem:[%s792_s23] sm:$0xf] %vm502_vm1, %v498_v63 }
 0x14d   : > { %v483_v4 = vadd.f32 %v470_v1, %v455_v2 }
 0x14f   : > { %vm487_vm2 = vcmp.gt.f32.partialorder %v483_v4, 0.0  ;;  %v491_v5 = vmul.f32 0.2, %v483_v4 }
 0x150   : > { %v385_v6 = vpop.f32.mrf.mxu2  ;;  %v449_v7 = vpop.f32.mrf.mxu3 }
 0x151   : > { %v495_v8 = vsel %vm487_vm2, %v483_v4, %v491_v5  ;;  %v392_v9 = vadd.f32 %v385_v6, %v326_v3 }
 0x152   : > { %v499_v10 = vpack.c.bf16 %v495_v8, %v495_v8 }
 0x153   : > { %v456_v12 = vadd.f32 %v449_v7, %v392_v9 }
 0x154   : > { %504 = vst.msk [vmem:[%s792_s23 + $0x4] sm:$0xf] %vm502_vm1, %v499_v10 }
 0x155   : > { %v484_v15 = vadd.f32 %v475_v11, %v456_v12 }
 0x157   : > { %vm488_vm3 = vcmp.gt.f32.partialorder %v484_v15, 0.0  ;;  %v492_v17 = vmul.f32 0.2, %v484_v15 }
 0x158   : > { %v387_v18 = vpop.f32.mrf.mxu2  ;;  %v451_v22 = vpop.f32.mrf.mxu3 }
 0x159   : > { %v496_v19 = vsel %vm488_vm3, %v484_v15, %v492_v17  ;;  %v393_v20 = vadd.f32 %v387_v18, %v328_v16 }
 0x15a   : > { %v500_v21 = vpack.c.bf16 %v496_v19, %v496_v19 }
 0x15b   : > { %v457_v23 = vadd.f32 %v451_v22, %v393_v20 }
 0x15c   : > { %505 = vst.msk [vmem:[%s792_s23 + $0x8] sm:$0xf] %vm502_vm1, %v500_v21 }
 0x15d   : > { %v485_v25 = vadd.f32 %v480_v24, %v457_v23 }
 0x15f   : > { %vm489_vm4 = vcmp.gt.f32.partialorder %v485_v25, 0.0  ;;  %v493_v26 = vmul.f32 0.2, %v485_v25 }
 0x161   : > { %v497_v27 = vsel %vm489_vm4, %v485_v25, %v493_v26 }
 0x162   : > { %v501_v28 = vpack.c.bf16 %v497_v27, %v497_v27 }
 0x164   : > { %506 = vst.msk [vmem:[%s792_s23 + $0xc] sm:$0xf] %vm502_vm1, %v501_v28 }
 0x165 PF: > { %s13_s12 = sadd.s32 1, %s688_s12  }
 0x166   : > { %p10_p4 = scmp.ge.s32.totalorder %s13_s12, 4  }
 0x168   :  { %12 = sbr.rel (!%p10_p4) target bundleno = 1 (0x1), region = 65 }

// kernel: forward.11
= control target key start
LH: loop header
LB: loop body
LE: loop exit
PB: predicated region body
PF: predicated region fallthrough
CT: control target
= control target key end

     0   :  { %s524_s14 = smov 0   ;;  %s581_s0 = inlined_call_operand.vmem [shape: bf16[2,128,6], index: 0, kind: input, shape index: {}]   ;;  %s582_s1 = inlined_call_operand.vmem [shape: bf16[4,1,128], index: 1, kind: input, shape index: {}]   ;;  %s583_s2 = inlined_call_operand.<no memory space> [shape: f32[1,1], index: 2, kind: input, shape index: {}]   ;;  %s584_s3 = inlined_call_operand.vmem [shape: f32[2,1,2], index: 3, kind: output, shape index: {}]  }
   0x1   :  { %v8_v0 = vstv %s583_s2 }
   0x2   :  { %9 = vst [vmem:[#allocation2] sm:$0x1] %v8_v0 }
   0x3 LB: > { %s423_s15 = sadd.s32 4294967295, %s495_s14   ;;  %p427_p0 = scmp.ge.s32.totalorder %s495_s14, 1  ;;  %s495_s14 = sphi %s524_s14, %s15_s14  }
   0x4   : > { %p139_p1 = scmp.lt.s32.totalorder %s495_s14, 3 }
   0x6   : > { %p140_p2 = pnand %p427_p0, %p139_p1 }
   0x7   : > { %p161_p3 = scmp.lt.s32.totalorder (!%p140_p2), %s423_s15, 1  ;;  %s497_s19 = smov (!%p140_p2), 126  }
   0x8   : > { %143 = sbr.rel (%p140_p2) target bundleno = 331 (0x14b), region = 32  ;;  %s498_s20 = smov (!%p140_p2), 127  }
   0x9   : > { %s499_s21 = smov (!%p140_p2), 125  }
   0xd   : > { %s586_s15 = smov (!%p161_p3, %s423_s15), 1  ;;  %v185_v23 = vld [vmem:[%s582_s1] sm:$0x1]  ;;  %v463_v25 = vld [vmem:[%s582_s1 + $0x2] sm:$0x1]  ;;  %v500_v29 = vmov 0  }
   0xe   : > { %s467_s2 = sshll.u32 %s586_s15, 6  ;;  %v366_v28 = vld [vmem:[#allocation2] sm:$0x1]  ;;  %488 = vset.pattern.permute.xlu0 %v500_v29  ;;  %v464_v36 = vld [vmem:[%s582_s1 + $0x3] sm:$0x1]  ;;  %s168_s5 = scalar_lea.vmem %s584_s3, %s586_s15  ;;  %vm374_vm0 = vcmask 8192  }
   0xf   : > { %s165_s18 = scalar_lea.vmem %s581_s0, %s467_s2  ;;  %v430_v38 = vld [vmem:[%s582_s1 + $0x1] sm:$0x1] }
  0x10   : > { %v475_v1 = vld [vmem:[%s165_s18 + $0x38] sm:$0xff]  ;;  %v474_v2 = vld [vmem:[%s165_s18 + $0x30] sm:$0xff]  ;;  %v473_v3 = vld [vmem:[%s165_s18 + $0x28] sm:$0xff] }
  0x11   : > { %302 = vrot.lane.b32.xlu0 %v475_v1, %s497_s19  ;;  %300 = vrot.lane.b32.xlu1 %v474_v2, %s497_s19  ;;  %v472_v4 = vld [vmem:[%s165_s18 + $0x20] sm:$0xff]  ;;  %v471_v5 = vld [vmem:[%s165_s18 + $0x18] sm:$0xff] }
  0x12   : > { %242 = vrot.lane.b32.xlu2 %v475_v1, %s498_s20  ;;  %273 = vmatpush.bf16.msra.mxu1 %v475_v1  ;;  %v470_v6 = vld [vmem:[%s165_s18 + $0x10] sm:$0xff]  ;;  %v469_v7 = vld [vmem:[%s165_s18 + $0x8] sm:$0xff]  ;;  %v468_v8 = vld [vmem:[%s165_s18] sm:$0xff] }
  0x16   : > { %274 = vmatpush.bf16.msra.mxu1 %v474_v2 }
  0x19   : > { %342 = vrot.lane.b32.xlu0 %v475_v1, %s499_s21  ;;  %340 = vrot.lane.b32.xlu1 %v474_v2, %s499_s21 }
  0x1a   : > { %298 = vrot.lane.b32.xlu2 %v473_v3, %s497_s19  ;;  %275 = vmatpush.bf16.msra.mxu1 %v473_v3 }
  0x1e   : > { %276 = vmatpush.bf16.msra.mxu1 %v472_v4 }
  0x21   : > { %240 = vrot.lane.b32.xlu1 %v474_v2, %s498_s20  ;;  %338 = vrot.lane.b32.xlu0 %v473_v3, %s499_s21 }
  0x22   : > { %296 = vrot.lane.b32.xlu2 %v472_v4, %s497_s19  ;;  %277 = vmatpush.bf16.msra.mxu1 %v471_v5 }
  0x26   : > { %278 = vmatpush.bf16.msra.mxu1 %v470_v6 }
  0x29   : > { %238 = vrot.lane.b32.xlu1 %v473_v3, %s498_s20  ;;  %336 = vrot.lane.b32.xlu0 %v472_v4, %s499_s21 }
  0x2a   : > { %294 = vrot.lane.b32.xlu2 %v471_v5, %s497_s19  ;;  %279 = vmatpush.bf16.msra.mxu1 %v469_v7 }
  0x2e   : > { %280 = vmatpush.bf16.msra.mxu1 %v468_v8 }
  0x31   : > { %236 = vrot.lane.b32.xlu1 %v472_v4, %s498_s20  ;;  %334 = vrot.lane.b32.xlu0 %v471_v5, %s499_s21 }
  0x32   : > { %292 = vrot.lane.b32.xlu2 %v470_v6, %s497_s19  ;;  %281 = vmatmul.bf16.vlgmr.msra.gmra.mxu1 %v185_v23 }
  0x39   : > { %234 = vrot.lane.b32.xlu1 %v471_v5, %s498_s20  ;;  %332 = vrot.lane.b32.xlu0 %v470_v6, %s499_s21 }
  0x3a   : > { %290 = vrot.lane.b32.xlu2 %v469_v7, %s497_s19 }
  0x41   : > { %232 = vrot.lane.b32.xlu1 %v470_v6, %s498_s20  ;;  %330 = vrot.lane.b32.xlu0 %v469_v7, %s499_s21 }
  0x42   : > { %288 = vrot.lane.b32.xlu2 %v468_v8, %s497_s19 }
  0x49   : > { %230 = vrot.lane.b32.xlu1 %v469_v7, %s498_s20  ;;  %328 = vrot.lane.b32.xlu0 %v468_v8, %s499_s21 }
  0x4a   : > { %228 = vrot.lane.b32.xlu2 %v468_v8, %s498_s20 }
  0x51   : > { %369 = vperm.xlu0 %488, %v366_v28  }
  0x6c   : > { %v243_v9 = vpop.permute.xlu2 %242 }
  0x6d   : > { %252 = vmatpush.bf16.msra.mxu0 %v243_v9 }
  0x74   : > { %v299_v10 = vpop.permute.xlu2 %298 }
  0x7c   : > { %v297_v11 = vpop.permute.xlu2 %296 }
  0x83   : > { %v303_v12 = vpop.permute.xlu0 %302  ;;  %v301_v13 = vpop.permute.xlu1 %300 }
  0x84   : > { %312 = vmatpush.bf16.msra.mxu2 %v303_v12  ;;  %v295_v14 = vpop.permute.xlu2 %294 }
  0x88   : > { %313 = vmatpush.bf16.msra.mxu2 %v301_v13 }
  0x8b   : > { %v343_v15 = vpop.permute.xlu0 %342  ;;  %v341_v16 = vpop.permute.xlu1 %340 }
  0x8c   : > { %352 = vmatpush.bf16.msra.mxu3 %v343_v15  ;;  %314 = vmatpush.bf16.msra.mxu2 %v299_v10  ;;  %v293_v17 = vpop.permute.xlu2 %292 }
  0x90   : > { %353 = vmatpush.bf16.msra.mxu3 %v341_v16  ;;  %315 = vmatpush.bf16.msra.mxu2 %v297_v11 }
  0x93   : > { %v241_v18 = vpop.permute.xlu1 %240  ;;  %v339_v19 = vpop.permute.xlu0 %338 }
  0x94   : > { %354 = vmatpush.bf16.msra.mxu3 %v339_v19  ;;  %253 = vmatpush.bf16.msra.mxu0 %v241_v18  ;;  %v291_v20 = vpop.permute.xlu2 %290 }
  0x95   : > { %316 = vmatpush.bf16.msra.mxu2 %v295_v14 }
  0x99   : > { %317 = vmatpush.bf16.msra.mxu2 %v293_v17 }
  0x9b   : > { %v239_v21 = vpop.permute.xlu1 %238  ;;  %v337_v22 = vpop.permute.xlu0 %336 }
  0x9c   : > { %355 = vmatpush.bf16.msra.mxu3 %v337_v22  ;;  %254 = vmatpush.bf16.msra.mxu0 %v239_v21  ;;  %v289_v24 = vpop.permute.xlu2 %288 }
  0x9d   : > { %318 = vmatpush.bf16.msra.mxu2 %v291_v20 }
  0xa1   : > { %319 = vmatpush.bf16.msra.mxu2 %v289_v24 }
  0xa3   : > { %v237_v26 = vpop.permute.xlu1 %236  ;;  %v335_v27 = vpop.permute.xlu0 %334 }
  0xa4   : > { %356 = vmatpush.bf16.msra.mxu3 %v335_v27  ;;  %255 = vmatpush.bf16.msra.mxu0 %v237_v26  ;;  %v229_v37 = vpop.permute.xlu2 %228 }
  0xa5   : > { %320 = vmatmul.bf16.vlgmr.msra.gmra.mxu2 %v463_v25 }
  0xab   : > { %v235_v30 = vpop.permute.xlu1 %234  ;;  %v333_v31 = vpop.permute.xlu0 %332 }
  0xac   : > { %357 = vmatpush.bf16.msra.mxu3 %v333_v31  ;;  %256 = vmatpush.bf16.msra.mxu0 %v235_v30 }
  0xaf   : > { %v282_v39 = vpop.f32.mrf.mxu1 }
  0xb3   : > { %v233_v32 = vpop.permute.xlu1 %232  ;;  %v331_v33 = vpop.permute.xlu0 %330 }
  0xb4   : > { %358 = vmatpush.bf16.msra.mxu3 %v331_v33  ;;  %257 = vmatpush.bf16.msra.mxu0 %v233_v32 }
  0xb7   : > { %v284_v40 = vpop.f32.mrf.mxu1 }
  0xbb   : > { %v231_v34 = vpop.permute.xlu1 %230  ;;  %v329_v35 = vpop.permute.xlu0 %328 }
  0xbc   : > { %258 = vmatpush.bf16.msra.mxu0 %v231_v34  ;;  %359 = vmatpush.bf16.msra.mxu3 %v329_v35 }
  0xbf   : > { %360 = vmatmul.bf16.vlgmr.msra.gmra.mxu3 %v464_v36 }
  0xc0   : > { %259 = vmatpush.bf16.msra.mxu0 %v229_v37 }
  0xc3   : > { %260 = vmatmul.bf16.vlgmr.msra.gmra.mxu0 %v430_v38  ;;  %v370_v44 = vpop.permute.xlu0 %369 }
  0xc4   : > { %v372_v48 = vperm.slane %v370_v44, 0 }
 0x128   : > { %v321_v41 = vpop.f32.mrf.mxu2 }
 0x130   : > { %v323_v42 = vpop.f32.mrf.mxu2 }
 0x140   : > { %v261_v43 = vpop.f32.mrf.mxu0 }
 0x141   : > { %v283_v45 = vadd.f32 %v282_v39, %v261_v43 }
 0x142   : > { %v361_v46 = vpop.f32.mrf.mxu3 }
 0x143   : > { %v325_v47 = vadd.f32 %v321_v41, %v283_v45 }
 0x145   : > { %v365_v49 = vadd.f32 %v361_v46, %v325_v47 }
 0x147   : > { %v373_v50 = vadd.f32 %v372_v48, %v365_v49 }
 0x148   : > { %v263_v51 = vpop.f32.mrf.mxu0 }
 0x149   : > { %375 = vst.msk [vmem:[%s168_s5] sm:$0x1] %vm374_vm0, %v373_v50 }
 0x14a   : > { %v363_v52 = vpop.f32.mrf.mxu3 }
 0x14b PF: > { %s15_s14 = sadd.s32 1, %s495_s14  }
 0x14c   : > { %p12_p4 = scmp.ge.s32.totalorder %s15_s14, 4  }
 0x14e   :  { %14 = sbr.rel (!%p12_p4) target bundleno = 3 (0x3), region = 65 }

</bundles_post_ra>
